<compile_context>
chip_gen: v5e
topology: v5e:2x2
jax: 0.10.0
libtpu: 0.0.40
codegen_flags: <defaults>
</compile_context>

<pallas_src>
import functools

import jax
import jax.numpy as jnp
from jax.experimental import pallas as pl
from jax.experimental.pallas import tpu as pltpu


def _conv3x3_chunk(src_ref, w_ref, start, rows, *, WP2, C, taps_per_matmul):
    """3x3 'valid' conv on the flattened padded layout.

    src_ref : (>= start + 2*WP2 + 2 + rows, C) flattened, reflection-padded input
    w_ref   : (3, 3*C, C) weights, per-dy rows ordered (dx, cin), cols = cout
    Computes pseudo-outputs q in [start, start+rows); tap (dy, dx) of pseudo-output
    q is src[q + dy*WP2 + dx].  Returns (rows, C) f32.
    """
    acc = None
    if taps_per_matmul == 3:
        # fat-K path (K = 3C >= 256 for realistic C): best on v6e/v7x (256-deep MXU)
        for dy in range(3):
            off = start + dy * WP2
            lhs = jnp.concatenate(
                [src_ref[off + dx:off + dx + rows, :] for dx in range(3)], axis=-1)
            p = jnp.dot(lhs, w_ref[dy], preferred_element_type=jnp.float32)
            acc = p if acc is None else acc + p
    else:
        # K = C path: zero patch materialization, optimal on v4/v5 (128-deep MXU)
        for dy in range(3):
            w_dy = w_ref[dy]
            for dx in range(3):
                off = start + dy * WP2 + dx
                p = jnp.dot(src_ref[off:off + rows, :],
                            w_dy[dx * C:(dx + 1) * C, :],
                            preferred_element_type=jnp.float32)
                acc = p if acc is None else acc + p
    return acc


def _residual_block_kernel(xp_ref, w1_ref, w2_ref, o_ref, h_ref, y2_ref, *,
                           H, W, C, conv_dtype, row_chunk, taps_per_matmul):
    """One batch element per grid step.

    xp_ref : ((H+2)*(W+2)+2, C)  flattened reflection-padded input, conv_dtype
    w*_ref : (3, 3*C, C)         per-dy im2col weights, conv_dtype
    o_ref  : (H*(W+2), C)        output incl. 2 garbage cols/row (sliced by wrapper)
    h_ref  : ((H+2)*(W+2)+2, C)  scratch: padded conv1 activation, conv_dtype
    y2_ref : (H*(W+2), C)        scratch: raw conv2 output, conv_dtype
    """
    WP2 = W + 2
    HTOT = (H + 2) * WP2 + 2
    inv_n = 1.0 / float(H * W)
    eps = 1e-5

    bounds = list(range(0, H, row_chunk)) + [H]
    chunks = list(zip(bounds[:-1], bounds[1:]))

    def col_index(rows):
        # chunk starts are row-aligned, so the column index is just iota % (W+2)
        return jax.lax.broadcasted_iota(jnp.int32, (rows, 1), 0) % WP2

    # ---- pass 1: conv1 chunks -> masked IN1 stats + padded raw activation in h ----
    # NOTE: conv biases omitted -- they are exactly cancelled by the mean
    # subtraction of InstanceNorm2d (affine=False), so the forward is unchanged.
    s1 = jnp.zeros((1, C), jnp.float32)
    q1 = jnp.zeros((1, C), jnp.float32)
    for (y0, y1) in chunks:
        rows = (y1 - y0) * WP2
        v = _conv3x3_chunk(xp_ref, w1_ref, y0 * WP2, rows, WP2=WP2, C=C,
                           taps_per_matmul=taps_per_matmul)
        col = col_index(rows)
        vm = jnp.where(col < W, v, 0.0)                       # mask garbage columns
        s1 = s1 + jnp.sum(vm, axis=0, keepdims=True)
        q1 = q1 + jnp.sum(vm * vm, axis=0, keepdims=True)
        # Bake the left/right reflection columns into the chunk: when the chunk is
        # stored at offset W+3 (padded coords), garbage column x==W lands on the
        # right-pad slot of the next padded row (wants value at q-2) and x==W+1 on
        # the left-pad slot two rows down (wants value at q+2).
        v_m2 = jnp.concatenate([v[:2, :], v[:-2, :]], axis=0)   # v_m2[q] = v[q-2]
        v_p2 = jnp.concatenate([v[2:, :], v[-2:, :]], axis=0)   # v_p2[q] = v[q+2]
        v = jnp.where(col == W, v_m2, jnp.where(col == W + 1, v_p2, v))
        hc = v.astype(conv_dtype)
        base = (y0 + 1) * WP2 + 1
        h_ref[base:base + rows, :] = hc
        # the one pad slot the chunk store cannot reach: left pad of padded row y0+1
        h_ref[(y0 + 1) * WP2:(y0 + 1) * WP2 + 1, :] = hc[1:2, :]
    # top / bottom reflection rows (their corner columns are already correct)
    h_ref[0:WP2, :] = h_ref[2 * WP2:3 * WP2, :]
    h_ref[(H + 1) * WP2:(H + 2) * WP2, :] = h_ref[(H - 1) * WP2:H * WP2, :]
    # slack rows only feed garbage pseudo-outputs; keep them finite
    h_ref[(H + 2) * WP2:HTOT, :] = jnp.zeros((2, C), conv_dtype)

    mu1 = s1 * inv_n
    var1 = jnp.maximum(q1 * inv_n - mu1 * mu1, 0.0)   # clamp single-pass variance
    rs1 = jax.lax.rsqrt(var1 + eps)

    # ---- pass 2: in-place IN1 + ReLU over the whole padded activation (chunked) ----
    step = row_chunk * WP2
    for a in range(0, HTOT, step):
        b = min(a + step, HTOT)
        t = h_ref[a:b, :].astype(jnp.float32)
        h_ref[a:b, :] = jnp.maximum((t - mu1) * rs1, 0.0).astype(conv_dtype)

    # ---- pass 3: conv2 chunks -> masked IN2 stats, raw conv2 kept in y2 ----
    s2 = jnp.zeros((1, C), jnp.float32)
    q2 = jnp.zeros((1, C), jnp.float32)
    for (y0, y1) in chunks:
        rows = (y1 - y0) * WP2
        v = _conv3x3_chunk(h_ref, w2_ref, y0 * WP2, rows, WP2=WP2, C=C,
                           taps_per_matmul=taps_per_matmul)
        col = col_index(rows)
        vm = jnp.where(col < W, v, 0.0)
        s2 = s2 + jnp.sum(vm, axis=0, keepdims=True)
        q2 = q2 + jnp.sum(vm * vm, axis=0, keepdims=True)
        y2_ref[y0 * WP2:y0 * WP2 + rows, :] = v.astype(conv_dtype)

    mu2 = s2 * inv_n
    var2 = jnp.maximum(q2 * inv_n - mu2 * mu2, 0.0)
    rs2 = jax.lax.rsqrt(var2 + eps)

    # ---- pass 4: IN2 + residual add + store (garbage columns sliced by wrapper) ----
    for (y0, y1) in chunks:
        rows = (y1 - y0) * WP2
        a = y0 * WP2
        y2 = y2_ref[a:a + rows, :].astype(jnp.float32)
        res = xp_ref[W + 3 + a:W + 3 + a + rows, :].astype(jnp.float32)
        o_ref[a:a + rows, :] = (res + (y2 - mu2) * rs2).astype(o_ref.dtype)


def _default_taps_per_matmul():
    # 128-deep MXU (v4/v5): K=C direct-tap matmuls, zero patch materialization.
    # 256-deep MXU (v6e/v7x): per-dy fused K=3C keeps the contraction depth >= 256.
    try:
        kind = jax.devices()[0].device_kind.lower()
    except Exception:
        return 3
    return 1 if ("v4" in kind or "v5" in kind) else 3


def _vmem_limit_bytes():
    # Generation-aware scoped-VMEM limit: ~3/4 of physical (96 MiB on 128-MiB
    # v5e/v6e, 48 MiB on 64-MiB v7x); conservative fallback if the query fails.
    try:
        phys = getattr(pltpu.get_tpu_info(), "vmem_capacity_bytes", None)
        if phys:
            return int(min(max(phys * 3 // 4, 32 * 1024 * 1024), 112 * 1024 * 1024))
    except Exception:
        pass
    return 48 * 1024 * 1024


def residual_block(x_nchw, w1, b1, w2, b2, *, conv_dtype=jnp.bfloat16,
                   row_chunk=None, taps_per_matmul=None):
    """ResidualBlock forward.

    x_nchw: (N, C, H, W); w*: (C, C, 3, 3) PyTorch OIHW layout; b*: (C,).
    conv_dtype: dtype of the conv input / weights / intermediate activations
    (accumulation and all InstanceNorm statistics are always f32).  Pass
    jnp.float32 for reference-accurate results; bf16 is MXU-native and halves
    the activation DMA / scratch footprint.
    """
    # Biases are mathematically a no-op before InstanceNorm2d (affine=False) -- see
    # kernel comment; a future affine=True variant must NOT reuse this shortcut.
    del b1, b2
    N, C, H, W = x_nchw.shape
    assert H >= 2 and W >= 2, "ReflectionPad2d(1) requires H, W >= 2"

    WP2 = W + 2
    HTOT = (H + 2) * WP2 + 2          # +2 slack rows so edge tap slices stay in-bounds
    M = H * WP2                        # pseudo-output rows per image

    if row_chunk is None:
        row_chunk = min(H, 32)
    row_chunk = max(1, min(row_chunk, H))
    if taps_per_matmul is None:
        taps_per_matmul = _default_taps_per_matmul()
    assert taps_per_matmul in (1, 3)

    # Flattened channels-last layout: NHWC -> reflection pad once -> flatten spatial,
    # append 2 zero slack rows, and DMA in conv_dtype (halves HBM->VMEM bytes).
    x_nhwc = jnp.transpose(x_nchw, (0, 2, 3, 1))
    xp = jnp.pad(x_nhwc, ((0, 0), (1, 1), (1, 1), (0, 0)), mode="reflect")
    xp = xp.reshape(N, (H + 2) * WP2, C)
    xp = jnp.pad(xp, ((0, 0), (0, 2), (0, 0)))
    xp = xp.astype(conv_dtype)

    # Per-dy im2col weights: (3[dy], 3*C[(dx, cin)], C[cout]).
    w1m = jnp.transpose(w1, (2, 3, 1, 0)).reshape(3, 3 * C, C).astype(conv_dtype)
    w2m = jnp.transpose(w2, (2, 3, 1, 0)).reshape(3, 3 * C, C).astype(conv_dtype)

    kernel = functools.partial(_residual_block_kernel,
                               H=H, W=W, C=C, conv_dtype=conv_dtype,
                               row_chunk=row_chunk, taps_per_matmul=taps_per_matmul)

    out = pl.pallas_call(
        kernel,
        out_shape=jax.ShapeDtypeStruct((N, M, C), x_nchw.dtype),
        grid_spec=pltpu.PrefetchScalarGridSpec(
            num_scalar_prefetch=0,
            grid=(N,),
            in_specs=[
                # leading None (= squeezed batch dim) -> kernel sees 2-D refs
                pl.BlockSpec((None, HTOT, C), lambda n: (n, 0, 0)),
                pl.BlockSpec((3, 3 * C, C), lambda n: (0, 0, 0)),
                pl.BlockSpec((3, 3 * C, C), lambda n: (0, 0, 0)),
            ],
            out_specs=pl.BlockSpec((None, M, C), lambda n: (n, 0, 0)),
            scratch_shapes=[
                pltpu.VMEM((HTOT, C), conv_dtype),   # padded conv1 activation
                pltpu.VMEM((M, C), conv_dtype),      # raw conv2 output (for 2-pass IN2)
            ],
        ),
        compiler_params=pltpu.CompilerParams(
            dimension_semantics=("parallel",),
            vmem_limit_bytes=_vmem_limit_bytes(),
        ),
    )(xp, w1m, w2m)

    # Drop the 2 garbage columns per row and go back to NCHW.
    out = out.reshape(N, H, WP2, C)[:, :, :W, :]
    return jnp.transpose(out, (0, 3, 1, 2))


def _reference(x_nchw, w1, b1, w2, b2):
    """Pure-JAX f32 reference matching the PyTorch module (sanity check only)."""
    def conv(x, w, b):
        xp = jnp.pad(x, ((0, 0), (0, 0), (1, 1), (1, 1)), mode="reflect")
        y = jax.lax.conv_general_dilated(
            xp, w, window_strides=(1, 1), padding="VALID",
            dimension_numbers=("NCHW", "OIHW", "NCHW"))
        return y + b[None, :, None, None]

    def inorm(x, eps=1e-5):
        mu = jnp.mean(x, axis=(2, 3), keepdims=True)
        var = jnp.mean((x - mu) ** 2, axis=(2, 3), keepdims=True)
        return (x - mu) * jax.lax.rsqrt(var + eps)

    h = conv(x_nchw, w1, b1)
    h = jnp.maximum(inorm(h), 0.0)
    h = inorm(conv(h, w2, b2))
    return x_nchw + h


if __name__ == "__main__":
    N, C, H, W = 2, 4, 16, 16
    key = jax.random.PRNGKey(0)
    kx, k1, k2, k3, k4 = jax.random.split(key, 5)

    x = jax.random.normal(kx, (N, C, H, W), dtype=jnp.float32)
    fan_in = C * 3 * 3
    bound = 1.0 / (fan_in ** 0.5)
    w1 = jax.random.uniform(k1, (C, C, 3, 3), jnp.float32, -bound, bound)
    b1 = jax.random.uniform(k2, (C,), jnp.float32, -bound, bound)
    w2 = jax.random.uniform(k3, (C, C, 3, 3), jnp.float32, -bound, bound)
    b2 = jax.random.uniform(k4, (C,), jnp.float32, -bound, bound)

    ref = jax.block_until_ready(_reference(x, w1, b1, w2, b2))

    # f32 path: faithful to the PyTorch forward (tight tolerance). Exercise both
    # im2col depths (K=C direct taps and per-dy fused K=3C) for correctness.
    for tpm in (1, 3):
        out_f32 = jax.block_until_ready(
            residual_block(x, w1, b1, w2, b2, conv_dtype=jnp.float32,
                           taps_per_matmul=tpm))
        assert out_f32.shape == (N, C, H, W)
        assert jnp.allclose(out_f32, ref, atol=1e-4, rtol=1e-4)

    # Default path: bf16 conv input/weights/activations (MXU-native) with f32
    # accumulation and f32 InstanceNorm stats -> bf16-mantissa-level differences.
    out_bf16 = jax.block_until_ready(residual_block(x, w1, b1, w2, b2))
    assert out_bf16.shape == (N, C, H, W)
    assert jnp.allclose(out_bf16, ref, atol=1e-1, rtol=1e-1)

    # Chunked path (multiple row chunks + ragged tail) to exercise the 2-pass IN.
    out_chunked = jax.block_until_ready(
        residual_block(x, w1, b1, w2, b2, conv_dtype=jnp.float32, row_chunk=5))
    assert jnp.allclose(out_chunked, ref, atol=1e-4, rtol=1e-4)

    print("KERNEL_OK")
</pallas_src>

<mosaic_0001>
module attributes {stable_mosaic.version = 11 : i64} {
  func.func @_residual_block_kernel(%arg0: i32, %arg1: memref<1x326x4xf32, #tpu.memory_space<vmem>>, %arg2: memref<3x12x4xf32, #tpu.memory_space<vmem>>, %arg3: memref<3x12x4xf32, #tpu.memory_space<vmem>>, %arg4: memref<1x288x4xf32, #tpu.memory_space<vmem>>, %arg5: memref<326x4xf32, #tpu.memory_space<vmem>>, %arg6: memref<288x4xf32, #tpu.memory_space<vmem>>) attributes {dimension_semantics = [#tpu.dimension_semantics<parallel>], iteration_bounds = array<i64: 2>, scalar_prefetch = 0 : i64, scratch_operands = 2 : i64, tpu.core_type = #tpu.core_type<tc>, window_params = [{transform_indices = @transform_0, window_bounds = array<i64: 1, 326, 4>}, {pipeline_mode = #tpu.pipeline_mode<synchronous>, transform_indices = @transform_1, window_bounds = array<i64: 3, 12, 4>}, {pipeline_mode = #tpu.pipeline_mode<synchronous>, transform_indices = @transform_2, window_bounds = array<i64: 3, 12, 4>}, {transform_indices = @transform_3, window_bounds = array<i64: 1, 288, 4>}]} {
    %cst = arith.constant 0.000000e+00 : f32
    %0 = vector.broadcast %cst : f32 to vector<1x4xf32>
    %cst_0 = arith.constant 0.000000e+00 : f32
    %1 = vector.broadcast %cst_0 : f32 to vector<1x4xf32>
    %c0 = arith.constant 0 : index
    %c0_1 = arith.constant 0 : index
    %c0_2 = arith.constant 0 : index
    %2 = vector.load %arg2[%c0, %c0_1, %c0_2] : memref<3x12x4xf32, #tpu.memory_space<vmem>>, vector<1x12x4xf32>
    %3 = vector.shape_cast %2 : vector<1x12x4xf32> to vector<12x4xf32>
    %c0_3 = arith.constant 0 : index
    %c0_4 = arith.constant 0 : index
    %c0_5 = arith.constant 0 : index
    %4 = vector.load %arg1[%c0_3, %c0_4, %c0_5] : memref<1x326x4xf32, #tpu.memory_space<vmem>>, vector<1x288x4xf32>
    %5 = vector.shape_cast %4 : vector<1x288x4xf32> to vector<288x4xf32>
    %6 = vector.extract_strided_slice %3 {offsets = [0, 0], sizes = [4, 4], strides = [1, 1]} : vector<12x4xf32> to vector<4x4xf32>
    %cst_6 = arith.constant dense<0.000000e+00> : vector<288x4xf32>
    %7 = tpu.matmul %5, %6, %cst_6 {dimension_numbers = #tpu.dot_dimension_numbers<[1], [0], [0], [1], [0, 0, 1, 1], [], []>} : vector<288x4xf32>, vector<4x4xf32>, vector<288x4xf32> -> vector<288x4xf32>
    %c0_7 = arith.constant 0 : index
    %c1 = arith.constant 1 : index
    %c0_8 = arith.constant 0 : index
    %8 = vector.load %arg1[%c0_7, %c1, %c0_8] : memref<1x326x4xf32, #tpu.memory_space<vmem>>, vector<1x288x4xf32>
    %9 = vector.shape_cast %8 : vector<1x288x4xf32> to vector<288x4xf32>
    %10 = vector.extract_strided_slice %3 {offsets = [4, 0], sizes = [4, 4], strides = [1, 1]} : vector<12x4xf32> to vector<4x4xf32>
    %cst_9 = arith.constant dense<0.000000e+00> : vector<288x4xf32>
    %11 = tpu.matmul %9, %10, %cst_9 {dimension_numbers = #tpu.dot_dimension_numbers<[1], [0], [0], [1], [0, 0, 1, 1], [], []>} : vector<288x4xf32>, vector<4x4xf32>, vector<288x4xf32> -> vector<288x4xf32>
    %12 = arith.addf %7, %11 : vector<288x4xf32>
    %c0_10 = arith.constant 0 : index
    %c2 = arith.constant 2 : index
    %c0_11 = arith.constant 0 : index
    %13 = vector.load %arg1[%c0_10, %c2, %c0_11] : memref<1x326x4xf32, #tpu.memory_space<vmem>>, vector<1x288x4xf32>
    %14 = vector.shape_cast %13 : vector<1x288x4xf32> to vector<288x4xf32>
    %15 = vector.extract_strided_slice %3 {offsets = [8, 0], sizes = [4, 4], strides = [1, 1]} : vector<12x4xf32> to vector<4x4xf32>
    %cst_12 = arith.constant dense<0.000000e+00> : vector<288x4xf32>
    %16 = tpu.matmul %14, %15, %cst_12 {dimension_numbers = #tpu.dot_dimension_numbers<[1], [0], [0], [1], [0, 0, 1, 1], [], []>} : vector<288x4xf32>, vector<4x4xf32>, vector<288x4xf32> -> vector<288x4xf32>
    %17 = arith.addf %12, %16 : vector<288x4xf32>
    %c1_13 = arith.constant 1 : index
    %c0_14 = arith.constant 0 : index
    %c0_15 = arith.constant 0 : index
    %18 = vector.load %arg2[%c1_13, %c0_14, %c0_15] : memref<3x12x4xf32, #tpu.memory_space<vmem>>, vector<1x12x4xf32>
    %19 = vector.shape_cast %18 : vector<1x12x4xf32> to vector<12x4xf32>
    %c0_16 = arith.constant 0 : index
    %c18 = arith.constant 18 : index
    %c0_17 = arith.constant 0 : index
    %20 = vector.load %arg1[%c0_16, %c18, %c0_17] : memref<1x326x4xf32, #tpu.memory_space<vmem>>, vector<1x288x4xf32>
    %21 = vector.shape_cast %20 : vector<1x288x4xf32> to vector<288x4xf32>
    %22 = vector.extract_strided_slice %19 {offsets = [0, 0], sizes = [4, 4], strides = [1, 1]} : vector<12x4xf32> to vector<4x4xf32>
    %cst_18 = arith.constant dense<0.000000e+00> : vector<288x4xf32>
    %23 = tpu.matmul %21, %22, %cst_18 {dimension_numbers = #tpu.dot_dimension_numbers<[1], [0], [0], [1], [0, 0, 1, 1], [], []>} : vector<288x4xf32>, vector<4x4xf32>, vector<288x4xf32> -> vector<288x4xf32>
    %24 = arith.addf %17, %23 : vector<288x4xf32>
    %c0_19 = arith.constant 0 : index
    %c19 = arith.constant 19 : index
    %c0_20 = arith.constant 0 : index
    %25 = vector.load %arg1[%c0_19, %c19, %c0_20] : memref<1x326x4xf32, #tpu.memory_space<vmem>>, vector<1x288x4xf32>
    %26 = vector.shape_cast %25 : vector<1x288x4xf32> to vector<288x4xf32>
    %27 = vector.extract_strided_slice %19 {offsets = [4, 0], sizes = [4, 4], strides = [1, 1]} : vector<12x4xf32> to vector<4x4xf32>
    %cst_21 = arith.constant dense<0.000000e+00> : vector<288x4xf32>
    %28 = tpu.matmul %26, %27, %cst_21 {dimension_numbers = #tpu.dot_dimension_numbers<[1], [0], [0], [1], [0, 0, 1, 1], [], []>} : vector<288x4xf32>, vector<4x4xf32>, vector<288x4xf32> -> vector<288x4xf32>
    %29 = arith.addf %24, %28 : vector<288x4xf32>
    %c0_22 = arith.constant 0 : index
    %c20 = arith.constant 20 : index
    %c0_23 = arith.constant 0 : index
    %30 = vector.load %arg1[%c0_22, %c20, %c0_23] : memref<1x326x4xf32, #tpu.memory_space<vmem>>, vector<1x288x4xf32>
    %31 = vector.shape_cast %30 : vector<1x288x4xf32> to vector<288x4xf32>
    %32 = vector.extract_strided_slice %19 {offsets = [8, 0], sizes = [4, 4], strides = [1, 1]} : vector<12x4xf32> to vector<4x4xf32>
    %cst_24 = arith.constant dense<0.000000e+00> : vector<288x4xf32>
    %33 = tpu.matmul %31, %32, %cst_24 {dimension_numbers = #tpu.dot_dimension_numbers<[1], [0], [0], [1], [0, 0, 1, 1], [], []>} : vector<288x4xf32>, vector<4x4xf32>, vector<288x4xf32> -> vector<288x4xf32>
    %34 = arith.addf %29, %33 : vector<288x4xf32>
    %c2_25 = arith.constant 2 : index
    %c0_26 = arith.constant 0 : index
    %c0_27 = arith.constant 0 : index
    %35 = vector.load %arg2[%c2_25, %c0_26, %c0_27] : memref<3x12x4xf32, #tpu.memory_space<vmem>>, vector<1x12x4xf32>
    %36 = vector.shape_cast %35 : vector<1x12x4xf32> to vector<12x4xf32>
    %c0_28 = arith.constant 0 : index
    %c36 = arith.constant 36 : index
    %c0_29 = arith.constant 0 : index
    %37 = vector.load %arg1[%c0_28, %c36, %c0_29] : memref<1x326x4xf32, #tpu.memory_space<vmem>>, vector<1x288x4xf32>
    %38 = vector.shape_cast %37 : vector<1x288x4xf32> to vector<288x4xf32>
    %39 = vector.extract_strided_slice %36 {offsets = [0, 0], sizes = [4, 4], strides = [1, 1]} : vector<12x4xf32> to vector<4x4xf32>
    %cst_30 = arith.constant dense<0.000000e+00> : vector<288x4xf32>
    %40 = tpu.matmul %38, %39, %cst_30 {dimension_numbers = #tpu.dot_dimension_numbers<[1], [0], [0], [1], [0, 0, 1, 1], [], []>} : vector<288x4xf32>, vector<4x4xf32>, vector<288x4xf32> -> vector<288x4xf32>
    %41 = arith.addf %34, %40 : vector<288x4xf32>
    %c0_31 = arith.constant 0 : index
    %c37 = arith.constant 37 : index
    %c0_32 = arith.constant 0 : index
    %42 = vector.load %arg1[%c0_31, %c37, %c0_32] : memref<1x326x4xf32, #tpu.memory_space<vmem>>, vector<1x288x4xf32>
    %43 = vector.shape_cast %42 : vector<1x288x4xf32> to vector<288x4xf32>
    %44 = vector.extract_strided_slice %36 {offsets = [4, 0], sizes = [4, 4], strides = [1, 1]} : vector<12x4xf32> to vector<4x4xf32>
    %cst_33 = arith.constant dense<0.000000e+00> : vector<288x4xf32>
    %45 = tpu.matmul %43, %44, %cst_33 {dimension_numbers = #tpu.dot_dimension_numbers<[1], [0], [0], [1], [0, 0, 1, 1], [], []>} : vector<288x4xf32>, vector<4x4xf32>, vector<288x4xf32> -> vector<288x4xf32>
    %46 = arith.addf %41, %45 : vector<288x4xf32>
    %c0_34 = arith.constant 0 : index
    %c38 = arith.constant 38 : index
    %c0_35 = arith.constant 0 : index
    %47 = vector.load %arg1[%c0_34, %c38, %c0_35] : memref<1x326x4xf32, #tpu.memory_space<vmem>>, vector<1x288x4xf32>
    %48 = vector.shape_cast %47 : vector<1x288x4xf32> to vector<288x4xf32>
    %49 = vector.extract_strided_slice %36 {offsets = [8, 0], sizes = [4, 4], strides = [1, 1]} : vector<12x4xf32> to vector<4x4xf32>
    %cst_36 = arith.constant dense<0.000000e+00> : vector<288x4xf32>
    %50 = tpu.matmul %48, %49, %cst_36 {dimension_numbers = #tpu.dot_dimension_numbers<[1], [0], [0], [1], [0, 0, 1, 1], [], []>} : vector<288x4xf32>, vector<4x4xf32>, vector<288x4xf32> -> vector<288x4xf32>
    %51 = arith.addf %46, %50 : vector<288x4xf32>
    %52 = tpu.iota {dimensions = array<i32: 0>} : vector<288x1xi32>
    %c18_i32 = arith.constant 18 : i32
    %c0_i32 = arith.constant 0 : i32
    %53 = arith.cmpi eq, %c18_i32, %c0_i32 : i32
    %c1_i32 = arith.constant 1 : i32
    %54 = arith.select %53, %c1_i32, %c18_i32 : i32
    %55 = vector.broadcast %54 : i32 to vector<288x1xi32>
    %56 = arith.remsi %52, %55 : vector<288x1xi32>
    %c0_i32_37 = arith.constant 0 : i32
    %57 = vector.broadcast %c0_i32_37 : i32 to vector<288x1xi32>
    %58 = arith.cmpi ne, %56, %57 : vector<288x1xi32>
    %c0_i32_38 = arith.constant 0 : i32
    %59 = vector.broadcast %c0_i32_38 : i32 to vector<288x1xi32>
    %60 = arith.cmpi slt, %56, %59 : vector<288x1xi32>
    %c0_i32_39 = arith.constant 0 : i32
    %61 = arith.cmpi slt, %54, %c0_i32_39 : i32
    %62 = vector.broadcast %61 : i1 to vector<288x1xi1>
    %63 = vector.broadcast %62 : vector<288x1xi1> to vector<288x1xi1>
    %64 = arith.xori %60, %63 : vector<288x1xi1>
    %65 = arith.andi %64, %58 : vector<288x1xi1>
    %66 = vector.broadcast %54 : i32 to vector<288x1xi32>
    %67 = arith.addi %56, %66 : vector<288x1xi32>
    %68 = arith.select %65, %67, %56 : vector<288x1xi1>, vector<288x1xi32>
    %c16_i32 = arith.constant 16 : i32
    %69 = vector.broadcast %c16_i32 : i32 to vector<288x1xi32>
    %70 = arith.cmpi slt, %68, %69 : vector<288x1xi32>
    %cst_40 = arith.constant 0.000000e+00 : f32
    %71 = vector.shape_cast %70 : vector<288x1xi1> to vector<288x1xi1>
    %72 = vector.broadcast %71 : vector<288x1xi1> to vector<288x4xi1>
    %73 = vector.broadcast %cst_40 : f32 to vector<288x4xf32>
    %74 = arith.select %72, %51, %73 : vector<288x4xi1>, vector<288x4xf32>
    %cst_41 = arith.constant dense<0.000000e+00> : vector<4xf32>
    %75 = vector.multi_reduction <add>, %74, %cst_41 [0] : vector<288x4xf32> to vector<4xf32>
    %76 = vector.shape_cast %75 : vector<4xf32> to vector<1x4xf32>
    %77 = arith.addf %0, %76 : vector<1x4xf32>
    %78 = arith.mulf %74, %74 : vector<288x4xf32>
    %cst_42 = arith.constant dense<0.000000e+00> : vector<4xf32>
    %79 = vector.multi_reduction <add>, %78, %cst_42 [0] : vector<288x4xf32> to vector<4xf32>
    %80 = vector.shape_cast %79 : vector<4xf32> to vector<1x4xf32>
    %81 = arith.addf %1, %80 : vector<1x4xf32>
    %82 = vector.extract_strided_slice %51 {offsets = [0, 0], sizes = [2, 4], strides = [1, 1]} : vector<288x4xf32> to vector<2x4xf32>
    %83 = vector.extract_strided_slice %51 {offsets = [0, 0], sizes = [286, 4], strides = [1, 1]} : vector<288x4xf32> to vector<286x4xf32>
    %84 = tpu.concatenate %82, %83 in 0 : vector<2x4xf32>, vector<286x4xf32> -> vector<288x4xf32>
    %85 = vector.extract_strided_slice %51 {offsets = [2, 0], sizes = [286, 4], strides = [1, 1]} : vector<288x4xf32> to vector<286x4xf32>
    %86 = vector.extract_strided_slice %51 {offsets = [286, 0], sizes = [2, 4], strides = [1, 1]} : vector<288x4xf32> to vector<2x4xf32>
    %87 = tpu.concatenate %85, %86 in 0 : vector<286x4xf32>, vector<2x4xf32> -> vector<288x4xf32>
    %c16_i32_43 = arith.constant 16 : i32
    %88 = vector.broadcast %c16_i32_43 : i32 to vector<288x1xi32>
    %89 = arith.cmpi eq, %68, %88 : vector<288x1xi32>
    %c17_i32 = arith.constant 17 : i32
    %90 = vector.broadcast %c17_i32 : i32 to vector<288x1xi32>
    %91 = arith.cmpi eq, %68, %90 : vector<288x1xi32>
    %92 = vector.shape_cast %91 : vector<288x1xi1> to vector<288x1xi1>
    %93 = vector.broadcast %92 : vector<288x1xi1> to vector<288x4xi1>
    %94 = arith.select %93, %87, %51 : vector<288x4xi1>, vector<288x4xf32>
    %95 = vector.shape_cast %89 : vector<288x1xi1> to vector<288x1xi1>
    %96 = vector.broadcast %95 : vector<288x1xi1> to vector<288x4xi1>
    %97 = arith.select %96, %84, %94 : vector<288x4xi1>, vector<288x4xf32>
    %c19_44 = arith.constant 19 : index
    %c0_45 = arith.constant 0 : index
    %98 = vector.load %arg5[%c19_44, %c0_45] : memref<326x4xf32, #tpu.memory_space<vmem>>, vector<288x4xf32>
    tpu.vector_store %arg5[%c19_44, %c0_45], %97 {strides = array<i32>} : memref<326x4xf32, #tpu.memory_space<vmem>>, vector<288x4xf32>,
    %99 = vector.extract_strided_slice %97 {offsets = [1, 0], sizes = [1, 4], strides = [1, 1]} : vector<288x4xf32> to vector<1x4xf32>
    %c18_46 = arith.constant 18 : index
    %c0_47 = arith.constant 0 : index
    %100 = vector.load %arg5[%c18_46, %c0_47] : memref<326x4xf32, #tpu.memory_space<vmem>>, vector<1x4xf32>
    tpu.vector_store %arg5[%c18_46, %c0_47], %99 {strides = array<i32>} : memref<326x4xf32, #tpu.memory_space<vmem>>, vector<1x4xf32>,
    %c36_48 = arith.constant 36 : index
    %c0_49 = arith.constant 0 : index
    %101 = vector.load %arg5[%c36_48, %c0_49] : memref<326x4xf32, #tpu.memory_space<vmem>>, vector<18x4xf32>
    %c0_50 = arith.constant 0 : index
    %c0_51 = arith.constant 0 : index
    %102 = vector.load %arg5[%c0_50, %c0_51] : memref<326x4xf32, #tpu.memory_space<vmem>>, vector<18x4xf32>
    tpu.vector_store %arg5[%c0_50, %c0_51], %101 {strides = array<i32>} : memref<326x4xf32, #tpu.memory_space<vmem>>, vector<18x4xf32>,
    %c270 = arith.constant 270 : index
    %c0_52 = arith.constant 0 : index
    %103 = vector.load %arg5[%c270, %c0_52] : memref<326x4xf32, #tpu.memory_space<vmem>>, vector<18x4xf32>
    %c306 = arith.constant 306 : index
    %c0_53 = arith.constant 0 : index
    %104 = vector.load %arg5[%c306, %c0_53] : memref<326x4xf32, #tpu.memory_space<vmem>>, vector<18x4xf32>
    tpu.vector_store %arg5[%c306, %c0_53], %103 {strides = array<i32>} : memref<326x4xf32, #tpu.memory_space<vmem>>, vector<18x4xf32>,
    %cst_54 = arith.constant 0.000000e+00 : f32
    %105 = vector.broadcast %cst_54 : f32 to vector<2x4xf32>
    %c324 = arith.constant 324 : index
    %c0_55 = arith.constant 0 : index
    %106 = vector.load %arg5[%c324, %c0_55] : memref<326x4xf32, #tpu.memory_space<vmem>>, vector<2x4xf32>
    tpu.vector_store %arg5[%c324, %c0_55], %105 {strides = array<i32>} : memref<326x4xf32, #tpu.memory_space<vmem>>, vector<2x4xf32>,
    %cst_56 = arith.constant 3.906250e-03 : f32
    %107 = vector.broadcast %cst_56 : f32 to vector<1x4xf32>
    %108 = arith.mulf %77, %107 : vector<1x4xf32>
    %cst_57 = arith.constant 3.906250e-03 : f32
    %109 = vector.broadcast %cst_57 : f32 to vector<1x4xf32>
    %110 = arith.mulf %81, %109 : vector<1x4xf32>
    %111 = arith.mulf %108, %108 : vector<1x4xf32>
    %112 = arith.subf %110, %111 : vector<1x4xf32>
    %cst_58 = arith.constant 0.000000e+00 : f32
    %113 = vector.broadcast %cst_58 : f32 to vector<1x4xf32>
    %114 = arith.maximumf %112, %113 : vector<1x4xf32>
    %cst_59 = arith.constant 9.99999974E-6 : f32
    %115 = vector.broadcast %cst_59 : f32 to vector<1x4xf32>
    %116 = arith.addf %114, %115 : vector<1x4xf32>
    %117 = math.rsqrt %116 : vector<1x4xf32>
    %c0_60 = arith.constant 0 : index
    %c0_61 = arith.constant 0 : index
    %118 = vector.load %arg5[%c0_60, %c0_61] : memref<326x4xf32, #tpu.memory_space<vmem>>, vector<288x4xf32>
    %119 = vector.broadcast %108 : vector<1x4xf32> to vector<288x4xf32>
    %120 = arith.subf %118, %119 : vector<288x4xf32>
    %121 = vector.broadcast %117 : vector<1x4xf32> to vector<288x4xf32>
    %122 = arith.mulf %120, %121 : vector<288x4xf32>
    %cst_62 = arith.constant 0.000000e+00 : f32
    %123 = vector.broadcast %cst_62 : f32 to vector<288x4xf32>
    %124 = arith.maximumf %122, %123 : vector<288x4xf32>
    %c0_63 = arith.constant 0 : index
    %c0_64 = arith.constant 0 : index
    %125 = vector.load %arg5[%c0_63, %c0_64] : memref<326x4xf32, #tpu.memory_space<vmem>>, vector<288x4xf32>
    tpu.vector_store %arg5[%c0_63, %c0_64], %124 {strides = array<i32>} : memref<326x4xf32, #tpu.memory_space<vmem>>, vector<288x4xf32>,
    %c288 = arith.constant 288 : index
    %c0_65 = arith.constant 0 : index
    %126 = vector.load %arg5[%c288, %c0_65] : memref<326x4xf32, #tpu.memory_space<vmem>>, vector<38x4xf32>
    %127 = vector.broadcast %108 : vector<1x4xf32> to vector<38x4xf32>
    %128 = arith.subf %126, %127 : vector<38x4xf32>
    %129 = vector.broadcast %117 : vector<1x4xf32> to vector<38x4xf32>
    %130 = arith.mulf %128, %129 : vector<38x4xf32>
    %cst_66 = arith.constant 0.000000e+00 : f32
    %131 = vector.broadcast %cst_66 : f32 to vector<38x4xf32>
    %132 = arith.maximumf %130, %131 : vector<38x4xf32>
    %c288_67 = arith.constant 288 : index
    %c0_68 = arith.constant 0 : index
    %133 = vector.load %arg5[%c288_67, %c0_68] : memref<326x4xf32, #tpu.memory_space<vmem>>, vector<38x4xf32>
    tpu.vector_store %arg5[%c288_67, %c0_68], %132 {strides = array<i32>} : memref<326x4xf32, #tpu.memory_space<vmem>>, vector<38x4xf32>,
    %cst_69 = arith.constant 0.000000e+00 : f32
    %134 = vector.broadcast %cst_69 : f32 to vector<1x4xf32>
    %cst_70 = arith.constant 0.000000e+00 : f32
    %135 = vector.broadcast %cst_70 : f32 to vector<1x4xf32>
    %c0_71 = arith.constant 0 : index
    %c0_72 = arith.constant 0 : index
    %c0_73 = arith.constant 0 : index
    %136 = vector.load %arg3[%c0_71, %c0_72, %c0_73] : memref<3x12x4xf32, #tpu.memory_space<vmem>>, vector<1x12x4xf32>
    %137 = vector.shape_cast %136 : vector<1x12x4xf32> to vector<12x4xf32>
    %c0_74 = arith.constant 0 : index
    %c0_75 = arith.constant 0 : index
    %138 = vector.load %arg5[%c0_74, %c0_75] : memref<326x4xf32, #tpu.memory_space<vmem>>, vector<288x4xf32>
    %139 = vector.extract_strided_slice %137 {offsets = [0, 0], sizes = [4, 4], strides = [1, 1]} : vector<12x4xf32> to vector<4x4xf32>
    %cst_76 = arith.constant dense<0.000000e+00> : vector<288x4xf32>
    %140 = tpu.matmul %138, %139, %cst_76 {dimension_numbers = #tpu.dot_dimension_numbers<[1], [0], [0], [1], [0, 0, 1, 1], [], []>} : vector<288x4xf32>, vector<4x4xf32>, vector<288x4xf32> -> vector<288x4xf32>
    %c1_77 = arith.constant 1 : index
    %c0_78 = arith.constant 0 : index
    %141 = vector.load %arg5[%c1_77, %c0_78] : memref<326x4xf32, #tpu.memory_space<vmem>>, vector<288x4xf32>
    %142 = vector.extract_strided_slice %137 {offsets = [4, 0], sizes = [4, 4], strides = [1, 1]} : vector<12x4xf32> to vector<4x4xf32>
    %cst_79 = arith.constant dense<0.000000e+00> : vector<288x4xf32>
    %143 = tpu.matmul %141, %142, %cst_79 {dimension_numbers = #tpu.dot_dimension_numbers<[1], [0], [0], [1], [0, 0, 1, 1], [], []>} : vector<288x4xf32>, vector<4x4xf32>, vector<288x4xf32> -> vector<288x4xf32>
    %144 = arith.addf %140, %143 : vector<288x4xf32>
    %c2_80 = arith.constant 2 : index
    %c0_81 = arith.constant 0 : index
    %145 = vector.load %arg5[%c2_80, %c0_81] : memref<326x4xf32, #tpu.memory_space<vmem>>, vector<288x4xf32>
    %146 = vector.extract_strided_slice %137 {offsets = [8, 0], sizes = [4, 4], strides = [1, 1]} : vector<12x4xf32> to vector<4x4xf32>
    %cst_82 = arith.constant dense<0.000000e+00> : vector<288x4xf32>
    %147 = tpu.matmul %145, %146, %cst_82 {dimension_numbers = #tpu.dot_dimension_numbers<[1], [0], [0], [1], [0, 0, 1, 1], [], []>} : vector<288x4xf32>, vector<4x4xf32>, vector<288x4xf32> -> vector<288x4xf32>
    %148 = arith.addf %144, %147 : vector<288x4xf32>
    %c1_83 = arith.constant 1 : index
    %c0_84 = arith.constant 0 : index
    %c0_85 = arith.constant 0 : index
    %149 = vector.load %arg3[%c1_83, %c0_84, %c0_85] : memref<3x12x4xf32, #tpu.memory_space<vmem>>, vector<1x12x4xf32>
    %150 = vector.shape_cast %149 : vector<1x12x4xf32> to vector<12x4xf32>
    %c18_86 = arith.constant 18 : index
    %c0_87 = arith.constant 0 : index
    %151 = vector.load %arg5[%c18_86, %c0_87] : memref<326x4xf32, #tpu.memory_space<vmem>>, vector<288x4xf32>
    %152 = vector.extract_strided_slice %150 {offsets = [0, 0], sizes = [4, 4], strides = [1, 1]} : vector<12x4xf32> to vector<4x4xf32>
    %cst_88 = arith.constant dense<0.000000e+00> : vector<288x4xf32>
    %153 = tpu.matmul %151, %152, %cst_88 {dimension_numbers = #tpu.dot_dimension_numbers<[1], [0], [0], [1], [0, 0, 1, 1], [], []>} : vector<288x4xf32>, vector<4x4xf32>, vector<288x4xf32> -> vector<288x4xf32>
    %154 = arith.addf %148, %153 : vector<288x4xf32>
    %c19_89 = arith.constant 19 : index
    %c0_90 = arith.constant 0 : index
    %155 = vector.load %arg5[%c19_89, %c0_90] : memref<326x4xf32, #tpu.memory_space<vmem>>, vector<288x4xf32>
    %156 = vector.extract_strided_slice %150 {offsets = [4, 0], sizes = [4, 4], strides = [1, 1]} : vector<12x4xf32> to vector<4x4xf32>
    %cst_91 = arith.constant dense<0.000000e+00> : vector<288x4xf32>
    %157 = tpu.matmul %155, %156, %cst_91 {dimension_numbers = #tpu.dot_dimension_numbers<[1], [0], [0], [1], [0, 0, 1, 1], [], []>} : vector<288x4xf32>, vector<4x4xf32>, vector<288x4xf32> -> vector<288x4xf32>
    %158 = arith.addf %154, %157 : vector<288x4xf32>
    %c20_92 = arith.constant 20 : index
    %c0_93 = arith.constant 0 : index
    %159 = vector.load %arg5[%c20_92, %c0_93] : memref<326x4xf32, #tpu.memory_space<vmem>>, vector<288x4xf32>
    %160 = vector.extract_strided_slice %150 {offsets = [8, 0], sizes = [4, 4], strides = [1, 1]} : vector<12x4xf32> to vector<4x4xf32>
    %cst_94 = arith.constant dense<0.000000e+00> : vector<288x4xf32>
    %161 = tpu.matmul %159, %160, %cst_94 {dimension_numbers = #tpu.dot_dimension_numbers<[1], [0], [0], [1], [0, 0, 1, 1], [], []>} : vector<288x4xf32>, vector<4x4xf32>, vector<288x4xf32> -> vector<288x4xf32>
    %162 = arith.addf %158, %161 : vector<288x4xf32>
    %c2_95 = arith.constant 2 : index
    %c0_96 = arith.constant 0 : index
    %c0_97 = arith.constant 0 : index
    %163 = vector.load %arg3[%c2_95, %c0_96, %c0_97] : memref<3x12x4xf32, #tpu.memory_space<vmem>>, vector<1x12x4xf32>
    %164 = vector.shape_cast %163 : vector<1x12x4xf32> to vector<12x4xf32>
    %c36_98 = arith.constant 36 : index
    %c0_99 = arith.constant 0 : index
    %165 = vector.load %arg5[%c36_98, %c0_99] : memref<326x4xf32, #tpu.memory_space<vmem>>, vector<288x4xf32>
    %166 = vector.extract_strided_slice %164 {offsets = [0, 0], sizes = [4, 4], strides = [1, 1]} : vector<12x4xf32> to vector<4x4xf32>
    %cst_100 = arith.constant dense<0.000000e+00> : vector<288x4xf32>
    %167 = tpu.matmul %165, %166, %cst_100 {dimension_numbers = #tpu.dot_dimension_numbers<[1], [0], [0], [1], [0, 0, 1, 1], [], []>} : vector<288x4xf32>, vector<4x4xf32>, vector<288x4xf32> -> vector<288x4xf32>
    %168 = arith.addf %162, %167 : vector<288x4xf32>
    %c37_101 = arith.constant 37 : index
    %c0_102 = arith.constant 0 : index
    %169 = vector.load %arg5[%c37_101, %c0_102] : memref<326x4xf32, #tpu.memory_space<vmem>>, vector<288x4xf32>
    %170 = vector.extract_strided_slice %164 {offsets = [4, 0], sizes = [4, 4], strides = [1, 1]} : vector<12x4xf32> to vector<4x4xf32>
    %cst_103 = arith.constant dense<0.000000e+00> : vector<288x4xf32>
    %171 = tpu.matmul %169, %170, %cst_103 {dimension_numbers = #tpu.dot_dimension_numbers<[1], [0], [0], [1], [0, 0, 1, 1], [], []>} : vector<288x4xf32>, vector<4x4xf32>, vector<288x4xf32> -> vector<288x4xf32>
    %172 = arith.addf %168, %171 : vector<288x4xf32>
    %c38_104 = arith.constant 38 : index
    %c0_105 = arith.constant 0 : index
    %173 = vector.load %arg5[%c38_104, %c0_105] : memref<326x4xf32, #tpu.memory_space<vmem>>, vector<288x4xf32>
    %174 = vector.extract_strided_slice %164 {offsets = [8, 0], sizes = [4, 4], strides = [1, 1]} : vector<12x4xf32> to vector<4x4xf32>
    %cst_106 = arith.constant dense<0.000000e+00> : vector<288x4xf32>
    %175 = tpu.matmul %173, %174, %cst_106 {dimension_numbers = #tpu.dot_dimension_numbers<[1], [0], [0], [1], [0, 0, 1, 1], [], []>} : vector<288x4xf32>, vector<4x4xf32>, vector<288x4xf32> -> vector<288x4xf32>
    %176 = arith.addf %172, %175 : vector<288x4xf32>
    %177 = tpu.iota {dimensions = array<i32: 0>} : vector<288x1xi32>
    %c18_i32_107 = arith.constant 18 : i32
    %c0_i32_108 = arith.constant 0 : i32
    %178 = arith.cmpi eq, %c18_i32_107, %c0_i32_108 : i32
    %c1_i32_109 = arith.constant 1 : i32
    %179 = arith.select %178, %c1_i32_109, %c18_i32_107 : i32
    %180 = vector.broadcast %179 : i32 to vector<288x1xi32>
    %181 = arith.remsi %177, %180 : vector<288x1xi32>
    %c0_i32_110 = arith.constant 0 : i32
    %182 = vector.broadcast %c0_i32_110 : i32 to vector<288x1xi32>
    %183 = arith.cmpi ne, %181, %182 : vector<288x1xi32>
    %c0_i32_111 = arith.constant 0 : i32
    %184 = vector.broadcast %c0_i32_111 : i32 to vector<288x1xi32>
    %185 = arith.cmpi slt, %181, %184 : vector<288x1xi32>
    %c0_i32_112 = arith.constant 0 : i32
    %186 = arith.cmpi slt, %179, %c0_i32_112 : i32
    %187 = vector.broadcast %186 : i1 to vector<288x1xi1>
    %188 = vector.broadcast %187 : vector<288x1xi1> to vector<288x1xi1>
    %189 = arith.xori %185, %188 : vector<288x1xi1>
    %190 = arith.andi %189, %183 : vector<288x1xi1>
    %191 = vector.broadcast %179 : i32 to vector<288x1xi32>
    %192 = arith.addi %181, %191 : vector<288x1xi32>
    %193 = arith.select %190, %192, %181 : vector<288x1xi1>, vector<288x1xi32>
    %c16_i32_113 = arith.constant 16 : i32
    %194 = vector.broadcast %c16_i32_113 : i32 to vector<288x1xi32>
    %195 = arith.cmpi slt, %193, %194 : vector<288x1xi32>
    %cst_114 = arith.constant 0.000000e+00 : f32
    %196 = vector.shape_cast %195 : vector<288x1xi1> to vector<288x1xi1>
    %197 = vector.broadcast %196 : vector<288x1xi1> to vector<288x4xi1>
    %198 = vector.broadcast %cst_114 : f32 to vector<288x4xf32>
    %199 = arith.select %197, %176, %198 : vector<288x4xi1>, vector<288x4xf32>
    %cst_115 = arith.constant dense<0.000000e+00> : vector<4xf32>
    %200 = vector.multi_reduction <add>, %199, %cst_115 [0] : vector<288x4xf32> to vector<4xf32>
    %201 = vector.shape_cast %200 : vector<4xf32> to vector<1x4xf32>
    %202 = arith.addf %134, %201 : vector<1x4xf32>
    %203 = arith.mulf %199, %199 : vector<288x4xf32>
    %cst_116 = arith.constant dense<0.000000e+00> : vector<4xf32>
    %204 = vector.multi_reduction <add>, %203, %cst_116 [0] : vector<288x4xf32> to vector<4xf32>
    %205 = vector.shape_cast %204 : vector<4xf32> to vector<1x4xf32>
    %206 = arith.addf %135, %205 : vector<1x4xf32>
    %c0_117 = arith.constant 0 : index
    %c0_118 = arith.constant 0 : index
    %207 = vector.load %arg6[%c0_117, %c0_118] : memref<288x4xf32, #tpu.memory_space<vmem>>, vector<288x4xf32>
    tpu.vector_store %arg6[%c0_117, %c0_118], %176 {strides = array<i32>} : memref<288x4xf32, #tpu.memory_space<vmem>>, vector<288x4xf32>,
    %cst_119 = arith.constant 3.906250e-03 : f32
    %208 = vector.broadcast %cst_119 : f32 to vector<1x4xf32>
    %209 = arith.mulf %202, %208 : vector<1x4xf32>
    %cst_120 = arith.constant 3.906250e-03 : f32
    %210 = vector.broadcast %cst_120 : f32 to vector<1x4xf32>
    %211 = arith.mulf %206, %210 : vector<1x4xf32>
    %212 = arith.mulf %209, %209 : vector<1x4xf32>
    %213 = arith.subf %211, %212 : vector<1x4xf32>
    %cst_121 = arith.constant 0.000000e+00 : f32
    %214 = vector.broadcast %cst_121 : f32 to vector<1x4xf32>
    %215 = arith.maximumf %213, %214 : vector<1x4xf32>
    %cst_122 = arith.constant 9.99999974E-6 : f32
    %216 = vector.broadcast %cst_122 : f32 to vector<1x4xf32>
    %217 = arith.addf %215, %216 : vector<1x4xf32>
    %218 = math.rsqrt %217 : vector<1x4xf32>
    %c0_123 = arith.constant 0 : index
    %c0_124 = arith.constant 0 : index
    %219 = vector.load %arg6[%c0_123, %c0_124] : memref<288x4xf32, #tpu.memory_space<vmem>>, vector<288x4xf32>
    %c0_125 = arith.constant 0 : index
    %c19_126 = arith.constant 19 : index
    %c0_127 = arith.constant 0 : index
    %220 = vector.load %arg1[%c0_125, %c19_126, %c0_127] : memref<1x326x4xf32, #tpu.memory_space<vmem>>, vector<1x288x4xf32>
    %221 = vector.shape_cast %220 : vector<1x288x4xf32> to vector<288x4xf32>
    %222 = vector.broadcast %209 : vector<1x4xf32> to vector<288x4xf32>
    %223 = arith.subf %219, %222 : vector<288x4xf32>
    %224 = vector.broadcast %218 : vector<1x4xf32> to vector<288x4xf32>
    %225 = arith.mulf %223, %224 : vector<288x4xf32>
    %226 = arith.addf %221, %225 : vector<288x4xf32>
    %c0_128 = arith.constant 0 : index
    %c0_129 = arith.constant 0 : index
    %c0_130 = arith.constant 0 : index
    %227 = vector.load %arg4[%c0_128, %c0_129, %c0_130] : memref<1x288x4xf32, #tpu.memory_space<vmem>>, vector<1x288x4xf32>
    %228 = vector.shape_cast %227 : vector<1x288x4xf32> to vector<288x4xf32>
    %229 = vector.shape_cast %226 : vector<288x4xf32> to vector<1x288x4xf32>
    tpu.vector_store %arg4[%c0_128, %c0_129, %c0_130], %229 {strides = array<i32>} : memref<1x288x4xf32, #tpu.memory_space<vmem>>, vector<1x288x4xf32>,
    return
  }
  func.func @transform_0(%arg0: i32) -> (i32, i32, i32) {
    %c0_i32 = arith.constant 0 : i32
    %c0_i32_0 = arith.constant 0 : i32
    %c0_i32_1 = arith.constant 0 : i32
    return %arg0, %c0_i32, %c0_i32_0 : i32, i32, i32
  }
  func.func @transform_1(%arg0: i32) -> (i32, i32, i32) {
    %c0_i32 = arith.constant 0 : i32
    %c0_i32_0 = arith.constant 0 : i32
    %c0_i32_1 = arith.constant 0 : i32
    %c0_i32_2 = arith.constant 0 : i32
    return %c0_i32, %c0_i32_0, %c0_i32_1 : i32, i32, i32
  }
  func.func @transform_2(%arg0: i32) -> (i32, i32, i32) {
    %c0_i32 = arith.constant 0 : i32
    %c0_i32_0 = arith.constant 0 : i32
    %c0_i32_1 = arith.constant 0 : i32
    %c0_i32_2 = arith.constant 0 : i32
    return %c0_i32, %c0_i32_0, %c0_i32_1 : i32, i32, i32
  }
  func.func @transform_3(%arg0: i32) -> (i32, i32, i32) {
    %c0_i32 = arith.constant 0 : i32
    %c0_i32_0 = arith.constant 0 : i32
    %c0_i32_1 = arith.constant 0 : i32
    return %arg0, %c0_i32, %c0_i32_0 : i32, i32, i32
  }
}

</mosaic_0001>

<bundles_post_ra>
// kernel: tpu_custom_call.1
= control target key start
LH: loop header
LB: loop body
LE: loop exit
PB: predicated region body
PF: predicated region fallthrough
CT: control target
= control target key end

     0   :  { %s9288_s12 = smov 0   ;;  %s13238_s0 = inlined_call_operand.vmem [shape: f32[2,326,4], index: 0, kind: input, shape index: {}]   ;;  %s13239_s1 = inlined_call_operand.vmem [shape: f32[3,12,4], index: 1, kind: input, shape index: {}]   ;;  %s13240_s2 = inlined_call_operand.vmem [shape: f32[3,12,4], index: 2, kind: input, shape index: {}]   ;;  %s13241_s3 = inlined_call_operand.vmem [shape: f32[2,288,4], index: 3, kind: output, shape index: {}]  }
   0x1 LB: > { %s8553_s13 = sadd.s32 4294967295, %s9264_s12   ;;  %p8557_p0 = scmp.ge.s32.totalorder %s9264_s12, 1  ;;  %s9264_s12 = sphi %s9288_s12, %s13_s12  }
   0x2   : > { %p137_p1 = scmp.lt.s32.totalorder %s9264_s12, 3 }
   0x4   : > { %p138_p2 = pnand %p8557_p0, %p137_p1 }
   0x6   : > { %141 = sbr.rel (%p138_p2) target bundleno = 2129 (0x851), region = 32 }
   0xb   : > { %v171_v0 = vld [vmem:[%s13239_s1] sm:$0xff]  ;;  %vm356_vm0 = vcmask 1043456   ;;  %p161_p3 = scmp.lt.s32.totalorder %s8553_s13, 1  ;;  %v172_v2 = vld [vmem:[%s13239_s1 + $0x8] sm:$0xf]  ;;  %v8671_v3 = vld [vmem:[%s13239_s1 + $0x10] sm:$0xff] }
   0xc   : > { %v246_v1 = vrot.slane %v171_v0, 4  ;;  %9237 = vmatpush.msk.msra.mxu3 %vm356_vm0, %v171_v0  ;;  %8597 = vmatpush.msk.msra.mxu1 %vm356_vm0, %v171_v0  ;;  %v1374_v4 = vrot.slane %v8671_v3, 4  ;;  %vm247_vm1 = vcmask 31744  }
   0xd   : > { %s13529_s13 = smov (!%p161_p3, %s8553_s13), 1 }
   0xe   : > { %8673 = vmatpush.msk.msrb.mxu3 %vm356_vm0, %v8671_v3  ;;  %9236 = vmatpush.msk.msra.mxu2 %vm356_vm0, %v246_v1  ;;  %s9238_s20 = smul.u32 328, %s13529_s13 }
   0xf   : > { %8560 = vmatpush.msk.msra.mxu0 %vm356_vm0, %v246_v1  ;;  %v8784_v1 = vld [vmem:[%s13239_s1 + $0x20] sm:$0xff]  ;;  %s9239_s17 = smul.u32 288, %s13529_s13 }
  0x10   : > { %8634 = vmatpush.msk.msrb.mxu2 %vm356_vm0, %v172_v2  ;;  %s9318_s23 = scalar_lea.vmem %s13238_s0, %s9238_s20  ;;  %v2301_v2 = vrot.slane %v8784_v1, 4 }
  0x11   : > { %8710 = vmatpush.msk.msrb.mxu0 %vm356_vm0, %v1374_v4  ;;  %v227_v5 = vld [vmem:[%s9318_s23 + $0x91] sm:$0xff]  ;;  %v209_v7 = vld [vmem:[%s9318_s23 + $0x1] sm:$0xff]  ;;  %v228_v9 = vld [vmem:[%s9318_s23 + $0x99] sm:$0xff]  ;;  %s13098_s19 = scalar_lea.vmem %s13241_s3, %s9239_s17 }
  0x12   : > { %v191_v6 = vld [vmem:[%s9318_s23 + $0x90] sm:$0xff]  ;;  %8579 = vmatmul.msk.f32.vlgmr.msra.gmra.mxu2 %vm247_vm1, %v227_v5  ;;  %v173_v8 = vld [vmem:[%s9318_s23] sm:$0xff]  ;;  %8561 = vmatmul.msk.f32.vlgmr.msra.gmra.mxu0 %vm247_vm1, %v209_v7  ;;  %v192_v10 = vld [vmem:[%s9318_s23 + $0x98] sm:$0xff] }
  0x13   : > { %8616 = vmatmul.msk.f32.vlgmr.msra.gmra.mxu3 %vm247_vm1, %v191_v6  ;;  %8598 = vmatmul.msk.f32.vlgmr.msra.gmra.mxu1 %vm247_vm1, %v173_v8  ;;  %v210_v11 = vld [vmem:[%s9318_s23 + $0x9] sm:$0xff]  ;;  %v229_v13 = vld [vmem:[%s9318_s23 + $0xa1] sm:$0xff]  ;;  %v211_v15 = vld [vmem:[%s9318_s23 + $0x11] sm:$0xff] }
  0x14   : > { %v174_v12 = vld [vmem:[%s9318_s23 + $0x8] sm:$0xff]  ;;  %v193_v14 = vld [vmem:[%s9318_s23 + $0xa0] sm:$0xff]  ;;  %v175_v16 = vld [vmem:[%s9318_s23 + $0x10] sm:$0xff]  ;;  %8786 = vmatpush.msk.msra.mxu2 %vm356_vm0, %v8784_v1  ;;  %8823 = vmatpush.msk.msra.mxu3 %vm356_vm0, %v2301_v2 }
  0x15   : > { %v230_v17 = vld [vmem:[%s9318_s23 + $0xa9] sm:$0xff]  ;;  %v212_v19 = vld [vmem:[%s9318_s23 + $0x19] sm:$0xff]  ;;  %v231_v21 = vld [vmem:[%s9318_s23 + $0xb1] sm:$0xff] }
  0x16   : > { %v194_v18 = vld [vmem:[%s9318_s23 + $0xa8] sm:$0xff]  ;;  %v176_v20 = vld [vmem:[%s9318_s23 + $0x18] sm:$0xff]  ;;  %v195_v22 = vld [vmem:[%s9318_s23 + $0xb0] sm:$0xff] }
  0x17   : > { %v213_v23 = vld [vmem:[%s9318_s23 + $0x21] sm:$0xff]  ;;  %v232_v25 = vld [vmem:[%s9318_s23 + $0xb9] sm:$0xff]  ;;  %v214_v27 = vld [vmem:[%s9318_s23 + $0x29] sm:$0xff] }
  0x18   : > { %v177_v24 = vld [vmem:[%s9318_s23 + $0x20] sm:$0xff]  ;;  %v196_v26 = vld [vmem:[%s9318_s23 + $0xb8] sm:$0xff]  ;;  %v178_v28 = vld [vmem:[%s9318_s23 + $0x28] sm:$0xff] }
  0x19   : > { %v233_v29 = vld [vmem:[%s9318_s23 + $0xc1] sm:$0xff]  ;;  %v215_v31 = vld [vmem:[%s9318_s23 + $0x31] sm:$0xff]  ;;  %v234_v33 = vld [vmem:[%s9318_s23 + $0xc9] sm:$0xff] }
  0x1a   : > { %8580 = vmatmul.msk.f32.gmra.mxu2 %vm247_vm1, %v228_v9  ;;  %8562 = vmatmul.msk.f32.gmra.mxu0 %vm247_vm1, %v210_v11  ;;  %v197_v30 = vld [vmem:[%s9318_s23 + $0xc0] sm:$0xff]  ;;  %v179_v32 = vld [vmem:[%s9318_s23 + $0x30] sm:$0xff]  ;;  %v198_v34 = vld [vmem:[%s9318_s23 + $0xc8] sm:$0xff] }
  0x1b   : > { %8617 = vmatmul.msk.f32.gmra.mxu3 %vm247_vm1, %v192_v10  ;;  %8599 = vmatmul.msk.f32.gmra.mxu1 %vm247_vm1, %v174_v12  ;;  %v216_v35 = vld [vmem:[%s9318_s23 + $0x39] sm:$0xff]  ;;  %v235_v37 = vld [vmem:[%s9318_s23 + $0xd1] sm:$0xff]  ;;  %v217_v39 = vld [vmem:[%s9318_s23 + $0x41] sm:$0xff] }
  0x1c   : > { %v180_v36 = vld [vmem:[%s9318_s23 + $0x38] sm:$0xff]  ;;  %v199_v38 = vld [vmem:[%s9318_s23 + $0xd0] sm:$0xff]  ;;  %v181_v40 = vld [vmem:[%s9318_s23 + $0x40] sm:$0xff] }
  0x1d   : > { %v236_v41 = vld [vmem:[%s9318_s23 + $0xd9] sm:$0xff]  ;;  %v218_v43 = vld [vmem:[%s9318_s23 + $0x49] sm:$0xff]  ;;  %v237_v45 = vld [vmem:[%s9318_s23 + $0xe1] sm:$0xff] }
  0x1e   : > { %v200_v42 = vld [vmem:[%s9318_s23 + $0xd8] sm:$0xff]  ;;  %v182_v44 = vld [vmem:[%s9318_s23 + $0x48] sm:$0xff]  ;;  %v201_v46 = vld [vmem:[%s9318_s23 + $0xe0] sm:$0xff] }
  0x1f   : > { %v219_v47 = vld [vmem:[%s9318_s23 + $0x51] sm:$0xff]  ;;  %v238_v49 = vld [vmem:[%s9318_s23 + $0xe9] sm:$0xff]  ;;  %v220_v51 = vld [vmem:[%s9318_s23 + $0x59] sm:$0xff] }
  0x20   : > { %v183_v48 = vld [vmem:[%s9318_s23 + $0x50] sm:$0xff]  ;;  %v202_v50 = vld [vmem:[%s9318_s23 + $0xe8] sm:$0xff]  ;;  %v184_v52 = vld [vmem:[%s9318_s23 + $0x58] sm:$0xff] }
  0x21   : > { %v239_v53 = vld [vmem:[%s9318_s23 + $0xf1] sm:$0xff]  ;;  %v221_v55 = vld [vmem:[%s9318_s23 + $0x61] sm:$0xff]  ;;  %v240_v57 = vld [vmem:[%s9318_s23 + $0xf9] sm:$0xff] }
  0x22   : > { %8581 = vmatmul.msk.f32.gmra.mxu2 %vm247_vm1, %v229_v13  ;;  %8563 = vmatmul.msk.f32.gmra.mxu0 %vm247_vm1, %v211_v15  ;;  %v203_v54 = vld [vmem:[%s9318_s23 + $0xf0] sm:$0xff]  ;;  %v185_v56 = vld [vmem:[%s9318_s23 + $0x60] sm:$0xff]  ;;  %v204_v58 = vld [vmem:[%s9318_s23 + $0xf8] sm:$0xff] }
  0x23   : > { %8618 = vmatmul.msk.f32.gmra.mxu3 %vm247_vm1, %v193_v14  ;;  %8600 = vmatmul.msk.f32.gmra.mxu1 %vm247_vm1, %v175_v16  ;;  %v222_v59 = vld [vmem:[%s9318_s23 + $0x69] sm:$0xff]  ;;  %v241_v61 = vld [vmem:[%s9318_s23 + $0x101] sm:$0xff]  ;;  %v223_v63 = vld [vmem:[%s9318_s23 + $0x71] sm:$0xff] }
  0x24   : > { %v186_v60 = vld [vmem:[%s9318_s23 + $0x68] sm:$0xff]  ;;  %v205_v62 = vld [vmem:[%s9318_s23 + $0x100] sm:$0xff]  ;;  %v187_v0 = vld [vmem:[%s9318_s23 + $0x70] sm:$0xff] }
  0x25   : > { %v242_v3 = vld [vmem:[%s9318_s23 + $0x109] sm:$0xff]  ;;  %v224_v5 = vld [vmem:[%s9318_s23 + $0x79] sm:$0xff]  ;;  %v243_v9 = vld [vmem:[%s9318_s23 + $0x111] sm:$0xff] }
  0x26   : > { %v206_v4 = vld [vmem:[%s9318_s23 + $0x108] sm:$0xff]  ;;  %v188_v6 = vld [vmem:[%s9318_s23 + $0x78] sm:$0xff]  ;;  %v207_v10 = vld [vmem:[%s9318_s23 + $0x110] sm:$0xff] }
  0x27   : > { %v8785_v7 = vld [vmem:[%s13239_s1 + $0x28] sm:$0xf]  ;;  %v8672_v8 = vld [vmem:[%s13239_s1 + $0x18] sm:$0xf]  ;;  %v189_v14 = vld [vmem:[%s9318_s23 + $0x80] sm:$0xff] }
  0x28   : > { %8860 = vmatpush.msk.msra.mxu0 %vm356_vm0, %v8785_v7  ;;  %8747 = vmatpush.msk.msrb.mxu1 %vm356_vm0, %v8672_v8  ;;  %v225_v13 = vld [vmem:[%s9318_s23 + $0x81] sm:$0xff]  ;;  %v9556_v1 = vld [vmem:[%s9318_s23 + $0x34] sm:$0xff] }
  0x29   : > { %v1343_v8 = vld [vmem:[%s9318_s23 + $0x3b] sm:$0xff] }
  0x2a   : > { %8582 = vmatmul.msk.f32.gmra.mxu2 %vm247_vm1, %v230_v17  ;;  %8564 = vmatmul.msk.f32.gmra.mxu0 %vm247_vm1, %v212_v19  ;;  %v208_v19 = vld [vmem:[%s9318_s23 + $0x118] sm:$0xff] }
  0x2b   : > { %8619 = vmatmul.msk.f32.gmra.mxu3 %vm247_vm1, %v194_v18  ;;  %8601 = vmatmul.msk.f32.gmra.mxu1 %vm247_vm1, %v176_v20  ;;  %v244_v18 = vld [vmem:[%s9318_s23 + $0x119] sm:$0xff] }
  0x32   : > { %8583 = vmatmul.msk.f32.gmra.mxu2 %vm247_vm1, %v231_v21  ;;  %8565 = vmatmul.msk.f32.gmra.mxu0 %vm247_vm1, %v213_v23  ;;  %v190_v23 = vld [vmem:[%s9318_s23 + $0x88] sm:$0xff] }
  0x33   : > { %8620 = vmatmul.msk.f32.gmra.mxu3 %vm247_vm1, %v195_v22  ;;  %8602 = vmatmul.msk.f32.gmra.mxu1 %vm247_vm1, %v177_v24  ;;  %v226_v22 = vld [vmem:[%s9318_s23 + $0x89] sm:$0xff] }
  0x3a   : > { %8584 = vmatmul.msk.f32.gmra.mxu2 %vm247_vm1, %v232_v25  ;;  %8566 = vmatmul.msk.f32.gmra.mxu0 %vm247_vm1, %v214_v27  ;;  %v719_v27 = vld [vmem:[%s9318_s23 + $0x2] sm:$0xff] }
  0x3b   : > { %8621 = vmatmul.msk.f32.gmra.mxu3 %vm247_vm1, %v196_v26  ;;  %8603 = vmatmul.msk.f32.gmra.mxu1 %vm247_vm1, %v178_v28  ;;  %v1030_v28 = vld [vmem:[%s9318_s23 + $0x12] sm:$0xff] }
  0x42   : > { %8585 = vmatmul.msk.f32.gmra.mxu2 %vm247_vm1, %v233_v29  ;;  %8567 = vmatmul.msk.f32.gmra.mxu0 %vm247_vm1, %v215_v31  ;;  %v1338_v31 = vld [vmem:[%s9318_s23 + $0x13] sm:$0xff] }
  0x43   : > { %8622 = vmatmul.msk.f32.gmra.mxu3 %vm247_vm1, %v197_v30  ;;  %8604 = vmatmul.msk.f32.gmra.mxu1 %vm247_vm1, %v179_v32  ;;  %v1646_v32 = vld [vmem:[%s9318_s23 + $0x14] sm:$0xff] }
  0x4a   : > { %8586 = vmatmul.msk.f32.gmra.mxu2 %vm247_vm1, %v234_v33  ;;  %8568 = vmatmul.msk.f32.gmra.mxu0 %vm247_vm1, %v216_v35 }
  0x4b   : > { %8623 = vmatmul.msk.f32.gmra.mxu3 %vm247_vm1, %v198_v34  ;;  %8605 = vmatmul.msk.f32.gmra.mxu1 %vm247_vm1, %v180_v36  ;;  %v720_v36 = vld [vmem:[%s9318_s23 + $0xa] sm:$0xff] }
  0x52   : > { %8587 = vmatmul.msk.f32.gmra.mxu2 %vm247_vm1, %v235_v37  ;;  %8569 = vmatmul.msk.f32.gmra.mxu0 %vm247_vm1, %v217_v39  ;;  %v1031_v37 = vld [vmem:[%s9318_s23 + $0x1a] sm:$0xff] }
  0x53   : > { %8624 = vmatmul.msk.f32.gmra.mxu3 %vm247_vm1, %v199_v38  ;;  %8606 = vmatmul.msk.f32.gmra.mxu1 %vm247_vm1, %v181_v40  ;;  %v1339_v40 = vld [vmem:[%s9318_s23 + $0x1b] sm:$0xff] }
  0x5a   : > { %8588 = vmatmul.msk.f32.gmra.mxu2 %vm247_vm1, %v236_v41  ;;  %8570 = vmatmul.msk.f32.gmra.mxu0 %vm247_vm1, %v218_v43  ;;  %v1647_v41 = vld [vmem:[%s9318_s23 + $0x1c] sm:$0xff] }
  0x5b   : > { %8625 = vmatmul.msk.f32.gmra.mxu3 %vm247_vm1, %v200_v42  ;;  %8607 = vmatmul.msk.f32.gmra.mxu1 %vm247_vm1, %v182_v44 }
  0x62   : > { %8589 = vmatmul.msk.f32.gmra.mxu2 %vm247_vm1, %v237_v45  ;;  %8571 = vmatmul.msk.f32.gmra.mxu0 %vm247_vm1, %v219_v47  ;;  %v1032_v45 = vld [vmem:[%s9318_s23 + $0x22] sm:$0xff] }
  0x63   : > { %8626 = vmatmul.msk.f32.gmra.mxu3 %vm247_vm1, %v201_v46  ;;  %8608 = vmatmul.msk.f32.gmra.mxu1 %vm247_vm1, %v183_v48  ;;  %v1340_v48 = vld [vmem:[%s9318_s23 + $0x23] sm:$0xff] }
  0x6a   : > { %8590 = vmatmul.msk.f32.gmra.mxu2 %vm247_vm1, %v238_v49  ;;  %8572 = vmatmul.msk.f32.gmra.mxu0 %vm247_vm1, %v220_v51  ;;  %v9524_v49 = vld [vmem:[%s9318_s23 + $0x24] sm:$0xff] }
  0x6b   : > { %8627 = vmatmul.msk.f32.gmra.mxu3 %vm247_vm1, %v202_v50  ;;  %8609 = vmatmul.msk.f32.gmra.mxu1 %vm247_vm1, %v184_v52 }
  0x72   : > { %8591 = vmatmul.msk.f32.gmra.mxu2 %vm247_vm1, %v239_v53  ;;  %8573 = vmatmul.msk.f32.gmra.mxu0 %vm247_vm1, %v221_v55  ;;  %v1033_v53 = vld [vmem:[%s9318_s23 + $0x2a] sm:$0xff] }
  0x73   : > { %8628 = vmatmul.msk.f32.gmra.mxu3 %vm247_vm1, %v203_v54  ;;  %8610 = vmatmul.msk.f32.gmra.mxu1 %vm247_vm1, %v185_v56  ;;  %v1341_v56 = vld [vmem:[%s9318_s23 + $0x2b] sm:$0xff] }
  0x7a   : > { %8592 = vmatmul.msk.f32.gmra.mxu2 %vm247_vm1, %v240_v57  ;;  %8574 = vmatmul.msk.f32.gmra.mxu0 %vm247_vm1, %v222_v59  ;;  %v9540_v57 = vld [vmem:[%s9318_s23 + $0x2c] sm:$0xff] }
  0x7b   : > { %8629 = vmatmul.msk.f32.gmra.mxu3 %vm247_vm1, %v204_v58  ;;  %8611 = vmatmul.msk.f32.gmra.mxu1 %vm247_vm1, %v186_v60 }
  0x82   : > { %8593 = vmatmul.msk.f32.gmra.mxu2 %vm247_vm1, %v241_v61  ;;  %8575 = vmatmul.msk.f32.gmra.mxu0 %vm247_vm1, %v223_v63  ;;  %v1034_v61 = vld [vmem:[%s9318_s23 + $0x32] sm:$0xff] }
  0x83   : > { %8630 = vmatmul.msk.f32.gmra.mxu3 %vm247_vm1, %v205_v62  ;;  %8612 = vmatmul.msk.f32.gmra.mxu1 %vm247_vm1, %v187_v0  ;;  %v1342_v0 = vld [vmem:[%s9318_s23 + $0x33] sm:$0xff] }
  0x8a   : > { %8594 = vmatmul.msk.f32.gmra.mxu2 %vm247_vm1, %v242_v3  ;;  %8576 = vmatmul.msk.f32.gmra.mxu0 %vm247_vm1, %v224_v5  ;;  %v1035_v5 = vld [vmem:[%s9318_s23 + $0x3a] sm:$0xff] }
  0x8b   : > { %8631 = vmatmul.msk.f32.gmra.mxu3 %vm247_vm1, %v206_v4  ;;  %8613 = vmatmul.msk.f32.gmra.mxu1 %vm247_vm1, %v188_v6 }
  0x8f   : > { %v9463_v11 = vpop.f32.mrf.mxu0 }
  0x90   : > { %v9465_v12 = vpop.f32.mrf.mxu1 }
  0x92   : > { %8595 = vmatmul.msk.f32.gmra.mxu2 %vm247_vm1, %v243_v9  ;;  %8577 = vmatmul.msk.f32.gmra.mxu0 %vm247_vm1, %v225_v13  ;;  %v9572_v9 = vld [vmem:[%s9318_s23 + $0x3c] sm:$0xff] }
  0x93   : > { %8632 = vmatmul.msk.f32.gmra.mxu3 %vm247_vm1, %v207_v10  ;;  %8614 = vmatmul.msk.f32.gmra.mxu1 %vm247_vm1, %v189_v14 }
  0x95   : > { %v430_v15 = vpop.f32.mrf.mxu2 }
  0x96   : > { %v665_v16 = vpop.f32.mrf.mxu3 }
  0x97   : > { %v9473_v17 = vadd.f32 %v665_v16, %v430_v15  ;;  %v9477_v20 = vpop.f32.mrf.mxu0  ;;  %v1036_v15 = vld [vmem:[%s9318_s23 + $0x42] sm:$0xff] }
  0x98   : > { %v9479_v21 = vpop.f32.mrf.mxu1 }
  0x9a   : > { %8596 = vmatmul.msk.f32.gmra.mxu2 %vm247_vm1, %v244_v18  ;;  %8578 = vmatmul.msk.f32.gmra.mxu0 %vm247_vm1, %v226_v22  ;;  %v9588_v22 = vld [vmem:[%s9318_s23 + $0x44] sm:$0xff] }
  0x9b   : > { %8633 = vmatmul.msk.f32.gmra.mxu3 %vm247_vm1, %v208_v19  ;;  %8615 = vmatmul.msk.f32.gmra.mxu1 %vm247_vm1, %v190_v23  ;;  %v1344_v19 = vld [vmem:[%s9318_s23 + $0x43] sm:$0xff] }
  0x9d   : > { %v433_v24 = vpop.f32.mrf.mxu2 }
  0x9e   : > { %v668_v25 = vpop.f32.mrf.mxu3 }
  0x9f   : > { %v9487_v26 = vadd.f32 %v668_v25, %v433_v24  ;;  %v9491_v29 = vpop.f32.mrf.mxu0 }
  0xa0   : > { %v9493_v30 = vpop.f32.mrf.mxu1 }
  0xa2   : > { %8635 = vmatmul.msk.f32.vlgmr.msrb.gmra.mxu2 %vm247_vm1, %v719_v27  ;;  %8711 = vmatmul.msk.f32.vlgmr.msrb.gmra.mxu0 %vm247_vm1, %v1338_v31  ;;  %v1037_v27 = vld [vmem:[%s9318_s23 + $0x4a] sm:$0xff] }
  0xa3   : > { %8674 = vmatmul.msk.f32.vlgmr.msrb.gmra.mxu3 %vm247_vm1, %v1030_v28  ;;  %8748 = vmatmul.msk.f32.vlgmr.msrb.gmra.mxu1 %vm247_vm1, %v1646_v32  ;;  %v1345_v32 = vld [vmem:[%s9318_s23 + $0x4b] sm:$0xff] }
  0xa5   : > { %v436_v33 = vpop.f32.mrf.mxu2 }
  0xa6   : > { %v671_v34 = vpop.f32.mrf.mxu3 }
  0xa7   : > { %v9501_v35 = vadd.f32 %v671_v34, %v436_v33  ;;  %v9505_v38 = vpop.f32.mrf.mxu0  ;;  %v9604_v33 = vld [vmem:[%s9318_s23 + $0x4c] sm:$0xff] }
  0xa8   : > { %v9507_v39 = vpop.f32.mrf.mxu1  ;;  %13308 = vst [vmem:[#allocation7_spill] sm:$0xff] %v9604_v33 }
  0xaa   : > { %8636 = vmatmul.msk.f32.gmra.mxu2 %vm247_vm1, %v720_v36  ;;  %8712 = vmatmul.msk.f32.gmra.mxu0 %vm247_vm1, %v1339_v40  ;;  %v1038_v40 = vld [vmem:[%s9318_s23 + $0x52] sm:$0xff] }
  0xab   : > { %8675 = vmatmul.msk.f32.gmra.mxu3 %vm247_vm1, %v1031_v37  ;;  %8749 = vmatmul.msk.f32.gmra.mxu1 %vm247_vm1, %v1647_v41 }
  0xad   : > { %v439_v42 = vpop.f32.mrf.mxu2 }
  0xae   : > { %v674_v43 = vpop.f32.mrf.mxu3 }
  0xaf   : > { %v9515_v44 = vadd.f32 %v674_v43, %v439_v42  ;;  %v9518_v46 = vpop.f32.mrf.mxu0  ;;  %v1346_v43 = vld [vmem:[%s9318_s23 + $0x53] sm:$0xff] }
  0xb0   : > { %v9520_v47 = vpop.f32.mrf.mxu1 }
  0xb2   : > { %8637 = vmatmul.msk.f32.gmra.mxu2 %vm247_vm1, %v1030_v28  ;;  %8713 = vmatmul.msk.f32.gmra.mxu0 %vm247_vm1, %v1340_v48 }
  0xb3   : > { %8676 = vmatmul.msk.f32.gmra.mxu3 %vm247_vm1, %v1032_v45  ;;  %8750 = vmatmul.msk.f32.gmra.mxu1 %vm247_vm1, %v9524_v49 }
  0xb5   : > { %v442_v50 = vpop.f32.mrf.mxu2 }
  0xb6   : > { %v677_v51 = vpop.f32.mrf.mxu3 }
  0xb7   : > { %v9531_v52 = vadd.f32 %v677_v51, %v442_v50  ;;  %v9534_v54 = vpop.f32.mrf.mxu0 }
  0xb8   : > { %v9536_v55 = vpop.f32.mrf.mxu1 }
  0xba   : > { %8638 = vmatmul.msk.f32.gmra.mxu2 %vm247_vm1, %v1031_v37  ;;  %8714 = vmatmul.msk.f32.gmra.mxu0 %vm247_vm1, %v1341_v56 }
  0xbb   : > { %8677 = vmatmul.msk.f32.gmra.mxu3 %vm247_vm1, %v1033_v53  ;;  %8751 = vmatmul.msk.f32.gmra.mxu1 %vm247_vm1, %v9540_v57 }
  0xbd   : > { %v445_v58 = vpop.f32.mrf.mxu2 }
  0xbe   : > { %v680_v59 = vpop.f32.mrf.mxu3 }
  0xbf   : > { %v9547_v60 = vadd.f32 %v680_v59, %v445_v58  ;;  %v9550_v62 = vpop.f32.mrf.mxu0  ;;  %v1347_v59 = vld [vmem:[%s9318_s23 + $0x5b] sm:$0xff] }
  0xc0   : > { %v9552_v63 = vpop.f32.mrf.mxu1 }
  0xc2   : > { %8639 = vmatmul.msk.f32.gmra.mxu2 %vm247_vm1, %v1032_v45  ;;  %8715 = vmatmul.msk.f32.gmra.mxu0 %vm247_vm1, %v1342_v0  ;;  %v9620_v45 = vld [vmem:[%s9318_s23 + $0x54] sm:$0xff] }
  0xc3   : > { %8678 = vmatmul.msk.f32.gmra.mxu3 %vm247_vm1, %v1034_v61  ;;  %8752 = vmatmul.msk.f32.gmra.mxu1 %vm247_vm1, %v9556_v1  ;;  %13310 = vst [vmem:[#allocation9_spill] sm:$0xff] %v9620_v45 }
  0xc5   : > { %v448_v2 = vpop.f32.mrf.mxu2 }
  0xc6   : > { %v683_v3 = vpop.f32.mrf.mxu3 }
  0xc7   : > { %v9563_v4 = vadd.f32 %v683_v3, %v448_v2  ;;  %v9566_v6 = vpop.f32.mrf.mxu0 }
  0xc8   : > { %v9568_v7 = vpop.f32.mrf.mxu1 }
  0xc9   : > { %13305 = vst [vmem:[#allocation4_spill] sm:$0xff] %v9563_v4 }
  0xca   : > { %8640 = vmatmul.msk.f32.gmra.mxu2 %vm247_vm1, %v1033_v53  ;;  %8716 = vmatmul.msk.f32.gmra.mxu0 %vm247_vm1, %v1343_v8  ;;  %v1039_v53 = vld [vmem:[%s9318_s23 + $0x5a] sm:$0xff] }
  0xcb   : > { %8679 = vmatmul.msk.f32.gmra.mxu3 %vm247_vm1, %v1035_v5  ;;  %8753 = vmatmul.msk.f32.gmra.mxu1 %vm247_vm1, %v9572_v9 }
  0xcd   : > { %v451_v10 = vpop.f32.mrf.mxu2 }
  0xce   : > { %v686_v13 = vpop.f32.mrf.mxu3 }
  0xcf   : > { %v9579_v14 = vadd.f32 %v686_v13, %v451_v10  ;;  %v9582_v16 = vpop.f32.mrf.mxu0  ;;  %v1348_v13 = vld [vmem:[%s9318_s23 + $0x63] sm:$0xff] }
  0xd0   : > { %v9584_v18 = vpop.f32.mrf.mxu1 }
  0xd1   : > { %13306 = vst [vmem:[#allocation5_spill] sm:$0xff] %v9579_v14 }
  0xd2   : > { %8641 = vmatmul.msk.f32.gmra.mxu2 %vm247_vm1, %v1034_v61  ;;  %8717 = vmatmul.msk.f32.gmra.mxu0 %vm247_vm1, %v1344_v19  ;;  %v9636_v61 = vld [vmem:[%s9318_s23 + $0x5c] sm:$0xff] }
  0xd3   : > { %8680 = vmatmul.msk.f32.gmra.mxu3 %vm247_vm1, %v1036_v15  ;;  %8754 = vmatmul.msk.f32.gmra.mxu1 %vm247_vm1, %v9588_v22  ;;  %13312 = vst [vmem:[#allocation11_spill] sm:$0xff] %v9636_v61 }
  0xd5   : > { %v454_v23 = vpop.f32.mrf.mxu2 }
  0xd6   : > { %v689_v24 = vpop.f32.mrf.mxu3 }
  0xd7   : > { %v9595_v25 = vadd.f32 %v689_v24, %v454_v23  ;;  %v9598_v28 = vpop.f32.mrf.mxu0 }
  0xd8   : > { %v9600_v31 = vpop.f32.mrf.mxu1 }
  0xd9   : > { %13307 = vst [vmem:[#allocation6_spill] sm:$0xff] %v9595_v25  ;;  %v1662_v25 = vld [vmem:[%s9318_s23 + $0x94] sm:$0xff] }
  0xda   : > { %8642 = vmatmul.msk.f32.gmra.mxu2 %vm247_vm1, %v1035_v5  ;;  %8718 = vmatmul.msk.f32.gmra.mxu0 %vm247_vm1, %v1345_v32  ;;  %v1040_v5 = vld [vmem:[%s9318_s23 + $0x62] sm:$0xff] }
  0xdb   : > { %8681 = vmatmul.msk.f32.gmra.mxu3 %vm247_vm1, %v1037_v27  ;;  %8755 = vmatmul.msk.f32.gmra.mxu1 %vm247_vm1, %v9604_v33  ;;  %v1355_v33 = vld [vmem:[%s9318_s23 + $0x9b] sm:$0xff] }
  0xdd   : > { %v457_v34 = vpop.f32.mrf.mxu2 }
  0xde   : > { %v692_v36 = vpop.f32.mrf.mxu3 }
  0xdf   : > { %v9611_v37 = vadd.f32 %v692_v36, %v457_v34  ;;  %v9614_v41 = vpop.f32.mrf.mxu0  ;;  %v1349_v36 = vld [vmem:[%s9318_s23 + $0x6b] sm:$0xff] }
  0xe0   : > { %v9616_v42 = vpop.f32.mrf.mxu1 }
  0xe1   : > { %13309 = vst [vmem:[#allocation8_spill] sm:$0xff] %v9611_v37 }
  0xe2   : > { %8643 = vmatmul.msk.f32.gmra.mxu2 %vm247_vm1, %v1036_v15  ;;  %8719 = vmatmul.msk.f32.gmra.mxu0 %vm247_vm1, %v1346_v43  ;;  %v9652_v15 = vld [vmem:[%s9318_s23 + $0x64] sm:$0xff] }
  0xe3   : > { %8682 = vmatmul.msk.f32.gmra.mxu3 %vm247_vm1, %v1038_v40  ;;  %8756 = vmatmul.msk.f32.gmra.mxu1 %vm247_vm1, %v9620_v45  ;;  %13314 = vst [vmem:[#allocation13_spill] sm:$0xff] %v9652_v15 }
  0xe5   : > { %v460_v48 = vpop.f32.mrf.mxu2 }
  0xe6   : > { %v695_v50 = vpop.f32.mrf.mxu3 }
  0xe7   : > { %v9627_v51 = vadd.f32 %v695_v50, %v460_v48  ;;  %v9630_v56 = vpop.f32.mrf.mxu0 }
  0xe8   : > { %v9632_v58 = vpop.f32.mrf.mxu1 }
  0xe9   : > { %13311 = vst [vmem:[#allocation10_spill] sm:$0xff] %v9627_v51 }
  0xea   : > { %8644 = vmatmul.msk.f32.gmra.mxu2 %vm247_vm1, %v1037_v27  ;;  %8720 = vmatmul.msk.f32.gmra.mxu0 %vm247_vm1, %v1347_v59  ;;  %v1041_v27 = vld [vmem:[%s9318_s23 + $0x6a] sm:$0xff]  ;;  %v1042_v59 = vld [vmem:[%s9318_s23 + $0x72] sm:$0xff] }
  0xeb   : > { %8683 = vmatmul.msk.f32.gmra.mxu3 %vm247_vm1, %v1039_v53  ;;  %8757 = vmatmul.msk.f32.gmra.mxu1 %vm247_vm1, %v9636_v61  ;;  %v1354_v61 = vld [vmem:[%s9318_s23 + $0x93] sm:$0xff] }
  0xed   : > { %v463_v0 = vpop.f32.mrf.mxu2 }
  0xee   : > { %v698_v2 = vpop.f32.mrf.mxu3 }
  0xef   : > { %v9643_v3 = vadd.f32 %v698_v2, %v463_v0  ;;  %v9646_v8 = vpop.f32.mrf.mxu0 }
  0xf0   : > { %v9648_v10 = vpop.f32.mrf.mxu1 }
  0xf1   : > { %13313 = vst [vmem:[#allocation12_spill] sm:$0xff] %v9643_v3 }
  0xf2   : > { %8645 = vmatmul.msk.f32.gmra.mxu2 %vm247_vm1, %v1038_v40  ;;  %8721 = vmatmul.msk.f32.gmra.mxu0 %vm247_vm1, %v1348_v13  ;;  %v9668_v40 = vld [vmem:[%s9318_s23 + $0x6c] sm:$0xff]  ;;  %v9684_v13 = vld [vmem:[%s9318_s23 + $0x74] sm:$0xff] }
  0xf3   : > { %8684 = vmatmul.msk.f32.gmra.mxu3 %vm247_vm1, %v1040_v5  ;;  %8758 = vmatmul.msk.f32.gmra.mxu1 %vm247_vm1, %v9652_v15  ;;  %13316 = vst [vmem:[#allocation15_spill] sm:$0xff] %v9668_v40  ;;  %v1661_v15 = vld [vmem:[%s9318_s23 + $0x8c] sm:$0xff] }
  0xf4   : > { %13318 = vst [vmem:[#allocation17_spill] sm:$0xff] %v9684_v13 }
  0xf5   : > { %v466_v19 = vpop.f32.mrf.mxu2 }
  0xf6   : > { %v701_v23 = vpop.f32.mrf.mxu3 }
  0xf7   : > { %v9659_v24 = vadd.f32 %v701_v23, %v466_v19  ;;  %v9662_v32 = vpop.f32.mrf.mxu0 }
  0xf8   : > { %v9664_v34 = vpop.f32.mrf.mxu1 }
  0xf9   : > { %13315 = vst [vmem:[#allocation14_spill] sm:$0xff] %v9659_v24  ;;  %v9700_v24 = vld [vmem:[%s9318_s23 + $0x7c] sm:$0xff] }
  0xfa   : > { %8646 = vmatmul.msk.f32.gmra.mxu2 %vm247_vm1, %v1039_v53  ;;  %8722 = vmatmul.msk.f32.gmra.mxu0 %vm247_vm1, %v1349_v36  ;;  %v1350_v53 = vld [vmem:[%s9318_s23 + $0x73] sm:$0xff]  ;;  %13320 = vst [vmem:[#allocation19_spill] sm:$0xff] %v9700_v24 }
  0xfb   : > { %8685 = vmatmul.msk.f32.gmra.mxu3 %vm247_vm1, %v1041_v27  ;;  %8759 = vmatmul.msk.f32.gmra.mxu1 %vm247_vm1, %v9668_v40  ;;  %v9716_v40 = vld [vmem:[%s9318_s23 + $0x84] sm:$0xff] }
  0xfc   : > { %13322 = vst [vmem:[#allocation21_spill] sm:$0xff] %v9716_v40 }
  0xfd   : > { %v469_v43 = vpop.f32.mrf.mxu2 }
  0xfe   : > { %v704_v48 = vpop.f32.mrf.mxu3 }
  0xff   : > { %v9675_v50 = vadd.f32 %v704_v48, %v469_v43  ;;  %v9678_v0 = vpop.f32.mrf.mxu0  ;;  %v1043_v43 = vld [vmem:[%s9318_s23 + $0x7a] sm:$0xff] }
 0x100   : > { %v9680_v2 = vpop.f32.mrf.mxu1 }
 0x101   : > { %13317 = vst [vmem:[#allocation16_spill] sm:$0xff] %v9675_v50 }
 0x102   : > { %8647 = vmatmul.msk.f32.gmra.mxu2 %vm247_vm1, %v1040_v5  ;;  %8723 = vmatmul.msk.f32.gmra.mxu0 %vm247_vm1, %v1350_v53  ;;  %v1351_v5 = vld [vmem:[%s9318_s23 + $0x7b] sm:$0xff] }
 0x103   : > { %8686 = vmatmul.msk.f32.gmra.mxu3 %vm247_vm1, %v1042_v59  ;;  %8760 = vmatmul.msk.f32.gmra.mxu1 %vm247_vm1, %v9684_v13 }
 0x105   : > { %v472_v19 = vpop.f32.mrf.mxu2 }
 0x106   : > { %v707_v23 = vpop.f32.mrf.mxu3 }
 0x107   : > { %v9691_v36 = vadd.f32 %v707_v23, %v472_v19  ;;  %v9694_v48 = vpop.f32.mrf.mxu0 }
 0x108   : > { %v9696_v50 = vpop.f32.mrf.mxu1 }
 0x109   : > { %13319 = vst [vmem:[#allocation18_spill] sm:$0xff] %v9691_v36  ;;  %v1044_v36 = vld [vmem:[%s9318_s23 + $0x82] sm:$0xff] }
 0x10a   : > { %8648 = vmatmul.msk.f32.gmra.mxu2 %vm247_vm1, %v1041_v27  ;;  %8724 = vmatmul.msk.f32.gmra.mxu0 %vm247_vm1, %v1351_v5  ;;  %v1352_v27 = vld [vmem:[%s9318_s23 + $0x83] sm:$0xff] }
 0x10b   : > { %8687 = vmatmul.msk.f32.gmra.mxu3 %vm247_vm1, %v1043_v43  ;;  %8761 = vmatmul.msk.f32.gmra.mxu1 %vm247_vm1, %v9700_v24 }
 0x10d   : > { %v475_v53 = vpop.f32.mrf.mxu2 }
 0x10e   : > { %v710_v19 = vpop.f32.mrf.mxu3 }
 0x10f   : > { %v9707_v23 = vadd.f32 %v710_v19, %v475_v53  ;;  %v9710_v13 = vpop.f32.mrf.mxu0 }
 0x110   : > { %v9712_v3 = vpop.f32.mrf.mxu1 }
 0x111   : > { %13321 = vst [vmem:[#allocation20_spill] sm:$0xff] %v9707_v23  ;;  %v1045_v23 = vld [vmem:[%s9318_s23 + $0x8a] sm:$0xff] }
 0x112   : > { %8649 = vmatmul.msk.f32.gmra.mxu2 %vm247_vm1, %v1042_v59  ;;  %8725 = vmatmul.msk.f32.gmra.mxu0 %vm247_vm1, %v1352_v27  ;;  %v1353_v59 = vld [vmem:[%s9318_s23 + $0x8b] sm:$0xff] }
 0x113   : > { %8688 = vmatmul.msk.f32.gmra.mxu3 %vm247_vm1, %v1044_v36  ;;  %8762 = vmatmul.msk.f32.gmra.mxu1 %vm247_vm1, %v9716_v40 }
 0x115   : > { %v478_v5 = vpop.f32.mrf.mxu2 }
 0x116   : > { %v713_v53 = vpop.f32.mrf.mxu3 }
 0x117   : > { %v9723_v19 = vadd.f32 %v713_v53, %v478_v5  ;;  %v9726_v24 = vpop.f32.mrf.mxu0 }
 0x118   : > { %v9728_v51 = vpop.f32.mrf.mxu1 }
 0x119   : > { %13323 = vst [vmem:[#allocation22_spill] sm:$0xff] %v9723_v19  ;;  %v1046_v19 = vld [vmem:[%s9318_s23 + $0x92] sm:$0xff] }
 0x11a   : > { %8650 = vmatmul.msk.f32.gmra.mxu2 %vm247_vm1, %v1043_v43  ;;  %8726 = vmatmul.msk.f32.gmra.mxu0 %vm247_vm1, %v1353_v59 }
 0x11b   : > { %8689 = vmatmul.msk.f32.gmra.mxu3 %vm247_vm1, %v1045_v23  ;;  %8763 = vmatmul.msk.f32.gmra.mxu1 %vm247_vm1, %v1661_v15  ;;  %v612_v15 = vadd.f32 %v9465_v12, %v9463_v11  ;;  %v615_v11 = vadd.f32 %v9479_v21, %v9477_v20  ;;  %v618_v20 = vadd.f32 %v9493_v30, %v9491_v29 }
 0x11c   : > { %v621_v29 = vadd.f32 %v9507_v39, %v9505_v38  ;;  %v624_v38 = vadd.f32 %v9520_v47, %v9518_v46  ;;  %v627_v46 = vadd.f32 %v9536_v55, %v9534_v54  ;;  %v630_v54 = vadd.f32 %v9552_v63, %v9550_v62 }
 0x11d   : > { %v481_v27 = vpop.f32.mrf.mxu2  ;;  %v633_v62 = vadd.f32 %v9568_v7, %v9566_v6  ;;  %v636_v6 = vadd.f32 %v9584_v18, %v9582_v16  ;;  %v639_v16 = vadd.f32 %v9600_v31, %v9598_v28  ;;  %v642_v28 = vadd.f32 %v9616_v42, %v9614_v41 }
 0x11e   : > { %v716_v5 = vpop.f32.mrf.mxu3  ;;  %v645_v41 = vadd.f32 %v9632_v58, %v9630_v56  ;;  %v648_v56 = vadd.f32 %v9648_v10, %v9646_v8  ;;  %v651_v8 = vadd.f32 %v9664_v34, %v9662_v32  ;;  %v654_v32 = vadd.f32 %v9680_v2, %v9678_v0 }
 0x11f   : > { %v9736_v53 = vadd.f32 %v716_v5, %v481_v27  ;;  %v1502_v40 = vpop.f32.mrf.mxu0  ;;  %v1047_v5 = vld [vmem:[%s9318_s23 + $0x9a] sm:$0xff]  ;;  %v657_v0 = vadd.f32 %v9696_v50, %v9694_v48  ;;  %v660_v50 = vadd.f32 %v9712_v3, %v9710_v13  ;;  %v663_v3 = vadd.f32 %v9728_v51, %v9726_v24 }
 0x120   : > { %v1810_v37 = vpop.f32.mrf.mxu1 }
 0x121   : > { %13324 = vst [vmem:[#allocation23_spill] sm:$0xff] %v9736_v53 }
 0x122   : > { %8651 = vmatmul.msk.f32.gmra.mxu2 %vm247_vm1, %v1044_v36  ;;  %8727 = vmatmul.msk.f32.gmra.mxu0 %vm247_vm1, %v1354_v61  ;;  %v1663_v36 = vld [vmem:[%s9318_s23 + $0x9c] sm:$0xff] }
 0x123   : > { %8690 = vmatmul.msk.f32.gmra.mxu3 %vm247_vm1, %v1046_v19  ;;  %8764 = vmatmul.msk.f32.gmra.mxu1 %vm247_vm1, %v1662_v25 }
 0x125   : > { %v883_v43 = vpop.f32.mrf.mxu2 }
 0x126   : > { %v1194_v59 = vpop.f32.mrf.mxu3  ;;  %v991_v27 = vadd.f32 %v883_v43, %v612_v15  ;;  %v1048_v43 = vld [vmem:[%s9318_s23 + $0xa2] sm:$0xff] }
 0x127   : > { %v1505_v45 = vpop.f32.mrf.mxu0 }
 0x128   : > { %v1302_v53 = vadd.f32 %v1194_v59, %v991_v27  ;;  %v1813_v14 = vpop.f32.mrf.mxu1  ;;  %v1664_v27 = vld [vmem:[%s9318_s23 + $0xa4] sm:$0xff] }
 0x12a   : > { %v1610_v4 = vadd.f32 %v1502_v40, %v1302_v53  ;;  %8652 = vmatmul.msk.f32.gmra.mxu2 %vm247_vm1, %v1045_v23  ;;  %8728 = vmatmul.msk.f32.gmra.mxu0 %vm247_vm1, %v1355_v33  ;;  %v1356_v23 = vld [vmem:[%s9318_s23 + $0xa3] sm:$0xff] }
 0x12b   : > { %8691 = vmatmul.msk.f32.gmra.mxu3 %vm247_vm1, %v1047_v5  ;;  %8765 = vmatmul.msk.f32.gmra.mxu1 %vm247_vm1, %v1663_v36 }
 0x12c   : > { %v9756_v12 = vadd.f32 %v1810_v37, %v1610_v4 }
 0x12d   : > { %v886_v25 = vpop.f32.mrf.mxu2 }
 0x12e   : > { %13325 = vst [vmem:[#allocation24_spill] sm:$0xff] %v9756_v12  ;;  %v1197_v61 = vpop.f32.mrf.mxu3  ;;  %v992_v15 = vadd.f32 %v886_v25, %v615_v11  ;;  %v1049_v11 = vld [vmem:[%s9318_s23 + $0xaa] sm:$0xff] }
 0x12f   : > { %v1508_v40 = vpop.f32.mrf.mxu0 }
 0x130   : > { %v1303_v59 = vadd.f32 %v1197_v61, %v992_v15  ;;  %v1816_v53 = vpop.f32.mrf.mxu1  ;;  %v1665_v15 = vld [vmem:[%s9318_s23 + $0xac] sm:$0xff] }
 0x132   : > { %v1611_v33 = vadd.f32 %v1505_v45, %v1303_v59  ;;  %8653 = vmatmul.msk.f32.gmra.mxu2 %vm247_vm1, %v1046_v19  ;;  %8729 = vmatmul.msk.f32.gmra.mxu0 %vm247_vm1, %v1356_v23  ;;  %v1357_v19 = vld [vmem:[%s9318_s23 + $0xab] sm:$0xff] }
 0x133   : > { %8692 = vmatmul.msk.f32.gmra.mxu3 %vm247_vm1, %v1048_v43  ;;  %8766 = vmatmul.msk.f32.gmra.mxu1 %vm247_vm1, %v1664_v27 }
 0x134   : > { %v9767_v21 = vadd.f32 %v1813_v14, %v1611_v33  ;;  %v1050_v33 = vld [vmem:[%s9318_s23 + $0xb2] sm:$0xff] }
 0x135   : > { %v889_v4 = vpop.f32.mrf.mxu2 }
 0x136   : > { %13326 = vst [vmem:[#allocation25_spill] sm:$0xff] %v9767_v21  ;;  %v1200_v37 = vpop.f32.mrf.mxu3  ;;  %v993_v36 = vadd.f32 %v889_v4, %v618_v20  ;;  %v2277_v21 = vld [vmem:[%s9318_s23 + $0x85] sm:$0xff] }
 0x137   : > { %v1511_v45 = vpop.f32.mrf.mxu0 }
 0x138   : > { %v1304_v25 = vadd.f32 %v1200_v37, %v993_v36  ;;  %v1819_v61 = vpop.f32.mrf.mxu1  ;;  %v1666_v37 = vld [vmem:[%s9318_s23 + $0xb4] sm:$0xff] }
 0x13a   : > { %v1612_v59 = vadd.f32 %v1508_v40, %v1304_v25  ;;  %8654 = vmatmul.msk.f32.gmra.mxu2 %vm247_vm1, %v1047_v5  ;;  %8730 = vmatmul.msk.f32.gmra.mxu0 %vm247_vm1, %v1357_v19  ;;  %v1358_v5 = vld [vmem:[%s9318_s23 + $0xb3] sm:$0xff] }
 0x13b   : > { %8693 = vmatmul.msk.f32.gmra.mxu3 %vm247_vm1, %v1049_v11  ;;  %8767 = vmatmul.msk.f32.gmra.mxu1 %vm247_vm1, %v1665_v15  ;;  %v1051_v15 = vld [vmem:[%s9318_s23 + $0xba] sm:$0xff] }
 0x13c   : > { %v9778_v30 = vadd.f32 %v1816_v53, %v1612_v59 }
 0x13d   : > { %v892_v14 = vpop.f32.mrf.mxu2 }
 0x13e   : > { %13327 = vst [vmem:[#allocation26_spill] sm:$0xff] %v9778_v30  ;;  %v1203_v23 = vpop.f32.mrf.mxu3  ;;  %v994_v27 = vadd.f32 %v892_v14, %v621_v29  ;;  %v1667_v14 = vld [vmem:[%s9318_s23 + $0xbc] sm:$0xff] }
 0x13f   : > { %v1514_v40 = vpop.f32.mrf.mxu0 }
 0x140   : > { %v1305_v20 = vadd.f32 %v1203_v23, %v994_v27  ;;  %v1822_v4 = vpop.f32.mrf.mxu1 }
 0x142   : > { %v1613_v36 = vadd.f32 %v1511_v45, %v1305_v20  ;;  %8655 = vmatmul.msk.f32.gmra.mxu2 %vm247_vm1, %v1048_v43  ;;  %8731 = vmatmul.msk.f32.gmra.mxu0 %vm247_vm1, %v1358_v5  ;;  %v1359_v43 = vld [vmem:[%s9318_s23 + $0xbb] sm:$0xff] }
 0x143   : > { %8694 = vmatmul.msk.f32.gmra.mxu3 %vm247_vm1, %v1050_v33  ;;  %8768 = vmatmul.msk.f32.gmra.mxu1 %vm247_vm1, %v1666_v37  ;;  %v1052_v5 = vld [vmem:[%s9318_s23 + $0xc2] sm:$0xff] }
 0x144   : > { %v9789_v39 = vadd.f32 %v1819_v61, %v1613_v36 }
 0x145   : > { %v895_v53 = vpop.f32.mrf.mxu2 }
 0x146   : > { %13328 = vst [vmem:[#allocation27_spill] sm:$0xff] %v9789_v39  ;;  %v1206_v25 = vpop.f32.mrf.mxu3  ;;  %v995_v19 = vadd.f32 %v895_v53, %v624_v38  ;;  %v1668_v38 = vld [vmem:[%s9318_s23 + $0xc4] sm:$0xff] }
 0x147   : > { %v1517_v45 = vpop.f32.mrf.mxu0 }
 0x148   : > { %v1306_v59 = vadd.f32 %v1206_v25, %v995_v19  ;;  %v1825_v29 = vpop.f32.mrf.mxu1 }
 0x14a   : > { %v1614_v23 = vadd.f32 %v1514_v40, %v1306_v59  ;;  %8656 = vmatmul.msk.f32.gmra.mxu2 %vm247_vm1, %v1049_v11  ;;  %8732 = vmatmul.msk.f32.gmra.mxu0 %vm247_vm1, %v1359_v43  ;;  %v1360_v11 = vld [vmem:[%s9318_s23 + $0xc3] sm:$0xff] }
 0x14b   : > { %8695 = vmatmul.msk.f32.gmra.mxu3 %vm247_vm1, %v1051_v15  ;;  %8769 = vmatmul.msk.f32.gmra.mxu1 %vm247_vm1, %v1667_v14  ;;  %v1053_v59 = vld [vmem:[%s9318_s23 + $0xca] sm:$0xff] }
 0x14c   : > { %v9800_v47 = vadd.f32 %v1822_v4, %v1614_v23  ;;  %v1669_v23 = vld [vmem:[%s9318_s23 + $0xcc] sm:$0xff] }
 0x14d   : > { %v898_v61 = vpop.f32.mrf.mxu2 }
 0x14e   : > { %13329 = vst [vmem:[#allocation28_spill] sm:$0xff] %v9800_v47  ;;  %v1209_v27 = vpop.f32.mrf.mxu3  ;;  %v996_v20 = vadd.f32 %v898_v61, %v627_v46 }
 0x14f   : > { %v1520_v40 = vpop.f32.mrf.mxu0 }
 0x150   : > { %v1307_v37 = vadd.f32 %v1209_v27, %v996_v20  ;;  %v1828_v36 = vpop.f32.mrf.mxu1  ;;  %v1054_v20 = vld [vmem:[%s9318_s23 + $0xd2] sm:$0xff] }
 0x152   : > { %v1615_v53 = vadd.f32 %v1517_v45, %v1307_v37  ;;  %8657 = vmatmul.msk.f32.gmra.mxu2 %vm247_vm1, %v1050_v33  ;;  %8733 = vmatmul.msk.f32.gmra.mxu0 %vm247_vm1, %v1360_v11  ;;  %v1361_v33 = vld [vmem:[%s9318_s23 + $0xcb] sm:$0xff] }
 0x153   : > { %8696 = vmatmul.msk.f32.gmra.mxu3 %vm247_vm1, %v1052_v5  ;;  %8770 = vmatmul.msk.f32.gmra.mxu1 %vm247_vm1, %v1668_v38  ;;  %v1670_v38 = vld [vmem:[%s9318_s23 + $0xd4] sm:$0xff] }
 0x154   : > { %v9811_v55 = vadd.f32 %v1825_v29, %v1615_v53 }
 0x155   : > { %v901_v4 = vpop.f32.mrf.mxu2 }
 0x156   : > { %13330 = vst [vmem:[#allocation29_spill] sm:$0xff] %v9811_v55  ;;  %v1212_v25 = vpop.f32.mrf.mxu3  ;;  %v997_v19 = vadd.f32 %v901_v4, %v630_v54  ;;  %v13354_v55 = vld [vmem:[#allocation16_spill] sm:$0xff] }
 0x157   : > { %v1523_v45 = vpop.f32.mrf.mxu0 }
 0x158   : > { %v1308_v43 = vadd.f32 %v1212_v25, %v997_v19  ;;  %v1831_v14 = vpop.f32.mrf.mxu1  ;;  %v1055_v25 = vld [vmem:[%s9318_s23 + $0xda] sm:$0xff] }
 0x15a   : > { %v1616_v46 = vadd.f32 %v1520_v40, %v1308_v43  ;;  %8658 = vmatmul.msk.f32.gmra.mxu2 %vm247_vm1, %v1051_v15  ;;  %8734 = vmatmul.msk.f32.gmra.mxu0 %vm247_vm1, %v1361_v33  ;;  %v1362_v15 = vld [vmem:[%s9318_s23 + $0xd3] sm:$0xff]  ;;  %v1671_v33 = vld [vmem:[%s9318_s23 + $0xdc] sm:$0xff] }
 0x15b   : > { %8697 = vmatmul.msk.f32.gmra.mxu3 %vm247_vm1, %v1053_v59  ;;  %8771 = vmatmul.msk.f32.gmra.mxu1 %vm247_vm1, %v1669_v23 }
 0x15c   : > { %v9822_v63 = vadd.f32 %v1828_v36, %v1616_v46 }
 0x15d   : > { %v904_v29 = vpop.f32.mrf.mxu2 }
 0x15e   : > { %13331 = vst [vmem:[#allocation30_spill] sm:$0xff] %v9822_v63  ;;  %v1215_v61 = vpop.f32.mrf.mxu3  ;;  %v998_v27 = vadd.f32 %v904_v29, %v633_v62  ;;  %v1056_v29 = vld [vmem:[%s9318_s23 + $0xe2] sm:$0xff] }
 0x15f   : > { %v1526_v40 = vpop.f32.mrf.mxu0  ;;  %v13352_v63 = vld [vmem:[#allocation19_spill] sm:$0xff] }
 0x160   : > { %v1309_v37 = vadd.f32 %v1215_v61, %v998_v27  ;;  %v1834_v11 = vpop.f32.mrf.mxu1 }
 0x162   : > { %v1617_v53 = vadd.f32 %v1523_v45, %v1309_v37  ;;  %8659 = vmatmul.msk.f32.gmra.mxu2 %vm247_vm1, %v1052_v5  ;;  %8735 = vmatmul.msk.f32.gmra.mxu0 %vm247_vm1, %v1362_v15  ;;  %v1363_v5 = vld [vmem:[%s9318_s23 + $0xdb] sm:$0xff] }
 0x163   : > { %8698 = vmatmul.msk.f32.gmra.mxu3 %vm247_vm1, %v1054_v20  ;;  %8772 = vmatmul.msk.f32.gmra.mxu1 %vm247_vm1, %v1670_v38 }
 0x164   : > { %v9833_v7 = vadd.f32 %v1831_v14, %v1617_v53 }
 0x165   : > { %v907_v36 = vpop.f32.mrf.mxu2 }
 0x166   : > { %13332 = vst [vmem:[#allocation31_spill] sm:$0xff] %v9833_v7  ;;  %v1218_v54 = vpop.f32.mrf.mxu3  ;;  %v999_v4 = vadd.f32 %v907_v36, %v636_v6  ;;  %v1057_v6 = vld [vmem:[%s9318_s23 + $0xea] sm:$0xff] }
 0x167   : > { %v1529_v43 = vpop.f32.mrf.mxu0 }
 0x168   : > { %v1310_v19 = vadd.f32 %v1218_v54, %v999_v4  ;;  %v1837_v45 = vpop.f32.mrf.mxu1 }
 0x16a   : > { %v1618_v23 = vadd.f32 %v1526_v40, %v1310_v19  ;;  %8660 = vmatmul.msk.f32.gmra.mxu2 %vm247_vm1, %v1053_v59  ;;  %8736 = vmatmul.msk.f32.gmra.mxu0 %vm247_vm1, %v1363_v5  ;;  %v1364_v59 = vld [vmem:[%s9318_s23 + $0xe3] sm:$0xff]  ;;  %v1673_v19 = vld [vmem:[%s9318_s23 + $0xec] sm:$0xff] }
 0x16b   : > { %8699 = vmatmul.msk.f32.gmra.mxu3 %vm247_vm1, %v1055_v25  ;;  %8773 = vmatmul.msk.f32.gmra.mxu1 %vm247_vm1, %v1671_v33  ;;  %v1672_v40 = vld [vmem:[%s9318_s23 + $0xe4] sm:$0xff] }
 0x16c   : > { %v9844_v18 = vadd.f32 %v1834_v11, %v1618_v23  ;;  %v1058_v23 = vld [vmem:[%s9318_s23 + $0xf2] sm:$0xff] }
 0x16d   : > { %v910_v14 = vpop.f32.mrf.mxu2 }
 0x16e   : > { %13333 = vst [vmem:[#allocation32_spill] sm:$0xff] %v9844_v18  ;;  %v1221_v46 = vpop.f32.mrf.mxu3  ;;  %v1000_v62 = vadd.f32 %v910_v14, %v639_v16 }
 0x16f   : > { %v1532_v27 = vpop.f32.mrf.mxu0 }
 0x170   : > { %v1311_v61 = vadd.f32 %v1221_v46, %v1000_v62  ;;  %v1840_v37 = vpop.f32.mrf.mxu1  ;;  %v1674_v62 = vld [vmem:[%s9318_s23 + $0xf4] sm:$0xff] }
 0x172   : > { %v1619_v15 = vadd.f32 %v1529_v43, %v1311_v61  ;;  %8661 = vmatmul.msk.f32.gmra.mxu2 %vm247_vm1, %v1054_v20  ;;  %8737 = vmatmul.msk.f32.gmra.mxu0 %vm247_vm1, %v1364_v59  ;;  %v1365_v20 = vld [vmem:[%s9318_s23 + $0xeb] sm:$0xff] }
 0x173   : > { %8700 = vmatmul.msk.f32.gmra.mxu3 %vm247_vm1, %v1056_v29  ;;  %8774 = vmatmul.msk.f32.gmra.mxu1 %vm247_vm1, %v1672_v40  ;;  %v1059_v40 = vld [vmem:[%s9318_s23 + $0xfa] sm:$0xff] }
 0x174   : > { %v9855_v31 = vadd.f32 %v1837_v45, %v1619_v15 }
 0x175   : > { %v913_v11 = vpop.f32.mrf.mxu2 }
 0x176   : > { %13334 = vst [vmem:[#allocation33_spill] sm:$0xff] %v9855_v31  ;;  %v1224_v38 = vpop.f32.mrf.mxu3  ;;  %v1001_v53 = vadd.f32 %v913_v11, %v642_v28 }
 0x177   : > { %v1535_v54 = vpop.f32.mrf.mxu0 }
 0x178   : > { %v1312_v36 = vadd.f32 %v1224_v38, %v1001_v53  ;;  %v1843_v4 = vpop.f32.mrf.mxu1  ;;  %v1675_v38 = vld [vmem:[%s9318_s23 + $0xfc] sm:$0xff] }
 0x17a   : > { %v1620_v43 = vadd.f32 %v1532_v27, %v1312_v36  ;;  %8662 = vmatmul.msk.f32.gmra.mxu2 %vm247_vm1, %v1055_v25  ;;  %8738 = vmatmul.msk.f32.gmra.mxu0 %vm247_vm1, %v1365_v20  ;;  %v1366_v25 = vld [vmem:[%s9318_s23 + $0xf3] sm:$0xff] }
 0x17b   : > { %8701 = vmatmul.msk.f32.gmra.mxu3 %vm247_vm1, %v1057_v6  ;;  %8775 = vmatmul.msk.f32.gmra.mxu1 %vm247_vm1, %v1673_v19 }
 0x17c   : > { %v9866_v42 = vadd.f32 %v1840_v37, %v1620_v43 }
 0x17d   : > { %v916_v45 = vpop.f32.mrf.mxu2 }
 0x17e   : > { %13335 = vst [vmem:[#allocation34_spill] sm:$0xff] %v9866_v42  ;;  %v1227_v5 = vpop.f32.mrf.mxu3  ;;  %v1002_v33 = vadd.f32 %v916_v45, %v645_v41  ;;  %v1676_v41 = vld [vmem:[%s9318_s23 + $0x104] sm:$0xff] }
 0x17f   : > { %v1538_v14 = vpop.f32.mrf.mxu0 }
 0x180   : > { %v1313_v16 = vadd.f32 %v1227_v5, %v1002_v33  ;;  %v9869_v46 = vpop.f32.mrf.mxu1 }
 0x182   : > { %v1621_v61 = vadd.f32 %v1535_v54, %v1313_v16  ;;  %8663 = vmatmul.msk.f32.gmra.mxu2 %vm247_vm1, %v1056_v29  ;;  %8739 = vmatmul.msk.f32.gmra.mxu0 %vm247_vm1, %v1366_v25  ;;  %v1367_v29 = vld [vmem:[%s9318_s23 + $0xfb] sm:$0xff]  ;;  %v1061_v16 = vld [vmem:[%s9318_s23 + $0x10a] sm:$0xff] }
 0x183   : > { %8702 = vmatmul.msk.f32.gmra.mxu3 %vm247_vm1, %v1058_v23  ;;  %8776 = vmatmul.msk.f32.gmra.mxu1 %vm247_vm1, %v1674_v62 }
 0x184   : > { %v9879_v58 = vadd.f32 %v1843_v4, %v1621_v61  ;;  %v1060_v4 = vld [vmem:[%s9318_s23 + $0x102] sm:$0xff]  ;;  %v1677_v61 = vld [vmem:[%s9318_s23 + $0x10c] sm:$0xff] }
 0x185   : > { %v919_v27 = vpop.f32.mrf.mxu2 }
 0x186   : > { %13336 = vst [vmem:[#allocation35_spill] sm:$0xff] %v9879_v58  ;;  %v1230_v37 = vpop.f32.mrf.mxu3  ;;  %v1003_v59 = vadd.f32 %v919_v27, %v648_v56 }
 0x187   : > { %v1541_v28 = vpop.f32.mrf.mxu0 }
 0x188   : > { %v1314_v15 = vadd.f32 %v1230_v37, %v1003_v59  ;;  %v9882_v11 = vpop.f32.mrf.mxu1  ;;  %v1062_v59 = vld [vmem:[%s9318_s23 + $0x112] sm:$0xff] }
 0x18a   : > { %v9886_v53 = vadd.f32 %v1538_v14, %v1314_v15  ;;  %8664 = vmatmul.msk.f32.gmra.mxu2 %vm247_vm1, %v1057_v6  ;;  %8740 = vmatmul.msk.f32.gmra.mxu0 %vm247_vm1, %v1367_v29  ;;  %v1368_v6 = vld [vmem:[%s9318_s23 + $0x103] sm:$0xff] }
 0x18b   : > { %8703 = vmatmul.msk.f32.gmra.mxu3 %vm247_vm1, %v1059_v40  ;;  %8777 = vmatmul.msk.f32.gmra.mxu1 %vm247_vm1, %v1675_v38  ;;  %v1678_v38 = vld [vmem:[%s9318_s23 + $0x114] sm:$0xff] }
 0x18d   : > { %v922_v10 = vpop.f32.mrf.mxu2 }
 0x18e   : > { %v1233_v36 = vpop.f32.mrf.mxu3  ;;  %v1004_v54 = vadd.f32 %v922_v10, %v651_v8 }
 0x18f   : > { %v1544_v19 = vpop.f32.mrf.mxu0 }
 0x190   : > { %v1315_v20 = vadd.f32 %v1233_v36, %v1004_v54  ;;  %v9895_v43 = vpop.f32.mrf.mxu1  ;;  %v1063_v54 = vld [vmem:[%s9318_s23 + $0x11a] sm:$0xff] }
 0x192   : > { %v9899_v45 = vadd.f32 %v1541_v28, %v1315_v20  ;;  %8665 = vmatmul.msk.f32.gmra.mxu2 %vm247_vm1, %v1058_v23  ;;  %8741 = vmatmul.msk.f32.gmra.mxu0 %vm247_vm1, %v1368_v6  ;;  %v1369_v23 = vld [vmem:[%s9318_s23 + $0x10b] sm:$0xff] }
 0x193   : > { %8704 = vmatmul.msk.f32.gmra.mxu3 %vm247_vm1, %v1060_v4  ;;  %8778 = vmatmul.msk.f32.gmra.mxu1 %vm247_vm1, %v1676_v41  ;;  %v1679_v41 = vld [vmem:[%s9318_s23 + $0x11c] sm:$0xff] }
 0x195   : > { %v925_v34 = vpop.f32.mrf.mxu2 }
 0x196   : > { %v1236_v5 = vpop.f32.mrf.mxu3  ;;  %v1005_v33 = vadd.f32 %v925_v34, %v654_v32 }
 0x197   : > { %v1547_v25 = vpop.f32.mrf.mxu0 }
 0x198   : > { %v1316_v14 = vadd.f32 %v1236_v5, %v1005_v33  ;;  %v9908_v62 = vpop.f32.mrf.mxu1  ;;  %v1064_v33 = vld [vmem:[%s9318_s23 + $0x122] sm:$0xff] }
 0x19a   : > { %v9912_v56 = vadd.f32 %v1544_v19, %v1316_v14  ;;  %8666 = vmatmul.msk.f32.gmra.mxu2 %vm247_vm1, %v1059_v40  ;;  %8742 = vmatmul.msk.f32.gmra.mxu0 %vm247_vm1, %v1369_v23  ;;  %v1370_v40 = vld [vmem:[%s9318_s23 + $0x113] sm:$0xff] }
 0x19b   : > { %8705 = vmatmul.msk.f32.gmra.mxu3 %vm247_vm1, %v1061_v16  ;;  %8779 = vmatmul.msk.f32.gmra.mxu1 %vm247_vm1, %v1677_v61  ;;  %v1680_v61 = vld [vmem:[%s9318_s23 + $0x124] sm:$0xff] }
 0x19d   : > { %v928_v2 = vpop.f32.mrf.mxu2 }
 0x19e   : > { %v1239_v27 = vpop.f32.mrf.mxu3  ;;  %v1006_v37 = vadd.f32 %v928_v2, %v657_v0 }
 0x19f   : > { %v1550_v28 = vpop.f32.mrf.mxu0 }
 0x1a0   : > { %v1317_v15 = vadd.f32 %v1239_v27, %v1006_v37  ;;  %v9921_v29 = vpop.f32.mrf.mxu1  ;;  %v1065_v27 = vld [vmem:[%s9318_s23 + $0x12a] sm:$0xff] }
 0x1a2   : > { %v9925_v8 = vadd.f32 %v1547_v25, %v1317_v15  ;;  %8667 = vmatmul.msk.f32.gmra.mxu2 %vm247_vm1, %v1060_v4  ;;  %8743 = vmatmul.msk.f32.gmra.mxu0 %vm247_vm1, %v1370_v40  ;;  %v1371_v4 = vld [vmem:[%s9318_s23 + $0x11b] sm:$0xff]  ;;  %v1373_v40 = vld [vmem:[%s9318_s23 + $0x12b] sm:$0xff] }
 0x1a3   : > { %8706 = vmatmul.msk.f32.gmra.mxu3 %vm247_vm1, %v1062_v59  ;;  %8780 = vmatmul.msk.f32.gmra.mxu1 %vm247_vm1, %v1678_v38  ;;  %v1681_v38 = vld [vmem:[%s9318_s23 + $0x12c] sm:$0xff] }
 0x1a5   : > { %v931_v48 = vpop.f32.mrf.mxu2 }
 0x1a6   : > { %v1242_v10 = vpop.f32.mrf.mxu3  ;;  %v1007_v36 = vadd.f32 %v931_v48, %v660_v50 }
 0x1a7   : > { %v1553_v19 = vpop.f32.mrf.mxu0 }
 0x1a8   : > { %v1318_v20 = vadd.f32 %v1242_v10, %v1007_v36  ;;  %v9934_v6 = vpop.f32.mrf.mxu1  ;;  %v2265_v10 = vld [vmem:[%s9318_s23 + $0x25] sm:$0xff] }
 0x1aa   : > { %v9938_v32 = vadd.f32 %v1550_v28, %v1318_v20  ;;  %8668 = vmatmul.msk.f32.gmra.mxu2 %vm247_vm1, %v1061_v16  ;;  %8744 = vmatmul.msk.f32.gmra.mxu0 %vm247_vm1, %v1371_v4  ;;  %v1372_v16 = vld [vmem:[%s9318_s23 + $0x123] sm:$0xff] }
 0x1ab   : > { %8707 = vmatmul.msk.f32.gmra.mxu3 %vm247_vm1, %v1063_v54  ;;  %8781 = vmatmul.msk.f32.gmra.mxu1 %vm247_vm1, %v1679_v41  ;;  %v2573_v4 = vld [vmem:[%s9318_s23 + $0x26] sm:$0xff] }
 0x1ad   : > { %v934_v13 = vpop.f32.mrf.mxu2 }
 0x1ae   : > { %v1245_v34 = vpop.f32.mrf.mxu3  ;;  %v1008_v5 = vadd.f32 %v934_v13, %v663_v3  ;;  %v2266_v13 = vld [vmem:[%s9318_s23 + $0x2d] sm:$0xff] }
 0x1af   : > { %v1556_v25 = vpop.f32.mrf.mxu0 }
 0x1b0   : > { %v1319_v14 = vadd.f32 %v1245_v34, %v1008_v5  ;;  %v9947_v23 = vpop.f32.mrf.mxu1 }
 0x1b2   : > { %v9951_v0 = vadd.f32 %v1553_v19, %v1319_v14  ;;  %8669 = vmatmul.msk.f32.gmra.mxu2 %vm247_vm1, %v1062_v59  ;;  %8745 = vmatmul.msk.f32.gmra.mxu0 %vm247_vm1, %v1372_v16  ;;  %v2574_v14 = vld [vmem:[%s9318_s23 + $0x2e] sm:$0xff] }
 0x1b3   : > { %8708 = vmatmul.msk.f32.gmra.mxu3 %vm247_vm1, %v1064_v33  ;;  %8782 = vmatmul.msk.f32.gmra.mxu1 %vm247_vm1, %v1680_v61  ;;  %v2267_v61 = vld [vmem:[%s9318_s23 + $0x35] sm:$0xff] }
 0x1b5   : > { %v937_v51 = vpop.f32.mrf.mxu2 }
 0x1b6   : > { %v1248_v24 = vpop.f32.mrf.mxu3  ;;  %v1009_v2 = vadd.f32 %v937_v51, %v9473_v17 }
 0x1b7   : > { %v1559_v15 = vpop.f32.mrf.mxu0 }
 0x1b8   : > { %v1320_v37 = vadd.f32 %v1248_v24, %v1009_v2  ;;  %v9959_v28 = vpop.f32.mrf.mxu1 }
 0x1ba   : > { %v9963_v59 = vadd.f32 %v1556_v25, %v1320_v37  ;;  %8670 = vmatmul.msk.f32.gmra.mxu2 %vm247_vm1, %v1063_v54  ;;  %8746 = vmatmul.msk.f32.gmra.mxu0 %vm247_vm1, %v1373_v40  ;;  %v2268_v40 = vld [vmem:[%s9318_s23 + $0x3d] sm:$0xff] }
 0x1bb   : > { %8709 = vmatmul.msk.f32.gmra.mxu3 %vm247_vm1, %v1065_v27  ;;  %8783 = vmatmul.msk.f32.gmra.mxu1 %vm247_vm1, %v1681_v38  ;;  %v2575_v27 = vld [vmem:[%s9318_s23 + $0x36] sm:$0xff] }
 0x1bd   : > { %v940_v17 = vpop.f32.mrf.mxu2 }
 0x1be   : > { %v1251_v50 = vpop.f32.mrf.mxu3  ;;  %v1010_v48 = vadd.f32 %v940_v17, %v9487_v26 }
 0x1bf   : > { %v1562_v20 = vpop.f32.mrf.mxu0 }
 0x1c0   : > { %v1321_v36 = vadd.f32 %v1251_v50, %v1010_v48  ;;  %v9971_v19 = vpop.f32.mrf.mxu1  ;;  %v2576_v48 = vld [vmem:[%s9318_s23 + $0x3e] sm:$0xff] }
 0x1c2   : > { %v9974_v41 = vadd.f32 %v1559_v15, %v1321_v36  ;;  %8787 = vmatmul.msk.f32.vlgmr.msra.gmra.mxu2 %vm247_vm1, %v9524_v49  ;;  %8861 = vmatmul.msk.f32.vlgmr.msra.gmra.mxu0 %vm247_vm1, %v2573_v4 }
 0x1c3   : > { %8824 = vmatmul.msk.f32.vlgmr.msra.gmra.mxu3 %vm247_vm1, %v2265_v10 }
 0x1c5   : > { %v943_v54 = vpop.f32.mrf.mxu2 }
 0x1c6   : > { %v1254_v3 = vpop.f32.mrf.mxu3  ;;  %v1011_v26 = vadd.f32 %v943_v54, %v9501_v35 }
 0x1c7   : > { %v1565_v5 = vpop.f32.mrf.mxu0 }
 0x1c8   : > { %v1322_v34 = vadd.f32 %v1254_v3, %v1011_v26  ;;  %v9982_v33 = vpop.f32.mrf.mxu1  ;;  %v2577_v26 = vld [vmem:[%s9318_s23 + $0x46] sm:$0xff] }
 0x1ca   : > { %v9985_v25 = vadd.f32 %v1562_v20, %v1322_v34  ;;  %8788 = vmatmul.msk.f32.gmra.mxu2 %vm247_vm1, %v9540_v57  ;;  %8862 = vmatmul.msk.f32.gmra.mxu0 %vm247_vm1, %v2574_v14  ;;  %v2269_v20 = vld [vmem:[%s9318_s23 + $0x45] sm:$0xff]  ;;  %v2270_v14 = vld [vmem:[%s9318_s23 + $0x4d] sm:$0xff] }
 0x1cb   : > { %8825 = vmatmul.msk.f32.gmra.mxu3 %vm247_vm1, %v2266_v13 }
 0x1cd   : > { %v946_v49 = vpop.f32.mrf.mxu2 }
 0x1ce   : > { %v1257_v16 = vpop.f32.mrf.mxu3  ;;  %v1012_v35 = vadd.f32 %v946_v49, %v9515_v44 }
 0x1cf   : > { %v1568_v24 = vpop.f32.mrf.mxu0 }
 0x1d0   : > { %v1323_v51 = vadd.f32 %v1257_v16, %v1012_v35  ;;  %v9993_v2 = vpop.f32.mrf.mxu1 }
 0x1d2   : > { %v9996_v37 = vadd.f32 %v1565_v5, %v1323_v51  ;;  %8789 = vmatmul.msk.f32.gmra.mxu2 %vm247_vm1, %v9556_v1  ;;  %8863 = vmatmul.msk.f32.gmra.mxu0 %vm247_vm1, %v2575_v27 }
 0x1d3   : > { %8826 = vmatmul.msk.f32.gmra.mxu3 %vm247_vm1, %v2267_v61  ;;  %v2578_v61 = vld [vmem:[%s9318_s23 + $0x4e] sm:$0xff] }
 0x1d5   : > { %v949_v57 = vpop.f32.mrf.mxu2 }
 0x1d6   : > { %v1260_v15 = vpop.f32.mrf.mxu3  ;;  %v1013_v44 = vadd.f32 %v949_v57, %v9531_v52  ;;  %v13339_v57 = vld [vmem:[#allocation5_spill] sm:$0xff] }
 0x1d7   : > { %v1571_v17 = vpop.f32.mrf.mxu0 }
 0x1d8   : > { %v1324_v38 = vadd.f32 %v1260_v15, %v1013_v44  ;;  %v10004_v50 = vpop.f32.mrf.mxu1  ;;  %v2271_v44 = vld [vmem:[%s9318_s23 + $0x55] sm:$0xff] }
 0x1da   : > { %v10007_v10 = vadd.f32 %v1568_v24, %v1324_v38  ;;  %8790 = vmatmul.msk.f32.gmra.mxu2 %vm247_vm1, %v9572_v9  ;;  %8864 = vmatmul.msk.f32.gmra.mxu0 %vm247_vm1, %v2576_v48  ;;  %v13338_v24 = vld [vmem:[#allocation7_spill] sm:$0xff] }
 0x1db   : > { %8827 = vmatmul.msk.f32.gmra.mxu3 %vm247_vm1, %v2268_v40 }
 0x1dd   : > { %v952_v1 = vpop.f32.mrf.mxu2 }
 0x1de   : > { %v1263_v36 = vpop.f32.mrf.mxu3  ;;  %v1014_v52 = vadd.f32 %v952_v1, %v9547_v60  ;;  %v13337_v60 = vld [vmem:[#allocation4_spill] sm:$0xff]  ;;  %v13340_v1 = vld [vmem:[#allocation9_spill] sm:$0xff] }
 0x1df   : > { %v1574_v54 = vpop.f32.mrf.mxu0 }
 0x1e0   : > { %v1325_v4 = vadd.f32 %v1263_v36, %v1014_v52  ;;  %v10015_v3 = vpop.f32.mrf.mxu1 }
 0x1e2   : > { %v10018_v13 = vadd.f32 %v1571_v17, %v1325_v4  ;;  %8791 = vmatmul.msk.f32.gmra.mxu2 %vm247_vm1, %v9588_v22  ;;  %8865 = vmatmul.msk.f32.gmra.mxu0 %vm247_vm1, %v2577_v26  ;;  %v2579_v17 = vld [vmem:[%s9318_s23 + $0x56] sm:$0xff] }
 0x1e3   : > { %8828 = vmatmul.msk.f32.gmra.mxu3 %vm247_vm1, %v2269_v20  ;;  %v13341_v4 = vld [vmem:[#allocation6_spill] sm:$0xff] }
 0x1e4   : > { %v2272_v26 = vld [vmem:[%s9318_s23 + $0x5d] sm:$0xff] }
 0x1e5   : > { %v955_v9 = vpop.f32.mrf.mxu2 }
 0x1e6   : > { %v1266_v34 = vpop.f32.mrf.mxu3  ;;  %v1015_v5 = vadd.f32 %v955_v9, %v13337_v60  ;;  %v2580_v60 = vld [vmem:[%s9318_s23 + $0x5e] sm:$0xff] }
 0x1e7   : > { %v1577_v16 = vpop.f32.mrf.mxu0 }
 0x1e8   : > { %v1326_v49 = vadd.f32 %v1266_v34, %v1015_v5  ;;  %v10026_v35 = vpop.f32.mrf.mxu1 }
 0x1ea   : > { %v10029_v51 = vadd.f32 %v1574_v54, %v1326_v49  ;;  %8792 = vmatmul.msk.f32.gmra.mxu2 %vm247_vm1, %v13338_v24  ;;  %8866 = vmatmul.msk.f32.gmra.mxu0 %vm247_vm1, %v2578_v61  ;;  %v13343_v24 = vld [vmem:[#allocation8_spill] sm:$0xff] }
 0x1eb   : > { %8829 = vmatmul.msk.f32.gmra.mxu3 %vm247_vm1, %v2270_v14  ;;  %v13342_v14 = vld [vmem:[#allocation11_spill] sm:$0xff] }
 0x1ed   : > { %v958_v22 = vpop.f32.mrf.mxu2 }
 0x1ee   : > { %v1269_v27 = vpop.f32.mrf.mxu3  ;;  %v1016_v15 = vadd.f32 %v958_v22, %v13339_v57 }
 0x1ef   : > { %v1580_v38 = vpop.f32.mrf.mxu0 }
 0x1f0   : > { %v1327_v40 = vadd.f32 %v1269_v27, %v1016_v15  ;;  %v10043_v36 = vpop.f32.mrf.mxu1  ;;  %v2273_v27 = vld [vmem:[%s9318_s23 + $0x65] sm:$0xff] }
 0x1f2   : > { %v10038_v48 = vadd.f32 %v1577_v16, %v1327_v40  ;;  %8793 = vmatmul.msk.f32.gmra.mxu2 %vm247_vm1, %v13340_v1  ;;  %8867 = vmatmul.msk.f32.gmra.mxu0 %vm247_vm1, %v2579_v17 }
 0x1f3   : > { %8830 = vmatmul.msk.f32.gmra.mxu3 %vm247_vm1, %v2271_v44  ;;  %v2581_v44 = vld [vmem:[%s9318_s23 + $0x66] sm:$0xff] }
 0x1f5   : > { %v961_v52 = vpop.f32.mrf.mxu2 }
 0x1f6   : > { %v1272_v20 = vpop.f32.mrf.mxu3  ;;  %v1017_v54 = vadd.f32 %v961_v52, %v13341_v4  ;;  %v13345_v52 = vld [vmem:[#allocation10_spill] sm:$0xff] }
 0x1f7   : > { %v1583_v34 = vpop.f32.mrf.mxu0 }
 0x1f8   : > { %v1328_v9 = vadd.f32 %v1272_v20, %v1017_v54  ;;  %v10055_v49 = vpop.f32.mrf.mxu1  ;;  %v2274_v54 = vld [vmem:[%s9318_s23 + $0x6d] sm:$0xff] }
 0x1fa   : > { %v10049_v5 = vadd.f32 %v1580_v38, %v1328_v9  ;;  %8794 = vmatmul.msk.f32.gmra.mxu2 %vm247_vm1, %v13342_v14  ;;  %8868 = vmatmul.msk.f32.gmra.mxu0 %vm247_vm1, %v2580_v60  ;;  %v13344_v38 = vld [vmem:[#allocation13_spill] sm:$0xff]  ;;  %v13346_v14 = vld [vmem:[#allocation15_spill] sm:$0xff] }
 0x1fb   : > { %8831 = vmatmul.msk.f32.gmra.mxu3 %vm247_vm1, %v2272_v26 }
 0x1fd   : > { %v964_v16 = vpop.f32.mrf.mxu2 }
 0x1fe   : > { %v1275_v61 = vpop.f32.mrf.mxu3  ;;  %v1018_v22 = vadd.f32 %v964_v16, %v13343_v24  ;;  %v13347_v24 = vld [vmem:[#allocation12_spill] sm:$0xff] }
 0x1ff   : > { %v1586_v15 = vpop.f32.mrf.mxu0 }
 0x200   : > { %v1329_v57 = vadd.f32 %v1275_v61, %v1018_v22  ;;  %v10067_v4 = vpop.f32.mrf.mxu1 }
 0x202   : > { %v10060_v40 = vadd.f32 %v1583_v34, %v1329_v57  ;;  %8795 = vmatmul.msk.f32.gmra.mxu2 %vm247_vm1, %v13344_v38  ;;  %8869 = vmatmul.msk.f32.gmra.mxu0 %vm247_vm1, %v2581_v44  ;;  %v2582_v34 = vld [vmem:[%s9318_s23 + $0x6e] sm:$0xff] }
 0x203   : > { %8832 = vmatmul.msk.f32.gmra.mxu3 %vm247_vm1, %v2273_v27  ;;  %v2881_v27 = vlaneseq  ;;  %v2275_v57 = vld [vmem:[%s9318_s23 + $0x75] sm:$0xff] }
 0x205   : > { %v967_v17 = vpop.f32.mrf.mxu2 }
 0x206   : > { %v1278_v1 = vpop.f32.mrf.mxu3  ;;  %v1019_v20 = vadd.f32 %v967_v17, %v13345_v52 }
 0x207   : > { %v1589_v9 = vpop.f32.mrf.mxu0 }
 0x208   : > { %v1330_v26 = vadd.f32 %v1278_v1, %v1019_v20  ;;  %v10079_v38 = vpop.f32.mrf.mxu1  ;;  %v10082_v1 = vshrl.u32 %v2881_v27, 7  ;;  %v13349_v20 = vld [vmem:[#allocation17_spill] sm:$0xff] }
 0x209   : > { %13348 = vst [vmem:[#allocation4_spill] sm:$0xff] %v10079_v38 }
 0x20a   : > { %v10071_v60 = vadd.f32 %v1586_v15, %v1330_v26  ;;  %8796 = vmatmul.msk.f32.gmra.mxu2 %vm247_vm1, %v13346_v14  ;;  %8870 = vmatmul.msk.f32.gmra.mxu0 %vm247_vm1, %v2582_v34  ;;  %v2583_v15 = vld [vmem:[%s9318_s23 + $0x76] sm:$0xff]  ;;  %v2922_v26 = vshrl.u32 %v10082_v1, 16  ;;  %v10114_v38 = vadd.s32 16, %v10082_v1 }
 0x20b   : > { %8833 = vmatmul.msk.f32.gmra.mxu3 %vm247_vm1, %v2274_v54  ;;  %v2921_v54 = vand.u32 65535, %v10082_v1 }
 0x20c   : > { %v2927_v31 = vmul.u32 58254, %v2922_v26 }
 0x20d   : > { %v970_v16 = vpop.f32.mrf.mxu2  ;;  %v2925_v34 = vmul.u32 58254, %v2921_v54 }
 0x20e   : > { %v1281_v61 = vpop.f32.mrf.mxu3  ;;  %v1020_v22 = vadd.f32 %v970_v16, %v13347_v24 }
 0x20f   : > { %v1592_v17 = vpop.f32.mrf.mxu0  ;;  %v2928_v27 = vshll.u32 %v2925_v34, 16 }
 0x210   : > { %v1331_v44 = vadd.f32 %v1281_v61, %v1020_v22  ;;  %v13350_v61 = vld [vmem:[#allocation14_spill] sm:$0xff]  ;;  %v2924_v22 = vmul.u32 14564, %v2921_v54  ;;  %v13250_v54 = vmov 0  }
 0x212   : > { %v10084_v52 = vadd.f32 %v1589_v9, %v1331_v44  ;;  %8797 = vmatmul.msk.f32.gmra.mxu2 %vm247_vm1, %v13349_v20  ;;  %8871 = vmatmul.msk.f32.gmra.mxu0 %vm247_vm1, %v2583_v15  ;;  %v2926_v9 = vmul.u32 14564, %v2922_v26  ;;  %v2276_v44 = vld [vmem:[%s9318_s23 + $0x7d] sm:$0xff]  ;;  %vm2932_vm2 = vc.u32 %v2924_v22, %v2928_v27  ;;  %v2934_v18 = vadd.s32 %v2928_v27, %v2924_v22 }
 0x213   : > { %8834 = vmatmul.msk.f32.gmra.mxu3 %vm247_vm1, %v2275_v57  ;;  %v2584_v20 = vld [vmem:[%s9318_s23 + $0x7e] sm:$0xff]  ;;  %v10096_v15 = vadd.s32 8, %v10082_v1  ;;  %v2929_v22 = vshrl.u32 %v2925_v34, 16 }
 0x214   : > { %v2930_v57 = vshll.u32 %v2926_v9, 16 }
 0x215   : > { %v973_v14 = vpop.f32.mrf.mxu2 }
 0x216   : > { %v1284_v16 = vpop.f32.mrf.mxu3  ;;  %v1021_v24 = vadd.f32 %v973_v14, %v13350_v61  ;;  %v10102_v14 = vpop.f32.mrf.mxu1  ;;  %vm2936_vm3 = vc.u32 %v2934_v18, %v2930_v57  ;;  %v2950_v61 = vand.u32 65535, %v10096_v15  ;;  %v2585_v57 = vld [vmem:[%s9318_s23 + $0x86] sm:$0xff] }
 0x217   : > { %v1595_v42 = vpop.f32.mrf.mxu0  ;;  %13353 = vst [vmem:[#allocation5_spill] sm:$0xff] %v10102_v14 }
 0x218   : > { %v1332_v58 = vadd.f32 %v1284_v16, %v1021_v24  ;;  %v2933_v16 = vsel %vm2932_vm2, 1, %v13250_v54  ;;  %v2953_v39 = vmul.u32 14564, %v2950_v61 }
 0x219   : > { %v2935_v26 = vadd.s32 %v2933_v16, %v2927_v31  ;;  %v2931_v16 = vshrl.u32 %v2926_v9, 16 }
 0x21a   : > { %v10098_v7 = vadd.f32 %v1592_v17, %v1332_v58  ;;  %8798 = vmatmul.msk.f32.gmra.mxu2 %vm247_vm1, %v13352_v63  ;;  %8872 = vmatmul.msk.f32.gmra.mxu0 %vm247_vm1, %v2584_v20  ;;  %v2937_v58 = vsel %vm2936_vm3, 1, %v13250_v54  ;;  %v2951_v17 = vshrl.u32 %v10096_v15, 16 }
 0x21b   : > { %8835 = vmatmul.msk.f32.gmra.mxu3 %vm247_vm1, %v2276_v44  ;;  %v2939_v27 = vadd.s32 %v2937_v58, %v2935_v26  ;;  %v2954_v44 = vmul.u32 58254, %v2950_v61  ;;  %v13356_v26 = vld [vmem:[#allocation21_spill] sm:$0xff]  ;;  %v2979_v61 = vand.u32 65535, %v10114_v38 }
 0x21c   : > { %13351 = vst [vmem:[#allocation7_spill] sm:$0xff] %v10098_v7  ;;  %v2955_v30 = vmul.u32 14564, %v2951_v17  ;;  %v2956_v12 = vmul.u32 58254, %v2951_v17 }
 0x21d   : > { %v976_v63 = vpop.f32.mrf.mxu2  ;;  %v2957_v20 = vshll.u32 %v2954_v44, 16  ;;  %v2940_v54 = vadd.s32 %v2939_v27, %v2929_v22  ;;  %v2958_v58 = vshrl.u32 %v2954_v44, 16  ;;  %v2980_v22 = vshrl.u32 %v10114_v38, 16 }
 0x21e   : > { %v1287_v24 = vpop.f32.mrf.mxu3  ;;  %v1022_v47 = vadd.f32 %v976_v63, %v13354_v55  ;;  %v2959_v14 = vshll.u32 %v2955_v30, 16  ;;  %v13357_v55 = vmov 0   ;;  %v10128_v27 = vmul.u32 58254, %v2979_v61 }
 0x21f   : > { %v1598_v18 = vpop.f32.mrf.mxu0  ;;  %vm2961_vm4 = vc.u32 %v2953_v39, %v2957_v20  ;;  %v2963_v7 = vadd.s32 %v2957_v20, %v2953_v39  ;;  %v10124_v39 = vpop.f32.mrf.mxu1  ;;  %v13359_v20 = vld [vmem:[#allocation18_spill] sm:$0xff] }
 0x220   : > { %v1333_v31 = vadd.f32 %v1287_v24, %v1022_v47  ;;  %v2962_v47 = vsel %vm2961_vm4, 1, %v13357_v55  ;;  %13358 = vst [vmem:[#allocation6_spill] sm:$0xff] %v10124_v39  ;;  %v2941_v24 = vadd.s32 %v2940_v54, %v2931_v16  ;;  %v2586_v39 = vld [vmem:[%s9318_s23 + $0x8e] sm:$0xff] }
 0x221   : > { %v2964_v9 = vadd.s32 %v2962_v47, %v2956_v12  ;;  %vm2965_vm5 = vc.u32 %v2963_v7, %v2959_v14  ;;  %v2278_v7 = vld [vmem:[%s9318_s23 + $0x8d] sm:$0xff]  ;;  %v2960_v14 = vshrl.u32 %v2955_v30, 16 }
 0x222   : > { %v10116_v34 = vadd.f32 %v1595_v42, %v1333_v31  ;;  %8799 = vmatmul.msk.f32.gmra.mxu2 %vm247_vm1, %v13356_v26  ;;  %8873 = vmatmul.msk.f32.gmra.mxu0 %vm247_vm1, %v2585_v57  ;;  %v2966_v42 = vsel %vm2965_vm5, 1, %v13357_v55  ;;  %v2982_v57 = vmul.u32 14564, %v2979_v61  ;;  %v10132_v26 = vmul.u32 14564, %v2980_v22 }
 0x223   : > { %8836 = vmatmul.msk.f32.gmra.mxu3 %vm247_vm1, %v2277_v21  ;;  %v2968_v21 = vadd.s32 %v2966_v42, %v2964_v9  ;;  %v2942_v54 = vshrl.u32 %v2941_v24, 4  ;;  %v9254_v9 = vld [vmem:[%s9318_s23 + $0x8c] sm:$0xff]  ;;  %v2985_v42 = vmul.u32 58254, %v2980_v22  ;;  %v10144_v61 = vadd.f32 %v9869_v46, %v9886_v53 }
 0x224   : > { %13355 = vst [vmem:[#allocation9_spill] sm:$0xff] %v10116_v34  ;;  %v2986_v34 = vshll.u32 %v10128_v27, 16  ;;  %v2988_v30 = vshll.u32 %v10132_v26, 16  ;;  %v10154_v24 = vadd.f32 %v9895_v43, %v9912_v56  ;;  %v10157_v22 = vadd.s32 24, %v10082_v1  ;;  %v13360_v43 = vld [vmem:[#allocation20_spill] sm:$0xff] }
 0x225   : > { %v979_v17 = vpop.f32.mrf.mxu2  ;;  %v2969_v31 = vadd.s32 %v2968_v21, %v2958_v58  ;;  %v10161_v46 = vadd.f32 %v9908_v62, %v9925_v8  ;;  %v10165_v53 = vadd.f32 %v9921_v29, %v9938_v32  ;;  %v10175_v8 = vadd.f32 %v9934_v6, %v9951_v0  ;;  %v2279_v29 = vld [vmem:[%s9318_s23 + $0x95] sm:$0xff] }
 0x226   : > { %v1290_v63 = vpop.f32.mrf.mxu3  ;;  %v1023_v12 = vadd.f32 %v979_v17, %v13359_v20  ;;  %vm2990_vm6 = vc.u32 %v2982_v57, %v2986_v34  ;;  %v3009_v62 = vshrl.u32 %v10157_v22, 16  ;;  %v10188_v6 = vadd.f32 %v9959_v28, %v9974_v41 }
 0x227   : > { %v1601_v47 = vpop.f32.mrf.mxu0  ;;  %v2970_v58 = vadd.s32 %v2969_v31, %v2960_v14  ;;  %v2991_v17 = vsel %vm2990_vm6, 1, %v13357_v55  ;;  %v10192_v0 = vadd.f32 %v9971_v19, %v9985_v25  ;;  %v10203_v28 = vadd.f32 %v9982_v33, %v9996_v37 }
 0x228   : > { %v1334_v44 = vadd.f32 %v1290_v63, %v1023_v12  ;;  %v10150_v63 = vadd.f32 %v9882_v11, %v9899_v45  ;;  %v2993_v21 = vadd.s32 %v2991_v17, %v2985_v42  ;;  %v2943_v45 = vmul.u32 18, %v2942_v54  ;;  %v9255_v17 = vld [vmem:[%s9318_s23 + $0x94] sm:$0xff] }
 0x229   : > { %v3008_v12 = vand.u32 65535, %v10157_v22  ;;  %v2971_v32 = vshrl.u32 %v2970_v58, 4  ;;  %v10180_v42 = vmul.u32 14564, %v3009_v62  ;;  %v10207_v19 = vadd.f32 %v9993_v2, %v10007_v10 }
 0x22a   : > { %v10136_v16 = vadd.f32 %v1598_v18, %v1334_v44  ;;  %8800 = vmatmul.msk.f32.gmra.mxu2 %vm247_vm1, %v9254_v9  ;;  %8874 = vmatmul.msk.f32.gmra.mxu0 %vm247_vm1, %v2586_v39  ;;  %v2992_v18 = vadd.s32 %v2986_v34, %v2982_v57  ;;  %v10167_v39 = vpop.f32.mrf.mxu1  ;;  %v2587_v44 = vld [vmem:[%s9318_s23 + $0x96] sm:$0xff]  ;;  %v2989_v41 = vshrl.u32 %v10132_v26, 16  ;;  %v10217_v33 = vadd.f32 %v10015_v3, %v10029_v51 }
 0x22b   : > { %8837 = vmatmul.msk.f32.gmra.mxu3 %vm247_vm1, %v2278_v7  ;;  %v2987_v7 = vshrl.u32 %v10128_v27, 16  ;;  %v3011_v54 = vmul.u32 14564, %v3008_v12  ;;  %v3012_v9 = vmul.u32 58254, %v3008_v12  ;;  %v2944_v27 = vsub.s32 %v10082_v1, %v2943_v45  ;;  %v2280_v3 = vld [vmem:[%s9318_s23 + $0x9d] sm:$0xff] }
 0x22c   : > { %vm2994_vm7 = vc.u32 %v2992_v18, %v2988_v30  ;;  %v10184_v30 = vadd.f32 %v9947_v23, %v9963_v59  ;;  %v3014_v18 = vmul.u32 58254, %v3009_v62  ;;  %v3017_v59 = vshll.u32 %v10180_v42, 16 }
 0x22d   : > { %v982_v34 = vpop.f32.mrf.mxu2  ;;  %v2995_v20 = vsel %vm2994_vm7, 1, %v13357_v55  ;;  %v3015_v23 = vshll.u32 %v3012_v9, 16  ;;  %vm3962_vm9 = vcmp.ne.s32.totalorder %v2944_v27, 0  ;;  %v10221_v26 = vadd.s32 32, %v10082_v1 }
 0x22e   : > { %v1293_v11 = vpop.f32.mrf.mxu3  ;;  %v1024_v56 = vadd.f32 %v982_v34, %v13360_v43  ;;  %v2997_v14 = vadd.s32 %v2995_v20, %v2993_v21  ;;  %v2972_v21 = vmul.u32 18, %v2971_v32  ;;  %vm3998_vm10 = vcmp.lt.s32.totalorder %v2944_v27, 0  ;;  %v2588_v32 = vld [vmem:[%s9318_s23 + $0x9e] sm:$0xff] }
 0x22f   : > { %v1604_v57 = vpop.f32.mrf.mxu0  ;;  %vm3019_vm8 = vc.u32 %v3011_v54, %v3015_v23  ;;  %v3021_v34 = vadd.s32 %v3015_v23, %v3011_v54  ;;  %v3016_v43 = vshrl.u32 %v3012_v9, 16  ;;  %v10232_v20 = vadd.f32 %v10043_v36, %v10049_v5  ;;  %vm10240_vm12 = vmand %vm3998_vm10, %vm3962_vm9  ;;  %v9256_v9 = vld [vmem:[%s9318_s23 + $0x9c] sm:$0xff] }
 0x230   : > { %v1335_v31 = vadd.f32 %v1293_v11, %v1024_v56  ;;  %v2998_v25 = vadd.s32 %v2997_v14, %v2987_v7  ;;  %v3020_v10 = vsel %vm3019_vm8, 1, %v13357_v55  ;;  %v13361_v11 = vld [vmem:[#allocation22_spill] sm:$0xff]  ;;  %v4070_v7 = vadd.s32 18, %v2944_v27 }
 0x231   : > { %vm3023_vm11 = vc.u32 %v3021_v34, %v3017_v59  ;;  %v2973_v14 = vsub.s32 %v10096_v15, %v2972_v21  ;;  %v3037_v36 = vand.u32 65535, %v10221_v26  ;;  %v3038_v5 = vshrl.u32 %v10221_v26, 16 }
 0x232   : > { %v10195_v58 = vadd.f32 %v1601_v47, %v1335_v31  ;;  %8801 = vmatmul.msk.f32.gmra.mxu2 %vm247_vm1, %v9255_v17  ;;  %8875 = vmatmul.msk.f32.gmra.mxu0 %vm247_vm1, %v2587_v44  ;;  %v10213_v47 = vadd.f32 %v10004_v50, %v10018_v13  ;;  %v3022_v50 = vadd.s32 %v3020_v10, %v3014_v18  ;;  %v3024_v56 = vsel %vm3023_vm11, 1, %v13357_v55  ;;  %v10234_v12 = vpop.f32.mrf.mxu1  ;;  %v13364_v17 = vld [vmem:[#allocation4_spill] sm:$0xff] }
 0x233   : > { %8838 = vmatmul.msk.f32.gmra.mxu3 %vm247_vm1, %v2279_v29  ;;  %v10226_v13 = vadd.f32 %v10026_v35, %v10038_v48  ;;  %v2999_v51 = vadd.s32 %v2998_v25, %v2989_v41  ;;  %v3018_v48 = vshrl.u32 %v10180_v42, 16  ;;  %v10249_v44 = vadd.f32 %v10055_v49, %v10060_v40  ;;  %v13365_v49 = vld [vmem:[#allocation7_spill] sm:$0xff]  ;;  %v13366_v40 = vld [vmem:[#allocation5_spill] sm:$0xff] }
 0x234   : > { %v3026_v31 = vadd.s32 %v3024_v56, %v3022_v50  ;;  %v10253_v15 = vadd.f32 %v10067_v4, %v10071_v60  ;;  %v10261_v42 = vadd.s32 40, %v10082_v1  ;;  %v10265_v18 = vadd.f32 %v13364_v17, %v10084_v52 }
 0x235   : > { %v985_v37 = vpop.f32.mrf.mxu2  ;;  %v10269_v23 = vadd.f32 %v13366_v40, %v13365_v49  ;;  %v3000_v4 = vshrl.u32 %v2999_v51, 4  ;;  %v3040_v59 = vmul.u32 14564, %v3037_v36  ;;  %v3041_v41 = vmul.u32 58254, %v3037_v36  ;;  %v2589_v36 = vld [vmem:[%s9318_s23 + $0xa6] sm:$0xff] }
 0x236   : > { %v1296_v2 = vpop.f32.mrf.mxu3  ;;  %v1025_v45 = vadd.f32 %v985_v37, %v13361_v11  ;;  %v3027_v60 = vadd.s32 %v3026_v31, %v3016_v43  ;;  %v10276_v25 = vmul.u32 14564, %v3038_v5  ;;  %vm3963_vm13 = vcmp.ne.s32.totalorder %v2973_v14, 0 }
 0x237   : > { %v1607_v29 = vpop.f32.mrf.mxu0  ;;  %vm3999_vm14 = vcmp.lt.s32.totalorder %v2973_v14, 0  ;;  %v4071_v34 = vadd.s32 18, %v2973_v14  ;;  %v3043_v11 = vmul.u32 58254, %v3038_v5  ;;  %v3066_v50 = vand.u32 65535, %v10261_v42  ;;  %v2590_v5 = vld [vmem:[%s9318_s23 + $0xae] sm:$0xff] }
 0x238   : > { %v1336_v62 = vadd.f32 %v1296_v2, %v1025_v45  ;;  %v3028_v37 = vadd.s32 %v3027_v60, %v3018_v48  ;;  %v13368_v2 = vld [vmem:[#allocation23_spill] sm:$0xff]  ;;  %v3044_v45 = vshll.u32 %v3041_v41, 16  ;;  %v3046_v43 = vshll.u32 %v10276_v25, 16  ;;  %vm10294_vm15 = vmand %vm3999_vm14, %vm3963_vm13 }
 0x239   : > { %v3067_v56 = vshrl.u32 %v10261_v42, 16  ;;  %v10289_v35 = vadd.f32 %v10167_v39, %v10136_v16  ;;  %v3069_v40 = vmul.u32 14564, %v3066_v50  ;;  %v9257_v39 = vld [vmem:[%s9318_s23 + $0xa4] sm:$0xff]  ;;  %vm4514_vm6 = vcmask 1041408  }
 0x23a   : > { %v10255_v54 = vadd.f32 %v1604_v57, %v1336_v62  ;;  %8802 = vmatmul.msk.f32.gmra.mxu2 %vm247_vm1, %v9256_v9  ;;  %8876 = vmatmul.msk.f32.gmra.mxu0 %vm247_vm1, %v2588_v32  ;;  %v10274_v57 = vsel %vm10240_vm12, %v4070_v7, %v2944_v27  ;;  %v3001_v27 = vmul.u32 18, %v3000_v4  ;;  %v3029_v51 = vshrl.u32 %v3028_v37, 4  ;;  %v13369_v62 = vld [vmem:[#allocation9_spill] sm:$0xff]  ;;  %v13370_v32 = vld [vmem:[#allocation6_spill] sm:$0xff]  ;;  %v10300_v4 = vpop.f32.mrf.mxu1 }
 0x23b   : > { %8839 = vmatmul.msk.f32.gmra.mxu3 %vm247_vm1, %v2280_v3  ;;  %13367 = vst [vmem:[#allocation11_spill] sm:$0xff] %v10274_v57  ;;  %v2281_v3 = vld [vmem:[%s9318_s23 + $0xa5] sm:$0xff]  ;;  %v10285_v7 = vadd.f32 %v13370_v32, %v13369_v62  ;;  %vm3048_vm2 = vc.u32 %v3040_v59, %v3044_v45  ;;  %vm4142_vm3 = vcmp.lt.s32.totalorder %v10274_v57, 16  ;;  %v3050_v49 = vadd.s32 %v3044_v45, %v3040_v59  ;;  %v2282_v62 = vld [vmem:[%s9318_s23 + $0xad] sm:$0xff] }
 0x23c   : > { %13371 = vst [vmem:[#allocation8_spill] sm:$0xff] %v10289_v35  ;;  %v3030_v9 = vmul.u32 18, %v3029_v51  ;;  %v3049_v17 = vsel %vm3048_vm2, 1, %v13357_v55  ;;  %v10314_v59 = vsel %vm10294_vm15, %v4071_v34, %v2973_v14  ;;  %v3002_v37 = vsub.s32 %v10114_v38, %v3001_v27  ;;  %v13375_v34 = vld [vmem:[#allocation24_spill] sm:$0xff] }
 0x23d   : > { %v988_v21 = vpop.f32.mrf.mxu2  ;;  %v3051_v60 = vadd.s32 %v3049_v17, %v3043_v11  ;;  %vm3052_vm4 = vc.u32 %v3050_v49, %v3046_v43  ;;  %v3072_v14 = vmul.u32 58254, %v3067_v56  ;;  %v1974_v43 = vld [vmem:[%s9318_s23 + $0xac] sm:$0xff]  ;;  %vm13253_vm10 = vcmp.lt.s32.totalorder %v10314_v59, 16 }
 0x23e   : > { %v1299_v52 = vpop.f32.mrf.mxu3  ;;  %v1026_v10 = vadd.f32 %v988_v21, %v13368_v2  ;;  %v10307_v21 = vmul.u32 58254, %v3066_v50  ;;  %v10318_v2 = vsub.s32 %v10157_v22, %v3030_v9  ;;  %v3053_v11 = vsel %vm3052_vm4, 1, %v13357_v55 }
 0x23f   : > { %v2737_v31 = vpop.f32.mrf.mxu0  ;;  %v3055_v51 = vadd.s32 %v3053_v11, %v3051_v60  ;;  %v10329_v22 = vadd.f32 %v10234_v12, %v10195_v58  ;;  %vm3964_vm7 = vcmp.ne.s32.totalorder %v3002_v37, 0  ;;  %vm4000_vm8 = vcmp.lt.s32.totalorder %v3002_v37, 0 }
 0x240   : > { %v1337_v48 = vadd.f32 %v1299_v52, %v1026_v10  ;;  %v10309_v52 = vmul.u32 14564, %v3067_v56  ;;  %v3047_v10 = vshrl.u32 %v10276_v25, 16  ;;  %v3073_v45 = vshll.u32 %v10307_v21, 16  ;;  %vm10346_vm12 = vmand %vm4000_vm8, %vm3964_vm7 }
 0x241   : > { %13374 = vst [vmem:[#allocation13_spill] sm:$0xff] %v10329_v22  ;;  %v4072_v9 = vadd.s32 18, %v3002_v37  ;;  %vm3965_vm9 = vcmp.ne.s32.totalorder %v10318_v2, 0  ;;  %v3074_v58 = vshrl.u32 %v10307_v21, 16  ;;  %vm4001_vm13 = vcmp.lt.s32.totalorder %v10318_v2, 0 }
 0x242   : > { %v10302_v16 = vadd.f32 %v1607_v29, %v1337_v48  ;;  %8803 = vmatmul.msk.f32.gmra.mxu2 %vm247_vm1, %v9257_v39  ;;  %8877 = vmatmul.msk.f32.gmra.mxu0 %vm247_vm1, %v2589_v36  ;;  %v3045_v29 = vshrl.u32 %v3041_v41, 16  ;;  %v3075_v38 = vshll.u32 %v10309_v52, 16  ;;  %v10325_v41 = vadd.s32 48, %v10082_v1  ;;  %vm10375_vm4 = vmand %vm4001_vm13, %vm3965_vm9 }
 0x243   : > { %8840 = vmatmul.msk.f32.gmra.mxu3 %vm247_vm1, %v2281_v3  ;;  %vm3077_vm5 = vc.u32 %v3069_v40, %v3073_v45  ;;  %v3079_v27 = vadd.s32 %v3073_v45, %v3069_v40  ;;  %v3076_v60 = vshrl.u32 %v10309_v52, 16  ;;  %vm4623_vm14 = vcmask 1045504   ;;  %v1915_v45 = vpop.f32.mrf.mxu1 }
 0x244   : > { %v3056_v56 = vadd.s32 %v3055_v51, %v3045_v29  ;;  %v3078_v32 = vsel %vm3077_vm5, 1, %v13357_v55  ;;  %v3095_v49 = vand.u32 65535, %v10325_v41  ;;  %vm4768_vm15 = vcmp.eq.s32.totalorder %v10274_v57, 17 }
 0x245   : > { %v2121_v50 = vpop.f32.mrf.mxu2  ;;  %v3080_v17 = vadd.s32 %v3078_v32, %v3072_v14  ;;  %vm3081_vm11 = vc.u32 %v3079_v27, %v3075_v38  ;;  %v4073_v52 = vadd.s32 18, %v10318_v2  ;;  %v10364_v51 = vadd.f32 %v10300_v4, %v10255_v54  ;;  %v1975_v32 = vld [vmem:[%s9318_s23 + $0xb4] sm:$0xff] }
 0x246   : > { %v2429_v3 = vpop.f32.mrf.mxu3  ;;  %v2229_v25 = vadd.f32 %v2121_v50, %v13375_v34  ;;  %v3057_v12 = vadd.s32 %v3056_v56, %v3047_v10  ;;  %v3082_v21 = vsel %vm3081_vm11, 1, %v13357_v55  ;;  %v3096_v10 = vshrl.u32 %v10325_v41, 16 }
 0x247   : > { %v2740_v36 = vpop.f32.mrf.mxu0  ;;  %v3084_v29 = vadd.s32 %v3082_v21, %v3080_v17  ;;  %v10355_v11 = vmul.u32 58254, %v3095_v49  ;;  %13378 = vst [vmem:[#allocation10_spill] sm:$0xff] %v10364_v51  ;;  %vm4732_vm2 = vcmp.eq.s32.totalorder %v10274_v57, 16  ;;  %v10369_v34 = vsel %vm10346_vm12, %v4072_v9, %v3002_v37  ;;  %v2284_v51 = vld [vmem:[%s9318_s23 + $0xbd] sm:$0xff]  ;;  %v2285_v57 = vld [vmem:[%s9318_s23 + $0xc5] sm:$0xff] }
 0x248   : > { %v2537_v48 = vadd.f32 %v2429_v3, %v2229_v25  ;;  %v3098_v3 = vmul.u32 14564, %v3095_v49  ;;  %v10383_v37 = vadd.f32 %v1915_v45, %v10302_v16  ;;  %vm5056_vm5 = vcmask 25601  }
 0x249   : > { %v3085_v27 = vadd.s32 %v3084_v29, %v3074_v58  ;;  %v3102_v56 = vshll.u32 %v10355_v11, 16  ;;  %v2591_v58 = vld [vmem:[%s9318_s23 + $0xb6] sm:$0xff]  ;;  %v10393_v39 = vsel %vm10375_vm4, %v4073_v52, %v10318_v2  ;;  %v10396_v21 = vadd.s32 56, %v10082_v1 }
 0x24a   : > { %v10340_v40 = vadd.f32 %v2737_v31, %v2537_v48  ;;  %8804 = vmatmul.msk.f32.gmra.mxu2 %vm247_vm1, %v1974_v43  ;;  %8878 = vmatmul.msk.f32.gmra.mxu0 %vm247_vm1, %v2590_v5  ;;  %v3058_v31 = vshrl.u32 %v3057_v12, 4  ;;  %v13381_v43 = vld [vmem:[#allocation25_spill] sm:$0xff]  ;;  %13382 = vst [vmem:[#allocation15_spill] sm:$0xff] %v10383_v37  ;;  %v10387_v12 = vmul.u32 14564, %v3096_v10  ;;  %vm13252_vm8 = vcmp.lt.s32.totalorder %v10369_v34, 16  ;;  %v1976_v37 = vld [vmem:[%s9318_s23 + $0xbc] sm:$0xff] }
 0x24b   : > { %8841 = vmatmul.msk.f32.gmra.mxu3 %vm247_vm1, %v2282_v62  ;;  %v2283_v48 = vld [vmem:[%s9318_s23 + $0xb5] sm:$0xff]  ;;  %v3086_v9 = vadd.s32 %v3085_v27, %v3076_v60  ;;  %13383 = vst [vmem:[#allocation12_spill] sm:$0xff] %v10393_v39  ;;  %vm3106_vm7 = vc.u32 %v3098_v3, %v3102_v56  ;;  %v3108_v25 = vadd.s32 %v3102_v56, %v3098_v3  ;;  %vm4769_vm9 = vcmp.eq.s32.totalorder %v10314_v59, 17 }
 0x24c   : > { %v4250_v50 = vsel %vm4142_vm3, %v10340_v40, 0.0  ;;  %v4515_v4 = vrot.slane %v10340_v40, 6  ;;  %v3059_v5 = vmul.u32 18, %v3058_v31  ;;  %v4624_v29 = vrot.slane %v10340_v40, 2 }
 0x24d   : > { %v2124_v14 = vpop.f32.mrf.mxu2  ;;  %v4364_v54 = vmul.f32 %v4250_v50, %v4250_v50  ;;  %v4286_v16 = vsel %vm247_vm1, %v4250_v50, 0.0  ;;  %v3087_v60 = vshrl.u32 %v3086_v9, 4  ;;  %v3101_v31 = vmul.u32 58254, %v3096_v10 }
 0x24e   : > { %v2432_v38 = vpop.f32.mrf.mxu3  ;;  %v2230_v62 = vadd.f32 %v2124_v14, %v13381_v43  ;;  %v4622_v14 = vsel %vm4514_vm6, %v10340_v40, %v4515_v4  ;;  %v3107_v2 = vsel %vm3106_vm7, 1, %v13357_v55  ;;  %v10411_v50 = vsub.s32 %v10221_v26, %v3059_v5 }
 0x24f   : > { %v2743_v49 = vpop.f32.mrf.mxu0  ;;  %v4400_v45 = vsel %vm247_vm1, %v4364_v54, 0.0  ;;  %v3088_v52 = vmul.u32 18, %v3087_v60  ;;  %v3104_v10 = vshll.u32 %v10387_v12, 16  ;;  %v3103_v43 = vshrl.u32 %v10355_v11, 16 }
 0x250   : > { %v2538_v17 = vadd.f32 %v2432_v38, %v2230_v62  ;;  %vm4733_vm11 = vcmp.eq.s32.totalorder %v10314_v59, 16  ;;  %vm4145_vm13 = vcmp.lt.s32.totalorder %v10393_v39, 16 }
 0x251   : > { %vm3110_vm12 = vc.u32 %v3108_v25, %v3104_v10 }
 0x252   : > { %v10404_v38 = vadd.f32 %v2740_v36, %v2538_v17  ;;  %8805 = vmatmul.msk.f32.gmra.mxu2 %vm247_vm1, %v1975_v32  ;;  %8879 = vmatmul.msk.f32.gmra.mxu0 %vm247_vm1, %v2591_v58  ;;  %v3109_v32 = vadd.s32 %v3107_v2, %v3101_v31  ;;  %v13384_v58 = vld [vmem:[#allocation26_spill] sm:$0xff]  ;;  %v3089_v31 = vsub.s32 %v10261_v42, %v3088_v52  ;;  %v3125_v42 = vshrl.u32 %v10396_v21, 16 }
 0x253   : > { %8842 = vmatmul.msk.f32.gmra.mxu3 %vm247_vm1, %v2283_v48  ;;  %v3124_v48 = vand.u32 65535, %v10396_v21 }
 0x254   : > { %v4251_v36 = vsel %vm13253_vm10, %v10404_v38, 0.0  ;;  %v4516_v27 = vrot.slane %v10404_v38, 6  ;;  %v4625_v54 = vrot.slane %v10404_v38, 2  ;;  %vm3967_vm4 = vcmp.ne.s32.totalorder %v3089_v31, 0 }
 0x255   : > { %v4287_v26 = vsel %vm247_vm1, %v4251_v36, 0.0  ;;  %v4365_v62 = vmul.f32 %v4251_v36, %v4251_v36  ;;  %v2127_v3 = vpop.f32.mrf.mxu2  ;;  %vm4003_vm7 = vcmp.lt.s32.totalorder %v3089_v31, 0  ;;  %v10451_v10 = vmul.u32 58254, %v3124_v48 }
 0x256   : > { %v2435_v56 = vpop.f32.mrf.mxu3  ;;  %v4288_v5 = vadd.f32 %v4287_v26, %v4286_v16  ;;  %v4517_v9 = vsel %vm4514_vm6, %v4515_v4, %v4516_v27  ;;  %v4626_v17 = vsel %vm4623_vm14, %v4624_v29, %v4625_v54  ;;  %v2231_v60 = vadd.f32 %v2127_v3, %v13384_v58  ;;  %v2592_v29 = vld [vmem:[%s9318_s23 + $0xbe] sm:$0xff]  ;;  %vm4039_vm10 = vmand %vm4003_vm7, %vm3967_vm4 }
 0x257   : > { %v4401_v11 = vsel %vm247_vm1, %v4365_v62, 0.0  ;;  %v4876_v36 = vsel %vm4768_vm15, %v4626_v17, %v10340_v40  ;;  %v2746_v26 = vpop.f32.mrf.mxu0  ;;  %v3111_v3 = vsel %vm3110_vm12, 1, %v13357_v55  ;;  %vm3966_vm15 = vcmp.ne.s32.totalorder %v10411_v50, 0 }
 0x258   : > { %v4402_v2 = vadd.f32 %v4401_v11, %v4400_v45  ;;  %v4984_v16 = vsel %vm4732_vm2, %v4622_v14, %v4876_v36  ;;  %v2539_v4 = vadd.f32 %v2435_v56, %v2231_v60  ;;  %v3105_v40 = vshrl.u32 %v10387_v12, 16 }
 0x259   : > { %5020 = vst.msk [vmem:[#allocation2 + $0x13] sm:$0xff] %vm247_vm1, %v4984_v16  ;;  %v3113_v62 = vadd.s32 %v3111_v3, %v3109_v32  ;;  %vm4002_vm2 = vcmp.lt.s32.totalorder %v10411_v50, 0  ;;  %v4074_v14 = vadd.s32 18, %v10411_v50  ;;  %v4075_v12 = vadd.s32 18, %v3089_v31 }
 0x25a   : > { %5057 = vst.msk [vmem:[#allocation2 + $0x11] sm:$0x2] %vm5056_vm5, %v4984_v16  ;;  %v10444_v45 = vadd.f32 %v2743_v49, %v2539_v4  ;;  %8806 = vmatmul.msk.f32.gmra.mxu2 %vm247_vm1, %v1976_v37  ;;  %8880 = vmatmul.msk.f32.gmra.mxu0 %vm247_vm1, %v2592_v29  ;;  %vm4770_vm5 = vcmp.eq.s32.totalorder %v10369_v34, 17  ;;  %v3127_v25 = vmul.u32 14564, %v3124_v48  ;;  %vm4734_vm12 = vcmp.eq.s32.totalorder %v10369_v34, 16  ;;  %v13387_v4 = vld [vmem:[#allocation27_spill] sm:$0xff] }
 0x25b   : > { %8843 = vmatmul.msk.f32.gmra.mxu3 %vm247_vm1, %v2284_v51  ;;  %v3114_v52 = vadd.s32 %v3113_v62, %v3103_v43  ;;  %v10469_v60 = vmul.u32 14564, %v3125_v42  ;;  %v10472_v48 = vadd.s32 64, %v10082_v1  ;;  %v3130_v35 = vmul.u32 58254, %v3125_v42 }
 0x25c   : > { %v4252_v49 = vsel %vm13252_vm8, %v10444_v45, 0.0  ;;  %v4518_v37 = vrot.slane %v10444_v45, 6  ;;  %v4627_v51 = vrot.slane %v10444_v45, 2  ;;  %vm10465_vm8 = vmand %vm4002_vm2, %vm3966_vm15 }
 0x25d   : > { %v4289_v56 = vsel %vm247_vm1, %v4252_v49, 0.0  ;;  %v4366_v32 = vmul.f32 %v4252_v49, %v4252_v49  ;;  %v2130_v43 = vpop.f32.mrf.mxu2  ;;  %v1977_v49 = vld [vmem:[%s9318_s23 + $0xc4] sm:$0xff]  ;;  %v3115_v22 = vadd.s32 %v3114_v52, %v3105_v40  ;;  %v3133_v52 = vshll.u32 %v10469_v60, 16 }
 0x25e   : > { %v2438_v17 = vpop.f32.mrf.mxu3  ;;  %v4290_v11 = vadd.f32 %v4289_v56, %v4288_v5  ;;  %v4519_v36 = vsel %vm4514_vm6, %v4516_v27, %v4518_v37  ;;  %v4628_v16 = vsel %vm4623_vm14, %v4625_v54, %v4627_v51  ;;  %v2232_v29 = vadd.f32 %v2130_v43, %v13387_v4  ;;  %v2593_v4 = vld [vmem:[%s9318_s23 + $0xc6] sm:$0xff] }
 0x25f   : > { %v4403_v3 = vsel %vm247_vm1, %v4366_v32, 0.0  ;;  %v4877_v62 = vsel %vm4769_vm9, %v4628_v16, %v10404_v38  ;;  %v3131_v5 = vshll.u32 %v10451_v10, 16  ;;  %v2749_v43 = vpop.f32.mrf.mxu0  ;;  %v10493_v32 = vsel %vm10465_vm8, %v4074_v14, %v10411_v50 }
 0x260   : > { %v4404_v56 = vadd.f32 %v4403_v3, %v4402_v2  ;;  %v4985_v27 = vsel %vm4733_vm11, %v4517_v9, %v4877_v62  ;;  %v2540_v54 = vadd.f32 %v2438_v17, %v2232_v29  ;;  %13388 = vst [vmem:[#allocation17_spill] sm:$0xff] %v10493_v32  ;;  %v10495_v38 = vsel %vm4039_vm10, %v4075_v12, %v3089_v31 }
 0x261   : > { %5021 = vst.msk [vmem:[#allocation2 + $0x1b] sm:$0xff] %vm247_vm1, %v4985_v27  ;;  %v3116_v40 = vshrl.u32 %v3115_v22, 4  ;;  %v3132_v9 = vshrl.u32 %v10451_v10, 16  ;;  %vm3135_vm9 = vc.u32 %v3127_v25, %v3131_v5  ;;  %v3137_v42 = vadd.s32 %v3131_v5, %v3127_v25 }
 0x262   : > { %13389 = vst [vmem:[#allocation14_spill] sm:$0xff] %v10495_v38  ;;  %v10498_v2 = vadd.f32 %v2746_v26, %v2540_v54  ;;  %8807 = vmatmul.msk.f32.gmra.mxu2 %vm247_vm1, %v1977_v49  ;;  %8881 = vmatmul.msk.f32.gmra.mxu0 %vm247_vm1, %v2593_v4  ;;  %v3136_v50 = vsel %vm3135_vm9, 1, %v13357_v55  ;;  %v3153_v31 = vand.u32 65535, %v10472_v48  ;;  %v3154_v22 = vshrl.u32 %v10472_v48, 16 }
 0x263   : > { %8844 = vmatmul.msk.f32.gmra.mxu3 %vm247_vm1, %v2285_v57  ;;  %v3117_v17 = vmul.u32 18, %v3116_v40  ;;  %vm4771_vm10 = vcmp.eq.s32.totalorder %v10393_v39, 17  ;;  %v3138_v12 = vadd.s32 %v3136_v50, %v3130_v35  ;;  %vm4735_vm8 = vcmp.eq.s32.totalorder %v10393_v39, 16  ;;  %v13392_v35 = vld [vmem:[#allocation28_spill] sm:$0xff]  ;;  %v2291_v39 = vld [vmem:[%s9318_s23 + $0xf5] sm:$0xff] }
 0x264   : > { %v4253_v26 = vsel %vm4145_vm13, %v10498_v2, 0.0  ;;  %v4520_v14 = vrot.slane %v10498_v2, 6  ;;  %v4629_v57 = vrot.slane %v10498_v2, 2  ;;  %vm10516_vm11 = vc.u32 %v3137_v42, %v3133_v52  ;;  %v1978_v40 = vld [vmem:[%s9318_s23 + $0xcc] sm:$0xff] }
 0x265   : > { %v4291_v10 = vsel %vm247_vm1, %v4253_v26, 0.0  ;;  %v4367_v25 = vmul.f32 %v4253_v26, %v4253_v26  ;;  %v2133_v58 = vpop.f32.mrf.mxu2  ;;  %v3118_v29 = vsub.s32 %v10325_v41, %v3117_v17  ;;  %v2286_v41 = vld [vmem:[%s9318_s23 + $0xcd] sm:$0xff]  ;;  %vm13257_vm7 = vcmp.lt.s32.totalorder %v10493_v32, 16 }
 0x266   : > { %v2441_v16 = vpop.f32.mrf.mxu3  ;;  %v4292_v62 = vadd.f32 %v4291_v10, %v4290_v11  ;;  %v4521_v49 = vsel %vm4514_vm6, %v4518_v37, %v4520_v14  ;;  %v4630_v5 = vsel %vm4623_vm14, %v4627_v51, %v4629_v57  ;;  %v2233_v27 = vadd.f32 %v2133_v58, %v13392_v35  ;;  %v2594_v17 = vld [vmem:[%s9318_s23 + $0xce] sm:$0xff] }
 0x267   : > { %v4405_v54 = vsel %vm247_vm1, %v4367_v25, 0.0  ;;  %v4878_v4 = vsel %vm4770_vm5, %v4630_v5, %v10444_v45  ;;  %vm3968_vm15 = vcmp.ne.s32.totalorder %v3118_v29, 0  ;;  %vm4004_vm2 = vcmp.lt.s32.totalorder %v3118_v29, 0  ;;  %v2752_v37 = vpop.f32.mrf.mxu0 }
 0x268   : > { %v4406_v52 = vadd.f32 %v4405_v54, %v4404_v56  ;;  %v4986_v11 = vsel %vm4734_vm12, %v4519_v36, %v4878_v4  ;;  %v2541_v42 = vadd.f32 %v2441_v16, %v2233_v27  ;;  %vm4040_vm4 = vmand %vm4004_vm2, %vm3968_vm15  ;;  %v4076_v51 = vadd.s32 18, %v3118_v29  ;;  %v5294_v36 = vld [vmem:[%s13240_s2] sm:$0xff] }
 0x269   : > { %5022 = vst.msk [vmem:[#allocation2 + $0x23] sm:$0xff] %vm247_vm1, %v4986_v11  ;;  %vm13256_vm9 = vcmp.lt.s32.totalorder %v10495_v38, 16  ;;  %v3140_v45 = vsel %vm10516_vm11, 1, %v13357_v55  ;;  %v10538_v50 = vmul.u32 58254, %v3153_v31  ;;  %v3134_v26 = vshrl.u32 %v10469_v60, 16  ;;  %8934 = vmatpush.msk.msrb.mxu2 %vm356_vm0, %v5294_v36 }
 0x26a   : > { %v10540_v56 = vadd.f32 %v2749_v43, %v2541_v42  ;;  %8808 = vmatmul.msk.f32.gmra.mxu2 %vm247_vm1, %v1978_v40  ;;  %v3142_v10 = vadd.s32 %v3140_v45, %v3138_v12  ;;  %v10549_v25 = vadd.s32 72, %v10082_v1  ;;  %8882 = vmatmul.msk.f32.gmra.mxu0 %vm247_vm1, %v2594_v17  ;;  %v10552_v58 = vsel %vm4040_vm4, %v4076_v51, %v3118_v29 }
 0x26b   : > { %8845 = vmatmul.msk.f32.gmra.mxu3 %vm247_vm1, %v2286_v41  ;;  %13393 = vst [vmem:[#allocation19_spill] sm:$0xff] %v10552_v58  ;;  %v5369_v43 = vrot.slane %v5294_v36, 4  ;;  %v3156_v16 = vmul.u32 14564, %v3153_v31  ;;  %v10554_v3 = vmul.u32 14564, %v3154_v22  ;;  %vm4772_vm5 = vcmp.eq.s32.totalorder %v10493_v32, 17  ;;  %v1979_v36 = vld [vmem:[%s9318_s23 + $0xd4] sm:$0xff] }
 0x26c   : > { %v4254_v5 = vsel %vm13257_vm7, %v10540_v56, 0.0  ;;  %v4522_v60 = vrot.slane %v10540_v56, 6  ;;  %v4631_v12 = vrot.slane %v10540_v56, 2  ;;  %v3143_v35 = vadd.s32 %v3142_v10, %v3132_v9  ;;  %v13394_v9 = vld [vmem:[#allocation29_spill] sm:$0xff] }
 0x26d   : > { %v4293_v29 = vsel %vm247_vm1, %v4254_v5, 0.0  ;;  %v4368_v31 = vmul.f32 %v4254_v5, %v4254_v5  ;;  %vm4736_vm12 = vcmp.eq.s32.totalorder %v10493_v32, 16  ;;  %v2136_v27 = vpop.f32.mrf.mxu2  ;;  %8897 = vmatpush.msk.msra.mxu1 %vm356_vm0, %v5369_v43  ;;  %v3159_v4 = vmul.u32 58254, %v3154_v22  ;;  %v2287_v10 = vld [vmem:[%s9318_s23 + $0xd5] sm:$0xff] }
 0x26e   : > { %v2444_v54 = vpop.f32.mrf.mxu3  ;;  %v3160_v40 = vshll.u32 %v10538_v50, 16  ;;  %v4294_v41 = vadd.f32 %v4293_v29, %v4292_v62  ;;  %v4523_v11 = vsel %vm4514_vm6, %v4520_v14, %v4522_v60  ;;  %v4632_v42 = vsel %vm4623_vm14, %v4629_v57, %v4631_v12  ;;  %v2595_v57 = vld [vmem:[%s9318_s23 + $0xd6] sm:$0xff] }
 0x26f   : > { %v2234_v17 = vadd.f32 %v2136_v27, %v13394_v9  ;;  %v4407_v51 = vsel %vm247_vm1, %v4368_v31, 0.0  ;;  %v4879_v45 = vsel %vm4771_vm10, %v4632_v42, %v10498_v2  ;;  %v3144_v43 = vadd.s32 %v3143_v35, %v3134_v26  ;;  %v2755_v29 = vpop.f32.mrf.mxu0  ;;  %v1983_v32 = vld [vmem:[%s9318_s23 + $0xf4] sm:$0xff] }
 0x270   : > { %v3162_v22 = vshll.u32 %v10554_v3, 16  ;;  %v4408_v5 = vadd.f32 %v4407_v51, %v4406_v52  ;;  %v4987_v62 = vsel %vm4735_vm8, %v4521_v49, %v4879_v45  ;;  %v3161_v27 = vshrl.u32 %v10538_v50, 16 }
 0x271   : > { %v2542_v14 = vadd.f32 %v2444_v54, %v2234_v17  ;;  %5023 = vst.msk [vmem:[#allocation2 + $0x2b] sm:$0xff] %vm247_vm1, %v4987_v62  ;;  %v3145_v31 = vshrl.u32 %v3144_v43, 4  ;;  %v3163_v9 = vshrl.u32 %v10554_v3, 16  ;;  %vm3164_vm10 = vc.u32 %v3156_v16, %v3160_v40 }
 0x272   : > { %v3166_v2 = vadd.s32 %v3160_v40, %v3156_v16  ;;  %8809 = vmatmul.msk.f32.gmra.mxu2 %vm247_vm1, %v1979_v36  ;;  %v3165_v49 = vsel %vm3164_vm10, 1, %v13357_v55  ;;  %v3182_v52 = vand.u32 65535, %v10549_v25  ;;  %v3183_v26 = vshrl.u32 %v10549_v25, 16  ;;  %8883 = vmatmul.msk.f32.gmra.mxu0 %vm247_vm1, %v2595_v57 }
 0x273   : > { %v10583_v42 = vadd.f32 %v2752_v37, %v2542_v14  ;;  %8846 = vmatmul.msk.f32.gmra.mxu3 %vm247_vm1, %v2287_v10  ;;  %v3146_v50 = vmul.u32 18, %v3145_v31  ;;  %v3167_v35 = vadd.s32 %v3165_v49, %v3159_v4  ;;  %v10592_v3 = vadd.s32 80, %v10082_v1  ;;  %v13395_v14 = vld [vmem:[#allocation30_spill] sm:$0xff] }
 0x274   : > { %vm3168_vm8 = vc.u32 %v3166_v2, %v3162_v22  ;;  %vm4737_vm11 = vcmp.eq.s32.totalorder %v10495_v38, 16  ;;  %v1980_v49 = vld [vmem:[%s9318_s23 + $0xdc] sm:$0xff]  ;;  %vm4773_vm10 = vcmp.eq.s32.totalorder %v10495_v38, 17 }
 0x275   : > { %v4255_v37 = vsel %vm13256_vm9, %v10583_v42, 0.0  ;;  %v4524_v16 = vrot.slane %v10583_v42, 6  ;;  %v4633_v54 = vrot.slane %v10583_v42, 2  ;;  %v3169_v40 = vsel %vm3168_vm8, 1, %v13357_v55  ;;  %v2139_v4 = vpop.f32.mrf.mxu2 }
 0x276   : > { %v4295_v17 = vsel %vm247_vm1, %v4255_v37, 0.0  ;;  %v4369_v51 = vmul.f32 %v4255_v37, %v4255_v37  ;;  %v2447_v45 = vpop.f32.mrf.mxu3  ;;  %v3147_v36 = vsub.s32 %v10396_v21, %v3146_v50  ;;  %v3171_v10 = vadd.s32 %v3169_v40, %v3167_v35  ;;  %v2288_v37 = vld [vmem:[%s9318_s23 + $0xdd] sm:$0xff] }
 0x277   : > { %v4296_v43 = vadd.f32 %v4295_v17, %v4294_v41  ;;  %v4525_v22 = vsel %vm4514_vm6, %v4522_v60, %v4524_v16  ;;  %v4634_v62 = vsel %vm4623_vm14, %v4631_v12, %v4633_v54  ;;  %v2235_v57 = vadd.f32 %v2139_v4, %v13395_v14  ;;  %v2758_v60 = vpop.f32.mrf.mxu0  ;;  %v2596_v35 = vld [vmem:[%s9318_s23 + $0xde] sm:$0xff] }
 0x278   : > { %v4409_v31 = vsel %vm247_vm1, %v4369_v51, 0.0  ;;  %v4880_v2 = vsel %vm4772_vm5, %v4634_v62, %v10540_v56  ;;  %vm3969_vm15 = vcmp.ne.s32.totalorder %v3147_v36, 0  ;;  %vm4005_vm2 = vcmp.lt.s32.totalorder %v3147_v36, 0 }
 0x279   : > { %v4410_v21 = vadd.f32 %v4409_v31, %v4408_v5  ;;  %v4988_v41 = vsel %vm4736_vm12, %v4523_v11, %v4880_v2  ;;  %v2543_v50 = vadd.f32 %v2447_v45, %v2235_v57  ;;  %vm4041_vm4 = vmand %vm4005_vm2, %vm3969_vm15  ;;  %v4077_v12 = vadd.s32 18, %v3147_v36 }
 0x27a   : > { %5024 = vst.msk [vmem:[#allocation2 + $0x33] sm:$0xff] %vm247_vm1, %v4988_v41  ;;  %vm13255_vm8 = vcmp.lt.s32.totalorder %v10552_v58, 16  ;;  %v3172_v56 = vadd.s32 %v3171_v10, %v3161_v27  ;;  %v10618_v40 = vmul.u32 58254, %v3182_v52  ;;  %vm5063_vm5 = vcmask 25600   ;;  %8810 = vmatmul.msk.f32.gmra.mxu2 %vm247_vm1, %v1980_v49  ;;  %8884 = vmatmul.msk.f32.gmra.mxu0 %vm247_vm1, %v2596_v35  ;;  %v13396_v41 = vld [vmem:[#allocation31_spill] sm:$0xff] }
 0x27b   : > { %v10620_v17 = vadd.f32 %v2755_v29, %v2543_v50  ;;  %8847 = vmatmul.msk.f32.gmra.mxu3 %vm247_vm1, %v2288_v37  ;;  %v3185_v11 = vmul.u32 14564, %v3182_v52  ;;  %v10624_v5 = vmul.u32 14564, %v3183_v26  ;;  %v10626_v51 = vsel %vm4041_vm4, %v4077_v12, %v3147_v36 }
 0x27c   : > { %v3173_v4 = vadd.s32 %v3172_v56, %v3163_v9  ;;  %v3188_v45 = vmul.u32 58254, %v3183_v26  ;;  %vm4774_vm12 = vcmp.eq.s32.totalorder %v10552_v58, 17  ;;  %vm4738_vm15 = vcmp.eq.s32.totalorder %v10552_v58, 16  ;;  %v1981_v56 = vld [vmem:[%s9318_s23 + $0xe4] sm:$0xff] }
 0x27d   : > { %v4256_v29 = vsel %vm13255_vm8, %v10620_v17, 0.0  ;;  %v4526_v10 = vrot.slane %v10620_v17, 6  ;;  %v4635_v62 = vrot.slane %v10620_v17, 2  ;;  %v2142_v26 = vpop.f32.mrf.mxu2  ;;  %v3189_v31 = vshll.u32 %v10618_v40, 16 }
 0x27e   : > { %v4297_v36 = vsel %vm247_vm1, %v4256_v29, 0.0  ;;  %v4370_v9 = vmul.f32 %v4256_v29, %v4256_v29  ;;  %v2450_v14 = vpop.f32.mrf.mxu3  ;;  %v3174_v57 = vshrl.u32 %v3173_v4, 4  ;;  %v2236_v50 = vadd.f32 %v2142_v26, %v13396_v41  ;;  %v2289_v4 = vld [vmem:[%s9318_s23 + $0xe5] sm:$0xff] }
 0x27f   : > { %v4298_v2 = vadd.f32 %v4297_v36, %v4296_v43  ;;  %v4527_v49 = vsel %vm4514_vm6, %v4524_v16, %v4526_v10  ;;  %v4636_v37 = vsel %vm4623_vm14, %v4633_v54, %v4635_v62  ;;  %vm4149_vm2 = vcmp.lt.s32.totalorder %v10626_v51, 16  ;;  %v2761_v27 = vpop.f32.mrf.mxu0  ;;  %v2597_v26 = vld [vmem:[%s9318_s23 + $0xe6] sm:$0xff] }
 0x280   : > { %v4411_v12 = vsel %vm247_vm1, %v4370_v9, 0.0  ;;  %v4881_v35 = vsel %vm4773_vm10, %v4636_v37, %v10583_v42  ;;  %v3175_v29 = vmul.u32 18, %v3174_v57  ;;  %v2544_v54 = vadd.f32 %v2450_v14, %v2236_v50 }
 0x281   : > { %v5059_v52 = vld [vmem:[#allocation2 + $0x2c] sm:$0xff]  ;;  %v5060_v43 = vld [vmem:[#allocation2 + $0x34] sm:$0x3]  ;;  %v4412_v36 = vadd.f32 %v4411_v12, %v4410_v21  ;;  %v4989_v16 = vsel %vm4737_vm11, %v4525_v22, %v4881_v35  ;;  %v3191_v9 = vshll.u32 %v10624_v5, 16  ;;  %v3190_v37 = vshrl.u32 %v10618_v40, 16 }
 0x282   : > { %5064 = vst.msk [vmem:[#allocation2 + $0x10] sm:$0x3] %vm5063_vm5, %v5060_v43  ;;  %v3176_v42 = vsub.s32 %v10472_v48, %v3175_v29  ;;  %vm3193_vm4 = vc.u32 %v3185_v11, %v3189_v31  ;;  %v3195_v41 = vadd.s32 %v3189_v31, %v3185_v11  ;;  %v10658_v57 = vadd.f32 %v2758_v60, %v2544_v54 }
 0x283   : > { %5062 = vst.msk [vmem:[#allocation2 + $0x8] sm:$0xff] %vm247_vm1, %v5059_v52  ;;  %8811 = vmatmul.msk.f32.gmra.mxu2 %vm247_vm1, %v1981_v56  ;;  %8848 = vmatmul.msk.f32.gmra.mxu3 %vm247_vm1, %v2289_v4  ;;  %v3194_v22 = vsel %vm3193_vm4, 1, %v13357_v55  ;;  %v13397_v21 = vand.u32 65535, %v10592_v3  ;;  %v13398_v48 = vshrl.u32 %v10592_v3, 16  ;;  %vm4775_vm4 = vcmp.eq.s32.totalorder %v10626_v51, 17 }
 0x284   : > { %5025 = vst.msk [vmem:[#allocation2 + $0x3b] sm:$0xff] %vm247_vm1, %v4989_v16  ;;  %vm3970_vm11 = vcmp.ne.s32.totalorder %v3176_v42, 0  ;;  %vm4006_vm10 = vcmp.lt.s32.totalorder %v3176_v42, 0  ;;  %v4078_v60 = vadd.s32 18, %v3176_v42  ;;  %8885 = vmatmul.msk.f32.gmra.mxu0 %vm247_vm1, %v2597_v26  ;;  %v3196_v40 = vadd.s32 %v3194_v22, %v3188_v45  ;;  %v13399_v26 = vld [vmem:[#allocation32_spill] sm:$0xff] }
 0x285   : > { %v10665_v14 = vmul.u32 58254, %v13397_v21  ;;  %v10669_v50 = vmul.u32 14564, %v13398_v48  ;;  %v4257_v11 = vsel %vm4149_vm2, %v10658_v57, 0.0  ;;  %v4528_v52 = vrot.slane %v10658_v57, 6  ;;  %vm4042_vm8 = vmand %vm4006_vm10, %vm3970_vm11  ;;  %v2145_v45 = vpop.f32.mrf.mxu2  ;;  %v1982_v21 = vld [vmem:[%s9318_s23 + $0xec] sm:$0xff] }
 0x286   : > { %v4637_v31 = vrot.slane %v10658_v57, 2  ;;  %vm3197_vm9 = vc.u32 %v3195_v41, %v3191_v9  ;;  %v4299_v12 = vsel %vm247_vm1, %v4257_v11, 0.0  ;;  %v4371_v35 = vmul.f32 %v4257_v11, %v4257_v11  ;;  %v2453_v56 = vpop.f32.mrf.mxu3  ;;  %v2290_v48 = vld [vmem:[%s9318_s23 + $0xed] sm:$0xff] }
 0x287   : > { %vm4739_vm7 = vcmp.eq.s32.totalorder %v10626_v51, 16  ;;  %v10681_v4 = vsel %vm4042_vm8, %v4078_v60, %v3176_v42  ;;  %v3198_v29 = vsel %vm3197_vm9, 1, %v13357_v55  ;;  %v4300_v43 = vadd.f32 %v4299_v12, %v4298_v2  ;;  %v2764_v12 = vpop.f32.mrf.mxu0 }
 0x288   : > { %v4529_v16 = vsel %vm4514_vm6, %v4526_v10, %v4528_v52  ;;  %v4638_v54 = vsel %vm4623_vm14, %v4635_v62, %v4637_v31  ;;  %v2237_v22 = vadd.f32 %v2145_v45, %v13399_v26  ;;  %v4413_v9 = vsel %vm247_vm1, %v4371_v35, 0.0  ;;  %v2598_v35 = vld [vmem:[%s9318_s23 + $0xee] sm:$0xff] }
 0x289   : > { %v4882_v41 = vsel %vm4774_vm12, %v4638_v54, %v10620_v17  ;;  %v3192_v42 = vshrl.u32 %v10624_v5, 16  ;;  %v13400_v60 = vand.u32 65535, %v10592_v3  ;;  %v4414_v2 = vadd.f32 %v4413_v9, %v4412_v36 }
 0x28a   : > { %v4990_v10 = vsel %vm4738_vm15, %v4527_v49, %v4882_v41  ;;  %v2545_v62 = vadd.f32 %v2453_v56, %v2237_v22  ;;  %vm4150_vm9 = vcmp.lt.s32.totalorder %v10681_v4, 16  ;;  %v3200_v45 = vadd.s32 %v3198_v29, %v3196_v40 }
 0x28b   : > { %v3214_v11 = vmul.u32 14564, %v13400_v60  ;;  %5026 = vst.msk [vmem:[#allocation2 + $0x43] sm:$0xff] %vm247_vm1, %v4990_v10  ;;  %v13401_v17 = vshrl.u32 %v10592_v3, 16  ;;  %v3218_v5 = vshll.u32 %v10665_v14, 16  ;;  %v3219_v26 = vshrl.u32 %v10665_v14, 16  ;;  %8812 = vmatmul.msk.f32.gmra.mxu2 %vm247_vm1, %v1982_v21  ;;  %8849 = vmatmul.msk.f32.gmra.mxu3 %vm247_vm1, %v2290_v48 }
 0x28c   : > { %v10705_v60 = vadd.f32 %v2761_v27, %v2545_v62  ;;  %v3220_v49 = vshll.u32 %v10669_v50, 16  ;;  %v3221_v36 = vshrl.u32 %v10669_v50, 16  ;;  %v10712_v56 = vadd.s32 88, %v10082_v1  ;;  %8886 = vmatmul.msk.f32.gmra.mxu0 %vm247_vm1, %v2598_v35 }
 0x28d   : > { %v3217_v54 = vmul.u32 58254, %v13401_v17  ;;  %v3201_v40 = vadd.s32 %v3200_v45, %v3190_v37  ;;  %vm3222_vm8 = vc.u32 %v3214_v11, %v3218_v5  ;;  %v3224_v29 = vadd.s32 %v3218_v5, %v3214_v11  ;;  %v2148_v21 = vpop.f32.mrf.mxu2  ;;  %v13402_v17 = vld [vmem:[#allocation33_spill] sm:$0xff] }
 0x28e   : > { %v10716_v14 = vadd.s32 96, %v10082_v1  ;;  %v4258_v27 = vsel %vm4150_vm9, %v10705_v60, 0.0  ;;  %v4530_v22 = vrot.slane %v10705_v60, 6  ;;  %v4639_v9 = vrot.slane %v10705_v60, 2  ;;  %v2456_v48 = vpop.f32.mrf.mxu3 }
 0x28f   : > { %vm4776_vm12 = vcmp.eq.s32.totalorder %v10681_v4, 17  ;;  %v3223_v37 = vsel %vm3222_vm8, 1, %v13357_v55  ;;  %v4301_v50 = vsel %vm247_vm1, %v4258_v27, 0.0  ;;  %v4372_v41 = vmul.f32 %v4258_v27, %v4258_v27 }
 0x290   : > { %vm4740_vm15 = vcmp.eq.s32.totalorder %v10681_v4, 16  ;;  %v3202_v11 = vadd.s32 %v3201_v40, %v3192_v42  ;;  %v3225_v10 = vadd.s32 %v3223_v37, %v3217_v54  ;;  %v10727_v62 = vadd.f32 %v4301_v50, %v4300_v43  ;;  %v2767_v54 = vpop.f32.mrf.mxu0  ;;  %v2599_v40 = vld [vmem:[%s9318_s23 + $0xf6] sm:$0xff] }
 0x291   : > { %v4531_v35 = vsel %vm4514_vm6, %v4528_v52, %v4530_v22  ;;  %v4640_v45 = vsel %vm4623_vm14, %v4637_v31, %v4639_v9  ;;  %v2238_v5 = vadd.f32 %v2148_v21, %v13402_v17  ;;  %v4415_v58 = vsel %vm247_vm1, %v4372_v41, 0.0 }
 0x292   : > { %v4883_v27 = vsel %vm4775_vm4, %v4640_v45, %v10658_v57  ;;  %v3203_v38 = vshrl.u32 %v3202_v11, 4  ;;  %vm3226_vm11 = vc.u32 %v3224_v29, %v3220_v49  ;;  %v10738_v42 = vadd.f32 %v4415_v58, %v4414_v2 }
 0x293   : > { %v4991_v43 = vsel %vm4739_vm7, %v4529_v16, %v4883_v27  ;;  %v2546_v52 = vadd.f32 %v2456_v48, %v2238_v5  ;;  %v3227_v31 = vsel %vm3226_vm11, 1, %v13357_v55  ;;  %v3240_v57 = vand.u32 65535, %v10712_v56  ;;  %8813 = vmatmul.msk.f32.gmra.mxu2 %vm247_vm1, %v1983_v32  ;;  %8850 = vmatmul.msk.f32.gmra.mxu3 %vm247_vm1, %v2291_v39  ;;  %v13403_v27 = vld [vmem:[#allocation34_spill] sm:$0xff] }
 0x294   : > { %5027 = vst.msk [vmem:[#allocation2 + $0x4b] sm:$0xff] %vm247_vm1, %v4991_v43  ;;  %v3204_v37 = vmul.u32 18, %v3203_v38  ;;  %v3229_v50 = vadd.s32 %v3227_v31, %v3225_v10  ;;  %v3241_v41 = vshrl.u32 %v10712_v56, 16  ;;  %v3269_v58 = vand.u32 65535, %v10716_v14  ;;  %8887 = vmatmul.msk.f32.gmra.mxu0 %vm247_vm1, %v2599_v40 }
 0x295   : > { %v10747_v21 = vadd.f32 %v2764_v12, %v2546_v52  ;;  %v3270_v16 = vshrl.u32 %v10716_v14, 16  ;;  %v10754_v2 = vadd.s32 104, %v10082_v1  ;;  %v3243_v29 = vmul.u32 14564, %v3240_v57  ;;  %v2151_v45 = vpop.f32.mrf.mxu2 }
 0x296   : > { %v3205_v38 = vsub.s32 %v10549_v25, %v3204_v37  ;;  %v3230_v49 = vadd.s32 %v3229_v50, %v3219_v26  ;;  %v10758_v48 = vmul.u32 58254, %v3240_v57  ;;  %v10762_v39 = vmul.u32 14564, %v3241_v41  ;;  %v2459_v25 = vpop.f32.mrf.mxu3  ;;  %v1984_v37 = vld [vmem:[%s9318_s23 + $0xfc] sm:$0xff] }
 0x297   : > { %v4532_v12 = vrot.slane %v10747_v21, 6  ;;  %v4641_v32 = vrot.slane %v10747_v21, 2  ;;  %v3246_v11 = vmul.u32 58254, %v3241_v41  ;;  %v2239_v43 = vadd.f32 %v2151_v45, %v13403_v27  ;;  %v2292_v50 = vld [vmem:[%s9318_s23 + $0xfd] sm:$0xff] }
 0x298   : > { %vm3971_vm7 = vcmp.ne.s32.totalorder %v3205_v38, 0  ;;  %vm4007_vm10 = vcmp.lt.s32.totalorder %v3205_v38, 0  ;;  %v4079_v10 = vadd.s32 18, %v3205_v38  ;;  %v3231_v26 = vadd.s32 %v3230_v49, %v3221_v36  ;;  %v2600_v57 = vld [vmem:[%s9318_s23 + $0xfe] sm:$0xff] }
 0x299   : > { %vm4043_vm4 = vmand %vm4007_vm10, %vm3971_vm7  ;;  %v10767_v17 = vsel %vm4514_vm6, %v4530_v22, %v4532_v12  ;;  %v4642_v5 = vsel %vm4623_vm14, %v4639_v9, %v4641_v32  ;;  %v3247_v52 = vshll.u32 %v10758_v48, 16  ;;  %v3248_v22 = vshrl.u32 %v10758_v48, 16 }
 0x29a   : > { %v10774_v31 = vsel %vm4043_vm4, %v4079_v10, %v3205_v38  ;;  %v4884_v36 = vsel %vm4776_vm12, %v4642_v5, %v10705_v60  ;;  %v3232_v40 = vshrl.u32 %v3231_v26, 4  ;;  %v2547_v60 = vadd.f32 %v2459_v25, %v2239_v43  ;;  %v2770_v26 = vpop.f32.mrf.mxu0 }
 0x29b   : > { %vm13266_vm8 = vcmp.lt.s32.totalorder %v10774_v31, 16  ;;  %vm4741_vm11 = vcmp.eq.s32.totalorder %v10774_v31, 16  ;;  %vm4777_vm7 = vcmp.eq.s32.totalorder %v10774_v31, 17  ;;  %v4992_v9 = vsel %vm4740_vm15, %v4531_v35, %v4884_v36  ;;  %8814 = vmatmul.msk.f32.gmra.mxu2 %vm247_vm1, %v1984_v37  ;;  %8851 = vmatmul.msk.f32.gmra.mxu3 %vm247_vm1, %v2292_v50 }
 0x29c   : > { %v4259_v41 = vsel %vm13266_vm8, %v10747_v21, 0.0  ;;  %5028 = vst.msk [vmem:[#allocation2 + $0x53] sm:$0xff] %vm247_vm1, %v4992_v9  ;;  %v3233_v38 = vmul.u32 18, %v3232_v40  ;;  %v3249_v49 = vshll.u32 %v10762_v39, 16  ;;  %v3250_v35 = vshrl.u32 %v10762_v39, 16  ;;  %8888 = vmatmul.msk.f32.gmra.mxu0 %vm247_vm1, %v2600_v57 }
 0x29d   : > { %v4303_v10 = vsel %vm247_vm1, %v4259_v41, 0.0  ;;  %v4373_v45 = vmul.f32 %v4259_v41, %v4259_v41  ;;  %vm3251_vm12 = vc.u32 %v3243_v29, %v3247_v52  ;;  %v10798_v27 = vadd.f32 %v2767_v54, %v2547_v60  ;;  %v2154_v54 = vpop.f32.mrf.mxu2  ;;  %v1985_v60 = vld [vmem:[%s9318_s23 + $0x104] sm:$0xff] }
 0x29e   : > { %v4304_v5 = vadd.f32 %v4303_v10, %v10727_v62  ;;  %v3234_v25 = vsub.s32 %v10592_v3, %v3233_v38  ;;  %v3252_v43 = vsel %vm3251_vm12, 1, %v13357_v55  ;;  %v3253_v40 = vadd.s32 %v3247_v52, %v3243_v29  ;;  %v2462_v3 = vpop.f32.mrf.mxu3  ;;  %v13404_v29 = vld [vmem:[#allocation35_spill] sm:$0xff] }
 0x29f   : > { %v4417_v36 = vsel %vm247_vm1, %v4373_v45, 0.0  ;;  %v3254_v37 = vadd.s32 %v3252_v43, %v3246_v11  ;;  %v3272_v39 = vmul.u32 14564, %v3269_v58  ;;  %v4534_v9 = vrot.slane %v10798_v27, 6 }
 0x2a0   : > { %v4418_v50 = vadd.f32 %v4417_v36, %v10738_v42  ;;  %vm3972_vm15 = vcmp.ne.s32.totalorder %v3234_v25, 0  ;;  %vm4008_vm10 = vcmp.lt.s32.totalorder %v3234_v25, 0  ;;  %v4080_v62 = vadd.s32 18, %v3234_v25  ;;  %v2293_v42 = vld [vmem:[%s9318_s23 + $0x105] sm:$0xff] }
 0x2a1   : > { %vm4044_vm4 = vmand %vm4008_vm10, %vm3972_vm15  ;;  %v4643_v57 = vrot.slane %v10798_v27, 2  ;;  %v2240_v52 = vadd.f32 %v2154_v54, %v13404_v29  ;;  %vm3255_vm12 = vc.u32 %v3253_v40, %v3249_v49  ;;  %v10817_v38 = vmul.u32 58254, %v3269_v58 }
 0x2a2   : > { %v10810_v11 = vsel %vm4044_vm4, %v4080_v62, %v3234_v25  ;;  %v3256_v41 = vsel %vm3255_vm12, 1, %v13357_v55  ;;  %v10821_v10 = vmul.u32 14564, %v3270_v16  ;;  %v4535_v49 = vsel %vm4514_vm6, %v4532_v12, %v4534_v9  ;;  %v2601_v25 = vld [vmem:[%s9318_s23 + $0x106] sm:$0xff] }
 0x2a3   : > { %vm13265_vm15 = vcmp.lt.s32.totalorder %v10810_v11, 16  ;;  %v4644_v45 = vsel %vm4623_vm14, %v4641_v32, %v4643_v57  ;;  %vm4742_vm10 = vcmp.eq.s32.totalorder %v10810_v11, 16  ;;  %vm4778_vm4 = vcmp.eq.s32.totalorder %v10810_v11, 17  ;;  %8815 = vmatmul.msk.f32.gmra.mxu2 %vm247_vm1, %v1985_v60  ;;  %8852 = vmatmul.msk.f32.gmra.mxu3 %vm247_vm1, %v2293_v42 }
 0x2a4   : > { %v4260_v58 = vsel %vm13265_vm15, %v10798_v27, 0.0  ;;  %v4885_v43 = vsel %vm4777_vm7, %v4644_v45, %v10747_v21  ;;  %v2548_v36 = vadd.f32 %v2462_v3, %v2240_v52  ;;  %v3258_v62 = vadd.s32 %v3256_v41, %v3254_v37  ;;  %8889 = vmatmul.msk.f32.gmra.mxu0 %vm247_vm1, %v2601_v25  ;;  %v2773_v52 = vpop.f32.mrf.mxu0 }
 0x2a5   : > { %v4305_v12 = vsel %vm247_vm1, %v4260_v58, 0.0  ;;  %v4374_v40 = vmul.f32 %v4260_v58, %v4260_v58  ;;  %v4993_v32 = vsel %vm4741_vm11, %v10767_v17, %v4885_v43  ;;  %v3275_v21 = vmul.u32 58254, %v3270_v16  ;;  %v2157_v42 = vpop.f32.mrf.mxu2 }
 0x2a6   : > { %v10845_v54 = vadd.f32 %v4305_v12, %v4304_v5  ;;  %5029 = vst.msk [vmem:[#allocation2 + $0x5b] sm:$0xff] %vm247_vm1, %v4993_v32  ;;  %v10848_v29 = vadd.f32 %v2770_v26, %v2548_v36  ;;  %v3276_v3 = vshll.u32 %v10817_v38, 16  ;;  %v3259_v37 = vadd.s32 %v3258_v62, %v3248_v22  ;;  %v2465_v45 = vpop.f32.mrf.mxu3  ;;  %v1986_v36 = vld [vmem:[%s9318_s23 + $0x10c] sm:$0xff] }
 0x2a7   : > { %v4419_v17 = vsel %vm247_vm1, %v4374_v40, 0.0  ;;  %v3277_v5 = vshrl.u32 %v10817_v38, 16  ;;  %v3278_v26 = vshll.u32 %v10821_v10, 16  ;;  %v3279_v25 = vshrl.u32 %v10821_v10, 16  ;;  %v2294_v12 = vld [vmem:[%s9318_s23 + $0x10d] sm:$0xff] }
 0x2a8   : > { %v10859_v41 = vadd.f32 %v4419_v17, %v4418_v50  ;;  %v4536_v16 = vrot.slane %v10848_v29, 6  ;;  %v4645_v60 = vrot.slane %v10848_v29, 2  ;;  %v3260_v48 = vadd.s32 %v3259_v37, %v3250_v35  ;;  %v2602_v62 = vld [vmem:[%s9318_s23 + $0x10e] sm:$0xff] }
 0x2a9   : > { %v2241_v22 = vadd.f32 %v2157_v42, %v10144_v61  ;;  %vm3280_vm11 = vc.u32 %v3272_v39, %v3276_v3  ;;  %v3282_v58 = vadd.s32 %v3276_v3, %v3272_v39  ;;  %v3298_v40 = vand.u32 65535, %v10754_v2 }
 0x2aa   : > { %v10866_v38 = vsel %vm4514_vm6, %v4534_v9, %v4536_v16  ;;  %v4646_v50 = vsel %vm4623_vm14, %v4643_v57, %v4645_v60  ;;  %v3281_v43 = vsel %vm3280_vm11, 1, %v13357_v55  ;;  %v3261_v32 = vshrl.u32 %v3260_v48, 4 }
 0x2ab   : > { %v4886_v35 = vsel %vm4778_vm4, %v4646_v50, %v10798_v27  ;;  %v2549_v10 = vadd.f32 %v2465_v45, %v2241_v22  ;;  %v3283_v61 = vadd.s32 %v3281_v43, %v3275_v21  ;;  %vm3284_vm7 = vc.u32 %v3282_v58, %v3278_v26  ;;  %8816 = vmatmul.msk.f32.gmra.mxu2 %vm247_vm1, %v1986_v36 }
 0x2ac   : > { %v4994_v39 = vsel %vm4742_vm10, %v4535_v49, %v4886_v35  ;;  %v3299_v9 = vshrl.u32 %v10754_v2, 16  ;;  %v3301_v57 = vmul.u32 14564, %v3298_v40  ;;  %v3262_v3 = vmul.u32 18, %v3261_v32  ;;  %8853 = vmatmul.msk.f32.gmra.mxu3 %vm247_vm1, %v2294_v12  ;;  %8890 = vmatmul.msk.f32.gmra.mxu0 %vm247_vm1, %v2602_v62  ;;  %v2776_v35 = vpop.f32.mrf.mxu0  ;;  %v1987_v62 = vld [vmem:[%s9318_s23 + $0x114] sm:$0xff] }
 0x2ad   : > { %5030 = vst.msk [vmem:[#allocation2 + $0x63] sm:$0xff] %vm247_vm1, %v4994_v39  ;;  %v10881_v17 = vadd.f32 %v2773_v52, %v2549_v10  ;;  %v3285_v37 = vsel %vm3284_vm7, 1, %v13357_v55  ;;  %v10886_v27 = vmul.u32 58254, %v3298_v40  ;;  %v10892_v26 = vadd.s32 112, %v10082_v1  ;;  %v2160_v50 = vpop.f32.mrf.mxu2  ;;  %v2295_v39 = vld [vmem:[%s9318_s23 + $0x115] sm:$0xff] }
 0x2ae   : > { %v3287_v21 = vadd.s32 %v3285_v37, %v3283_v61  ;;  %v10888_v42 = vmul.u32 14564, %v3299_v9  ;;  %v3304_v49 = vmul.u32 58254, %v3299_v9  ;;  %v3263_v52 = vsub.s32 %v10712_v56, %v3262_v3  ;;  %v2468_v43 = vpop.f32.mrf.mxu3 }
 0x2af   : > { %v4538_v45 = vrot.slane %v10881_v17, 6  ;;  %v4647_v48 = vrot.slane %v10881_v17, 2  ;;  %v3305_v22 = vshll.u32 %v10886_v27, 16  ;;  %v3306_v36 = vshrl.u32 %v10886_v27, 16 }
 0x2b0   : > { %v3288_v58 = vadd.s32 %v3287_v21, %v3277_v5  ;;  %v3307_v12 = vshll.u32 %v10888_v42, 16  ;;  %v3308_v40 = vshrl.u32 %v10888_v42, 16  ;;  %vm3973_vm12 = vcmp.ne.s32.totalorder %v3263_v52, 0 }
 0x2b1   : > { %vm4009_vm10 = vcmp.lt.s32.totalorder %v3263_v52, 0  ;;  %v4081_v56 = vadd.s32 18, %v3263_v52  ;;  %v10904_v32 = vsel %vm4514_vm6, %v4536_v16, %v4538_v45  ;;  %v4648_v10 = vsel %vm4623_vm14, %v4645_v60, %v4647_v48 }
 0x2b2   : > { %vm4045_vm4 = vmand %vm4009_vm10, %vm3973_vm12  ;;  %v3289_v5 = vadd.s32 %v3288_v58, %v3279_v25  ;;  %v2242_v61 = vadd.f32 %v2160_v50, %v10150_v63  ;;  %vm3309_vm11 = vc.u32 %v3301_v57, %v3305_v22  ;;  %v3311_v37 = vadd.s32 %v3305_v22, %v3301_v57  ;;  %v2603_v57 = vld [vmem:[%s9318_s23 + $0x116] sm:$0xff] }
 0x2b3   : > { %v10912_v9 = vsel %vm4045_vm4, %v4081_v56, %v3263_v52  ;;  %v3310_v3 = vsel %vm3309_vm11, 1, %v13357_v55  ;;  %v3327_v16 = vand.u32 65535, %v10892_v26  ;;  %8817 = vmatmul.msk.f32.gmra.mxu2 %vm247_vm1, %v1987_v62 }
 0x2b4   : > { %vm13264_vm7 = vcmp.lt.s32.totalorder %v10912_v9, 16  ;;  %vm4743_vm12 = vcmp.eq.s32.totalorder %v10912_v9, 16  ;;  %vm4779_vm10 = vcmp.eq.s32.totalorder %v10912_v9, 17  ;;  %v3290_v60 = vshrl.u32 %v3289_v5, 4  ;;  %8854 = vmatmul.msk.f32.gmra.mxu3 %vm247_vm1, %v2295_v39  ;;  %8891 = vmatmul.msk.f32.gmra.mxu0 %vm247_vm1, %v2603_v57 }
 0x2b5   : > { %v4261_v63 = vsel %vm13264_vm7, %v10848_v29, 0.0  ;;  %v4887_v25 = vsel %vm4779_vm10, %v4648_v10, %v10848_v29  ;;  %v2550_v27 = vadd.f32 %v2468_v43, %v2242_v61  ;;  %v3312_v21 = vadd.s32 %v3310_v3, %v3304_v49 }
 0x2b6   : > { %v4307_v52 = vsel %vm247_vm1, %v4261_v63, 0.0  ;;  %v4375_v22 = vmul.f32 %v4261_v63, %v4261_v63  ;;  %v3291_v58 = vmul.u32 18, %v3290_v60  ;;  %v4995_v50 = vsel %vm4743_vm12, %v10866_v38, %v4887_v25  ;;  %v2163_v38 = vpop.f32.mrf.mxu2  ;;  %v1988_v60 = vld [vmem:[%s9318_s23 + $0x11c] sm:$0xff] }
 0x2b7   : > { %v4308_v56 = vadd.f32 %v4307_v52, %v10845_v54  ;;  %5031 = vst.msk [vmem:[#allocation2 + $0x6b] sm:$0xff] %vm247_vm1, %v4995_v50  ;;  %v10931_v29 = vadd.f32 %v2776_v35, %v2550_v27  ;;  %vm3313_vm4 = vc.u32 %v3311_v37, %v3307_v12  ;;  %v3328_v49 = vshrl.u32 %v10892_v26, 16  ;;  %v2471_v12 = vpop.f32.mrf.mxu3  ;;  %v2296_v63 = vld [vmem:[%s9318_s23 + $0x11d] sm:$0xff]  ;;  %v2779_v27 = vpop.f32.mrf.mxu0 }
 0x2b8   : > { %v4421_v43 = vsel %vm247_vm1, %v4375_v22, 0.0  ;;  %v3292_v5 = vsub.s32 %v10716_v14, %v3291_v58  ;;  %v3314_v10 = vsel %vm3313_vm4, 1, %v13357_v55  ;;  %v3330_v61 = vmul.u32 14564, %v3327_v16 }
 0x2b9   : > { %v4422_v62 = vadd.f32 %v4421_v43, %v10859_v41  ;;  %v3316_v54 = vadd.s32 %v3314_v10, %v3312_v21  ;;  %v4540_v39 = vrot.slane %v10931_v29, 6  ;;  %v4649_v35 = vrot.slane %v10931_v29, 2 }
 0x2ba   : > { %vm3974_vm11 = vcmp.ne.s32.totalorder %v3292_v5, 0  ;;  %vm4010_vm12 = vcmp.lt.s32.totalorder %v3292_v5, 0  ;;  %v4082_v3 = vadd.s32 18, %v3292_v5  ;;  %v2243_v37 = vadd.f32 %v2163_v38, %v10154_v24 }
 0x2bb   : > { %vm4046_vm10 = vmand %vm4010_vm12, %vm3974_vm11  ;;  %v3317_v14 = vadd.s32 %v3316_v54, %v3306_v36  ;;  %v10946_v25 = vsel %vm4514_vm6, %v4538_v45, %v4540_v39  ;;  %v4650_v41 = vsel %vm4623_vm14, %v4647_v48, %v4649_v35  ;;  %v3331_v21 = vmul.u32 58254, %v3327_v16  ;;  %8818 = vmatmul.msk.f32.gmra.mxu2 %vm247_vm1, %v1988_v60 }
 0x2bc   : > { %v10951_v57 = vsel %vm4046_vm10, %v4082_v3, %v3292_v5  ;;  %v2551_v52 = vadd.f32 %v2471_v12, %v2243_v37  ;;  %v10953_v22 = vmul.u32 14564, %v3328_v49  ;;  %v3333_v24 = vmul.u32 58254, %v3328_v49  ;;  %8855 = vmatmul.msk.f32.gmra.mxu3 %vm247_vm1, %v2296_v63  ;;  %v2604_v37 = vld [vmem:[%s9318_s23 + $0x11e] sm:$0xff] }
 0x2bd   : > { %vm13262_vm4 = vcmp.lt.s32.totalorder %v10951_v57, 16  ;;  %vm4744_vm11 = vcmp.eq.s32.totalorder %v10951_v57, 16  ;;  %vm4780_vm12 = vcmp.eq.s32.totalorder %v10951_v57, 17  ;;  %v3318_v45 = vadd.s32 %v3317_v14, %v3308_v40  ;;  %v1989_v14 = vld [vmem:[%s9318_s23 + $0x124] sm:$0xff]  ;;  %8892 = vmatmul.msk.f32.gmra.mxu0 %vm247_vm1, %v2604_v37 }
 0x2be   : > { %v4262_v48 = vsel %vm13262_vm4, %v10881_v17, 0.0  ;;  %v4888_v36 = vsel %vm4780_vm12, %v4650_v41, %v10881_v17  ;;  %v10966_v16 = vadd.f32 %v2779_v27, %v2551_v52  ;;  %v3334_v58 = vshll.u32 %v3331_v21, 16  ;;  %v2166_v38 = vpop.f32.mrf.mxu2  ;;  %v2297_v41 = vld [vmem:[%s9318_s23 + $0x125] sm:$0xff] }
 0x2bf   : > { %v4309_v50 = vsel %vm247_vm1, %v4262_v48, 0.0  ;;  %v4376_v49 = vmul.f32 %v4262_v48, %v4262_v48  ;;  %v3319_v43 = vshrl.u32 %v3318_v45, 4  ;;  %v4996_v42 = vsel %vm4744_vm11, %v10904_v32, %v4888_v36 }
 0x2c0   : > { %v4310_v40 = vadd.f32 %v4309_v50, %v4308_v56  ;;  %5032 = vst.msk [vmem:[#allocation2 + $0x73] sm:$0xff] %vm247_vm1, %v4996_v42  ;;  %v3335_v5 = vshrl.u32 %v3331_v21, 16  ;;  %v3336_v10 = vshll.u32 %v10953_v22, 16  ;;  %v3337_v17 = vshrl.u32 %v10953_v22, 16  ;;  %v2474_v22 = vpop.f32.mrf.mxu3 }
 0x2c1   : > { %v4423_v54 = vsel %vm247_vm1, %v4376_v49, 0.0  ;;  %v3320_v12 = vmul.u32 18, %v3319_v43  ;;  %vm3338_vm10 = vc.u32 %v3330_v61, %v3334_v58  ;;  %v3340_v3 = vadd.s32 %v3334_v58, %v3330_v61 }
 0x2c2   : > { %v4424_v60 = vadd.f32 %v4423_v54, %v4422_v62  ;;  %v3339_v32 = vsel %vm3338_vm10, 1, %v13357_v55  ;;  %v4542_v56 = vrot.slane %v10966_v16, 6  ;;  %v4651_v63 = vrot.slane %v10966_v16, 2 }
 0x2c3   : > { %v3321_v27 = vsub.s32 %v10754_v2, %v3320_v12  ;;  %v3341_v21 = vadd.s32 %v3339_v32, %v3333_v24  ;;  %vm3342_vm11 = vc.u32 %v3340_v3, %v3336_v10  ;;  %v2244_v52 = vadd.f32 %v2166_v38, %v10161_v46  ;;  %v2782_v46 = vpop.f32.mrf.mxu0  ;;  %8819 = vmatmul.msk.f32.gmra.mxu2 %vm247_vm1, %v1989_v14 }
 0x2c4   : > { %v3343_v61 = vsel %vm3342_vm11, 1, %v13357_v55  ;;  %v10987_v62 = vsel %vm4514_vm6, %v4540_v39, %v4542_v56  ;;  %v4652_v45 = vsel %vm4623_vm14, %v4649_v35, %v4651_v63  ;;  %v10993_v48 = vadd.s32 120, %v10082_v1  ;;  %8856 = vmatmul.msk.f32.gmra.mxu3 %vm247_vm1, %v2297_v41 }
 0x2c5   : > { %vm3975_vm12 = vcmp.ne.s32.totalorder %v3321_v27, 0  ;;  %vm4011_vm10 = vcmp.lt.s32.totalorder %v3321_v27, 0  ;;  %v4083_v2 = vadd.s32 18, %v3321_v27  ;;  %v3345_v24 = vadd.s32 %v3343_v61, %v3341_v21 }
 0x2c6   : > { %vm4047_vm11 = vmand %vm4011_vm10, %vm3975_vm12  ;;  %v2552_v36 = vadd.f32 %v2474_v22, %v2244_v52  ;;  %v3356_v39 = vand.u32 65535, %v10993_v48  ;;  %v3357_v58 = vshrl.u32 %v10993_v48, 16  ;;  %v11000_v35 = vadd.s32 128, %v10082_v1  ;;  %v2169_v38 = vpop.f32.mrf.mxu2 }
 0x2c7   : > { %v11002_v50 = vsel %vm4047_vm11, %v4083_v2, %v3321_v27  ;;  %v3346_v49 = vadd.s32 %v3345_v24, %v3335_v5  ;;  %v11005_v43 = vadd.s32 136, %v10082_v1  ;;  %v11008_v42 = vadd.s32 144, %v10082_v1  ;;  %v1990_v27 = vld [vmem:[%s9318_s23 + $0x12c] sm:$0xff] }
 0x2c8   : > { %vm13263_vm12 = vcmp.lt.s32.totalorder %v11002_v50, 16  ;;  %vm4745_vm10 = vcmp.eq.s32.totalorder %v11002_v50, 16  ;;  %vm4781_vm4 = vcmp.eq.s32.totalorder %v11002_v50, 17  ;;  %v11013_v10 = vadd.f32 %v2782_v46, %v2552_v36  ;;  %v2298_v2 = vld [vmem:[%s9318_s23 + $0x12d] sm:$0xff] }
 0x2c9   : > { %v4263_v5 = vsel %vm13263_vm12, %v10931_v29, 0.0  ;;  %v3347_v54 = vadd.s32 %v3346_v49, %v3337_v17  ;;  %v4889_v12 = vsel %vm4781_vm4, %v4652_v45, %v10931_v29  ;;  %v3359_v3 = vmul.u32 14564, %v3356_v39  ;;  %v2605_v24 = vld [vmem:[%s9318_s23 + $0x126] sm:$0xff] }
 0x2ca   : > { %v4311_v37 = vsel %vm247_vm1, %v4263_v5, 0.0  ;;  %v4377_v32 = vmul.f32 %v4263_v5, %v4263_v5  ;;  %v4997_v14 = vsel %vm4745_vm10, %v10946_v25, %v4889_v12  ;;  %v3360_v41 = vmul.u32 58254, %v3356_v39  ;;  %8893 = vmatmul.msk.f32.gmra.mxu0 %vm247_vm1, %v2605_v24 }
 0x2cb   : > { %v4312_v21 = vadd.f32 %v4311_v37, %v4310_v40  ;;  %v3348_v52 = vshrl.u32 %v3347_v54, 4  ;;  %5033 = vst.msk [vmem:[#allocation2 + $0x7b] sm:$0xff] %vm247_vm1, %v4997_v14  ;;  %v3361_v22 = vmul.u32 14564, %v3357_v58  ;;  %v3362_v61 = vmul.u32 58254, %v3357_v58  ;;  %v2477_v40 = vpop.f32.mrf.mxu3  ;;  %8820 = vmatmul.msk.f32.gmra.mxu2 %vm247_vm1, %v1990_v27 }
 0x2cc   : > { %v4425_v17 = vsel %vm247_vm1, %v4377_v32, 0.0  ;;  %v3363_v46 = vshll.u32 %v3360_v41, 16  ;;  %v3364_v29 = vshrl.u32 %v3360_v41, 16  ;;  %v4544_v45 = vrot.slane %v11013_v10, 6  ;;  %8857 = vmatmul.msk.f32.gmra.mxu3 %vm247_vm1, %v2298_v2  ;;  %v2785_v32 = vpop.f32.mrf.mxu0 }
 0x2cd   : > { %v4426_v36 = vadd.f32 %v4425_v17, %v4424_v60  ;;  %v3349_v25 = vmul.u32 18, %v3348_v52  ;;  %v3365_v39 = vshll.u32 %v3361_v22, 16  ;;  %v3366_v49 = vshrl.u32 %v3361_v22, 16 }
 0x2ce   : > { %vm3367_vm4 = vc.u32 %v3359_v3, %v3363_v46  ;;  %v3369_v58 = vadd.s32 %v3363_v46, %v3359_v3  ;;  %v11035_v5 = vsel %vm4514_vm6, %v4542_v56, %v4544_v45  ;;  %v4653_v54 = vrot.slane %v11013_v10, 2  ;;  %v2172_v27 = vpop.f32.mrf.mxu2 }
 0x2cf   : > { %v3350_v60 = vsub.s32 %v10892_v26, %v3349_v25  ;;  %v3368_v12 = vsel %vm3367_vm4, 1, %v13357_v55  ;;  %v2245_v37 = vadd.f32 %v2169_v38, %v10165_v53  ;;  %v3385_v14 = vand.u32 65535, %v11000_v35 }
 0x2d0   : > { %v3370_v41 = vadd.s32 %v3368_v12, %v3362_v61  ;;  %vm3371_vm11 = vc.u32 %v3369_v58, %v3365_v39  ;;  %v4654_v56 = vsel %vm4623_vm14, %v4651_v63, %v4653_v54  ;;  %v3386_v3 = vshrl.u32 %v11000_v35, 16 }
 0x2d1   : > { %vm3976_vm10 = vcmp.ne.s32.totalorder %v3350_v60, 0  ;;  %vm4012_vm12 = vcmp.lt.s32.totalorder %v3350_v60, 0  ;;  %v4084_v26 = vadd.s32 18, %v3350_v60  ;;  %v3372_v52 = vsel %vm3371_vm11, 1, %v13357_v55 }
 0x2d2   : > { %vm4048_vm4 = vmand %vm4012_vm12, %vm3976_vm10  ;;  %v3374_v53 = vadd.s32 %v3372_v52, %v3370_v41  ;;  %v2553_v38 = vadd.f32 %v2477_v40, %v2245_v37  ;;  %v3388_v22 = vmul.u32 14564, %v3385_v14  ;;  %v3389_v61 = vmul.u32 58254, %v3385_v14 }
 0x2d3   : > { %v11049_v2 = vsel %vm4048_vm4, %v4084_v26, %v3350_v60  ;;  %v11051_v24 = vmul.u32 14564, %v3386_v3  ;;  %v3391_v17 = vmul.u32 58254, %v3386_v3  ;;  %v2246_v63 = vadd.f32 %v2172_v27, %v10175_v8  ;;  %v1991_v60 = vld [vmem:[%s9318_s23 + $0x134] sm:$0xff] }
 0x2d4   : > { %vm13270_vm7 = vcmp.lt.s32.totalorder %v11049_v2, 16  ;;  %vm4746_vm15 = vcmp.eq.s32.totalorder %v11049_v2, 16  ;;  %vm4782_vm8 = vcmp.eq.s32.totalorder %v11049_v2, 17  ;;  %v3375_v46 = vadd.s32 %v3374_v53, %v3364_v29  ;;  %8821 = vmatmul.msk.f32.gmra.mxu2 %vm247_vm1, %v1991_v60  ;;  %v2299_v3 = vld [vmem:[%s9318_s23 + $0x135] sm:$0xff] }
 0x2d5   : > { %v4264_v25 = vsel %vm13270_vm7, %v10966_v16, 0.0  ;;  %v4890_v39 = vsel %vm4782_vm8, %v4654_v56, %v10966_v16  ;;  %v11061_v40 = vadd.f32 %v2785_v32, %v2553_v38  ;;  %v3392_v58 = vshll.u32 %v3389_v61, 16  ;;  %v2480_v56 = vpop.f32.mrf.mxu3  ;;  %v2606_v27 = vld [vmem:[%s9318_s23 + $0x12e] sm:$0xff]  ;;  %8858 = vmatmul.msk.f32.gmra.mxu3 %vm247_vm1, %v2299_v3 }
 0x2d6   : > { %v4313_v8 = vsel %vm247_vm1, %v4264_v25, 0.0  ;;  %v4378_v12 = vmul.f32 %v4264_v25, %v4264_v25  ;;  %v3376_v37 = vadd.s32 %v3375_v46, %v3366_v49  ;;  %v4998_v14 = vsel %vm4746_vm15, %v10987_v62, %v4890_v39  ;;  %8894 = vmatmul.msk.f32.gmra.mxu0 %vm247_vm1, %v2606_v27  ;;  %v2175_v60 = vpop.f32.mrf.mxu2 }
 0x2d7   : > { %v11067_v29 = vadd.f32 %v4313_v8, %v4312_v21  ;;  %5034 = vst.msk [vmem:[#allocation2 + $0x83] sm:$0xff] %vm247_vm1, %v4998_v14  ;;  %v3393_v41 = vshrl.u32 %v3389_v61, 16  ;;  %v3394_v16 = vshll.u32 %v11051_v24, 16  ;;  %v3395_v32 = vshrl.u32 %v11051_v24, 16  ;;  %v2788_v61 = vpop.f32.mrf.mxu0  ;;  %v5058_v24 = vld [vmem:[#allocation2 + $0x24] sm:$0xff] }
 0x2d8   : > { %v4427_v26 = vsel %vm247_vm1, %v4378_v12, 0.0  ;;  %v3377_v52 = vshrl.u32 %v3376_v37, 4  ;;  %vm3396_vm8 = vc.u32 %v3388_v22, %v3392_v58  ;;  %v3398_v49 = vadd.s32 %v3392_v58, %v3388_v22  ;;  %5061 = vst.msk [vmem:[#allocation2] sm:$0xff] %vm247_vm1, %v5058_v24 }
 0x2d9   : > { %v11077_v62 = vadd.f32 %v4427_v26, %v4426_v36  ;;  %v3397_v21 = vsel %vm3396_vm8, 1, %v13357_v55  ;;  %v4546_v53 = vrot.slane %v11061_v40, 6  ;;  %v4655_v38 = vrot.slane %v11061_v40, 2 }
 0x2da   : > { %v3378_v46 = vmul.u32 18, %v3377_v52  ;;  %v3399_v25 = vadd.s32 %v3397_v21, %v3391_v17  ;;  %vm3400_vm15 = vc.u32 %v3398_v49, %v3394_v16  ;;  %v2554_v39 = vadd.f32 %v2480_v56, %v2246_v63  ;;  %v1992_v49 = vld [vmem:[%s9318_s23 + $0x13c] sm:$0xff] }
 0x2db   : > { %v3401_v22 = vsel %vm3400_vm15, 1, %v13357_v55  ;;  %v11087_v36 = vsel %vm4514_vm6, %v4544_v45, %v4546_v53  ;;  %v4656_v58 = vsel %vm4623_vm14, %v4653_v54, %v4655_v38  ;;  %v3414_v8 = vand.u32 65535, %v11005_v43 }
 0x2dc   : > { %v3379_v17 = vsub.s32 %v10993_v48, %v3378_v46  ;;  %v3403_v12 = vadd.s32 %v3401_v22, %v3399_v25  ;;  %v11094_v63 = vadd.f32 %v2788_v61, %v2554_v39  ;;  %v3415_v37 = vshrl.u32 %v11005_v43, 16  ;;  %8822 = vmatmul.msk.f32.gmra.mxu2 %vm247_vm1, %v1992_v49  ;;  %v2300_v46 = vld [vmem:[%s9318_s23 + $0x13d] sm:$0xff] }
 0x2dd   : > { %v3417_v14 = vmul.u32 14564, %v3414_v8  ;;  %v11097_v16 = vmul.u32 58254, %v3414_v8  ;;  %v2247_v45 = vadd.f32 %v2175_v60, %v10184_v30  ;;  %v3443_v56 = vand.u32 65535, %v11008_v42  ;;  %v2607_v25 = vld [vmem:[%s9318_s23 + $0x136] sm:$0xff]  ;;  %v2483_v8 = vpop.f32.mrf.mxu3  ;;  %8859 = vmatmul.msk.f32.gmra.mxu3 %vm247_vm1, %v2300_v46 }
 0x2de   : > { %vm3977_vm12 = vcmp.ne.s32.totalorder %v3379_v17, 0  ;;  %vm4013_vm11 = vcmp.lt.s32.totalorder %v3379_v17, 0  ;;  %v4085_v54 = vadd.s32 18, %v3379_v17  ;;  %v3404_v3 = vadd.s32 %v3403_v12, %v3393_v41  ;;  %8895 = vmatmul.msk.f32.gmra.mxu0 %vm247_vm1, %v2607_v25 }
 0x2df   : > { %vm4049_vm10 = vmand %vm4013_vm11, %vm3977_vm12  ;;  %v11101_v48 = vmul.u32 14564, %v3415_v37  ;;  %v3420_v27 = vmul.u32 58254, %v3415_v37  ;;  %v3421_v26 = vshll.u32 %v11097_v16, 16  ;;  %v3422_v52 = vshrl.u32 %v11097_v16, 16 }
 0x2e0   : > { %v11106_v21 = vsel %vm4049_vm10, %v4085_v54, %v3379_v17  ;;  %v3405_v30 = vadd.s32 %v3404_v3, %v3395_v32  ;;  %v4548_v61 = vrot.slane %v11094_v63, 6  ;;  %v4657_v24 = vrot.slane %v11094_v63, 2 }
 0x2e1   : > { %vm13267_vm4 = vcmp.lt.s32.totalorder %v11106_v21, 16  ;;  %vm4747_vm8 = vcmp.eq.s32.totalorder %v11106_v21, 16  ;;  %vm4783_vm15 = vcmp.eq.s32.totalorder %v11106_v21, 17  ;;  %v3423_v41 = vshll.u32 %v11101_v48, 16 }
 0x2e2   : > { %v4265_v32 = vsel %vm13267_vm4, %v11013_v10, 0.0  ;;  %v3406_v39 = vshrl.u32 %v3405_v30, 4  ;;  %v4891_v60 = vsel %vm4783_vm15, %v4656_v58, %v11013_v10  ;;  %v3424_v22 = vshrl.u32 %v11101_v48, 16  ;;  %v2791_v30 = vpop.f32.mrf.mxu0 }
 0x2e3   : > { %v4315_v17 = vsel %vm247_vm1, %v4265_v32, 0.0  ;;  %v4379_v12 = vmul.f32 %v4265_v32, %v4265_v32  ;;  %v4999_v37 = vsel %vm4747_vm8, %v11035_v5, %v4891_v60  ;;  %vm3425_vm12 = vc.u32 %v3417_v14, %v3421_v26 }
 0x2e4   : > { %v4316_v16 = vadd.f32 %v4315_v17, %v11067_v29  ;;  %v3407_v54 = vmul.u32 18, %v3406_v39  ;;  %5035 = vst.msk [vmem:[#allocation2 + $0x8b] sm:$0xff] %vm247_vm1, %v4999_v37  ;;  %v3426_v10 = vsel %vm3425_vm12, 1, %v13357_v55  ;;  %v3427_v58 = vadd.s32 %v3421_v26, %v3417_v14  ;;  %v2178_v14 = vpop.f32.mrf.mxu2 }
 0x2e5   : > { %v4429_v3 = vsel %vm247_vm1, %v4379_v12, 0.0  ;;  %v3428_v48 = vadd.s32 %v3426_v10, %v3420_v27  ;;  %v11133_v49 = vsel %vm4514_vm6, %v4546_v53, %v4548_v61  ;;  %v4658_v5 = vsel %vm4623_vm14, %v4655_v38, %v4657_v24 }
 0x2e6   : > { %v4430_v29 = vadd.f32 %v4429_v3, %v11077_v62  ;;  %v3408_v46 = vsub.s32 %v11000_v35, %v3407_v54  ;;  %vm3429_vm11 = vc.u32 %v3427_v58, %v3423_v41  ;;  %v2555_v25 = vadd.f32 %v2483_v8, %v2247_v45 }
 0x2e7   : > { %v3430_v26 = vsel %vm3429_vm11, 1, %v13357_v55  ;;  %v3444_v27 = vshrl.u32 %v11008_v42, 16  ;;  %v3446_v32 = vmul.u32 14564, %v3443_v56  ;;  %v3447_v39 = vmul.u32 58254, %v3443_v56 }
 0x2e8   : > { %vm3978_vm10 = vcmp.ne.s32.totalorder %v3408_v46, 0  ;;  %vm4014_vm8 = vcmp.lt.s32.totalorder %v3408_v46, 0  ;;  %v4086_v53 = vadd.s32 18, %v3408_v46  ;;  %v3432_v60 = vadd.s32 %v3430_v26, %v3428_v48  ;;  %v2608_v26 = vld [vmem:[%s9318_s23 + $0x13e] sm:$0xff] }
 0x2e9   : > { %vm4050_vm15 = vmand %vm4014_vm8, %vm3978_vm10  ;;  %v11142_v38 = vadd.f32 %v2791_v30, %v2555_v25  ;;  %v3448_v17 = vmul.u32 14564, %v3444_v27  ;;  %v3449_v62 = vmul.u32 58254, %v3444_v27  ;;  %v3450_v12 = vshll.u32 %v3447_v39, 16  ;;  %8896 = vmatmul.msk.f32.gmra.mxu0 %vm247_vm1, %v2608_v26 }
 0x2ea   : > { %v11144_v35 = vsel %vm4050_vm15, %v4086_v53, %v3408_v46  ;;  %v3433_v45 = vadd.s32 %v3432_v60, %v3422_v52  ;;  %v3451_v41 = vshrl.u32 %v3447_v39, 16  ;;  %v2248_v8 = vadd.f32 %v2178_v14, %v10188_v6  ;;  %v2486_v52 = vpop.f32.mrf.mxu3  ;;  %v2794_v39 = vpop.f32.mrf.mxu0 }
 0x2eb   : > { %vm13268_vm12 = vcmp.lt.s32.totalorder %v11144_v35, 16  ;;  %vm4748_vm11 = vcmp.eq.s32.totalorder %v11144_v35, 16  ;;  %vm4784_vm4 = vcmp.eq.s32.totalorder %v11144_v35, 17  ;;  %v3452_v56 = vshll.u32 %v3448_v17, 16 }
 0x2ec   : > { %v4266_v37 = vsel %vm13268_vm12, %v11061_v40, 0.0  ;;  %v3434_v54 = vadd.s32 %v3433_v45, %v3424_v22  ;;  %v4892_v10 = vsel %vm4784_vm4, %v4658_v5, %v11061_v40  ;;  %v3453_v58 = vshrl.u32 %v3448_v17, 16  ;;  %v2181_v60 = vpop.f32.mrf.mxu2 }
 0x2ed   : > { %v4317_v3 = vsel %vm247_vm1, %v4266_v37, 0.0  ;;  %v4380_v6 = vmul.f32 %v4266_v37, %v4266_v37  ;;  %v5000_v48 = vsel %vm4748_vm11, %v11087_v36, %v4892_v10  ;;  %vm3454_vm10 = vc.u32 %v3446_v32, %v3450_v12 }
 0x2ee   : > { %v4318_v30 = vadd.f32 %v4317_v3, %v4316_v16  ;;  %v3435_v46 = vshrl.u32 %v3434_v54, 4  ;;  %5036 = vst.msk [vmem:[#allocation2 + $0x93] sm:$0xff] %vm247_vm1, %v5000_v48  ;;  %v3455_v25 = vsel %vm3454_vm10, 1, %v13357_v55  ;;  %v3456_v14 = vadd.s32 %v3450_v12, %v3446_v32 }
 0x2ef   : > { %v4431_v22 = vsel %vm247_vm1, %v4380_v6, 0.0  ;;  %v3457_v27 = vadd.s32 %v3455_v25, %v3449_v62  ;;  %v4550_v40 = vrot.slane %v11142_v38, 6  ;;  %v4659_v5 = vrot.slane %v11142_v38, 2 }
 0x2f0   : > { %v4432_v36 = vadd.f32 %v4431_v22, %v4430_v29  ;;  %v3436_v53 = vmul.u32 18, %v3435_v46  ;;  %vm3458_vm4 = vc.u32 %v3456_v14, %v3452_v56  ;;  %v2556_v16 = vadd.f32 %v2486_v52, %v2248_v8 }
 0x2f1   : > { %v3459_v17 = vsel %vm3458_vm4, 1, %v13357_v55  ;;  %v11167_v32 = vsel %vm4514_vm6, %v4548_v61, %v4550_v40  ;;  %v4660_v62 = vsel %vm4623_vm14, %v4657_v24, %v4659_v5  ;;  %v11173_v12 = vadd.s32 152, %v10082_v1 }
 0x2f2   : > { %v3437_v29 = vsub.s32 %v11005_v43, %v3436_v53  ;;  %v3461_v45 = vadd.s32 %v3459_v17, %v3457_v27  ;;  %v11176_v56 = vadd.f32 %v2794_v39, %v2556_v16  ;;  %v2249_v8 = vadd.f32 %v2181_v60, %v10192_v0  ;;  %v2489_v26 = vpop.f32.mrf.mxu3 }
 0x2f3   : > { %v3472_v37 = vand.u32 65535, %v11173_v12  ;;  %v3473_v54 = vshrl.u32 %v11173_v12, 16  ;;  %v11182_v61 = vadd.s32 160, %v10082_v1  ;;  %v11185_v10 = vadd.s32 168, %v10082_v1 }
 0x2f4   : > { %vm3979_vm8 = vcmp.ne.s32.totalorder %v3437_v29, 0  ;;  %vm4015_vm15 = vcmp.lt.s32.totalorder %v3437_v29, 0  ;;  %v4087_v24 = vadd.s32 18, %v3437_v29  ;;  %v3462_v52 = vadd.s32 %v3461_v45, %v3451_v41 }
 0x2f5   : > { %vm4051_vm11 = vmand %vm4015_vm15, %vm3979_vm8  ;;  %v3475_v43 = vmul.u32 14564, %v3472_v37  ;;  %v3476_v3 = vmul.u32 58254, %v3472_v37  ;;  %v11187_v6 = vmul.u32 14564, %v3473_v54  ;;  %v3478_v0 = vmul.u32 58254, %v3473_v54 }
 0x2f6   : > { %v11189_v48 = vsel %vm4051_vm11, %v4087_v24, %v3437_v29  ;;  %v3463_v46 = vadd.s32 %v3462_v52, %v3453_v58  ;;  %v4552_v25 = vrot.slane %v11176_v56, 6  ;;  %v4661_v14 = vrot.slane %v11176_v56, 2 }
 0x2f7   : > { %vm13269_vm10 = vcmp.lt.s32.totalorder %v11189_v48, 16  ;;  %vm4749_vm4 = vcmp.eq.s32.totalorder %v11189_v48, 16  ;;  %vm4785_vm12 = vcmp.eq.s32.totalorder %v11189_v48, 17  ;;  %v3479_v41 = vshll.u32 %v3476_v3, 16 }
 0x2f8   : > { %v4267_v22 = vsel %vm13269_vm10, %v11094_v63, 0.0  ;;  %v3464_v27 = vshrl.u32 %v3463_v46, 4  ;;  %v4893_v39 = vsel %vm4785_vm12, %v4660_v62, %v11094_v63  ;;  %v3480_v58 = vshrl.u32 %v3476_v3, 16 }
 0x2f9   : > { %v4319_v53 = vsel %vm247_vm1, %v4267_v22, 0.0  ;;  %v4381_v16 = vmul.f32 %v4267_v22, %v4267_v22  ;;  %v5001_v60 = vsel %vm4749_vm4, %v11133_v49, %v4893_v39  ;;  %v3481_v17 = vshll.u32 %v11187_v6, 16 }
 0x2fa   : > { %v4320_v29 = vadd.f32 %v4319_v53, %v4318_v30  ;;  %v3465_v45 = vmul.u32 18, %v3464_v27  ;;  %5037 = vst.msk [vmem:[#allocation2 + $0x9b] sm:$0xff] %vm247_vm1, %v5001_v60  ;;  %v3482_v37 = vshrl.u32 %v11187_v6, 16  ;;  %vm3483_vm8 = vc.u32 %v3475_v43, %v3479_v41  ;;  %v2797_v6 = vpop.f32.mrf.mxu0 }
 0x2fb   : > { %v4433_v54 = vsel %vm247_vm1, %v4381_v16, 0.0  ;;  %v3484_v24 = vsel %vm3483_vm8, 1, %v13357_v55  ;;  %v3485_v63 = vadd.s32 %v3479_v41, %v3475_v43  ;;  %v11210_v62 = vsel %vm4514_vm6, %v4550_v40, %v4552_v25  ;;  %v2184_v41 = vpop.f32.mrf.mxu2  ;;  %v2492_v16 = vpop.f32.mrf.mxu3 }
 0x2fc   : > { %v4434_v49 = vadd.f32 %v4433_v54, %v4432_v36  ;;  %v3466_v52 = vsub.s32 %v11008_v42, %v3465_v45  ;;  %v3486_v30 = vadd.s32 %v3484_v24, %v3478_v0  ;;  %v4662_v3 = vsel %vm4623_vm14, %v4659_v5, %v4661_v14 }
 0x2fd   : > { %vm3487_vm12 = vc.u32 %v3485_v63, %v3481_v17  ;;  %v2557_v46 = vadd.f32 %v2489_v26, %v2249_v8  ;;  %v3501_v22 = vand.u32 65535, %v11182_v61  ;;  %v3502_v43 = vshrl.u32 %v11182_v61, 16 }
 0x2fe   : > { %vm3980_vm15 = vcmp.ne.s32.totalorder %v3466_v52, 0  ;;  %vm4016_vm11 = vcmp.lt.s32.totalorder %v3466_v52, 0  ;;  %v4088_v40 = vadd.s32 18, %v3466_v52  ;;  %v3488_v36 = vsel %vm3487_vm12, 1, %v13357_v55 }
 0x2ff   : > { %vm4052_vm4 = vmand %vm4016_vm11, %vm3980_vm15  ;;  %v3490_v42 = vadd.s32 %v3488_v36, %v3486_v30  ;;  %v11219_v0 = vadd.f32 %v2797_v6, %v2557_v46  ;;  %v3504_v27 = vmul.u32 14564, %v3501_v22  ;;  %v3505_v39 = vmul.u32 58254, %v3501_v22 }
 0x300   : > { %v11221_v5 = vsel %vm4052_vm4, %v4088_v40, %v3466_v52  ;;  %v3506_v53 = vmul.u32 14564, %v3502_v43  ;;  %v3507_v8 = vmul.u32 58254, %v3502_v43  ;;  %v2250_v26 = vadd.f32 %v2184_v41, %v10203_v28 }
 0x301   : > { %vm13273_vm8 = vcmp.lt.s32.totalorder %v11221_v5, 16  ;;  %vm4750_vm10 = vcmp.eq.s32.totalorder %v11221_v5, 16  ;;  %vm4786_vm7 = vcmp.eq.s32.totalorder %v11221_v5, 17  ;;  %v3491_v60 = vadd.s32 %v3490_v42, %v3480_v58 }
 0x302   : > { %v4268_v17 = vsel %vm13273_vm8, %v11142_v38, 0.0  ;;  %v4894_v45 = vsel %vm4786_vm7, %v4662_v3, %v11142_v38  ;;  %v3508_v54 = vshll.u32 %v3505_v39, 16  ;;  %v3509_v24 = vshrl.u32 %v3505_v39, 16  ;;  %v2800_v42 = vpop.f32.mrf.mxu0 }
 0x303   : > { %v4321_v63 = vsel %vm247_vm1, %v4268_v17, 0.0  ;;  %v4382_v52 = vmul.f32 %v4268_v17, %v4268_v17  ;;  %v3492_v28 = vadd.s32 %v3491_v60, %v3482_v37  ;;  %v5002_v30 = vsel %vm4750_vm10, %v11167_v32, %v4894_v45 }
 0x304   : > { %v4322_v6 = vadd.f32 %v4321_v63, %v4320_v29  ;;  %5038 = vst.msk [vmem:[#allocation2 + $0xa3] sm:$0xff] %vm247_vm1, %v5002_v30  ;;  %v3510_v46 = vshll.u32 %v3506_v53, 16  ;;  %v3511_v22 = vshrl.u32 %v3506_v53, 16  ;;  %vm3512_vm12 = vc.u32 %v3504_v27, %v3508_v54  ;;  %v2187_v53 = vpop.f32.mrf.mxu2 }
 0x305   : > { %v4435_v58 = vsel %vm247_vm1, %v4382_v52, 0.0  ;;  %v3493_v43 = vshrl.u32 %v3492_v28, 4  ;;  %v3513_v41 = vsel %vm3512_vm12, 1, %v13357_v55  ;;  %v3514_v38 = vadd.s32 %v3508_v54, %v3504_v27 }
 0x306   : > { %v4436_v3 = vadd.f32 %v4435_v58, %v4434_v49  ;;  %v3515_v40 = vadd.s32 %v3513_v41, %v3507_v8  ;;  %v4554_v36 = vrot.slane %v11219_v0, 6  ;;  %v4663_v37 = vrot.slane %v11219_v0, 2 }
 0x307   : > { %v3494_v32 = vmul.u32 18, %v3493_v43  ;;  %vm3516_vm7 = vc.u32 %v3514_v38, %v3510_v46  ;;  %v2558_v29 = vadd.f32 %v2492_v16, %v2250_v26  ;;  %v3530_v39 = vand.u32 65535, %v11185_v10 }
 0x308   : > { %v3517_v60 = vsel %vm3516_vm7, 1, %v13357_v55  ;;  %v11243_v17 = vsel %vm4514_vm6, %v4552_v25, %v4554_v36  ;;  %v4664_v49 = vsel %vm4623_vm14, %v4661_v14, %v4663_v37  ;;  %v3531_v27 = vshrl.u32 %v11185_v10, 16  ;;  %v2495_v25 = vpop.f32.mrf.mxu3 }
 0x309   : > { %v3495_v8 = vsub.s32 %v11173_v12, %v3494_v32  ;;  %v3519_v45 = vadd.s32 %v3517_v60, %v3515_v40  ;;  %v11250_v26 = vadd.f32 %v2800_v42, %v2558_v29  ;;  %v3533_v16 = vmul.u32 14564, %v3530_v39 }
 0x30a   : > { %v3534_v54 = vmul.u32 58254, %v3530_v39  ;;  %v11252_v63 = vmul.u32 14564, %v3531_v27  ;;  %v3536_v52 = vmul.u32 58254, %v3531_v27  ;;  %v2251_v28 = vadd.f32 %v2187_v53, %v10207_v19 }
 0x30b   : > { %vm3981_vm10 = vcmp.ne.s32.totalorder %v3495_v8, 0  ;;  %vm4017_vm15 = vcmp.lt.s32.totalorder %v3495_v8, 0  ;;  %v4089_v30 = vadd.s32 18, %v3495_v8  ;;  %v3520_v46 = vadd.s32 %v3519_v45, %v3509_v24 }
 0x30c   : > { %vm4053_vm11 = vmand %vm4017_vm15, %vm3981_vm10  ;;  %v3537_v14 = vshll.u32 %v3534_v54, 16  ;;  %v3538_v58 = vshrl.u32 %v3534_v54, 16  ;;  %v3539_v12 = vshll.u32 %v11252_v63, 16  ;;  %v3540_v43 = vshrl.u32 %v11252_v63, 16  ;;  %v2803_v63 = vpop.f32.mrf.mxu0 }
 0x30d   : > { %v11257_v41 = vsel %vm4053_vm11, %v4089_v30, %v3495_v8  ;;  %v3521_v38 = vadd.s32 %v3520_v46, %v3511_v22  ;;  %v4556_v40 = vrot.slane %v11250_v26, 6  ;;  %v4665_v42 = vrot.slane %v11250_v26, 2 }
 0x30e   : > { %vm13271_vm4 = vcmp.lt.s32.totalorder %v11257_v41, 16  ;;  %vm4751_vm12 = vcmp.eq.s32.totalorder %v11257_v41, 16  ;;  %vm4787_vm7 = vcmp.eq.s32.totalorder %v11257_v41, 17  ;;  %vm3541_vm10 = vc.u32 %v3533_v16, %v3537_v14 }
 0x30f   : > { %v4269_v19 = vsel %vm13271_vm4, %v11176_v56, 0.0  ;;  %v3522_v24 = vshrl.u32 %v3521_v38, 4  ;;  %v4895_v32 = vsel %vm4787_vm7, %v4664_v49, %v11176_v56  ;;  %v3542_v22 = vsel %vm3541_vm10, 1, %v13357_v55 }
 0x310   : > { %v4323_v29 = vsel %vm247_vm1, %v4269_v19, 0.0  ;;  %v4383_v39 = vmul.f32 %v4269_v19, %v4269_v19  ;;  %v5003_v53 = vsel %vm4751_vm12, %v11210_v62, %v4895_v32  ;;  %v3543_v60 = vadd.s32 %v3537_v14, %v3533_v16  ;;  %v2190_v16 = vpop.f32.mrf.mxu2 }
 0x311   : > { %v4324_v27 = vadd.f32 %v4323_v29, %v4322_v6  ;;  %v3523_v8 = vmul.u32 18, %v3522_v24  ;;  %5039 = vst.msk [vmem:[#allocation2 + $0xab] sm:$0xff] %vm247_vm1, %v5003_v53  ;;  %v3544_v45 = vadd.s32 %v3542_v22, %v3536_v52  ;;  %v11275_v54 = vsel %vm4514_vm6, %v4554_v36, %v4556_v40 }
 0x312   : > { %v4437_v56 = vsel %vm247_vm1, %v4383_v39, 0.0  ;;  %vm3545_vm15 = vc.u32 %v3543_v60, %v3539_v12  ;;  %v4666_v49 = vsel %vm4623_vm14, %v4663_v37, %v4665_v42  ;;  %v2559_v62 = vadd.f32 %v2495_v25, %v2251_v28  ;;  %v2498_v12 = vpop.f32.mrf.mxu3 }
 0x313   : > { %v4438_v6 = vadd.f32 %v4437_v56, %v4436_v3  ;;  %v3524_v30 = vsub.s32 %v11182_v61, %v3523_v8  ;;  %v3546_v52 = vsel %vm3545_vm15, 1, %v13357_v55  ;;  %v11284_v46 = vadd.s32 176, %v10082_v1 }
 0x314   : > { %v3548_v36 = vadd.s32 %v3546_v52, %v3544_v45  ;;  %v11286_v14 = vadd.f32 %v2803_v63, %v2559_v62  ;;  %v2252_v38 = vadd.f32 %v2190_v16, %v10213_v47  ;;  %v11290_v19 = vadd.s32 184, %v10082_v1 }
 0x315   : > { %vm3982_vm11 = vcmp.ne.s32.totalorder %v3524_v30, 0  ;;  %vm4018_vm12 = vcmp.lt.s32.totalorder %v3524_v30, 0  ;;  %v4090_v37 = vadd.s32 18, %v3524_v30  ;;  %v3559_v3 = vand.u32 65535, %v11284_v46 }
 0x316   : > { %vm4054_vm7 = vmand %vm4018_vm12, %vm3982_vm11  ;;  %v3549_v61 = vadd.s32 %v3548_v36, %v3538_v58  ;;  %v3560_v28 = vshrl.u32 %v11284_v46, 16  ;;  %v4558_v25 = vrot.slane %v11286_v14, 6  ;;  %v4667_v24 = vrot.slane %v11286_v14, 2  ;;  %v2806_v36 = vpop.f32.mrf.mxu0 }
 0x317   : > { %v11296_v32 = vsel %vm4054_vm7, %v4090_v37, %v3524_v30  ;;  %v3562_v47 = vmul.u32 14564, %v3559_v3  ;;  %v3563_v22 = vmul.u32 58254, %v3559_v3  ;;  %v2560_v29 = vadd.f32 %v2498_v12, %v2252_v38 }
 0x318   : > { %13405 = vst [vmem:[#allocation16_spill] sm:$0xff] %v11296_v32  ;;  %vm13272_vm10 = vcmp.lt.s32.totalorder %v11296_v32, 16  ;;  %vm4752_vm15 = vcmp.eq.s32.totalorder %v11296_v32, 16  ;;  %vm4788_vm4 = vcmp.eq.s32.totalorder %v11296_v32, 17  ;;  %v3550_v39 = vadd.s32 %v3549_v61, %v3540_v43 }
 0x319   : > { %v4270_v58 = vsel %vm13272_vm10, %v11219_v0, 0.0  ;;  %v4896_v53 = vsel %vm4788_vm4, %v4666_v49, %v11219_v0  ;;  %v3564_v60 = vmul.u32 14564, %v3560_v28  ;;  %v3565_v8 = vmul.u32 58254, %v3560_v28  ;;  %v2193_v49 = vpop.f32.mrf.mxu2 }
 0x31a   : > { %v4325_v45 = vsel %vm247_vm1, %v4270_v58, 0.0  ;;  %v4384_v63 = vmul.f32 %v4270_v58, %v4270_v58  ;;  %v3551_v56 = vshrl.u32 %v3550_v39, 4  ;;  %v5004_v62 = vsel %vm4752_vm15, %v11243_v17, %v4896_v53 }
 0x31b   : > { %v4326_v16 = vadd.f32 %v4325_v45, %v4324_v27  ;;  %5040 = vst.msk [vmem:[#allocation2 + $0xb3] sm:$0xff] %vm247_vm1, %v5004_v62  ;;  %v3566_v30 = vshll.u32 %v3563_v22, 16  ;;  %v3567_v52 = vshrl.u32 %v3563_v22, 16  ;;  %v3568_v43 = vshll.u32 %v3564_v60, 16 }
 0x31c   : > { %v4439_v38 = vsel %vm247_vm1, %v4384_v63, 0.0  ;;  %v3552_v12 = vmul.u32 18, %v3551_v56  ;;  %v3569_v37 = vshrl.u32 %v3564_v60, 16  ;;  %v11314_v0 = vsel %vm4514_vm6, %v4556_v40, %v4558_v25 }
 0x31d   : > { %v4440_v17 = vadd.f32 %v4439_v38, %v4438_v6  ;;  %vm3570_vm4 = vc.u32 %v3562_v47, %v3566_v30  ;;  %v3572_v27 = vadd.s32 %v3566_v30, %v3562_v47  ;;  %v4668_v3 = vsel %vm4623_vm14, %v4665_v42, %v4667_v24 }
 0x31e   : > { %v3553_v61 = vsub.s32 %v11185_v10, %v3552_v12  ;;  %v3571_v28 = vsel %vm3570_vm4, 1, %v13357_v55  ;;  %v11323_v22 = vadd.f32 %v2806_v36, %v2560_v29  ;;  %v3588_v39 = vand.u32 65535, %v11290_v19  ;;  %v2501_v29 = vpop.f32.mrf.mxu3 }
 0x31f   : > { %v3573_v40 = vadd.s32 %v3571_v28, %v3565_v8  ;;  %vm3574_vm11 = vc.u32 %v3572_v27, %v3568_v43  ;;  %v3589_v6 = vshrl.u32 %v11290_v19, 16  ;;  %v2253_v47 = vadd.f32 %v2193_v49, %v10217_v33 }
 0x320   : > { %vm3983_vm12 = vcmp.ne.s32.totalorder %v3553_v61, 0  ;;  %vm4019_vm7 = vcmp.lt.s32.totalorder %v3553_v61, 0  ;;  %v4091_v58 = vadd.s32 18, %v3553_v61  ;;  %v3575_v53 = vsel %vm3574_vm11, 1, %v13357_v55 }
 0x321   : > { %vm4055_vm15 = vmand %vm4019_vm7, %vm3983_vm12  ;;  %v3577_v42 = vadd.s32 %v3575_v53, %v3573_v40  ;;  %v3591_v10 = vmul.u32 14564, %v3588_v39  ;;  %v3592_v60 = vmul.u32 58254, %v3588_v39  ;;  %v3593_v45 = vmul.u32 14564, %v3589_v6 }
 0x322   : > { %v11329_v63 = vsel %vm4055_vm15, %v4091_v58, %v3553_v61  ;;  %v3594_v56 = vmul.u32 58254, %v3589_v6  ;;  %v4560_v8 = vrot.slane %v11323_v22, 6  ;;  %v13274_v62 = vrot.slane %v11323_v22, 2 }
 0x323   : > { %13406 = vst [vmem:[#allocation21_spill] sm:$0xff] %v11329_v63  ;;  %vm13276_vm4 = vcmp.lt.s32.totalorder %v11329_v63, 16  ;;  %vm4753_vm10 = vcmp.eq.s32.totalorder %v11329_v63, 16  ;;  %vm4789_vm8 = vcmp.eq.s32.totalorder %v11329_v63, 17  ;;  %v3578_v33 = vadd.s32 %v3577_v42, %v3567_v52 }
 0x324   : > { %v4271_v30 = vsel %vm13276_vm4, %v11250_v26, 0.0  ;;  %v4897_v43 = vsel %vm4789_vm8, %v4668_v3, %v11250_v26  ;;  %v3595_v36 = vshll.u32 %v3592_v60, 16  ;;  %v3596_v38 = vshrl.u32 %v3592_v60, 16 }
 0x325   : > { %v4327_v12 = vsel %vm247_vm1, %v4271_v30, 0.0  ;;  %v4385_v49 = vmul.f32 %v4271_v30, %v4271_v30  ;;  %v3579_v27 = vadd.s32 %v3578_v33, %v3569_v37  ;;  %v5005_v61 = vsel %vm4753_vm10, %v11275_v54, %v4897_v43  ;;  %v2809_v37 = vpop.f32.mrf.mxu0 }
 0x326   : > { %v4328_v28 = vadd.f32 %v4327_v12, %v4326_v16  ;;  %5041 = vst.msk [vmem:[#allocation2 + $0xbb] sm:$0xff] %vm247_vm1, %v5005_v61  ;;  %v3597_v39 = vshll.u32 %v3593_v45, 16  ;;  %v3598_v40 = vshrl.u32 %v3593_v45, 16  ;;  %vm3599_vm11 = vc.u32 %v3591_v10, %v3595_v36 }
 0x327   : > { %v4441_v52 = vsel %vm247_vm1, %v4385_v49, 0.0  ;;  %v3580_v6 = vshrl.u32 %v3579_v27, 4  ;;  %v3600_v58 = vsel %vm3599_vm11, 1, %v13357_v55  ;;  %v3601_v26 = vadd.s32 %v3595_v36, %v3591_v10  ;;  %v2196_v10 = vpop.f32.mrf.mxu2 }
 0x328   : > { %v4442_v3 = vadd.f32 %v4441_v52, %v4440_v17  ;;  %v3602_v53 = vadd.s32 %v3600_v58, %v3594_v56  ;;  %v11350_v54 = vsel %vm4514_vm6, %v4558_v25, %v4560_v8  ;;  %v4670_v16 = vsel %vm4623_vm14, %v4667_v24, %v13274_v62 }
 0x329   : > { %v3581_v42 = vmul.u32 18, %v3580_v6  ;;  %vm3603_vm8 = vc.u32 %v3601_v26, %v3597_v39  ;;  %v2561_v60 = vadd.f32 %v2501_v29, %v2253_v47  ;;  %v11358_v17 = vadd.s32 192, %v10082_v1  ;;  %v2504_v29 = vpop.f32.mrf.mxu3 }
 0x32a   : > { %v3604_v45 = vsel %vm3603_vm8, 1, %v13357_v55  ;;  %v2254_v56 = vadd.f32 %v2196_v10, %v10226_v13  ;;  %v11363_v25 = vadd.s32 200, %v10082_v1  ;;  %v11366_v33 = vadd.s32 208, %v10082_v1 }
 0x32b   : > { %v3582_v24 = vsub.s32 %v11284_v46, %v3581_v42  ;;  %v3606_v30 = vadd.s32 %v3604_v45, %v3602_v53  ;;  %v11369_v43 = vadd.f32 %v2809_v37, %v2561_v60  ;;  %v3617_v47 = vand.u32 65535, %v11358_v17 }
 0x32c   : > { %v3618_v36 = vshrl.u32 %v11358_v17, 16  ;;  %v2562_v12 = vadd.f32 %v2504_v29, %v2254_v56  ;;  %v3646_v49 = vand.u32 65535, %v11363_v25  ;;  %v3647_v13 = vshrl.u32 %v11363_v25, 16 }
 0x32d   : > { %vm3984_vm10 = vcmp.ne.s32.totalorder %v3582_v24, 0  ;;  %vm4020_vm12 = vcmp.lt.s32.totalorder %v3582_v24, 0  ;;  %v4092_v27 = vadd.s32 18, %v3582_v24  ;;  %v3607_v61 = vadd.s32 %v3606_v30, %v3596_v38 }
 0x32e   : > { %vm4056_vm7 = vmand %vm4020_vm12, %vm3984_vm10  ;;  %v3620_v39 = vmul.u32 14564, %v3617_v47  ;;  %v3621_v46 = vmul.u32 58254, %v3617_v47  ;;  %v3622_v52 = vmul.u32 14564, %v3618_v36  ;;  %v3623_v6 = vmul.u32 58254, %v3618_v36 }
 0x32f   : > { %v11375_v58 = vsel %vm4056_vm7, %v4092_v27, %v3582_v24  ;;  %v3608_v26 = vadd.s32 %v3607_v61, %v3598_v40  ;;  %v4562_v53 = vrot.slane %v11369_v43, 6  ;;  %v4671_v37 = vrot.slane %v11369_v43, 2  ;;  %v2812_v27 = vpop.f32.mrf.mxu0 }
 0x330   : > { %13407 = vst [vmem:[#allocation18_spill] sm:$0xff] %v11375_v58  ;;  %vm13275_vm15 = vcmp.lt.s32.totalorder %v11375_v58, 16  ;;  %vm4754_vm11 = vcmp.eq.s32.totalorder %v11375_v58, 16  ;;  %vm4790_vm8 = vcmp.eq.s32.totalorder %v11375_v58, 17  ;;  %v3624_v42 = vshll.u32 %v3621_v46, 16 }
 0x331   : > { %v4272_v38 = vsel %vm13275_vm15, %v11286_v14, 0.0  ;;  %v3609_v60 = vshrl.u32 %v3608_v26, 4  ;;  %v4898_v10 = vsel %vm4790_vm8, %v4670_v16, %v11286_v14  ;;  %v3625_v45 = vshrl.u32 %v3621_v46, 16 }
 0x332   : > { %v4329_v40 = vsel %vm247_vm1, %v4272_v38, 0.0  ;;  %v4386_v56 = vmul.f32 %v4272_v38, %v4272_v38  ;;  %v5006_v24 = vsel %vm4754_vm11, %v11314_v0, %v4898_v10  ;;  %v3626_v30 = vshll.u32 %v3622_v52, 16  ;;  %v2199_v0 = vpop.f32.mrf.mxu2  ;;  %v2507_v10 = vpop.f32.mrf.mxu3 }
 0x333   : > { %v4330_v47 = vadd.f32 %v4329_v40, %v4328_v28  ;;  %v3610_v29 = vmul.u32 18, %v3609_v60  ;;  %5042 = vst.msk [vmem:[#allocation2 + $0xc3] sm:$0xff] %vm247_vm1, %v5006_v24  ;;  %v3627_v36 = vshrl.u32 %v3622_v52, 16  ;;  %vm3628_vm10 = vc.u32 %v3620_v39, %v3624_v42 }
 0x334   : > { %v4443_v61 = vsel %vm247_vm1, %v4386_v56, 0.0  ;;  %v3629_v26 = vsel %vm3628_vm10, 1, %v13357_v55  ;;  %v3630_v62 = vadd.s32 %v3624_v42, %v3620_v39  ;;  %v11396_v14 = vsel %vm4514_vm6, %v4560_v8, %v4562_v53 }
 0x335   : > { %v4444_v28 = vadd.f32 %v4443_v61, %v4442_v3  ;;  %v3611_v16 = vsub.s32 %v11290_v19, %v3610_v29  ;;  %v3631_v46 = vadd.s32 %v3629_v26, %v3623_v6  ;;  %v13408_v52 = vrot.slane %v11323_v22, 2 }
 0x336   : > { %vm3632_vm12 = vc.u32 %v3630_v62, %v3626_v30  ;;  %v11404_v39 = vadd.f32 %v2812_v27, %v2562_v12  ;;  %v3649_v42 = vmul.u32 14564, %v3646_v49  ;;  %v3650_v60 = vmul.u32 58254, %v3646_v49 }
 0x337   : > { %v4672_v38 = vsel %vm4623_vm14, %v13408_v52, %v4671_v37  ;;  %vm3985_vm7 = vcmp.ne.s32.totalorder %v3611_v16, 0  ;;  %vm4021_vm11 = vcmp.lt.s32.totalorder %v3611_v16, 0  ;;  %v4093_v8 = vadd.s32 18, %v3611_v16 }
 0x338   : > { %v3633_v3 = vsel %vm3632_vm12, 1, %v13357_v55  ;;  %vm4057_vm8 = vmand %vm4021_vm11, %vm3985_vm7  ;;  %v3651_v6 = vmul.u32 14564, %v3647_v13  ;;  %v3652_v40 = vmul.u32 58254, %v3647_v13  ;;  %v3653_v56 = vshll.u32 %v3650_v60, 16 }
 0x339   : > { %v3635_v19 = vadd.s32 %v3633_v3, %v3631_v46  ;;  %v11407_v24 = vsel %vm4057_vm8, %v4093_v8, %v3611_v16  ;;  %v3654_v29 = vshrl.u32 %v3650_v60, 16  ;;  %v4564_v62 = vrot.slane %v11404_v39, 6 }
 0x33a   : > { %13409 = vst [vmem:[#allocation20_spill] sm:$0xff] %v11407_v24  ;;  %v4673_v12 = vrot.slane %v11404_v39, 2  ;;  %vm13277_vm10 = vcmp.lt.s32.totalorder %v11407_v24, 16  ;;  %vm4755_vm15 = vcmp.eq.s32.totalorder %v11407_v24, 16  ;;  %vm4791_vm4 = vcmp.eq.s32.totalorder %v11407_v24, 17 }
 0x33b   : > { %v3636_v49 = vadd.s32 %v3635_v19, %v3625_v45  ;;  %v4273_v30 = vsel %vm13277_vm10, %v11323_v22, 0.0  ;;  %v4899_v13 = vsel %vm4791_vm4, %v4672_v38, %v11323_v22  ;;  %v3655_v27 = vshll.u32 %v3651_v6, 16 }
 0x33c   : > { %v3656_v61 = vshrl.u32 %v3651_v6, 16  ;;  %v4331_v26 = vsel %vm247_vm1, %v4273_v30, 0.0  ;;  %v4387_v16 = vmul.f32 %v4273_v30, %v4273_v30  ;;  %v5007_v52 = vsel %vm4755_vm15, %v11350_v54, %v4899_v13  ;;  %v2510_v13 = vpop.f32.mrf.mxu3 }
 0x33d   : > { %v3637_v46 = vadd.s32 %v3636_v49, %v3627_v36  ;;  %v4332_v60 = vadd.f32 %v4331_v26, %v4330_v47  ;;  %5043 = vst.msk [vmem:[#allocation2 + $0xcb] sm:$0xff] %vm247_vm1, %v5007_v52  ;;  %vm3657_vm12 = vc.u32 %v3649_v42, %v3653_v56  ;;  %v3659_v8 = vadd.s32 %v3653_v56, %v3649_v42  ;;  %v2815_v47 = vpop.f32.mrf.mxu0  ;;  %v2202_v36 = vpop.f32.mrf.mxu2 }
 0x33e   : > { %v11426_v45 = vsel %vm4514_vm6, %v4562_v53, %v4564_v62  ;;  %v4445_v22 = vsel %vm247_vm1, %v4387_v16, 0.0  ;;  %v3658_v3 = vsel %vm3657_vm12, 1, %v13357_v55  ;;  %v4674_v54 = vsel %vm4623_vm14, %v4671_v37, %v4673_v12 }
 0x33f   : > { %v3638_v38 = vshrl.u32 %v3637_v46, 4  ;;  %v4446_v42 = vadd.f32 %v4445_v22, %v4444_v28  ;;  %v3660_v19 = vadd.s32 %v3658_v3, %v3652_v40  ;;  %vm3661_vm4 = vc.u32 %v3659_v8, %v3655_v27 }
 0x340   : > { %v2255_v6 = vadd.f32 %v2199_v0, %v10232_v20  ;;  %v3662_v56 = vsel %vm3661_vm4, 1, %v13357_v55  ;;  %v3675_v49 = vand.u32 65535, %v11366_v33  ;;  %v3676_v30 = vshrl.u32 %v11366_v33, 16 }
 0x341   : > { %v3639_v53 = vmul.u32 18, %v3638_v38  ;;  %v3664_v26 = vadd.s32 %v3662_v56, %v3660_v19  ;;  %v2256_v46 = vadd.f32 %v2202_v36, %v10249_v44  ;;  %v11441_v37 = vadd.s32 216, %v10082_v1 }
 0x342   : > { %v2563_v16 = vadd.f32 %v2507_v10, %v2255_v6  ;;  %v3678_v40 = vmul.u32 14564, %v3675_v49  ;;  %v3679_v27 = vmul.u32 58254, %v3675_v49  ;;  %v11444_v20 = vmul.u32 14564, %v3676_v30 }
 0x343   : > { %v3640_v28 = vsub.s32 %v11358_v17, %v3639_v53  ;;  %v3665_v0 = vadd.s32 %v3664_v26, %v3654_v29  ;;  %v3681_v8 = vmul.u32 58254, %v3676_v30  ;;  %v2564_v22 = vadd.f32 %v2510_v13, %v2256_v46 }
 0x344   : > { %v11446_v52 = vadd.f32 %v2815_v47, %v2563_v16  ;;  %v3682_v10 = vshll.u32 %v3679_v27, 16  ;;  %v3683_v3 = vshrl.u32 %v3679_v27, 16  ;;  %v3684_v36 = vshll.u32 %v11444_v20, 16 }
 0x345   : > { %vm3986_vm15 = vcmp.ne.s32.totalorder %v3640_v28, 0  ;;  %vm4022_vm7 = vcmp.lt.s32.totalorder %v3640_v28, 0  ;;  %v4094_v38 = vadd.s32 18, %v3640_v28  ;;  %v3666_v44 = vadd.s32 %v3665_v0, %v3656_v61  ;;  %v2818_v49 = vpop.f32.mrf.mxu0 }
 0x346   : > { %vm4058_vm11 = vmand %vm4022_vm7, %vm3986_vm15  ;;  %v3685_v17 = vshrl.u32 %v11444_v20, 16  ;;  %vm3686_vm8 = vc.u32 %v3678_v40, %v3682_v10  ;;  %v3688_v6 = vadd.s32 %v3682_v10, %v3678_v40  ;;  %v4566_v29 = vrot.slane %v11446_v52, 6  ;;  %v2205_v10 = vpop.f32.mrf.mxu2 }
 0x347   : > { %v11450_v19 = vsel %vm4058_vm11, %v4094_v38, %v3640_v28  ;;  %v3667_v47 = vshrl.u32 %v3666_v44, 4  ;;  %v3687_v56 = vsel %vm3686_vm8, 1, %v13357_v55  ;;  %v4675_v20 = vrot.slane %v11446_v52, 2 }
 0x348   : > { %13410 = vst [vmem:[#allocation22_spill] sm:$0xff] %v11450_v19  ;;  %vm13280_vm12 = vcmp.lt.s32.totalorder %v11450_v19, 16  ;;  %vm4756_vm4 = vcmp.eq.s32.totalorder %v11450_v19, 16  ;;  %vm4792_vm10 = vcmp.eq.s32.totalorder %v11450_v19, 17  ;;  %vm3690_vm15 = vc.u32 %v3688_v6, %v3684_v36 }
 0x349   : > { %v4274_v61 = vsel %vm13280_vm12, %v11369_v43, 0.0  ;;  %v4900_v53 = vsel %vm4792_vm10, %v4674_v54, %v11369_v43  ;;  %v3668_v26 = vmul.u32 18, %v3667_v47  ;;  %v3689_v28 = vadd.s32 %v3687_v56, %v3681_v8  ;;  %v2513_v47 = vpop.f32.mrf.mxu3 }
 0x34a   : > { %v4333_v30 = vsel %vm247_vm1, %v4274_v61, 0.0  ;;  %v4388_v13 = vmul.f32 %v4274_v61, %v4274_v61  ;;  %v5008_v16 = vsel %vm4756_vm4, %v11396_v14, %v4900_v53  ;;  %v3691_v40 = vsel %vm3690_vm15, 1, %v13357_v55 }
 0x34b   : > { %v4334_v46 = vadd.f32 %v4333_v30, %v4332_v60  ;;  %5044 = vst.msk [vmem:[#allocation2 + $0xd3] sm:$0xff] %vm247_vm1, %v5008_v16  ;;  %v11470_v43 = vsel %vm4514_vm6, %v4564_v62, %v4566_v29  ;;  %v3669_v27 = vsub.s32 %v11363_v25, %v3668_v26  ;;  %v11475_v14 = vadd.f32 %v2818_v49, %v2564_v22 }
 0x34c   : > { %v4447_v54 = vsel %vm247_vm1, %v4388_v13, 0.0  ;;  %v3693_v0 = vadd.s32 %v3691_v40, %v3689_v28  ;;  %v3704_v8 = vand.u32 65535, %v11441_v37  ;;  %v3705_v38 = vshrl.u32 %v11441_v37, 16 }
 0x34d   : > { %v4448_v60 = vadd.f32 %v4447_v54, %v4446_v42  ;;  %vm3987_vm10 = vcmp.ne.s32.totalorder %v3669_v27, 0  ;;  %vm4023_vm7 = vcmp.lt.s32.totalorder %v3669_v27, 0  ;;  %v4095_v44 = vadd.s32 18, %v3669_v27 }
 0x34e   : > { %v4676_v62 = vsel %vm4623_vm14, %v4673_v12, %v4675_v20  ;;  %vm4059_vm11 = vmand %vm4023_vm7, %vm3987_vm10  ;;  %v3694_v25 = vadd.s32 %v3693_v0, %v3683_v3  ;;  %v3707_v36 = vmul.u32 14564, %v3704_v8  ;;  %v3708_v6 = vmul.u32 58254, %v3704_v8 }
 0x34f   : > { %v3709_v22 = vmul.u32 14564, %v3705_v38  ;;  %v11482_v42 = vsel %vm4059_vm11, %v4095_v44, %v3669_v27  ;;  %v3710_v61 = vmul.u32 58254, %v3705_v38  ;;  %v4568_v53 = vrot.slane %v11475_v14, 6 }
 0x350   : > { %13411 = vst [vmem:[#allocation4_spill] sm:$0xff] %v11482_v42  ;;  %v4677_v56 = vrot.slane %v11475_v14, 2  ;;  %vm13278_vm8 = vcmp.lt.s32.totalorder %v11482_v42, 16  ;;  %vm4757_vm4 = vcmp.eq.s32.totalorder %v11482_v42, 16  ;;  %vm4793_vm15 = vcmp.eq.s32.totalorder %v11482_v42, 17 }
 0x351   : > { %v3695_v12 = vadd.s32 %v3694_v25, %v3685_v17  ;;  %v4275_v3 = vsel %vm13278_vm8, %v11404_v39, 0.0  ;;  %v4901_v49 = vsel %vm4793_vm15, %v4676_v62, %v11404_v39  ;;  %v3711_v30 = vshll.u32 %v3708_v6, 16  ;;  %v2821_v25 = vpop.f32.mrf.mxu0 }
 0x352   : > { %v3712_v13 = vshrl.u32 %v3708_v6, 16  ;;  %v4335_v26 = vsel %vm247_vm1, %v4275_v3, 0.0  ;;  %v4389_v16 = vmul.f32 %v4275_v3, %v4275_v3  ;;  %v5009_v40 = vsel %vm4757_vm4, %v11426_v45, %v4901_v49  ;;  %v2516_v49 = vpop.f32.mrf.mxu3 }
 0x353   : > { %v3696_v28 = vshrl.u32 %v3695_v12, 4  ;;  %v4336_v54 = vadd.f32 %v4335_v26, %v4334_v46  ;;  %5045 = vst.msk [vmem:[#allocation2 + $0xdb] sm:$0xff] %vm247_vm1, %v5009_v40  ;;  %v3713_v27 = vshll.u32 %v3709_v22, 16  ;;  %v3714_v0 = vshrl.u32 %v3709_v22, 16 }
 0x354   : > { %vm3715_vm10 = vc.u32 %v3707_v36, %v3711_v30  ;;  %v4449_v17 = vsel %vm247_vm1, %v4389_v16, 0.0  ;;  %v3717_v39 = vadd.s32 %v3711_v30, %v3707_v36  ;;  %v11503_v45 = vsel %vm4514_vm6, %v4566_v29, %v4568_v53  ;;  %v2208_v36 = vpop.f32.mrf.mxu2 }
 0x355   : > { %v3697_v8 = vmul.u32 18, %v3696_v28  ;;  %v3716_v38 = vsel %vm3715_vm10, 1, %v13357_v55  ;;  %v4450_v44 = vadd.f32 %v4449_v17, %v4448_v60  ;;  %v4678_v46 = vsel %vm4623_vm14, %v4675_v20, %v4677_v56 }
 0x356   : > { %v3718_v62 = vadd.s32 %v3716_v38, %v3710_v61  ;;  %vm3719_vm7 = vc.u32 %v3717_v39, %v3713_v27  ;;  %v2257_v22 = vadd.f32 %v2205_v10, %v10253_v15  ;;  %v11511_v60 = vadd.s32 224, %v10082_v1 }
 0x357   : > { %v3698_v6 = vsub.s32 %v11366_v33, %v3697_v8  ;;  %v3720_v61 = vsel %vm3719_vm7, 1, %v13357_v55  ;;  %v2258_v12 = vadd.f32 %v2208_v36, %v10265_v18  ;;  %v11516_v29 = vadd.s32 232, %v10082_v1 }
 0x358   : > { %v11519_v3 = vadd.s32 240, %v10082_v1  ;;  %v3722_v20 = vadd.s32 %v3720_v61, %v3718_v62  ;;  %v2565_v15 = vadd.f32 %v2513_v47, %v2257_v22  ;;  %v3733_v10 = vand.u32 65535, %v11511_v60 }
 0x359   : > { %vm3988_vm11 = vcmp.ne.s32.totalorder %v3698_v6, 0  ;;  %vm4024_vm4 = vcmp.lt.s32.totalorder %v3698_v6, 0  ;;  %v4096_v33 = vadd.s32 18, %v3698_v6  ;;  %v3734_v30 = vshrl.u32 %v11511_v60, 16 }
 0x35a   : > { %vm4060_vm15 = vmand %vm4024_vm4, %vm3988_vm11  ;;  %v2566_v26 = vadd.f32 %v2516_v49, %v2258_v12  ;;  %v3723_v18 = vadd.s32 %v3722_v20, %v3712_v13  ;;  %v3762_v28 = vand.u32 65535, %v11516_v29  ;;  %v3763_v40 = vshrl.u32 %v11516_v29, 16 }
 0x35b   : > { %v11523_v16 = vsel %vm4060_vm15, %v4096_v33, %v3698_v6  ;;  %v11530_v27 = vadd.f32 %v2821_v25, %v2565_v15  ;;  %v3736_v13 = vmul.u32 14564, %v3733_v10  ;;  %v3737_v6 = vmul.u32 58254, %v3733_v10 }
 0x35c   : > { %13412 = vst [vmem:[#allocation7_spill] sm:$0xff] %v11523_v16  ;;  %vm13279_vm10 = vcmp.lt.s32.totalorder %v11523_v16, 16  ;;  %vm4758_vm7 = vcmp.eq.s32.totalorder %v11523_v16, 16  ;;  %vm4794_vm8 = vcmp.eq.s32.totalorder %v11523_v16, 17  ;;  %v3724_v17 = vadd.s32 %v3723_v18, %v3714_v0 }
 0x35d   : > { %v4276_v47 = vsel %vm13279_vm10, %v11446_v52, 0.0  ;;  %v4902_v8 = vsel %vm4794_vm8, %v4678_v46, %v11446_v52  ;;  %v3738_v25 = vmul.u32 14564, %v3734_v30  ;;  %v3739_v61 = vmul.u32 58254, %v3734_v30  ;;  %v2824_v52 = vpop.f32.mrf.mxu0  ;;  %v2211_v30 = vpop.f32.mrf.mxu2 }
 0x35e   : > { %v4337_v38 = vsel %vm247_vm1, %v4276_v47, 0.0  ;;  %v4390_v39 = vmul.f32 %v4276_v47, %v4276_v47  ;;  %v5010_v62 = vsel %vm4758_vm7, %v11470_v43, %v4902_v8  ;;  %v3725_v36 = vshrl.u32 %v3724_v17, 4 }
 0x35f   : > { %v4338_v22 = vadd.f32 %v4337_v38, %v4336_v54  ;;  %5046 = vst.msk [vmem:[#allocation2 + $0xe3] sm:$0xff] %vm247_vm1, %v5010_v62  ;;  %v3740_v33 = vshll.u32 %v3737_v6, 16  ;;  %v3741_v20 = vshrl.u32 %v3737_v6, 16  ;;  %v4570_v0 = vrot.slane %v11530_v27, 6  ;;  %v2519_v62 = vpop.f32.mrf.mxu3 }
 0x360   : > { %v4451_v12 = vsel %vm247_vm1, %v4390_v39, 0.0  ;;  %v3726_v49 = vmul.u32 18, %v3725_v36  ;;  %v3742_v15 = vshll.u32 %v3738_v25, 16  ;;  %v3743_v18 = vshrl.u32 %v3738_v25, 16 }
 0x361   : > { %v4452_v46 = vadd.f32 %v4451_v12, %v4450_v44  ;;  %vm3744_vm8 = vc.u32 %v3736_v13, %v3740_v33  ;;  %v3746_v43 = vadd.s32 %v3740_v33, %v3736_v13  ;;  %v11544_v54 = vsel %vm4514_vm6, %v4568_v53, %v4570_v0 }
 0x362   : > { %v4679_v10 = vrot.slane %v11530_v27, 2  ;;  %v3727_v47 = vsub.s32 %v11441_v37, %v3726_v49  ;;  %v3745_v17 = vsel %vm3744_vm8, 1, %v13357_v55  ;;  %v11549_v8 = vadd.f32 %v2824_v52, %v2566_v26 }
 0x363   : > { %v3765_v44 = vmul.u32 14564, %v3762_v28  ;;  %v3747_v38 = vadd.s32 %v3745_v17, %v3739_v61  ;;  %vm3748_vm11 = vc.u32 %v3746_v43, %v3742_v15  ;;  %v3766_v39 = vmul.u32 58254, %v3762_v28 }
 0x364   : > { %v4680_v13 = vsel %vm4623_vm14, %v4677_v56, %v4679_v10  ;;  %vm3989_vm4 = vcmp.ne.s32.totalorder %v3727_v47, 0  ;;  %vm4025_vm15 = vcmp.lt.s32.totalorder %v3727_v47, 0  ;;  %v4097_v53 = vadd.s32 18, %v3727_v47 }
 0x365   : > { %v3749_v6 = vsel %vm3748_vm11, 1, %v13357_v55  ;;  %vm4061_vm7 = vmand %vm4025_vm15, %vm3989_vm4  ;;  %v3767_v36 = vmul.u32 14564, %v3763_v40  ;;  %v3768_v25 = vmul.u32 58254, %v3763_v40  ;;  %v3769_v26 = vshll.u32 %v3766_v39, 16 }
 0x366   : > { %v3751_v37 = vadd.s32 %v3749_v6, %v3747_v38  ;;  %v11555_v12 = vsel %vm4061_vm7, %v4097_v53, %v3727_v47  ;;  %v3770_v61 = vshrl.u32 %v3766_v39, 16  ;;  %v4572_v33 = vrot.slane %v11549_v8, 6 }
 0x367   : > { %13413 = vst [vmem:[#allocation5_spill] sm:$0xff] %v11555_v12  ;;  %v4681_v52 = vrot.slane %v11549_v8, 2  ;;  %vm13281_vm8 = vcmp.lt.s32.totalorder %v11555_v12, 16  ;;  %vm4759_vm10 = vcmp.eq.s32.totalorder %v11555_v12, 16  ;;  %vm4795_vm12 = vcmp.eq.s32.totalorder %v11555_v12, 17 }
 0x368   : > { %v3752_v56 = vadd.s32 %v3751_v37, %v3741_v20  ;;  %v4277_v28 = vsel %vm13281_vm8, %v11475_v14, 0.0  ;;  %v4903_v40 = vsel %vm4795_vm12, %v4680_v13, %v11475_v14  ;;  %v3771_v49 = vshll.u32 %v3767_v36, 16 }
 0x369   : > { %v3772_v15 = vshrl.u32 %v3767_v36, 16  ;;  %v4339_v43 = vsel %vm247_vm1, %v4277_v28, 0.0  ;;  %v4391_v47 = vmul.f32 %v4277_v28, %v4277_v28  ;;  %v5011_v38 = vsel %vm4759_vm10, %v11503_v45, %v4903_v40  ;;  %v2827_v45 = vpop.f32.mrf.mxu0  ;;  %v2522_v40 = vpop.f32.mrf.mxu3 }
 0x36a   : > { %v3753_v17 = vadd.s32 %v3752_v56, %v3743_v18  ;;  %v4340_v39 = vadd.f32 %v4339_v43, %v4338_v22  ;;  %5047 = vst.msk [vmem:[#allocation2 + $0xeb] sm:$0xff] %vm247_vm1, %v5011_v38  ;;  %vm3773_vm11 = vc.u32 %v3765_v44, %v3769_v26  ;;  %v3775_v53 = vadd.s32 %v3769_v26, %v3765_v44  ;;  %v2214_v22 = vpop.f32.mrf.mxu2 }
 0x36b   : > { %v11572_v20 = vsel %vm4514_vm6, %v4570_v0, %v4572_v33  ;;  %v4453_v14 = vsel %vm247_vm1, %v4391_v47, 0.0  ;;  %v3774_v6 = vsel %vm3773_vm11, 1, %v13357_v55  ;;  %v4682_v18 = vsel %vm4623_vm14, %v4679_v10, %v4681_v52 }
 0x36c   : > { %v3754_v13 = vshrl.u32 %v3753_v17, 4  ;;  %v4454_v37 = vadd.f32 %v4453_v14, %v4452_v46  ;;  %v3776_v36 = vadd.s32 %v3774_v6, %v3768_v25  ;;  %vm3777_vm12 = vc.u32 %v3775_v53, %v3771_v49 }
 0x36d   : > { %v2259_v44 = vadd.f32 %v2211_v30, %v10269_v23  ;;  %v3778_v0 = vsel %vm3777_vm12, 1, %v13357_v55  ;;  %v3791_v56 = vand.u32 65535, %v11519_v3  ;;  %v3792_v28 = vshrl.u32 %v11519_v3, 16 }
 0x36e   : > { %v3755_v26 = vmul.u32 18, %v3754_v13  ;;  %v3780_v43 = vadd.s32 %v3778_v0, %v3776_v36  ;;  %v2260_v17 = vadd.f32 %v2214_v22, %v10285_v7  ;;  %v11585_v10 = vadd.s32 248, %v10082_v1 }
 0x36f   : > { %v2567_v47 = vadd.f32 %v2519_v62, %v2259_v44  ;;  %v3794_v25 = vmul.u32 14564, %v3791_v56  ;;  %v3795_v49 = vmul.u32 58254, %v3791_v56  ;;  %v11588_v23 = vmul.u32 14564, %v3792_v28 }
 0x370   : > { %v3756_v46 = vsub.s32 %v11511_v60, %v3755_v26  ;;  %v3781_v30 = vadd.s32 %v3780_v43, %v3770_v61  ;;  %v3797_v53 = vmul.u32 58254, %v3792_v28  ;;  %v2568_v14 = vadd.f32 %v2522_v40, %v2260_v17 }
 0x371   : > { %v11590_v38 = vadd.f32 %v2827_v45, %v2567_v47  ;;  %v3798_v62 = vshll.u32 %v3795_v49, 16  ;;  %v3799_v6 = vshrl.u32 %v3795_v49, 16  ;;  %v3800_v22 = vshll.u32 %v11588_v23, 16  ;;  %v2830_v56 = vpop.f32.mrf.mxu0 }
 0x372   : > { %vm3990_vm10 = vcmp.ne.s32.totalorder %v3756_v46, 0  ;;  %vm4026_vm4 = vcmp.lt.s32.totalorder %v3756_v46, 0  ;;  %v4098_v13 = vadd.s32 18, %v3756_v46  ;;  %v3782_v7 = vadd.s32 %v3781_v30, %v3772_v15 }
 0x373   : > { %vm4062_vm15 = vmand %vm4026_vm4, %vm3990_vm10  ;;  %v3801_v60 = vshrl.u32 %v11588_v23, 16  ;;  %vm3802_vm7 = vc.u32 %v3794_v25, %v3798_v62  ;;  %v3804_v44 = vadd.s32 %v3798_v62, %v3794_v25  ;;  %v4574_v61 = vrot.slane %v11590_v38, 6  ;;  %v2217_v62 = vpop.f32.mrf.mxu2 }
 0x374   : > { %v11594_v36 = vsel %vm4062_vm15, %v4098_v13, %v3756_v46  ;;  %v3783_v45 = vshrl.u32 %v3782_v7, 4  ;;  %v3803_v0 = vsel %vm3802_vm7, 1, %v13357_v55  ;;  %v4683_v23 = vrot.slane %v11590_v38, 2 }
 0x375   : > { %13414 = vst [vmem:[#allocation23_spill] sm:$0xff] %v11594_v36  ;;  %vm13285_vm11 = vcmp.lt.s32.totalorder %v11594_v36, 16  ;;  %vm4760_vm12 = vcmp.eq.s32.totalorder %v11594_v36, 16  ;;  %vm4796_vm8 = vcmp.eq.s32.totalorder %v11594_v36, 17  ;;  %vm3806_vm10 = vc.u32 %v3804_v44, %v3800_v22 }
 0x376   : > { %v4278_v15 = vsel %vm13285_vm11, %v11530_v27, 0.0  ;;  %v4904_v26 = vsel %vm4796_vm8, %v4682_v18, %v11530_v27  ;;  %v3784_v43 = vmul.u32 18, %v3783_v45  ;;  %v3805_v46 = vadd.s32 %v3803_v0, %v3797_v53  ;;  %v2525_v45 = vpop.f32.mrf.mxu3 }
 0x377   : > { %v4341_v28 = vsel %vm247_vm1, %v4278_v15, 0.0  ;;  %v4392_v40 = vmul.f32 %v4278_v15, %v4278_v15  ;;  %v5012_v47 = vsel %vm4760_vm12, %v11544_v54, %v4904_v26  ;;  %v3807_v25 = vsel %vm3806_vm10, 1, %v13357_v55 }
 0x378   : > { %v4342_v17 = vadd.f32 %v4341_v28, %v4340_v39  ;;  %5048 = vst.msk [vmem:[#allocation2 + $0xf3] sm:$0xff] %vm247_vm1, %v5012_v47  ;;  %v11614_v27 = vsel %vm4514_vm6, %v4572_v33, %v4574_v61  ;;  %v3785_v49 = vsub.s32 %v11516_v29, %v3784_v43  ;;  %v11619_v54 = vadd.f32 %v2830_v56, %v2568_v14 }
 0x379   : > { %v4455_v18 = vsel %vm247_vm1, %v4392_v40, 0.0  ;;  %v3809_v30 = vadd.s32 %v3807_v25, %v3805_v46  ;;  %v3820_v53 = vand.u32 65535, %v11585_v10  ;;  %v3821_v13 = vshrl.u32 %v11585_v10, 16 }
 0x37a   : > { %v4456_v39 = vadd.f32 %v4455_v18, %v4454_v37  ;;  %vm3991_vm8 = vcmp.ne.s32.totalorder %v3785_v49, 0  ;;  %vm4027_vm4 = vcmp.lt.s32.totalorder %v3785_v49, 0  ;;  %v4099_v7 = vadd.s32 18, %v3785_v49 }
 0x37b   : > { %v4684_v33 = vsel %vm4623_vm14, %v4681_v52, %v4683_v23  ;;  %vm4063_vm15 = vmand %vm4027_vm4, %vm3991_vm8  ;;  %v3810_v29 = vadd.s32 %v3809_v30, %v3799_v6  ;;  %v3823_v22 = vmul.u32 14564, %v3820_v53  ;;  %v3824_v44 = vmul.u32 58254, %v3820_v53 }
 0x37c   : > { %v3825_v14 = vmul.u32 14564, %v3821_v13  ;;  %v11626_v37 = vsel %vm4063_vm15, %v4099_v7, %v3785_v49  ;;  %v3826_v15 = vmul.u32 58254, %v3821_v13  ;;  %v4576_v26 = vrot.slane %v11619_v54, 6 }
 0x37d   : > { %13415 = vst [vmem:[#allocation9_spill] sm:$0xff] %v11626_v37  ;;  %v13283_v0 = vrot.slane %v11619_v54, 2  ;;  %vm13282_vm7 = vcmp.lt.s32.totalorder %v11626_v37, 16  ;;  %vm4761_vm12 = vcmp.eq.s32.totalorder %v11626_v37, 16  ;;  %vm4797_vm10 = vcmp.eq.s32.totalorder %v11626_v37, 17 }
 0x37e   : > { %v3811_v52 = vadd.s32 %v3810_v29, %v3801_v60  ;;  %v4279_v6 = vsel %vm13282_vm7, %v11549_v8, 0.0  ;;  %v4905_v56 = vsel %vm4797_vm10, %v4684_v33, %v11549_v8  ;;  %v3827_v28 = vshll.u32 %v3824_v44, 16  ;;  %v2833_v29 = vpop.f32.mrf.mxu0 }
 0x37f   : > { %v3828_v40 = vshrl.u32 %v3824_v44, 16  ;;  %v4343_v43 = vsel %vm247_vm1, %v4279_v6, 0.0  ;;  %v4393_v47 = vmul.f32 %v4279_v6, %v4279_v6  ;;  %v5013_v25 = vsel %vm4761_vm12, %v11572_v20, %v4905_v56  ;;  %v13417_v6 = vld [vmem:[#allocation13_spill] sm:$0xff] }
 0x380   : > { %v3812_v46 = vshrl.u32 %v3811_v52, 4  ;;  %v4344_v18 = vadd.f32 %v4343_v43, %v4342_v17  ;;  %5049 = vst.msk [vmem:[#allocation2 + $0xfb] sm:$0xff] %vm247_vm1, %v5013_v25  ;;  %v3829_v49 = vshll.u32 %v3825_v14, 16  ;;  %v3830_v30 = vshrl.u32 %v3825_v14, 16  ;;  %v13416_v14 = vld [vmem:[#allocation8_spill] sm:$0xff]  ;;  %v2528_v43 = vpop.f32.mrf.mxu3 }
 0x381   : > { %vm3831_vm8 = vc.u32 %v3823_v22, %v3827_v28  ;;  %v4457_v60 = vsel %vm247_vm1, %v4393_v47, 0.0  ;;  %v3833_v8 = vadd.s32 %v3827_v28, %v3823_v22  ;;  %v11647_v20 = vsel %vm4514_vm6, %v4574_v61, %v4576_v26  ;;  %v2220_v22 = vpop.f32.mrf.mxu2 }
 0x382   : > { %v3813_v53 = vmul.u32 18, %v3812_v46  ;;  %v3832_v13 = vsel %vm3831_vm8, 1, %v13357_v55  ;;  %v4458_v7 = vadd.f32 %v4457_v60, %v4456_v39  ;;  %v4686_v17 = vsel %vm4623_vm14, %v4683_v23, %v13283_v0 }
 0x383   : > { %v3834_v33 = vadd.s32 %v3832_v13, %v3826_v15  ;;  %vm3835_vm4 = vc.u32 %v3833_v8, %v3829_v49  ;;  %v2261_v52 = vadd.f32 %v2217_v62, %v13416_v14  ;;  %v11655_v39 = vadd.s32 256, %v10082_v1 }
 0x384   : > { %v3814_v44 = vsub.s32 %v11519_v3, %v3813_v53  ;;  %v3836_v15 = vsel %vm3835_vm4, 1, %v13357_v55  ;;  %v2262_v56 = vadd.f32 %v2220_v22, %v13417_v6  ;;  %v11660_v61 = vadd.s32 264, %v10082_v1 }
 0x385   : > { %v11663_v28 = vadd.s32 272, %v10082_v1  ;;  %v3838_v23 = vadd.s32 %v3836_v15, %v3834_v33  ;;  %v2569_v62 = vadd.f32 %v2525_v45, %v2261_v52  ;;  %v3849_v47 = vand.u32 65535, %v11655_v39 }
 0x386   : > { %vm3992_vm15 = vcmp.ne.s32.totalorder %v3814_v44, 0  ;;  %vm4028_vm12 = vcmp.lt.s32.totalorder %v3814_v44, 0  ;;  %v4100_v3 = vadd.s32 18, %v3814_v44  ;;  %v3850_v46 = vshrl.u32 %v11655_v39, 16 }
 0x387   : > { %vm4064_vm10 = vmand %vm4028_vm12, %vm3992_vm15  ;;  %v2570_v25 = vadd.f32 %v2528_v43, %v2262_v56  ;;  %v3839_v60 = vadd.s32 %v3838_v23, %v3828_v40  ;;  %v3878_v53 = vand.u32 65535, %v11660_v61  ;;  %v3879_v13 = vshrl.u32 %v11660_v61, 16 }
 0x388   : > { %v11667_v49 = vsel %vm4064_vm10, %v4100_v3, %v3814_v44  ;;  %v11674_v8 = vadd.f32 %v2833_v29, %v2569_v62  ;;  %v3852_v40 = vmul.u32 14564, %v3849_v47  ;;  %v3853_v15 = vmul.u32 58254, %v3849_v47 }
 0x389   : > { %13418 = vst [vmem:[#allocation6_spill] sm:$0xff] %v11667_v49  ;;  %vm13284_vm8 = vcmp.lt.s32.totalorder %v11667_v49, 16  ;;  %vm4762_vm4 = vcmp.eq.s32.totalorder %v11667_v49, 16  ;;  %vm4798_vm7 = vcmp.eq.s32.totalorder %v11667_v49, 17  ;;  %v3840_v33 = vadd.s32 %v3839_v60, %v3830_v30 }
 0x38a   : > { %v4280_v45 = vsel %vm13284_vm8, %v11590_v38, 0.0  ;;  %v4906_v44 = vsel %vm4798_vm7, %v4686_v17, %v11590_v38  ;;  %v3854_v29 = vmul.u32 14564, %v3850_v46  ;;  %v3855_v3 = vmul.u32 58254, %v3850_v46  ;;  %v2836_v38 = vpop.f32.mrf.mxu0  ;;  %v2223_v46 = vpop.f32.mrf.mxu2 }
 0x38b   : > { %v4345_v14 = vsel %vm247_vm1, %v4280_v45, 0.0  ;;  %v4394_v52 = vmul.f32 %v4280_v45, %v4280_v45  ;;  %v5014_v22 = vsel %vm4762_vm4, %v11614_v27, %v4906_v44  ;;  %v3841_v56 = vshrl.u32 %v3840_v33, 4 }
 0x38c   : > { %v4346_v6 = vadd.f32 %v4345_v14, %v4344_v18  ;;  %5050 = vst.msk [vmem:[#allocation2 + $0x103] sm:$0xff] %vm247_vm1, %v5014_v22  ;;  %v3856_v43 = vshll.u32 %v3853_v15, 16  ;;  %v3857_v62 = vshrl.u32 %v3853_v15, 16  ;;  %v4578_v30 = vrot.slane %v11674_v8, 6 }
 0x38d   : > { %v4459_v23 = vsel %vm247_vm1, %v4394_v52, 0.0  ;;  %v3842_v60 = vmul.u32 18, %v3841_v56  ;;  %v3858_v0 = vshll.u32 %v3854_v29, 16  ;;  %v3859_v45 = vshrl.u32 %v3854_v29, 16  ;;  %v2531_v56 = vpop.f32.mrf.mxu3 }
 0x38e   : > { %v4460_v17 = vadd.f32 %v4459_v23, %v4458_v7  ;;  %vm3860_vm7 = vc.u32 %v3852_v40, %v3856_v43  ;;  %v3862_v27 = vadd.s32 %v3856_v43, %v3852_v40  ;;  %v11688_v18 = vsel %vm4514_vm6, %v4576_v26, %v4578_v30 }
 0x38f   : > { %v4687_v47 = vrot.slane %v11674_v8, 2  ;;  %v3843_v33 = vsub.s32 %v11585_v10, %v3842_v60  ;;  %v3861_v44 = vsel %vm3860_vm7, 1, %v13357_v55  ;;  %v11693_v14 = vadd.f32 %v2836_v38, %v2570_v25 }
 0x390   : > { %v3881_v7 = vmul.u32 14564, %v3878_v53  ;;  %v3863_v52 = vadd.s32 %v3861_v44, %v3855_v3  ;;  %vm3864_vm15 = vc.u32 %v3862_v27, %v3858_v0  ;;  %v13419_v22 = vrot.slane %v11619_v54, 2 }
 0x391   : > { %v3882_v15 = vmul.u32 58254, %v3878_v53  ;;  %vm3993_vm12 = vcmp.ne.s32.totalorder %v3843_v33, 0  ;;  %vm4029_vm10 = vcmp.lt.s32.totalorder %v3843_v33, 0  ;;  %v4101_v26 = vadd.s32 18, %v3843_v33 }
 0x392   : > { %v4688_v40 = vsel %vm4623_vm14, %v13419_v22, %v4687_v47  ;;  %v3865_v29 = vsel %vm3864_vm15, 1, %v13357_v55  ;;  %vm4065_vm4 = vmand %vm4029_vm10, %vm3993_vm12  ;;  %v3883_v23 = vmul.u32 14564, %v3879_v13  ;;  %v3884_v43 = vmul.u32 58254, %v3879_v13 }
 0x393   : > { %v3867_v10 = vadd.s32 %v3865_v29, %v3863_v52  ;;  %v3885_v25 = vshll.u32 %v3882_v15, 16  ;;  %v11699_v38 = vsel %vm4065_vm4, %v4101_v26, %v3843_v33  ;;  %v3886_v3 = vshrl.u32 %v3882_v15, 16 }
 0x394   : > { %13420 = vst [vmem:[#allocation24_spill] sm:$0xff] %v11699_v38  ;;  %v13286_v0 = vrot.slane %v11693_v14, 6  ;;  %vm13289_vm7 = vcmp.lt.s32.totalorder %v11699_v38, 16  ;;  %vm4763_vm8 = vcmp.eq.s32.totalorder %v11699_v38, 16  ;;  %vm4799_vm11 = vcmp.eq.s32.totalorder %v11699_v38, 17  ;;  %v13423_v38 = vld [vmem:[#allocation15_spill] sm:$0xff] }
 0x395   : > { %v3868_v53 = vadd.s32 %v3867_v10, %v3857_v62  ;;  %v4281_v27 = vsel %vm13289_vm7, %v11619_v54, 0.0  ;;  %v4907_v13 = vsel %vm4799_vm11, %v4688_v40, %v11619_v54  ;;  %v3887_v33 = vshll.u32 %v3883_v23, 16 }
 0x396   : > { %v3888_v44 = vshrl.u32 %v3883_v23, 16  ;;  %v4347_v52 = vsel %vm247_vm1, %v4281_v27, 0.0  ;;  %v4395_v22 = vmul.f32 %v4281_v27, %v4281_v27  ;;  %v5015_v26 = vsel %vm4763_vm8, %v11647_v20, %v4907_v13  ;;  %v2839_v20 = vpop.f32.mrf.mxu0 }
 0x397   : > { %v3869_v15 = vadd.s32 %v3868_v53, %v3859_v45  ;;  %v4348_v29 = vadd.f32 %v4347_v52, %v4346_v6  ;;  %5051 = vst.msk [vmem:[#allocation2 + $0x10b] sm:$0xff] %vm247_vm1, %v5015_v26  ;;  %vm3889_vm15 = vc.u32 %v3881_v7, %v3885_v25  ;;  %v3891_v60 = vadd.s32 %v3885_v25, %v3881_v7  ;;  %v2226_v6 = vpop.f32.mrf.mxu2  ;;  %v13422_v7 = vld [vmem:[#allocation10_spill] sm:$0xff] }
 0x398   : > { %v11716_v62 = vsel %vm4514_vm6, %v4578_v30, %v13286_v0  ;;  %v4461_v54 = vsel %vm247_vm1, %v4395_v22, 0.0  ;;  %v3890_v10 = vsel %vm3889_vm15, 1, %v13357_v55  ;;  %v13421_v23 = vrot.slane %v11693_v14, 2 }
 0x399   : > { %v3870_v40 = vshrl.u32 %v3869_v15, 4  ;;  %v4462_v53 = vadd.f32 %v4461_v54, %v4460_v17  ;;  %v3892_v27 = vadd.s32 %v3890_v10, %v3884_v43  ;;  %vm3893_vm11 = vc.u32 %v3891_v60, %v3887_v33  ;;  %v2534_v15 = vpop.f32.mrf.mxu3 }
 0x39a   : > { %v4690_v45 = vsel %vm4623_vm14, %v4687_v47, %v13421_v23  ;;  %v2263_v25 = vadd.f32 %v2223_v46, %v13422_v7  ;;  %v3894_v30 = vsel %vm3893_vm11, 1, %v13357_v55  ;;  %v3907_v52 = vand.u32 65535, %v11663_v28 }
 0x39b   : > { %v3871_v13 = vmul.u32 18, %v3870_v40  ;;  %v3908_v22 = vshrl.u32 %v11663_v28, 16  ;;  %v3896_v26 = vadd.s32 %v3894_v30, %v3892_v27  ;;  %v2264_v49 = vadd.f32 %v2226_v6, %v13423_v38 }
 0x39c   : > { %v2571_v0 = vadd.f32 %v2531_v56, %v2263_v25  ;;  %v11729_v47 = vadd.s32 280, %v10082_v1  ;;  %v3910_v43 = vmul.u32 14564, %v3907_v52  ;;  %v3911_v60 = vmul.u32 58254, %v3907_v52 }
 0x39d   : > { %v3872_v17 = vsub.s32 %v11655_v39, %v3871_v13  ;;  %v3912_v46 = vmul.u32 14564, %v3908_v22  ;;  %v3897_v33 = vadd.s32 %v3896_v26, %v3886_v3  ;;  %v3913_v40 = vmul.u32 58254, %v3908_v22 }
 0x39e   : > { %v11732_v54 = vadd.f32 %v2839_v20, %v2571_v0  ;;  %v2572_v10 = vadd.f32 %v2534_v15, %v2264_v49  ;;  %v3914_v27 = vshll.u32 %v3911_v60, 16  ;;  %v3915_v38 = vshrl.u32 %v3911_v60, 16  ;;  %v2842_v20 = vpop.f32.mrf.mxu0 }
 0x39f   : > { %vm3994_vm8 = vcmp.ne.s32.totalorder %v3872_v17, 0  ;;  %vm4030_vm12 = vcmp.lt.s32.totalorder %v3872_v17, 0  ;;  %v4102_v23 = vadd.s32 18, %v3872_v17  ;;  %v3898_v56 = vadd.s32 %v3897_v33, %v3888_v44 }
 0x3a0   : > { %vm4066_vm10 = vmand %vm4030_vm12, %vm3994_vm8  ;;  %v3916_v6 = vshll.u32 %v3912_v46, 16  ;;  %v3917_v1 = vshrl.u32 %v3912_v46, 16  ;;  %vm3918_vm4 = vc.u32 %v3910_v43, %v3914_v27  ;;  %v3920_v39 = vadd.s32 %v3914_v27, %v3910_v43 }
 0x3a1   : > { %v11734_v7 = vsel %vm4066_vm10, %v4102_v23, %v3872_v17  ;;  %v4582_v25 = vrot.slane %v11732_v54, 6  ;;  %v3899_v49 = vshrl.u32 %v3898_v56, 4  ;;  %v3919_v44 = vsel %vm3918_vm4, 1, %v13357_v55 }
 0x3a2   : > { %13424 = vst [vmem:[#allocation25_spill] sm:$0xff] %v11734_v7  ;;  %vm4174_vm15 = vcmp.lt.s32.totalorder %v11734_v7, 16  ;;  %vm4764_vm11 = vcmp.eq.s32.totalorder %v11734_v7, 16  ;;  %vm4800_vm7 = vcmp.eq.s32.totalorder %v11734_v7, 17  ;;  %vm3922_vm8 = vc.u32 %v3920_v39, %v3916_v6 }
 0x3a3   : > { %v4282_v3 = vsel %vm4174_vm15, %v11674_v8, 0.0  ;;  %v4908_v0 = vsel %vm4800_vm7, %v4690_v45, %v11674_v8  ;;  %v3900_v52 = vmul.u32 18, %v3899_v49  ;;  %v3921_v26 = vadd.s32 %v3919_v44, %v3913_v40 }
 0x3a4   : > { %v4349_v13 = vsel %vm247_vm1, %v4282_v3, 0.0  ;;  %v4396_v30 = vmul.f32 %v4282_v3, %v4282_v3  ;;  %v5016_v22 = vsel %vm4764_vm11, %v11688_v18, %v4908_v0  ;;  %v3923_v17 = vsel %vm3922_vm8, 1, %v13357_v55 }
 0x3a5   : > { %v4350_v15 = vadd.f32 %v4349_v13, %v4348_v29  ;;  %5052 = vst.msk [vmem:[#allocation2 + $0x113] sm:$0xff] %vm247_vm1, %v5016_v22  ;;  %v13425_v43 = vrot.slane %v11693_v14, 6  ;;  %v3901_v60 = vsub.s32 %v11660_v61, %v3900_v52  ;;  %v4691_v46 = vrot.slane %v11732_v54, 2 }
 0x3a6   : > { %v4463_v45 = vsel %vm247_vm1, %v4396_v30, 0.0  ;;  %v11757_v33 = vadd.f32 %v2842_v20, %v2572_v10  ;;  %v3925_v29 = vadd.s32 %v3923_v17, %v3921_v26  ;;  %v3936_v23 = vand.u32 65535, %v11729_v47 }
 0x3a7   : > { %v11752_v8 = vsel %vm4514_vm6, %v13425_v43, %v4582_v25  ;;  %v4464_v18 = vadd.f32 %v4463_v45, %v4462_v53  ;;  %v3937_v40 = vshrl.u32 %v11729_v47, 16  ;;  %vm3995_vm7 = vcmp.ne.s32.totalorder %v3901_v60, 0 }
 0x3a8   : > { %vm4031_vm12 = vcmp.lt.s32.totalorder %v3901_v60, 0  ;;  %v4103_v27 = vadd.s32 18, %v3901_v60  ;;  %v13426_v56 = vrot.slane %v11693_v14, 2  ;;  %v3926_v39 = vadd.s32 %v3925_v29, %v3915_v38 }
 0x3a9   : > { %vm4067_vm10 = vmand %vm4031_vm12, %vm3995_vm7  ;;  %v3939_v61 = vmul.u32 14564, %v3936_v23  ;;  %v3940_v49 = vmul.u32 58254, %v3936_v23  ;;  %v3941_v10 = vmul.u32 14564, %v3937_v40  ;;  %v3942_v53 = vmul.u32 58254, %v3937_v40 }
 0x3aa   : > { %v4692_v6 = vsel %vm4623_vm14, %v13426_v56, %v4691_v46  ;;  %v11764_v3 = vsel %vm4067_vm10, %v4103_v27, %v3901_v60  ;;  %v4584_v0 = vrot.slane %v11757_v33, 6  ;;  %v3927_v44 = vadd.s32 %v3926_v39, %v3917_v1 }
 0x3ab   : > { %13427 = vst [vmem:[#allocation26_spill] sm:$0xff] %v11764_v3  ;;  %vm13290_vm4 = vcmp.lt.s32.totalorder %v11764_v3, 16  ;;  %vm4765_vm11 = vcmp.eq.s32.totalorder %v11764_v3, 16  ;;  %vm4801_vm8 = vcmp.eq.s32.totalorder %v11764_v3, 17  ;;  %v3943_v13 = vshll.u32 %v3940_v49, 16 }
 0x3ac   : > { %v4283_v20 = vsel %vm13290_vm4, %v11693_v14, 0.0  ;;  %v4909_v38 = vsel %vm4801_vm8, %v4692_v6, %v11693_v14  ;;  %v4693_v30 = vrot.slane %v11757_v33, 2  ;;  %v3928_v26 = vshrl.u32 %v3927_v44, 4 }
 0x3ad   : > { %v4351_v52 = vsel %vm247_vm1, %v4283_v20, 0.0  ;;  %v4397_v22 = vmul.f32 %v4283_v20, %v4283_v20  ;;  %v5017_v17 = vsel %vm4765_vm11, %v11716_v62, %v4909_v38  ;;  %v3945_v45 = vshll.u32 %v3941_v10, 16 }
 0x3ae   : > { %v4352_v43 = vadd.f32 %v4351_v52, %v4350_v15  ;;  %5053 = vst.msk [vmem:[#allocation2 + $0x11b] sm:$0xff] %vm247_vm1, %v5017_v17  ;;  %vm3947_vm7 = vc.u32 %v3939_v61, %v3943_v13  ;;  %v3929_v60 = vmul.u32 18, %v3928_v26  ;;  %v3949_v14 = vadd.s32 %v3943_v13, %v3939_v61 }
 0x3af   : > { %v4465_v1 = vsel %vm247_vm1, %v4397_v22, 0.0  ;;  %v3948_v29 = vsel %vm3947_vm7, 1, %v13357_v55  ;;  %v4585_v27 = vsel %vm4514_vm6, %v4582_v25, %v4584_v0  ;;  %v4694_v56 = vsel %vm4623_vm14, %v4691_v46, %v4693_v30 }
 0x3b0   : > { %v4466_v23 = vadd.f32 %v4465_v1, %v4464_v18  ;;  %v3950_v40 = vadd.s32 %v3948_v29, %v3942_v53  ;;  %v3930_v6 = vsub.s32 %v11663_v28, %v3929_v60  ;;  %v3944_v62 = vshrl.u32 %v3940_v49, 16 }
 0x3b1   : > { %vm3951_vm12 = vc.u32 %v3949_v14, %v3945_v45  ;;  %v3946_v15 = vshrl.u32 %v3941_v10, 16 }
 0x3b2   : > { %v3952_v39 = vsel %vm3951_vm12, 1, %v13357_v55  ;;  %vm3996_vm10 = vcmp.ne.s32.totalorder %v3930_v6, 0  ;;  %vm4032_vm11 = vcmp.lt.s32.totalorder %v3930_v6, 0  ;;  %v4104_v44 = vadd.s32 18, %v3930_v6 }
 0x3b3   : > { %v3954_v20 = vadd.s32 %v3952_v39, %v3950_v40  ;;  %vm4068_vm8 = vmand %vm4032_vm11, %vm3996_vm10 }
 0x3b4   : > { %v11784_v38 = vsel %vm4068_vm8, %v4104_v44, %v3930_v6 }
 0x3b5   : > { %13428 = vst [vmem:[#allocation27_spill] sm:$0xff] %v11784_v38  ;;  %v5066_v18 = vld [vmem:[#allocation2 + $0x116] sm:$0xff]  ;;  %v5067_v61 = vld [vmem:[#allocation2 + $0x11e] sm:$0x3]  ;;  %v3955_v53 = vadd.s32 %v3954_v20, %v3944_v62  ;;  %vm4176_vm6 = vcmp.lt.s32.totalorder %v11784_v38, 16  ;;  %vm4766_vm7 = vcmp.eq.s32.totalorder %v11784_v38, 16 }
 0x3b6   : > { %vm4802_vm4 = vcmp.eq.s32.totalorder %v11784_v38, 17  ;;  %5069 = vst.msk [vmem:[#allocation2 + $0x13a] sm:$0xff] %vm247_vm1, %v5066_v18  ;;  %v4284_v55 = vsel %vm4176_vm6, %v11732_v54, 0.0 }
 0x3b7   : > { %5070 = vst.msk [vmem:[#allocation2 + $0x142] sm:$0x3] %vm5063_vm5, %v5067_v61  ;;  %v3956_v28 = vadd.s32 %v3955_v53, %v3946_v15  ;;  %v4910_v25 = vsel %vm4802_vm4, %v4694_v56, %v11732_v54  ;;  %v4353_v46 = vsel %vm247_vm1, %v4284_v55, 0.0  ;;  %v4398_v49 = vmul.f32 %v4284_v55, %v4284_v55 }
 0x3b8   : > { %v5018_v10 = vsel %vm4766_vm7, %v11752_v8, %v4910_v25  ;;  %v4354_v0 = vadd.f32 %v4353_v46, %v4352_v43  ;;  %v4731_v54 = vsel %vm4623_vm14, %v4693_v30, %v11757_v33  ;;  %v5065_v30 = vld [vmem:[#allocation2 + $0x10e] sm:$0xff] }
 0x3b9   : > { %v3957_v13 = vshrl.u32 %v3956_v28, 4  ;;  %5054 = vst.msk [vmem:[#allocation2 + $0x123] sm:$0xff] %vm247_vm1, %v5018_v10  ;;  %v4467_v52 = vsel %vm247_vm1, %v4398_v49, 0.0  ;;  %v5295_v49 = vld [vmem:[%s13240_s2 + $0x8] sm:$0xf] }
 0x3ba   : > { %v4468_v22 = vadd.f32 %v4467_v52, %v4466_v23  ;;  %8971 = vmatpush.msk.msrb.mxu3 %vm356_vm0, %v5295_v49 }
 0x3bb   : > { %v3958_v26 = vmul.u32 18, %v3957_v13  ;;  %v9008_v13 = vld [vmem:[%s13240_s2 + $0x10] sm:$0xff] }
 0x3bc   : > { %9010 = vmatpush.msk.msrb.mxu0 %vm356_vm0, %v9008_v13  ;;  %v6495_v52 = vrot.slane %v9008_v13, 4 }
 0x3bd   : > { %v3959_v17 = vsub.s32 %v11729_v47, %v3958_v26 }
 0x3be   : > { %9047 = vmatpush.msk.msrb.mxu1 %vm356_vm0, %v6495_v52 }
 0x3bf   : > { %vm3997_vm12 = vcmp.ne.s32.totalorder %v3959_v17, 0  ;;  %vm4033_vm10 = vcmp.lt.s32.totalorder %v3959_v17, 0  ;;  %v4105_v45 = vadd.s32 18, %v3959_v17 }
 0x3c0   : > { %vm4069_vm11 = vmand %vm4033_vm10, %vm3997_vm12 }
 0x3c1   : > { %v11802_v1 = vsel %vm4069_vm11, %v4105_v45, %v3959_v17 }
 0x3c2   : > { %13429 = vst [vmem:[#allocation28_spill] sm:$0xff] %v11802_v1  ;;  %vm4177_vm4 = vcmp.lt.s32.totalorder %v11802_v1, 16  ;;  %vm4767_vm8 = vcmp.eq.s32.totalorder %v11802_v1, 16  ;;  %vm4803_vm7 = vcmp.eq.s32.totalorder %v11802_v1, 17 }
 0x3c3   : > { %v4285_v8 = vsel %vm4177_vm4, %v11757_v33, 0.0  ;;  %v4911_v47 = vsel %vm4803_vm7, %v4731_v54, %v11757_v33  ;;  %vm13466_vm7 = vcmp.lt.s32.totalorder %v10912_v9, 16 }
 0x3c4   : > { %v4355_v43 = vsel %vm247_vm1, %v4285_v8, 0.0  ;;  %v4399_v60 = vmul.f32 %v4285_v8, %v4285_v8  ;;  %v5019_v29 = vsel %vm4767_vm8, %v4585_v27, %v4911_v47  ;;  %v5121_v8 = vld [vmem:[#allocation2 + $0x108] sm:$0xff] }
 0x3c5   : > { %v4356_v14 = vadd.f32 %v4355_v43, %v4354_v0  ;;  %5055 = vst.msk [vmem:[#allocation2 + $0x12b] sm:$0xff] %vm247_vm1, %v5019_v29  ;;  %v5268_v43 = vld [vmem:[#allocation2 + $0x120] sm:$0xff] }
 0x3c6   : > { %v4469_v23 = vsel %vm247_vm1, %v4399_v60, 0.0  ;;  %5068 = vst.msk [vmem:[#allocation2 + $0x132] sm:$0xff] %vm247_vm1, %v5065_v30 }
 0x3c7   : > { %v4357_v40 = vrot.slane %v4356_v14, 4  ;;  %v4470_v56 = vadd.f32 %v4469_v23, %v4468_v22 }
 0x3c9   : > { %v4358_v6 = vadd.f32 %v4357_v40, %v4356_v14  ;;  %v4471_v62 = vrot.slane %v4470_v56, 4 }
 0x3cb   : > { %v4359_v15 = vrot.slane %v4358_v6, 2  ;;  %v4472_v39 = vadd.f32 %v4471_v62, %v4470_v56 }
 0x3cc   : > { %v5269_v60 = vld [vmem:[#allocation2 + $0x128] sm:$0xff] }
 0x3cd   : > { %v4360_v44 = vadd.f32 %v4359_v15, %v4358_v6  ;;  %v4473_v33 = vrot.slane %v4472_v39, 2  ;;  %v5270_v29 = vld [vmem:[#allocation2 + $0x130] sm:$0xff]  ;;  %v5271_v30 = vld [vmem:[#allocation2 + $0x138] sm:$0xff] }
 0x3cf   : > { %v4361_v20 = vrot.slane %v4360_v44, 1  ;;  %v4474_v18 = vadd.f32 %v4473_v33, %v4472_v39 }
 0x3d1   : > { %v4362_v61 = vadd.f32 %v4361_v20, %v4360_v44  ;;  %v4475_v27 = vrot.slane %v4474_v18, 1 }
 0x3d3   : > { %v4476_v53 = vadd.f32 %v4475_v27, %v4474_v18  ;;  %v11815_v55 = vmul.f32 0.00390625, %v4362_v61  ;;  %v5091_v18 = vld [vmem:[#allocation2 + $0x18] sm:$0xff] }
 0x3d5   : > { %v5073_v28 = vmul.f32 0.00390625, %v4476_v53  ;;  %v5074_v25 = vmul.f32 %v11815_v55, %v11815_v55  ;;  %v5157_v14 = vsub.f32 %v5121_v8, %v11815_v55  ;;  %v5273_v23 = vsub.f32 %v5268_v43, %v11815_v55  ;;  %v5099_v8 = vld [vmem:[#allocation2 + $0x58] sm:$0xff] }
 0x3d6   : > { %v5274_v40 = vsub.f32 %v5269_v60, %v11815_v55  ;;  %v5275_v56 = vsub.f32 %v5270_v29, %v11815_v55  ;;  %v5276_v62 = vsub.f32 %v5271_v30, %v11815_v55  ;;  %v5135_v30 = vsub.f32 %v5099_v8, %v11815_v55  ;;  %v5107_v8 = vld [vmem:[#allocation2 + $0x98] sm:$0xff] }
 0x3d7   : > { %v5075_v46 = vsub.f32 %v5073_v28, %v5074_v25  ;;  %v5094_v28 = vld [vmem:[#allocation2 + $0x30] sm:$0xff]  ;;  %v5095_v25 = vld [vmem:[#allocation2 + $0x38] sm:$0xff] }
 0x3d8   : > { %v5130_v52 = vsub.f32 %v5094_v28, %v11815_v55 }
 0x3d9   : > { %v5076_v10 = vmax.f32 %v5075_v46, 0.0  ;;  %v5096_v46 = vld [vmem:[#allocation2 + $0x40] sm:$0xff] }
 0x3db   : > { %v5077_v0 = vadd.f32 1e-05, %v5076_v10  ;;  %v5127_v10 = vsub.f32 %v5091_v18, %v11815_v55  ;;  %v5103_v18 = vld [vmem:[#allocation2 + $0x78] sm:$0xff] }
 0x3dd   : > { %9250 = vrsqrt.f32 %v5077_v0  ;;  %vm5084_vm12 = vweird.f32 %v5077_v0 }
 0x3e3   : > { %v9251_v22 = vpop.eup %9250 }
 0x3e4   : > { %v5079_v26 = vmul.f32 %v9251_v22, %v5077_v0  ;;  %vm5085_vm14 = vweird.f32 %v9251_v22  ;;  %v5097_v0 = vld [vmem:[#allocation2 + $0x48] sm:$0xff] }
 0x3e5   : > { %vm5086_vm10 = vmor %vm5084_vm12, %vm5085_vm14  ;;  %vm13467_vm14 = vcmp.lt.s32.totalorder %v10951_v57, 16  ;;  %vm13468_vm12 = vcmp.lt.s32.totalorder %v11002_v50, 16 }
 0x3e6   : > { %v5080_v17 = vmul.f32 %v9251_v22, %v5079_v26  ;;  %v5132_v26 = vsub.f32 %v5096_v46, %v11815_v55  ;;  %v5139_v46 = vsub.f32 %v5103_v18, %v11815_v55  ;;  %v5111_v18 = vld [vmem:[#allocation2 + $0xb8] sm:$0xff] }
 0x3e8   : > { %v5081_v45 = vmul.f32 0.5, %v5080_v17  ;;  %v5098_v17 = vld [vmem:[#allocation2 + $0x50] sm:$0xff] }
 0x3ea   : > { %v5082_v54 = vsub.f32 1.5, %v5081_v45  ;;  %v5133_v45 = vsub.f32 %v5097_v0, %v11815_v55  ;;  %v5105_v0 = vld [vmem:[#allocation2 + $0x88] sm:$0xff] }
 0x3ec   : > { %v5083_v47 = vmul.f32 %v9251_v22, %v5082_v54 }
 0x3ee   : > { %v11832_v6 = vsel %vm5086_vm10, %v9251_v22, %v5083_v47  ;;  %v5131_v22 = vsub.f32 %v5095_v25, %v11815_v55  ;;  %v5134_v47 = vsub.f32 %v5098_v17, %v11815_v55  ;;  %v5104_v25 = vld [vmem:[#allocation2 + $0x80] sm:$0xff]  ;;  %v5141_v17 = vsub.f32 %v5105_v0, %v11815_v55 }
 0x3ef   : > { %v5193_v15 = vmul.f32 %v5157_v14, %v11832_v6  ;;  %v5278_v39 = vmul.f32 %v5273_v23, %v11832_v6  ;;  %v5279_v44 = vmul.f32 %v5274_v40, %v11832_v6  ;;  %v5280_v33 = vmul.f32 %v5275_v56, %v11832_v6  ;;  %v5100_v14 = vld [vmem:[#allocation2 + $0x60] sm:$0xff]  ;;  %v5101_v40 = vld [vmem:[#allocation2 + $0x68] sm:$0xff]  ;;  %v5102_v56 = vld [vmem:[#allocation2 + $0x70] sm:$0xff] }
 0x3f0   : > { %v5281_v20 = vmul.f32 %v5276_v62, %v11832_v6  ;;  %v5163_v54 = vmul.f32 %v5127_v10, %v11832_v6  ;;  %v5166_v43 = vmul.f32 %v5130_v52, %v11832_v6  ;;  %v5167_v60 = vmul.f32 %v5131_v22, %v11832_v6 }
 0x3f1   : > { %v5229_v61 = vmax.f32 %v5193_v15, 0.0  ;;  %v5283_v27 = vmax.f32 %v5278_v39, 0.0  ;;  %v5284_v53 = vmax.f32 %v5279_v44, 0.0  ;;  %v5285_v49 = vmax.f32 %v5280_v33, 0.0 }
 0x3f2   : > { %v5286_v13 = vmax.f32 %v5281_v20, 0.0  ;;  %v5168_v29 = vmul.f32 %v5132_v26, %v11832_v6  ;;  %v5169_v23 = vmul.f32 %v5133_v45, %v11832_v6  ;;  %v5136_v62 = vsub.f32 %v5100_v14, %v11815_v55  ;;  %v5106_v26 = vld [vmem:[#allocation2 + $0x90] sm:$0xff] }
 0x3f3   : > { %5265 = vst.msk [vmem:[#allocation2 + $0x108] sm:$0xff] %vm247_vm1, %v5229_v61  ;;  %v5170_v15 = vmul.f32 %v5134_v47, %v11832_v6  ;;  %v5137_v39 = vsub.f32 %v5101_v40, %v11815_v55  ;;  %v5138_v44 = vsub.f32 %v5102_v56, %v11815_v55  ;;  %v5171_v33 = vmul.f32 %v5135_v30, %v11832_v6  ;;  %v5109_v40 = vld [vmem:[#allocation2 + $0xa8] sm:$0xff] }
 0x3f4   : > { %5288 = vst.msk [vmem:[#allocation2 + $0x120] sm:$0xff] %vm247_vm1, %v5283_v27  ;;  %v5199_v20 = vmax.f32 %v5163_v54, 0.0  ;;  %v5172_v61 = vmul.f32 %v5136_v62, %v11832_v6  ;;  %v5202_v27 = vmax.f32 %v5166_v43, 0.0  ;;  %v5204_v28 = vmax.f32 %v5168_v29, 0.0  ;;  %v5108_v29 = vld [vmem:[#allocation2 + $0xa0] sm:$0xff] }
 0x3f5   : > { %5289 = vst.msk [vmem:[#allocation2 + $0x128] sm:$0xff] %vm247_vm1, %v5284_v53  ;;  %v5203_v53 = vmax.f32 %v5167_v60, 0.0  ;;  %v5205_v10 = vmax.f32 %v5169_v23, 0.0  ;;  %v5174_v52 = vmul.f32 %v5138_v44, %v11832_v6  ;;  %v5206_v22 = vmax.f32 %v5170_v15, 0.0 }
 0x3f6   : > { %5290 = vst.msk [vmem:[#allocation2 + $0x130] sm:$0xff] %vm247_vm1, %v5285_v49  ;;  %v5173_v49 = vmul.f32 %v5137_v39, %v11832_v6  ;;  %v5175_v45 = vmul.f32 %v5139_v46, %v11832_v6  ;;  %v5207_v54 = vmax.f32 %v5171_v33, 0.0  ;;  %v5142_v47 = vsub.f32 %v5106_v26, %v11815_v55  ;;  %v5110_v39 = vld [vmem:[#allocation2 + $0xb0] sm:$0xff] }
 0x3f7   : > { %5291 = vst.msk [vmem:[#allocation2 + $0x138] sm:$0xff] %vm247_vm1, %v5286_v13  ;;  %v5140_v13 = vsub.f32 %v5104_v25, %v11815_v55  ;;  %v5208_v60 = vmax.f32 %v5172_v61, 0.0  ;;  %v5143_v14 = vsub.f32 %v5107_v8, %v11815_v55  ;;  %v5177_v30 = vmul.f32 %v5141_v17, %v11832_v6 }
 0x3f8   : > { %5235 = vst.msk [vmem:[#allocation2 + $0x18] sm:$0xff] %vm247_vm1, %v5199_v20  ;;  %v5209_v23 = vmax.f32 %v5173_v49, 0.0  ;;  %v5144_v56 = vsub.f32 %v5108_v29, %v11815_v55  ;;  %v5178_v62 = vmul.f32 %v5142_v47, %v11832_v6  ;;  %v5210_v15 = vmax.f32 %v5174_v52, 0.0 }
 0x3f9   : > { %5238 = vst.msk [vmem:[#allocation2 + $0x30] sm:$0xff] %vm247_vm1, %v5202_v27  ;;  %v5176_v43 = vmul.f32 %v5140_v13, %v11832_v6  ;;  %v5145_v44 = vsub.f32 %v5109_v40, %v11815_v55  ;;  %v5179_v33 = vmul.f32 %v5143_v14, %v11832_v6  ;;  %v5211_v20 = vmax.f32 %v5175_v45, 0.0 }
 0x3fa   : > { %5239 = vst.msk [vmem:[#allocation2 + $0x38] sm:$0xff] %vm247_vm1, %v5203_v53  ;;  %v5146_v61 = vsub.f32 %v5110_v39, %v11815_v55  ;;  %v5180_v27 = vmul.f32 %v5144_v56, %v11832_v6  ;;  %v5147_v25 = vsub.f32 %v5111_v18, %v11815_v55  ;;  %v5213_v49 = vmax.f32 %v5177_v30, 0.0 }
 0x3fb   : > { %5240 = vst.msk [vmem:[#allocation2 + $0x40] sm:$0xff] %vm247_vm1, %v5204_v28  ;;  %v5212_v53 = vmax.f32 %v5176_v43, 0.0  ;;  %v5112_v28 = vld [vmem:[#allocation2 + $0xc0] sm:$0xff]  ;;  %v5181_v46 = vmul.f32 %v5145_v44, %v11832_v6  ;;  %v5214_v52 = vmax.f32 %v5178_v62, 0.0  ;;  %v5215_v45 = vmax.f32 %v5179_v33, 0.0 }
 0x3fc   : > { %5241 = vst.msk [vmem:[#allocation2 + $0x48] sm:$0xff] %vm247_vm1, %v5205_v10  ;;  %v5113_v10 = vld [vmem:[#allocation2 + $0xc8] sm:$0xff]  ;;  %v5148_v0 = vsub.f32 %v5112_v28, %v11815_v55  ;;  %v5182_v13 = vmul.f32 %v5146_v61, %v11832_v6  ;;  %v5183_v17 = vmul.f32 %v5147_v25, %v11832_v6  ;;  %v5216_v43 = vmax.f32 %v5180_v27, 0.0 }
 0x3fd   : > { %5242 = vst.msk [vmem:[#allocation2 + $0x50] sm:$0xff] %vm247_vm1, %v5206_v22  ;;  %v5114_v22 = vld [vmem:[#allocation2 + $0xd0] sm:$0xff]  ;;  %v5149_v26 = vsub.f32 %v5113_v10, %v11815_v55  ;;  %v5217_v30 = vmax.f32 %v5181_v46, 0.0  ;;  %vm13469_vm10 = vcmp.lt.s32.totalorder %v11049_v2, 16 }
 0x3fe   : > { %5243 = vst.msk [vmem:[#allocation2 + $0x58] sm:$0xff] %vm247_vm1, %v5207_v54  ;;  %v5115_v54 = vld [vmem:[#allocation2 + $0xd8] sm:$0xff]  ;;  %v5150_v8 = vsub.f32 %v5114_v22, %v11815_v55  ;;  %v5184_v47 = vmul.f32 %v5148_v0, %v11832_v6  ;;  %v5218_v62 = vmax.f32 %v5182_v13, 0.0  ;;  %v5219_v33 = vmax.f32 %v5183_v17, 0.0  ;;  %v5088_v17 = vld [vmem:[#allocation2] sm:$0xff] }
 0x3ff   : > { %5244 = vst.msk [vmem:[#allocation2 + $0x60] sm:$0xff] %vm247_vm1, %v5208_v60  ;;  %v5116_v60 = vld [vmem:[#allocation2 + $0xe0] sm:$0xff]  ;;  %v5151_v29 = vsub.f32 %v5115_v54, %v11815_v55  ;;  %v5185_v14 = vmul.f32 %v5149_v26, %v11832_v6 }
 0x400   : > { %5245 = vst.msk [vmem:[#allocation2 + $0x68] sm:$0xff] %vm247_vm1, %v5209_v23  ;;  %v5117_v23 = vld [vmem:[#allocation2 + $0xe8] sm:$0xff]  ;;  %v5152_v40 = vsub.f32 %v5116_v60, %v11815_v55  ;;  %v5186_v56 = vmul.f32 %v5150_v8, %v11832_v6  ;;  %v5220_v27 = vmax.f32 %v5184_v47, 0.0  ;;  %v5124_v47 = vsub.f32 %v5088_v17, %v11815_v55 }
 0x401   : > { %5246 = vst.msk [vmem:[#allocation2 + $0x70] sm:$0xff] %vm247_vm1, %v5210_v15  ;;  %v5118_v15 = vld [vmem:[#allocation2 + $0xf0] sm:$0xff]  ;;  %v5153_v39 = vsub.f32 %v5117_v23, %v11815_v55  ;;  %v5187_v44 = vmul.f32 %v5151_v29, %v11832_v6  ;;  %v5221_v46 = vmax.f32 %v5185_v14, 0.0  ;;  %v5089_v8 = vld [vmem:[#allocation2 + $0x8] sm:$0xff] }
 0x402   : > { %5247 = vst.msk [vmem:[#allocation2 + $0x78] sm:$0xff] %vm247_vm1, %v5211_v20  ;;  %v5119_v20 = vld [vmem:[#allocation2 + $0xf8] sm:$0xff]  ;;  %v5154_v18 = vsub.f32 %v5118_v15, %v11815_v55  ;;  %v5188_v61 = vmul.f32 %v5152_v40, %v11832_v6  ;;  %v5222_v13 = vmax.f32 %v5186_v56, 0.0  ;;  %v5125_v29 = vsub.f32 %v5089_v8, %v11815_v55  ;;  %v5090_v14 = vld [vmem:[#allocation2 + $0x10] sm:$0xff]  ;;  %v5092_v56 = vld [vmem:[#allocation2 + $0x20] sm:$0xff] }
 0x403   : > { %5248 = vst.msk [vmem:[#allocation2 + $0x80] sm:$0xff] %vm247_vm1, %v5212_v53  ;;  %v5120_v53 = vld [vmem:[#allocation2 + $0x100] sm:$0xff]  ;;  %v5155_v28 = vsub.f32 %v5119_v20, %v11815_v55  ;;  %v5189_v25 = vmul.f32 %v5153_v39, %v11832_v6  ;;  %v5223_v26 = vmax.f32 %v5187_v44, 0.0  ;;  %v5160_v23 = vmul.f32 %v5124_v47, %v11832_v6  ;;  %v5093_v44 = vld [vmem:[#allocation2 + $0x28] sm:$0xff] }
 0x404   : > { %5249 = vst.msk [vmem:[#allocation2 + $0x88] sm:$0xff] %vm247_vm1, %v5213_v49  ;;  %v5123_v49 = vld [vmem:[#allocation2 + $0x118] sm:$0xff]  ;;  %v5156_v10 = vsub.f32 %v5120_v53, %v11815_v55  ;;  %v5190_v0 = vmul.f32 %v5154_v18, %v11832_v6  ;;  %v5224_v54 = vmax.f32 %v5188_v61, 0.0  ;;  %v5126_v40 = vsub.f32 %v5090_v14, %v11815_v55  ;;  %v5122_v61 = vld [vmem:[#allocation2 + $0x110] sm:$0xff] }
 0x405   : > { %5250 = vst.msk [vmem:[#allocation2 + $0x90] sm:$0xff] %vm247_vm1, %v5214_v52  ;;  %v5159_v52 = vsub.f32 %v5123_v49, %v11815_v55  ;;  %v5191_v22 = vmul.f32 %v5155_v28, %v11832_v6  ;;  %v5225_v60 = vmax.f32 %v5189_v25, 0.0  ;;  %v5161_v15 = vmul.f32 %v5125_v29, %v11832_v6  ;;  %v7084_v12 = vld [vmem:[#allocation2 + $0x54] sm:$0xff] }
 0x406   : > { %5251 = vst.msk [vmem:[#allocation2 + $0x98] sm:$0xff] %vm247_vm1, %v5215_v45  ;;  %v5192_v45 = vmul.f32 %v5156_v10, %v11832_v6  ;;  %v5128_v39 = vsub.f32 %v5092_v56, %v11815_v55  ;;  %v5162_v20 = vmul.f32 %v5126_v40, %v11832_v6  ;;  %v5129_v18 = vsub.f32 %v5093_v44, %v11815_v55  ;;  %v5299_v40 = vld [vmem:[#allocation2 + $0x18] sm:$0xff] }
 0x407   : > { %5252 = vst.msk [vmem:[#allocation2 + $0xa0] sm:$0xff] %vm247_vm1, %v5216_v43  ;;  %v5195_v43 = vmul.f32 %v5159_v52, %v11832_v6  ;;  %v5158_v28 = vsub.f32 %v5122_v61, %v11815_v55  ;;  %v5196_v25 = vmax.f32 %v5160_v23, 0.0  ;;  %v5197_v49 = vmax.f32 %v5161_v15, 0.0  ;;  %v6155_v44 = vld [vmem:[#allocation2 + $0x32] sm:$0xff]  ;;  %v6468_v58 = vld [vmem:[#allocation2 + $0x5b] sm:$0xff] }
 0x408   : > { %5253 = vst.msk [vmem:[#allocation2 + $0xa8] sm:$0xff] %vm247_vm1, %v5217_v30  ;;  %v5226_v30 = vmax.f32 %v5190_v0, 0.0  ;;  %v5164_v53 = vmul.f32 %v5128_v39, %v11832_v6  ;;  %v5198_v0 = vmax.f32 %v5162_v20, 0.0  ;;  %v6470_v32 = vld [vmem:[#allocation2 + $0x6b] sm:$0xff] }
 0x409   : > { %5254 = vst.msk [vmem:[#allocation2 + $0xb0] sm:$0xff] %vm247_vm1, %v5218_v62  ;;  %v5227_v62 = vmax.f32 %v5191_v22, 0.0  ;;  %v5194_v10 = vmul.f32 %v5158_v28, %v11832_v6  ;;  %v5338_v28 = vld [vmem:[#allocation2 + $0x31] sm:$0xff] }
 0x40a   : > { %5255 = vst.msk [vmem:[#allocation2 + $0xb8] sm:$0xff] %vm247_vm1, %v5219_v33  ;;  %v5228_v33 = vmax.f32 %v5192_v45, 0.0 }
 0x40b   : > { %5256 = vst.msk [vmem:[#allocation2 + $0xc0] sm:$0xff] %vm247_vm1, %v5220_v27  ;;  %v5231_v27 = vmax.f32 %v5195_v43, 0.0  ;;  %v5230_v22 = vmax.f32 %v5194_v10, 0.0  ;;  %v5303_v10 = vld [vmem:[#allocation2 + $0x38] sm:$0xff] }
 0x40c   : > { %5257 = vst.msk [vmem:[#allocation2 + $0xc8] sm:$0xff] %vm247_vm1, %v5221_v46  ;;  %v5165_v46 = vmul.f32 %v5129_v18, %v11832_v6  ;;  %v6156_v18 = vld [vmem:[#allocation2 + $0x3a] sm:$0xff] }
 0x40d   : > { %5258 = vst.msk [vmem:[#allocation2 + $0xd0] sm:$0xff] %vm247_vm1, %v5222_v13  ;;  %v5200_v13 = vmax.f32 %v5164_v53, 0.0  ;;  %v5302_v53 = vld [vmem:[#allocation2 + $0x30] sm:$0xff] }
 0x40e   : > { %5259 = vst.msk [vmem:[#allocation2 + $0xd8] sm:$0xff] %vm247_vm1, %v5223_v26  ;;  %v5201_v52 = vmax.f32 %v5165_v46, 0.0  ;;  %v9267_v26 = vmov 0.0   ;;  %v6157_v46 = vld [vmem:[#allocation2 + $0x42] sm:$0xff] }
 0x40f   : > { %5260 = vst.msk [vmem:[#allocation2 + $0xe0] sm:$0xff] %vm247_vm1, %v5224_v54 }
 0x410   : > { %5261 = vst.msk [vmem:[#allocation2 + $0xe8] sm:$0xff] %vm247_vm1, %v5225_v60 }
 0x411   : > { %5262 = vst.msk [vmem:[#allocation2 + $0xf0] sm:$0xff] %vm247_vm1, %v5226_v30 }
 0x412   : > { %5263 = vst.msk [vmem:[#allocation2 + $0xf8] sm:$0xff] %vm247_vm1, %v5227_v62 }
 0x413   : > { %5264 = vst.msk [vmem:[#allocation2 + $0x100] sm:$0xff] %vm247_vm1, %v5228_v33 }
 0x414   : > { %5267 = vst.msk [vmem:[#allocation2 + $0x118] sm:$0xff] %vm247_vm1, %v5231_v27 }
 0x415   : > { %5232 = vst.msk [vmem:[#allocation2] sm:$0xff] %vm247_vm1, %v5196_v25 }
 0x416   : > { %5233 = vst.msk [vmem:[#allocation2 + $0x8] sm:$0xff] %vm247_vm1, %v5197_v49 }
 0x417   : > { %5234 = vst.msk [vmem:[#allocation2 + $0x10] sm:$0xff] %vm247_vm1, %v5198_v0  ;;  %v5339_v0 = vld [vmem:[#allocation2 + $0x39] sm:$0xff] }
 0x418   : > { %5236 = vst.msk [vmem:[#allocation2 + $0x20] sm:$0xff] %vm247_vm1, %v5200_v13  ;;  %v5340_v13 = vld [vmem:[#allocation2 + $0x41] sm:$0xff]  ;;  %v7719_v4 = vld [vmem:[#allocation2 + $0xee] sm:$0xff] }
 0x419   : > { %5237 = vst.msk [vmem:[#allocation2 + $0x28] sm:$0xff] %vm247_vm1, %v5201_v52  ;;  %v6159_v52 = vld [vmem:[#allocation2 + $0x52] sm:$0xff] }
 0x41a   : > { %5266 = vst.msk [vmem:[#allocation2 + $0x110] sm:$0xff] %vm247_vm1, %v5230_v22  ;;  %v5305_v22 = vld [vmem:[#allocation2 + $0x48] sm:$0xff] }
 0x41b   : > { %5071 = vst.msk [vmem:[#allocation2 + $0x144] sm:$0x3] %vm5063_vm5, %v9267_v26  ;;  %vm5292_vm5 = vcmask 29696   ;;  %v5341_v26 = vld [vmem:[#allocation2 + $0x49] sm:$0xff] }
 0x41c   : > { %v5296_v17 = vld [vmem:[#allocation2] sm:$0xff] }
 0x41d   : > { %v5332_v45 = vld [vmem:[#allocation2 + $0x1] sm:$0xff]  ;;  %8935 = vmatmul.msk.f32.vlgmr.msrb.gmra.mxu2 %vm247_vm1, %v5296_v17 }
 0x41e   : > { %v5840_v54 = vld [vmem:[#allocation2 + $0x2] sm:$0xff]  ;;  %8898 = vmatmul.msk.f32.vlgmr.msra.gmra.mxu1 %vm247_vm1, %v5332_v45  ;;  %v6151_v8 = vld [vmem:[#allocation2 + $0x12] sm:$0xff]  ;;  %v5841_v60 = vld [vmem:[#allocation2 + $0xa] sm:$0xff] }
 0x41f   : > { %8972 = vmatmul.msk.f32.vlgmr.msrb.gmra.mxu3 %vm247_vm1, %v5840_v54  ;;  %9011 = vmatmul.msk.f32.vlgmr.msrb.gmra.mxu0 %vm247_vm1, %v6151_v8  ;;  %v5297_v47 = vld [vmem:[#allocation2 + $0x8] sm:$0xff]  ;;  %v6152_v29 = vld [vmem:[#allocation2 + $0x1a] sm:$0xff]  ;;  %v5298_v14 = vld [vmem:[#allocation2 + $0x10] sm:$0xff] }
 0x420   : > { %v5333_v43 = vld [vmem:[#allocation2 + $0x9] sm:$0xff]  ;;  %v5334_v30 = vld [vmem:[#allocation2 + $0x11] sm:$0xff]  ;;  %v5335_v56 = vld [vmem:[#allocation2 + $0x19] sm:$0xff] }
 0x421   : > { %v6153_v23 = vld [vmem:[#allocation2 + $0x22] sm:$0xff]  ;;  %v6154_v62 = vld [vmem:[#allocation2 + $0x2a] sm:$0xff]  ;;  %v6160_v17 = vld [vmem:[#allocation2 + $0x5a] sm:$0xff] }
 0x422   : > { %v5300_v15 = vld [vmem:[#allocation2 + $0x20] sm:$0xff]  ;;  %v5301_v33 = vld [vmem:[#allocation2 + $0x28] sm:$0xff]  ;;  %v5306_v45 = vld [vmem:[#allocation2 + $0x50] sm:$0xff] }
 0x423   : > { %v5336_v39 = vld [vmem:[#allocation2 + $0x21] sm:$0xff]  ;;  %v5337_v20 = vld [vmem:[#allocation2 + $0x29] sm:$0xff]  ;;  %v5342_v54 = vld [vmem:[#allocation2 + $0x51] sm:$0xff] }
 0x424   : > { %v5272_v61 = vld [vmem:[#allocation2 + $0x140] sm:$0x3f] }
 0x425   : > { %8936 = vmatmul.msk.f32.gmra.mxu2 %vm247_vm1, %v5297_v47  ;;  %v5277_v27 = vsub.f32 %v5272_v61, %v11815_v55  ;;  %v6158_v55 = vld [vmem:[#allocation2 + $0x4a] sm:$0xff]  ;;  %v5307_v47 = vld [vmem:[#allocation2 + $0x58] sm:$0xff] }
 0x426   : > { %8899 = vmatmul.msk.f32.gmra.mxu1 %vm247_vm1, %v5333_v43  ;;  %v5343_v43 = vld [vmem:[#allocation2 + $0x59] sm:$0xff] }
 0x427   : > { %8973 = vmatmul.msk.f32.gmra.mxu3 %vm247_vm1, %v5841_v60  ;;  %9012 = vmatmul.msk.f32.gmra.mxu0 %vm247_vm1, %v6152_v29  ;;  %v5282_v25 = vmul.f32 %v5277_v27, %v11832_v6  ;;  %v5304_v6 = vld [vmem:[#allocation2 + $0x40] sm:$0xff]  ;;  %v6162_v60 = vld [vmem:[#allocation2 + $0x6a] sm:$0xff] }
 0x428   : > { %v5312_v27 = vld [vmem:[#allocation2 + $0x80] sm:$0xff] }
 0x429   : > { %v5287_v49 = vmax.f32 %v5282_v25, 0.0 }
 0x42b   : > { %5293 = vst.msk [vmem:[#allocation2 + $0x140] sm:$0x3f] %vm5292_vm5, %v5287_v49  ;;  %vm13470_vm5 = vcmp.lt.s32.totalorder %v11106_v21, 16 }
 0x42d   : > { %8937 = vmatmul.msk.f32.gmra.mxu2 %vm247_vm1, %v5298_v14  ;;  %v5344_v14 = vld [vmem:[#allocation2 + $0x61] sm:$0xff] }
 0x42e   : > { %8900 = vmatmul.msk.f32.gmra.mxu1 %vm247_vm1, %v5334_v30  ;;  %v6163_v30 = vld [vmem:[#allocation2 + $0x72] sm:$0xff] }
 0x42f   : > { %8974 = vmatmul.msk.f32.gmra.mxu3 %vm247_vm1, %v6151_v8  ;;  %9013 = vmatmul.msk.f32.gmra.mxu0 %vm247_vm1, %v6153_v23  ;;  %v6161_v8 = vld [vmem:[#allocation2 + $0x62] sm:$0xff] }
 0x435   : > { %8938 = vmatmul.msk.f32.gmra.mxu2 %vm247_vm1, %v5299_v40  ;;  %v5345_v40 = vld [vmem:[#allocation2 + $0x69] sm:$0xff] }
 0x436   : > { %8901 = vmatmul.msk.f32.gmra.mxu1 %vm247_vm1, %v5335_v56  ;;  %v6164_v56 = vld [vmem:[#allocation2 + $0x7a] sm:$0xff] }
 0x437   : > { %8975 = vmatmul.msk.f32.gmra.mxu3 %vm247_vm1, %v6152_v29  ;;  %9014 = vmatmul.msk.f32.gmra.mxu0 %vm247_vm1, %v6154_v62  ;;  %v5308_v29 = vld [vmem:[#allocation2 + $0x60] sm:$0xff] }
 0x43d   : > { %8939 = vmatmul.msk.f32.gmra.mxu2 %vm247_vm1, %v5300_v15  ;;  %v5346_v15 = vld [vmem:[#allocation2 + $0x71] sm:$0xff] }
 0x43e   : > { %8902 = vmatmul.msk.f32.gmra.mxu1 %vm247_vm1, %v5336_v39  ;;  %v6165_v39 = vld [vmem:[#allocation2 + $0x82] sm:$0xff] }
 0x43f   : > { %8976 = vmatmul.msk.f32.gmra.mxu3 %vm247_vm1, %v6153_v23  ;;  %9015 = vmatmul.msk.f32.gmra.mxu0 %vm247_vm1, %v6155_v44  ;;  %v5309_v23 = vld [vmem:[#allocation2 + $0x68] sm:$0xff] }
 0x445   : > { %8940 = vmatmul.msk.f32.gmra.mxu2 %vm247_vm1, %v5301_v33  ;;  %v5347_v33 = vld [vmem:[#allocation2 + $0x79] sm:$0xff] }
 0x446   : > { %8903 = vmatmul.msk.f32.gmra.mxu1 %vm247_vm1, %v5337_v20  ;;  %v6166_v20 = vld [vmem:[#allocation2 + $0x8a] sm:$0xff] }
 0x447   : > { %8977 = vmatmul.msk.f32.gmra.mxu3 %vm247_vm1, %v6154_v62  ;;  %9016 = vmatmul.msk.f32.gmra.mxu0 %vm247_vm1, %v6156_v18  ;;  %v5310_v62 = vld [vmem:[#allocation2 + $0x70] sm:$0xff] }
 0x44d   : > { %8941 = vmatmul.msk.f32.gmra.mxu2 %vm247_vm1, %v5302_v53  ;;  %v5348_v53 = vld [vmem:[#allocation2 + $0x81] sm:$0xff] }
 0x44e   : > { %8904 = vmatmul.msk.f32.gmra.mxu1 %vm247_vm1, %v5338_v28  ;;  %v6167_v28 = vld [vmem:[#allocation2 + $0x92] sm:$0xff] }
 0x44f   : > { %8978 = vmatmul.msk.f32.gmra.mxu3 %vm247_vm1, %v6155_v44  ;;  %9017 = vmatmul.msk.f32.gmra.mxu0 %vm247_vm1, %v6157_v46  ;;  %v5311_v44 = vld [vmem:[#allocation2 + $0x78] sm:$0xff] }
 0x455   : > { %8942 = vmatmul.msk.f32.gmra.mxu2 %vm247_vm1, %v5303_v10 }
 0x456   : > { %8905 = vmatmul.msk.f32.gmra.mxu1 %vm247_vm1, %v5339_v0 }
 0x457   : > { %8979 = vmatmul.msk.f32.gmra.mxu3 %vm247_vm1, %v6156_v18  ;;  %9018 = vmatmul.msk.f32.gmra.mxu0 %vm247_vm1, %v6158_v55 }
 0x45d   : > { %8943 = vmatmul.msk.f32.gmra.mxu2 %vm247_vm1, %v5304_v6  ;;  %v5313_v6 = vld [vmem:[#allocation2 + $0x88] sm:$0xff] }
 0x45e   : > { %8906 = vmatmul.msk.f32.gmra.mxu1 %vm247_vm1, %v5340_v13  ;;  %v5349_v13 = vld [vmem:[#allocation2 + $0x89] sm:$0xff] }
 0x45f   : > { %8980 = vmatmul.msk.f32.gmra.mxu3 %vm247_vm1, %v6157_v46  ;;  %9019 = vmatmul.msk.f32.gmra.mxu0 %vm247_vm1, %v6159_v52 }
 0x465   : > { %8944 = vmatmul.msk.f32.gmra.mxu2 %vm247_vm1, %v5305_v22  ;;  %v6168_v22 = vld [vmem:[#allocation2 + $0x9a] sm:$0xff] }
 0x466   : > { %8907 = vmatmul.msk.f32.gmra.mxu1 %vm247_vm1, %v5341_v26 }
 0x467   : > { %8981 = vmatmul.msk.f32.gmra.mxu3 %vm247_vm1, %v6158_v55  ;;  %9020 = vmatmul.msk.f32.gmra.mxu0 %vm247_vm1, %v6160_v17 }
 0x46d   : > { %8945 = vmatmul.msk.f32.gmra.mxu2 %vm247_vm1, %v5306_v45 }
 0x46e   : > { %8908 = vmatmul.msk.f32.gmra.mxu1 %vm247_vm1, %v5342_v54 }
 0x46f   : > { %8982 = vmatmul.msk.f32.gmra.mxu3 %vm247_vm1, %v6159_v52  ;;  %9021 = vmatmul.msk.f32.gmra.mxu0 %vm247_vm1, %v6161_v8 }
 0x475   : > { %8946 = vmatmul.msk.f32.gmra.mxu2 %vm247_vm1, %v5307_v47 }
 0x476   : > { %8909 = vmatmul.msk.f32.gmra.mxu1 %vm247_vm1, %v5343_v43  ;;  %v5314_v43 = vld [vmem:[#allocation2 + $0x90] sm:$0xff] }
 0x477   : > { %8983 = vmatmul.msk.f32.gmra.mxu3 %vm247_vm1, %v6160_v17  ;;  %9022 = vmatmul.msk.f32.gmra.mxu0 %vm247_vm1, %v6162_v60 }
 0x47d   : > { %8947 = vmatmul.msk.f32.gmra.mxu2 %vm247_vm1, %v5308_v29 }
 0x47e   : > { %8910 = vmatmul.msk.f32.gmra.mxu1 %vm247_vm1, %v5344_v14  ;;  %v6169_v14 = vld [vmem:[#allocation2 + $0xa2] sm:$0xff] }
 0x47f   : > { %8984 = vmatmul.msk.f32.gmra.mxu3 %vm247_vm1, %v6161_v8  ;;  %9023 = vmatmul.msk.f32.gmra.mxu0 %vm247_vm1, %v6163_v30 }
 0x485   : > { %8948 = vmatmul.msk.f32.gmra.mxu2 %vm247_vm1, %v5309_v23 }
 0x486   : > { %8911 = vmatmul.msk.f32.gmra.mxu1 %vm247_vm1, %v5345_v40 }
 0x487   : > { %8985 = vmatmul.msk.f32.gmra.mxu3 %vm247_vm1, %v6162_v60  ;;  %9024 = vmatmul.msk.f32.gmra.mxu0 %vm247_vm1, %v6164_v56  ;;  %v5350_v60 = vld [vmem:[#allocation2 + $0x91] sm:$0xff] }
 0x48d   : > { %8949 = vmatmul.msk.f32.gmra.mxu2 %vm247_vm1, %v5310_v62 }
 0x48e   : > { %8912 = vmatmul.msk.f32.gmra.mxu1 %vm247_vm1, %v5346_v15 }
 0x48f   : > { %8986 = vmatmul.msk.f32.gmra.mxu3 %vm247_vm1, %v6163_v30  ;;  %9025 = vmatmul.msk.f32.gmra.mxu0 %vm247_vm1, %v6165_v39 }
 0x495   : > { %8950 = vmatmul.msk.f32.gmra.mxu2 %vm247_vm1, %v5311_v44  ;;  %v5351_v44 = vld [vmem:[#allocation2 + $0x99] sm:$0xff] }
 0x496   : > { %8913 = vmatmul.msk.f32.gmra.mxu1 %vm247_vm1, %v5347_v33 }
 0x497   : > { %8987 = vmatmul.msk.f32.gmra.mxu3 %vm247_vm1, %v6164_v56  ;;  %9026 = vmatmul.msk.f32.gmra.mxu0 %vm247_vm1, %v6166_v20 }
 0x49b   : > { %v5497_v18 = vpop.f32.mrf.mxu1 }
 0x49c   : > { %v6315_v61 = vpop.f32.mrf.mxu0 }
 0x49d   : > { %8951 = vmatmul.msk.f32.gmra.mxu2 %vm247_vm1, %v5312_v27 }
 0x49e   : > { %8914 = vmatmul.msk.f32.gmra.mxu1 %vm247_vm1, %v5348_v53 }
 0x49f   : > { %8988 = vmatmul.msk.f32.gmra.mxu3 %vm247_vm1, %v6165_v39  ;;  %9027 = vmatmul.msk.f32.gmra.mxu0 %vm247_vm1, %v6167_v28  ;;  %v5315_v39 = vld [vmem:[#allocation2 + $0x98] sm:$0xff] }
 0x4a0   : > { %v5732_v25 = vpop.f32.mrf.mxu2 }
 0x4a1   : > { %v5733_v46 = vadd.f32 %v5732_v25, %v5497_v18 }
 0x4a2   : > { %v6004_v49 = vpop.f32.mrf.mxu3 }
 0x4a3   : > { %v6112_v10 = vadd.f32 %v6004_v49, %v5733_v46  ;;  %v5500_v0 = vpop.f32.mrf.mxu1  ;;  %v5316_v46 = vld [vmem:[#allocation2 + $0xa0] sm:$0xff] }
 0x4a4   : > { %v6318_v55 = vpop.f32.mrf.mxu0  ;;  %v5352_v49 = vld [vmem:[#allocation2 + $0xa1] sm:$0xff] }
 0x4a5   : > { %8952 = vmatmul.msk.f32.gmra.mxu2 %vm247_vm1, %v5313_v6  ;;  %v12022_v52 = vadd.f32 %v6315_v61, %v6112_v10 }
 0x4a6   : > { %8915 = vmatmul.msk.f32.gmra.mxu1 %vm247_vm1, %v5349_v13 }
 0x4a7   : > { %8989 = vmatmul.msk.f32.gmra.mxu3 %vm247_vm1, %v6166_v20  ;;  %9028 = vmatmul.msk.f32.gmra.mxu0 %vm247_vm1, %v6168_v22  ;;  %v6170_v20 = vld [vmem:[#allocation2 + $0xaa] sm:$0xff] }
 0x4a8   : > { %v5735_v26 = vpop.f32.mrf.mxu2 }
 0x4a9   : > { %v5736_v17 = vadd.f32 %v5735_v26, %v5500_v0  ;;  %v6171_v0 = vld [vmem:[#allocation2 + $0xb2] sm:$0xff] }
 0x4aa   : > { %v6007_v45 = vpop.f32.mrf.mxu3 }
 0x4ab   : > { %v6113_v54 = vadd.f32 %v6007_v45, %v5736_v17  ;;  %v5503_v8 = vpop.f32.mrf.mxu1  ;;  %v5317_v45 = vld [vmem:[#allocation2 + $0xa8] sm:$0xff] }
 0x4ac   : > { %v6321_v47 = vpop.f32.mrf.mxu0 }
 0x4ad   : > { %8953 = vmatmul.msk.f32.gmra.mxu2 %vm247_vm1, %v5314_v43  ;;  %v12028_v29 = vadd.f32 %v6318_v55, %v6113_v54  ;;  %v5353_v54 = vld [vmem:[#allocation2 + $0xa9] sm:$0xff] }
 0x4ae   : > { %8916 = vmatmul.msk.f32.gmra.mxu1 %vm247_vm1, %v5350_v60 }
 0x4af   : > { %8990 = vmatmul.msk.f32.gmra.mxu3 %vm247_vm1, %v6167_v28  ;;  %9029 = vmatmul.msk.f32.gmra.mxu0 %vm247_vm1, %v6169_v14 }
 0x4b0   : > { %v5738_v30 = vpop.f32.mrf.mxu2 }
 0x4b1   : > { %v5739_v23 = vadd.f32 %v5738_v30, %v5503_v8 }
 0x4b2   : > { %v6010_v40 = vpop.f32.mrf.mxu3 }
 0x4b3   : > { %v6114_v56 = vadd.f32 %v6010_v40, %v5739_v23  ;;  %v5506_v62 = vpop.f32.mrf.mxu1 }
 0x4b4   : > { %v6324_v15 = vpop.f32.mrf.mxu0 }
 0x4b5   : > { %8954 = vmatmul.msk.f32.gmra.mxu2 %vm247_vm1, %v5315_v39  ;;  %v12034_v33 = vadd.f32 %v6321_v47, %v6114_v56  ;;  %v6172_v47 = vld [vmem:[#allocation2 + $0xba] sm:$0xff]  ;;  %v5318_v56 = vld [vmem:[#allocation2 + $0xb0] sm:$0xff]  ;;  %v6173_v39 = vld [vmem:[#allocation2 + $0xc2] sm:$0xff] }
 0x4b6   : > { %8917 = vmatmul.msk.f32.gmra.mxu1 %vm247_vm1, %v5351_v44 }
 0x4b7   : > { %8991 = vmatmul.msk.f32.gmra.mxu3 %vm247_vm1, %v6168_v22  ;;  %9030 = vmatmul.msk.f32.gmra.mxu0 %vm247_vm1, %v6170_v20 }
 0x4b8   : > { %v5741_v18 = vpop.f32.mrf.mxu2 }
 0x4b9   : > { %v5742_v61 = vadd.f32 %v5741_v18, %v5506_v62  ;;  %v5354_v62 = vld [vmem:[#allocation2 + $0xb1] sm:$0xff] }
 0x4ba   : > { %v6013_v27 = vpop.f32.mrf.mxu3 }
 0x4bb   : > { %v6115_v53 = vadd.f32 %v6013_v27, %v5742_v61  ;;  %v5509_v28 = vpop.f32.mrf.mxu1 }
 0x4bc   : > { %v6327_v25 = vpop.f32.mrf.mxu0 }
 0x4bd   : > { %8955 = vmatmul.msk.f32.gmra.mxu2 %vm247_vm1, %v5316_v46  ;;  %v12040_v10 = vadd.f32 %v6324_v15, %v6115_v53 }
 0x4be   : > { %8918 = vmatmul.msk.f32.gmra.mxu1 %vm247_vm1, %v5352_v49  ;;  %v6174_v49 = vld [vmem:[#allocation2 + $0xca] sm:$0xff] }
 0x4bf   : > { %8992 = vmatmul.msk.f32.gmra.mxu3 %vm247_vm1, %v6169_v14  ;;  %9031 = vmatmul.msk.f32.gmra.mxu0 %vm247_vm1, %v6171_v0 }
 0x4c0   : > { %v5744_v55 = vpop.f32.mrf.mxu2 }
 0x4c1   : > { %v5745_v6 = vadd.f32 %v5744_v55, %v5509_v28  ;;  %v5319_v28 = vld [vmem:[#allocation2 + $0xb8] sm:$0xff] }
 0x4c2   : > { %v6016_v13 = vpop.f32.mrf.mxu3 }
 0x4c3   : > { %v6116_v22 = vadd.f32 %v6016_v13, %v5745_v6  ;;  %v5512_v26 = vpop.f32.mrf.mxu1 }
 0x4c4   : > { %v6330_v17 = vpop.f32.mrf.mxu0 }
 0x4c5   : > { %8956 = vmatmul.msk.f32.gmra.mxu2 %vm247_vm1, %v5317_v45  ;;  %v12046_v8 = vadd.f32 %v6327_v25, %v6116_v22  ;;  %v5355_v25 = vld [vmem:[#allocation2 + $0xb9] sm:$0xff]  ;;  %v5356_v45 = vld [vmem:[#allocation2 + $0xc1] sm:$0xff] }
 0x4c6   : > { %8919 = vmatmul.msk.f32.gmra.mxu1 %vm247_vm1, %v5353_v54  ;;  %v6175_v54 = vld [vmem:[#allocation2 + $0xd2] sm:$0xff] }
 0x4c7   : > { %8993 = vmatmul.msk.f32.gmra.mxu3 %vm247_vm1, %v6170_v20  ;;  %9032 = vmatmul.msk.f32.gmra.mxu0 %vm247_vm1, %v6172_v47 }
 0x4c8   : > { %v5747_v43 = vpop.f32.mrf.mxu2 }
 0x4c9   : > { %v5748_v60 = vadd.f32 %v5747_v43, %v5512_v26 }
 0x4ca   : > { %v6019_v14 = vpop.f32.mrf.mxu3 }
 0x4cb   : > { %v6117_v30 = vadd.f32 %v6019_v14, %v5748_v60  ;;  %v5515_v23 = vpop.f32.mrf.mxu1 }
 0x4cc   : > { %v6333_v40 = vpop.f32.mrf.mxu0 }
 0x4cd   : > { %8957 = vmatmul.msk.f32.gmra.mxu2 %vm247_vm1, %v5318_v56  ;;  %v12052_v15 = vadd.f32 %v6330_v17, %v6117_v30  ;;  %v5320_v17 = vld [vmem:[#allocation2 + $0xc0] sm:$0xff]  ;;  %v5321_v56 = vld [vmem:[#allocation2 + $0xc8] sm:$0xff] }
 0x4ce   : > { %8920 = vmatmul.msk.f32.gmra.mxu1 %vm247_vm1, %v5354_v62  ;;  %v5357_v62 = vld [vmem:[#allocation2 + $0xc9] sm:$0xff] }
 0x4cf   : > { %8994 = vmatmul.msk.f32.gmra.mxu3 %vm247_vm1, %v6171_v0  ;;  %9033 = vmatmul.msk.f32.gmra.mxu0 %vm247_vm1, %v6173_v39 }
 0x4d0   : > { %v5750_v44 = vpop.f32.mrf.mxu2 }
 0x4d1   : > { %v5751_v20 = vadd.f32 %v5750_v44, %v5515_v23 }
 0x4d2   : > { %v6022_v18 = vpop.f32.mrf.mxu3 }
 0x4d3   : > { %v6118_v61 = vadd.f32 %v6022_v18, %v5751_v20  ;;  %v5518_v27 = vpop.f32.mrf.mxu1 }
 0x4d4   : > { %v6336_v53 = vpop.f32.mrf.mxu0 }
 0x4d5   : > { %8958 = vmatmul.msk.f32.gmra.mxu2 %vm247_vm1, %v5319_v28  ;;  %v12058_v46 = vadd.f32 %v6333_v40, %v6118_v61 }
 0x4d6   : > { %8921 = vmatmul.msk.f32.gmra.mxu1 %vm247_vm1, %v5355_v25  ;;  %v5322_v25 = vld [vmem:[#allocation2 + $0xd0] sm:$0xff] }
 0x4d7   : > { %8995 = vmatmul.msk.f32.gmra.mxu3 %vm247_vm1, %v6172_v47  ;;  %9034 = vmatmul.msk.f32.gmra.mxu0 %vm247_vm1, %v6174_v49 }
 0x4d8   : > { %v5753_v0 = vpop.f32.mrf.mxu2 }
 0x4d9   : > { %v5754_v55 = vadd.f32 %v5753_v0, %v5518_v27  ;;  %v5358_v0 = vld [vmem:[#allocation2 + $0xd1] sm:$0xff] }
 0x4da   : > { %v6025_v6 = vpop.f32.mrf.mxu3 }
 0x4db   : > { %v6119_v13 = vadd.f32 %v6025_v6, %v5754_v55  ;;  %v5521_v22 = vpop.f32.mrf.mxu1 }
 0x4dc   : > { %v6339_v26 = vpop.f32.mrf.mxu0 }
 0x4dd   : > { %8959 = vmatmul.msk.f32.gmra.mxu2 %vm247_vm1, %v5320_v17  ;;  %v12066_v43 = vadd.f32 %v6336_v53, %v6119_v13 }
 0x4de   : > { %8922 = vmatmul.msk.f32.gmra.mxu1 %vm247_vm1, %v5356_v45 }
 0x4df   : > { %8996 = vmatmul.msk.f32.gmra.mxu3 %vm247_vm1, %v6173_v39  ;;  %9035 = vmatmul.msk.f32.gmra.mxu0 %vm247_vm1, %v6175_v54  ;;  %v6176_v39 = vld [vmem:[#allocation2 + $0xda] sm:$0xff] }
 0x4e0   : > { %v5756_v47 = vpop.f32.mrf.mxu2 }
 0x4e1   : > { %v5757_v60 = vadd.f32 %v5756_v47, %v5521_v22  ;;  %v5323_v47 = vld [vmem:[#allocation2 + $0xd8] sm:$0xff] }
 0x4e2   : > { %v6028_v14 = vpop.f32.mrf.mxu3 }
 0x4e3   : > { %v6120_v30 = vadd.f32 %v6028_v14, %v5757_v60  ;;  %v5524_v23 = vpop.f32.mrf.mxu1  ;;  %v5359_v60 = vld [vmem:[#allocation2 + $0xd9] sm:$0xff] }
 0x4e4   : > { %v6342_v40 = vpop.f32.mrf.mxu0 }
 0x4e5   : > { %8960 = vmatmul.msk.f32.gmra.mxu2 %vm247_vm1, %v5321_v56  ;;  %v12073_v44 = vadd.f32 %v6339_v26, %v6120_v30 }
 0x4e6   : > { %8923 = vmatmul.msk.f32.gmra.mxu1 %vm247_vm1, %v5357_v62 }
 0x4e7   : > { %8997 = vmatmul.msk.f32.gmra.mxu3 %vm247_vm1, %v6174_v49  ;;  %9036 = vmatmul.msk.f32.gmra.mxu0 %vm247_vm1, %v6176_v39  ;;  %v6177_v49 = vld [vmem:[#allocation2 + $0xe2] sm:$0xff] }
 0x4e8   : > { %v5759_v20 = vpop.f32.mrf.mxu2 }
 0x4e9   : > { %v5760_v18 = vadd.f32 %v5759_v20, %v5524_v23 }
 0x4ea   : > { %v6031_v61 = vpop.f32.mrf.mxu3 }
 0x4eb   : > { %v6121_v27 = vadd.f32 %v6031_v61, %v5760_v18  ;;  %v5527_v53 = vpop.f32.mrf.mxu1  ;;  %v5324_v18 = vld [vmem:[#allocation2 + $0xe0] sm:$0xff] }
 0x4ec   : > { %v6345_v28 = vpop.f32.mrf.mxu0  ;;  %v5360_v61 = vld [vmem:[#allocation2 + $0xe1] sm:$0xff] }
 0x4ed   : > { %8961 = vmatmul.msk.f32.gmra.mxu2 %vm247_vm1, %v5322_v25  ;;  %v12079_v6 = vadd.f32 %v6342_v40, %v6121_v27 }
 0x4ee   : > { %8924 = vmatmul.msk.f32.gmra.mxu1 %vm247_vm1, %v5358_v0 }
 0x4ef   : > { %8998 = vmatmul.msk.f32.gmra.mxu3 %vm247_vm1, %v6175_v54  ;;  %9037 = vmatmul.msk.f32.gmra.mxu0 %vm247_vm1, %v6177_v49  ;;  %v6178_v54 = vld [vmem:[#allocation2 + $0xea] sm:$0xff] }
 0x4f0   : > { %v5762_v55 = vpop.f32.mrf.mxu2 }
 0x4f1   : > { %v5763_v13 = vadd.f32 %v5762_v55, %v5527_v53 }
 0x4f2   : > { %v6034_v22 = vpop.f32.mrf.mxu3 }
 0x4f3   : > { %v6122_v26 = vadd.f32 %v6034_v22, %v5763_v13  ;;  %v5530_v17 = vpop.f32.mrf.mxu1  ;;  %v5325_v22 = vld [vmem:[#allocation2 + $0xe8] sm:$0xff] }
 0x4f4   : > { %v6348_v45 = vpop.f32.mrf.mxu0 }
 0x4f5   : > { %8962 = vmatmul.msk.f32.gmra.mxu2 %vm247_vm1, %v5323_v47  ;;  %v12085_v40 = vadd.f32 %v6345_v28, %v6122_v26  ;;  %v5361_v26 = vld [vmem:[#allocation2 + $0xe9] sm:$0xff] }
 0x4f6   : > { %8925 = vmatmul.msk.f32.gmra.mxu1 %vm247_vm1, %v5359_v60 }
 0x4f7   : > { %8999 = vmatmul.msk.f32.gmra.mxu3 %vm247_vm1, %v6176_v39  ;;  %9038 = vmatmul.msk.f32.gmra.mxu0 %vm247_vm1, %v6178_v54  ;;  %v6179_v39 = vld [vmem:[#allocation2 + $0xf2] sm:$0xff] }
 0x4f8   : > { %v5765_v14 = vpop.f32.mrf.mxu2 }
 0x4f9   : > { %v5766_v30 = vadd.f32 %v5765_v14, %v5530_v17 }
 0x4fa   : > { %v6037_v23 = vpop.f32.mrf.mxu3 }
 0x4fb   : > { %v6123_v56 = vadd.f32 %v6037_v23, %v5766_v30  ;;  %v5533_v62 = vpop.f32.mrf.mxu1 }
 0x4fc   : > { %v6351_v20 = vpop.f32.mrf.mxu0 }
 0x4fd   : > { %8963 = vmatmul.msk.f32.gmra.mxu2 %vm247_vm1, %v5324_v18  ;;  %v12091_v0 = vadd.f32 %v6348_v45, %v6123_v56  ;;  %v5326_v56 = vld [vmem:[#allocation2 + $0xf0] sm:$0xff] }
 0x4fe   : > { %8926 = vmatmul.msk.f32.gmra.mxu1 %vm247_vm1, %v5360_v61 }
 0x4ff   : > { %9000 = vmatmul.msk.f32.gmra.mxu3 %vm247_vm1, %v6177_v49  ;;  %9039 = vmatmul.msk.f32.gmra.mxu0 %vm247_vm1, %v6179_v39  ;;  %v6180_v49 = vld [vmem:[#allocation2 + $0xfa] sm:$0xff] }
 0x500   : > { %v5768_v27 = vpop.f32.mrf.mxu2 }
 0x501   : > { %v5769_v53 = vadd.f32 %v5768_v27, %v5533_v62  ;;  %v5362_v62 = vld [vmem:[#allocation2 + $0xf1] sm:$0xff] }
 0x502   : > { %v6040_v25 = vpop.f32.mrf.mxu3 }
 0x503   : > { %v6124_v28 = vadd.f32 %v6040_v25, %v5769_v53  ;;  %v5536_v55 = vpop.f32.mrf.mxu1 }
 0x504   : > { %v6354_v13 = vpop.f32.mrf.mxu0 }
 0x505   : > { %8964 = vmatmul.msk.f32.gmra.mxu2 %vm247_vm1, %v5325_v22  ;;  %v12097_v30 = vadd.f32 %v6351_v20, %v6124_v28  ;;  %v9009_v20 = vld [vmem:[%s13240_s2 + $0x18] sm:$0xf] }
 0x506   : > { %8927 = vmatmul.msk.f32.gmra.mxu1 %vm247_vm1, %v5361_v26  ;;  %v5327_v28 = vld [vmem:[#allocation2 + $0xf8] sm:$0xff]  ;;  %9084 = vmatpush.msk.msra.mxu2 %vm356_vm0, %v9009_v20 }
 0x507   : > { %9001 = vmatmul.msk.f32.gmra.mxu3 %vm247_vm1, %v6178_v54  ;;  %9040 = vmatmul.msk.f32.gmra.mxu0 %vm247_vm1, %v6180_v49  ;;  %v6181_v54 = vld [vmem:[#allocation2 + $0x102] sm:$0xff]  ;;  %v5363_v26 = vld [vmem:[#allocation2 + $0xf9] sm:$0xff] }
 0x508   : > { %v5771_v17 = vpop.f32.mrf.mxu2 }
 0x509   : > { %v5772_v47 = vadd.f32 %v5771_v17, %v5536_v55  ;;  %v9121_v55 = vld [vmem:[%s13240_s2 + $0x20] sm:$0xff] }
 0x50a   : > { %v6043_v60 = vpop.f32.mrf.mxu3  ;;  %9123 = vmatpush.msk.msra.mxu3 %vm356_vm0, %v9121_v55  ;;  %v7422_v17 = vrot.slane %v9121_v55, 4 }
 0x50b   : > { %v6125_v14 = vadd.f32 %v6043_v60, %v5772_v47  ;;  %v5539_v45 = vpop.f32.mrf.mxu1  ;;  %v6182_v47 = vld [vmem:[#allocation2 + $0x10a] sm:$0xff] }
 0x50c   : > { %v6357_v23 = vpop.f32.mrf.mxu0  ;;  %9160 = vmatpush.msk.msra.mxu0 %vm356_vm0, %v7422_v17  ;;  %v5365_v17 = vld [vmem:[#allocation2 + $0x109] sm:$0xff] }
 0x50d   : > { %8965 = vmatmul.msk.f32.gmra.mxu2 %vm247_vm1, %v5326_v56 }
 0x50e   : > { %8928 = vmatmul.msk.f32.gmra.mxu1 %vm247_vm1, %v5362_v62  ;;  %v5328_v62 = vld [vmem:[#allocation2 + $0x100] sm:$0xff] }
 0x50f   : > { %9002 = vmatmul.msk.f32.gmra.mxu3 %vm247_vm1, %v6179_v39  ;;  %9041 = vmatmul.msk.f32.gmra.mxu0 %vm247_vm1, %v6181_v54  ;;  %v12110_v39 = vadd.f32 %v6354_v13, %v6125_v14 }
 0x510   : > { %v5774_v18 = vpop.f32.mrf.mxu2 }
 0x511   : > { %v5775_v61 = vadd.f32 %v5774_v18, %v5539_v45  ;;  %v5364_v18 = vld [vmem:[#allocation2 + $0x101] sm:$0xff] }
 0x512   : > { %v6046_v27 = vpop.f32.mrf.mxu3 }
 0x513   : > { %v6126_v53 = vadd.f32 %v6046_v27, %v5775_v61  ;;  %v5542_v25 = vpop.f32.mrf.mxu1 }
 0x514   : > { %v6360_v22 = vpop.f32.mrf.mxu0 }
 0x515   : > { %8966 = vmatmul.msk.f32.gmra.mxu2 %vm247_vm1, %v5327_v28  ;;  %v12119_v61 = vadd.f32 %v6357_v23, %v6126_v53  ;;  %v5329_v53 = vld [vmem:[#allocation2 + $0x108] sm:$0xff] }
 0x516   : > { %8929 = vmatmul.msk.f32.gmra.mxu1 %vm247_vm1, %v5363_v26 }
 0x517   : > { %9003 = vmatmul.msk.f32.gmra.mxu3 %vm247_vm1, %v6180_v49  ;;  %9042 = vmatmul.msk.f32.gmra.mxu0 %vm247_vm1, %v6182_v47  ;;  %v6183_v49 = vld [vmem:[#allocation2 + $0x112] sm:$0xff] }
 0x518   : > { %v5777_v60 = vpop.f32.mrf.mxu2 }
 0x519   : > { %v5778_v45 = vadd.f32 %v5777_v60, %v5542_v25  ;;  %v9122_v25 = vld [vmem:[%s13240_s2 + $0x28] sm:$0xf] }
 0x51a   : > { %v6049_v13 = vpop.f32.mrf.mxu3  ;;  %9197 = vmatpush.msk.msra.mxu1 %vm356_vm0, %v9122_v25  ;;  %vm13455_vm0 = vcmp.lt.s32.totalorder %v10314_v59, 16  ;;  %v7712_v59 = vld [vmem:[#allocation2 + $0xb6] sm:$0xff] }
 0x51b   : > { %v6127_v14 = vadd.f32 %v6049_v13, %v5778_v45  ;;  %v5545_v56 = vpop.f32.mrf.mxu1 }
 0x51c   : > { %v6363_v27 = vpop.f32.mrf.mxu0 }
 0x51d   : > { %8967 = vmatmul.msk.f32.gmra.mxu2 %vm247_vm1, %v5328_v62  ;;  %v12131_v60 = vadd.f32 %v6360_v22, %v6127_v14 }
 0x51e   : > { %8930 = vmatmul.msk.f32.gmra.mxu1 %vm247_vm1, %v5364_v18 }
 0x51f   : > { %9004 = vmatmul.msk.f32.gmra.mxu3 %vm247_vm1, %v6181_v54  ;;  %9043 = vmatmul.msk.f32.gmra.mxu0 %vm247_vm1, %v6183_v49  ;;  %v6184_v54 = vld [vmem:[#allocation2 + $0x11a] sm:$0xff] }
 0x520   : > { %v5780_v20 = vpop.f32.mrf.mxu2 }
 0x521   : > { %v5781_v28 = vadd.f32 %v5780_v20, %v5545_v56  ;;  %v5330_v20 = vld [vmem:[#allocation2 + $0x110] sm:$0xff] }
 0x522   : > { %v6052_v55 = vpop.f32.mrf.mxu3 }
 0x523   : > { %v6128_v26 = vadd.f32 %v6052_v55, %v5781_v28  ;;  %v5548_v23 = vpop.f32.mrf.mxu1  ;;  %v5366_v28 = vld [vmem:[#allocation2 + $0x111] sm:$0xff] }
 0x524   : > { %v6366_v13 = vpop.f32.mrf.mxu0 }
 0x525   : > { %8968 = vmatmul.msk.f32.gmra.mxu2 %vm247_vm1, %v5329_v53  ;;  %v12138_v22 = vadd.f32 %v6363_v27, %v6128_v26 }
 0x526   : > { %8931 = vmatmul.msk.f32.gmra.mxu1 %vm247_vm1, %v5365_v17 }
 0x527   : > { %9005 = vmatmul.msk.f32.gmra.mxu3 %vm247_vm1, %v6182_v47  ;;  %9044 = vmatmul.msk.f32.gmra.mxu0 %vm247_vm1, %v6184_v54  ;;  %v6185_v47 = vld [vmem:[#allocation2 + $0x122] sm:$0xff] }
 0x528   : > { %v5783_v45 = vpop.f32.mrf.mxu2 }
 0x529   : > { %v5784_v62 = vadd.f32 %v5783_v45, %v5548_v23 }
 0x52a   : > { %v6055_v56 = vpop.f32.mrf.mxu3 }
 0x52b   : > { %v6129_v18 = vadd.f32 %v6055_v56, %v5784_v62  ;;  %v5551_v25 = vpop.f32.mrf.mxu1  ;;  %v5331_v62 = vld [vmem:[#allocation2 + $0x118] sm:$0xff] }
 0x52c   : > { %v6369_v23 = vpop.f32.mrf.mxu0  ;;  %v5367_v56 = vld [vmem:[#allocation2 + $0x119] sm:$0xff] }
 0x52d   : > { %8969 = vmatmul.msk.f32.gmra.mxu2 %vm247_vm1, %v5330_v20  ;;  %v12144_v27 = vadd.f32 %v6366_v13, %v6129_v18 }
 0x52e   : > { %8932 = vmatmul.msk.f32.gmra.mxu1 %vm247_vm1, %v5366_v28 }
 0x52f   : > { %9006 = vmatmul.msk.f32.gmra.mxu3 %vm247_vm1, %v6183_v49  ;;  %9045 = vmatmul.msk.f32.gmra.mxu0 %vm247_vm1, %v6185_v47  ;;  %v6186_v49 = vld [vmem:[#allocation2 + $0x12a] sm:$0xff] }
 0x530   : > { %v5786_v14 = vpop.f32.mrf.mxu2 }
 0x531   : > { %v5787_v55 = vadd.f32 %v5786_v14, %v5551_v25  ;;  %v6767_v14 = vld [vmem:[#allocation2 + $0x14] sm:$0xff] }
 0x532   : > { %v6058_v53 = vpop.f32.mrf.mxu3 }
 0x533   : > { %v6130_v17 = vadd.f32 %v6058_v53, %v5787_v55  ;;  %v5554_v45 = vpop.f32.mrf.mxu1  ;;  %v6459_v53 = vld [vmem:[#allocation2 + $0x13] sm:$0xff] }
 0x534   : > { %v6372_v55 = vpop.f32.mrf.mxu0 }
 0x535   : > { %8970 = vmatmul.msk.f32.gmra.mxu2 %vm247_vm1, %v5331_v62  ;;  %v7078_v62 = vld [vmem:[#allocation2 + $0x24] sm:$0xff] }
 0x536   : > { %8933 = vmatmul.msk.f32.gmra.mxu1 %vm247_vm1, %v5367_v56 }
 0x537   : > { %9007 = vmatmul.msk.f32.gmra.mxu3 %vm247_vm1, %v6184_v54  ;;  %9046 = vmatmul.msk.f32.gmra.mxu0 %vm247_vm1, %v6186_v49  ;;  %v7386_v54 = vld [vmem:[#allocation2 + $0x25] sm:$0xff] }
 0x538   : > { %v5789_v20 = vpop.f32.mrf.mxu2 }
 0x539   : > { %v5790_v26 = vadd.f32 %v5789_v20, %v5554_v45  ;;  %v12150_v45 = vadd.f32 %v6369_v23, %v6130_v17 }
 0x53a   : > { %v6061_v25 = vpop.f32.mrf.mxu3 }
 0x53b   : > { %v6131_v28 = vadd.f32 %v6061_v25, %v5790_v26  ;;  %v5557_v47 = vpop.f32.mrf.mxu1  ;;  %v6768_v26 = vld [vmem:[#allocation2 + $0x1c] sm:$0xff] }
 0x53c   : > { %v6460_v25 = vld [vmem:[#allocation2 + $0x1b] sm:$0xff]  ;;  %v12157_v1 = vpop.f32.mrf.mxu0 }
 0x53d   : > { %9085 = vmatmul.msk.f32.vlgmr.msra.gmra.mxu2 %vm247_vm1, %v6767_v14  ;;  %v7079_v14 = vld [vmem:[#allocation2 + $0x2c] sm:$0xff] }
 0x53e   : > { %9048 = vmatmul.msk.f32.vlgmr.msrb.gmra.mxu1 %vm247_vm1, %v6459_v53  ;;  %v7387_v53 = vld [vmem:[#allocation2 + $0x2d] sm:$0xff] }
 0x53f   : > { %9124 = vmatmul.msk.f32.vlgmr.msra.gmra.mxu3 %vm247_vm1, %v7078_v62  ;;  %9161 = vmatmul.msk.f32.vlgmr.msra.gmra.mxu0 %vm247_vm1, %v7386_v54  ;;  %v12160_v54 = vadd.f32 %v6372_v55, %v6131_v28 }
 0x540   : > { %v5792_v56 = vpop.f32.mrf.mxu2 }
 0x541   : > { %v5793_v13 = vadd.f32 %v5792_v56, %v5557_v47 }
 0x542   : > { %v6064_v18 = vpop.f32.mrf.mxu3 }
 0x543   : > { %v12152_v49 = vadd.f32 %v6064_v18, %v5793_v13  ;;  %v5560_v20 = vpop.f32.mrf.mxu1  ;;  %v6461_v18 = vld [vmem:[#allocation2 + $0x23] sm:$0xff] }
 0x544   : > { %v12168_v38 = vpop.f32.mrf.mxu0 }
 0x545   : > { %9086 = vmatmul.msk.f32.gmra.mxu2 %vm247_vm1, %v6768_v26  ;;  %v7080_v26 = vld [vmem:[#allocation2 + $0x34] sm:$0xff] }
 0x546   : > { %9049 = vmatmul.msk.f32.gmra.mxu1 %vm247_vm1, %v6460_v25  ;;  %v7388_v25 = vld [vmem:[#allocation2 + $0x35] sm:$0xff] }
 0x547   : > { %9125 = vmatmul.msk.f32.gmra.mxu3 %vm247_vm1, %v7079_v14  ;;  %9162 = vmatmul.msk.f32.gmra.mxu0 %vm247_vm1, %v7387_v53 }
 0x548   : > { %v5795_v47 = vpop.f32.mrf.mxu2 }
 0x549   : > { %v5796_v23 = vadd.f32 %v5795_v47, %v5560_v20 }
 0x54a   : > { %v6067_v17 = vpop.f32.mrf.mxu3 }
 0x54b   : > { %v12162_v56 = vadd.f32 %v6067_v17, %v5796_v23  ;;  %v5563_v13 = vpop.f32.mrf.mxu1  ;;  %v6462_v23 = vld [vmem:[#allocation2 + $0x2b] sm:$0xff]  ;;  %v7389_v17 = vld [vmem:[#allocation2 + $0x3d] sm:$0xff] }
 0x54c   : > { %v12176_v7 = vpop.f32.mrf.mxu0 }
 0x54d   : > { %9087 = vmatmul.msk.f32.gmra.mxu2 %vm247_vm1, %v7078_v62  ;;  %v7081_v62 = vld [vmem:[#allocation2 + $0x3c] sm:$0xff] }
 0x54e   : > { %9050 = vmatmul.msk.f32.gmra.mxu1 %vm247_vm1, %v6461_v18 }
 0x54f   : > { %9126 = vmatmul.msk.f32.gmra.mxu3 %vm247_vm1, %v7080_v26  ;;  %9163 = vmatmul.msk.f32.gmra.mxu0 %vm247_vm1, %v7388_v25 }
 0x550   : > { %v5798_v53 = vpop.f32.mrf.mxu2 }
 0x551   : > { %v5799_v20 = vadd.f32 %v5798_v53, %v5563_v13 }
 0x552   : > { %v6070_v28 = vpop.f32.mrf.mxu3 }
 0x553   : > { %v12170_v55 = vadd.f32 %v6070_v28, %v5799_v20  ;;  %v5566_v47 = vpop.f32.mrf.mxu1  ;;  %v6463_v20 = vld [vmem:[#allocation2 + $0x33] sm:$0xff]  ;;  %v7390_v28 = vld [vmem:[#allocation2 + $0x45] sm:$0xff] }
 0x555   : > { %9088 = vmatmul.msk.f32.gmra.mxu2 %vm247_vm1, %v7079_v14  ;;  %v7082_v14 = vld [vmem:[#allocation2 + $0x44] sm:$0xff] }
 0x556   : > { %9051 = vmatmul.msk.f32.gmra.mxu1 %vm247_vm1, %v6462_v23 }
 0x557   : > { %9127 = vmatmul.msk.f32.gmra.mxu3 %vm247_vm1, %v7081_v62  ;;  %9164 = vmatmul.msk.f32.gmra.mxu0 %vm247_vm1, %v7389_v17 }
 0x558   : > { %v5801_v18 = vpop.f32.mrf.mxu2 }
 0x559   : > { %v5802_v25 = vadd.f32 %v5801_v18, %v5566_v47 }
 0x55a   : > { %v6073_v3 = vpop.f32.mrf.mxu3 }
 0x55b   : > { %v12178_v13 = vadd.f32 %v6073_v3, %v5802_v25  ;;  %v5569_v53 = vpop.f32.mrf.mxu1  ;;  %v12186_v3 = vpop.f32.mrf.mxu0  ;;  %v6464_v25 = vld [vmem:[#allocation2 + $0x3b] sm:$0xff] }
 0x55d   : > { %9089 = vmatmul.msk.f32.gmra.mxu2 %vm247_vm1, %v7080_v26  ;;  %v7083_v26 = vld [vmem:[#allocation2 + $0x4c] sm:$0xff] }
 0x55e   : > { %9052 = vmatmul.msk.f32.gmra.mxu1 %vm247_vm1, %v6463_v20  ;;  %v7391_v20 = vld [vmem:[#allocation2 + $0x4d] sm:$0xff] }
 0x55f   : > { %9128 = vmatmul.msk.f32.gmra.mxu3 %vm247_vm1, %v7082_v14  ;;  %9165 = vmatmul.msk.f32.gmra.mxu0 %vm247_vm1, %v7390_v28 }
 0x560   : > { %v5804_v23 = vpop.f32.mrf.mxu2 }
 0x561   : > { %v5805_v17 = vadd.f32 %v5804_v23, %v5569_v53 }
 0x562   : > { %v6076_v47 = vpop.f32.mrf.mxu3 }
 0x563   : > { %v12184_v18 = vadd.f32 %v6076_v47, %v5805_v17  ;;  %v5572_v37 = vpop.f32.mrf.mxu1  ;;  %v6465_v47 = vld [vmem:[#allocation2 + $0x43] sm:$0xff] }
 0x565   : > { %9090 = vmatmul.msk.f32.gmra.mxu2 %vm247_vm1, %v7081_v62  ;;  %v7392_v62 = vld [vmem:[#allocation2 + $0x55] sm:$0xff] }
 0x566   : > { %9053 = vmatmul.msk.f32.gmra.mxu1 %vm247_vm1, %v6464_v25  ;;  %v12197_v25 = vpop.f32.mrf.mxu0 }
 0x567   : > { %9129 = vmatmul.msk.f32.gmra.mxu3 %vm247_vm1, %v7083_v26  ;;  %9166 = vmatmul.msk.f32.gmra.mxu0 %vm247_vm1, %v7391_v20 }
 0x568   : > { %v5807_v28 = vpop.f32.mrf.mxu2 }
 0x569   : > { %v5808_v36 = vadd.f32 %v5807_v28, %v5572_v37 }
 0x56a   : > { %v6079_v53 = vpop.f32.mrf.mxu3 }
 0x56b   : > { %v12192_v23 = vadd.f32 %v6079_v53, %v5808_v36  ;;  %v5575_v17 = vpop.f32.mrf.mxu1  ;;  %v6466_v53 = vld [vmem:[#allocation2 + $0x4b] sm:$0xff] }
 0x56d   : > { %9091 = vmatmul.msk.f32.gmra.mxu2 %vm247_vm1, %v7082_v14  ;;  %v7085_v14 = vld [vmem:[#allocation2 + $0x5c] sm:$0xff] }
 0x56e   : > { %9054 = vmatmul.msk.f32.gmra.mxu1 %vm247_vm1, %v6465_v47  ;;  %v7393_v47 = vld [vmem:[#allocation2 + $0x5d] sm:$0xff]  ;;  %v12206_v19 = vpop.f32.mrf.mxu0 }
 0x56f   : > { %9130 = vmatmul.msk.f32.gmra.mxu3 %vm247_vm1, %v7084_v12  ;;  %9167 = vmatmul.msk.f32.gmra.mxu0 %vm247_vm1, %v7392_v62 }
 0x570   : > { %v5810_v20 = vpop.f32.mrf.mxu2 }
 0x571   : > { %v5811_v16 = vadd.f32 %v5810_v20, %v5575_v17 }
 0x572   : > { %v6082_v37 = vpop.f32.mrf.mxu3 }
 0x573   : > { %v12200_v28 = vadd.f32 %v6082_v37, %v5811_v16  ;;  %v5578_v36 = vpop.f32.mrf.mxu1  ;;  %v6467_v37 = vld [vmem:[#allocation2 + $0x53] sm:$0xff] }
 0x575   : > { %9092 = vmatmul.msk.f32.gmra.mxu2 %vm247_vm1, %v7083_v26  ;;  %v7086_v26 = vld [vmem:[#allocation2 + $0x64] sm:$0xff] }
 0x576   : > { %9055 = vmatmul.msk.f32.gmra.mxu1 %vm247_vm1, %v6466_v53  ;;  %v7394_v53 = vld [vmem:[#allocation2 + $0x65] sm:$0xff] }
 0x577   : > { %9131 = vmatmul.msk.f32.gmra.mxu3 %vm247_vm1, %v7085_v14  ;;  %9168 = vmatmul.msk.f32.gmra.mxu0 %vm247_vm1, %v7393_v47  ;;  %v12215_v47 = vadd.f32 %v12157_v1, %v12152_v49  ;;  %v7395_v1 = vld [vmem:[#allocation2 + $0x6d] sm:$0xff]  ;;  %v12227_v49 = vadd.f32 %v12168_v38, %v12162_v56  ;;  %v7396_v38 = vld [vmem:[#allocation2 + $0x75] sm:$0xff]  ;;  %v12239_v56 = vadd.f32 %v12176_v7, %v12170_v55 }
 0x578   : > { %v5813_v42 = vpop.f32.mrf.mxu2  ;;  %v12249_v7 = vadd.f32 %v12186_v3, %v12178_v13  ;;  %v7398_v13 = vld [vmem:[#allocation2 + $0x85] sm:$0xff]  ;;  %v12261_v3 = vadd.f32 %v12197_v25, %v12184_v18  ;;  %v7399_v18 = vld [vmem:[#allocation2 + $0x8d] sm:$0xff]  ;;  %v12273_v25 = vadd.f32 %v12206_v19, %v12192_v23  ;;  %v7400_v19 = vld [vmem:[#allocation2 + $0x95] sm:$0xff] }
 0x579   : > { %v5814_v62 = vadd.f32 %v5813_v42, %v5578_v36 }
 0x57a   : > { %v6085_v17 = vpop.f32.mrf.mxu3  ;;  %13430 = vst [vmem:[#allocation29_spill] sm:$0xff] %v12249_v7  ;;  %v6472_v7 = vld [vmem:[#allocation2 + $0x7b] sm:$0xff] }
 0x57b   : > { %v12208_v20 = vadd.f32 %v6085_v17, %v5814_v62  ;;  %v5581_v16 = vpop.f32.mrf.mxu1  ;;  %v12218_v17 = vpop.f32.mrf.mxu0  ;;  %13431 = vst [vmem:[#allocation30_spill] sm:$0xff] %v12261_v3  ;;  %v6473_v3 = vld [vmem:[#allocation2 + $0x83] sm:$0xff] }
 0x57c   : > { %13432 = vst [vmem:[#allocation31_spill] sm:$0xff] %v12273_v25  ;;  %v12285_v23 = vadd.f32 %v12218_v17, %v12200_v28  ;;  %v7401_v28 = vld [vmem:[#allocation2 + $0x9d] sm:$0xff] }
 0x57d   : > { %9093 = vmatmul.msk.f32.gmra.mxu2 %vm247_vm1, %v7084_v12 }
 0x57e   : > { %9056 = vmatmul.msk.f32.gmra.mxu1 %vm247_vm1, %v6467_v37  ;;  %v7087_v37 = vld [vmem:[#allocation2 + $0x6c] sm:$0xff]  ;;  %13433 = vst [vmem:[#allocation32_spill] sm:$0xff] %v12285_v23 }
 0x57f   : > { %9132 = vmatmul.msk.f32.gmra.mxu3 %vm247_vm1, %v7086_v26  ;;  %9169 = vmatmul.msk.f32.gmra.mxu0 %vm247_vm1, %v7394_v53  ;;  %v6475_v23 = vld [vmem:[#allocation2 + $0x93] sm:$0xff] }
 0x580   : > { %v5816_v42 = vpop.f32.mrf.mxu2 }
 0x581   : > { %v5817_v36 = vadd.f32 %v5816_v42, %v5581_v16 }
 0x582   : > { %v6088_v62 = vpop.f32.mrf.mxu3 }
 0x583   : > { %v12220_v24 = vadd.f32 %v6088_v62, %v5817_v36  ;;  %v5584_v12 = vpop.f32.mrf.mxu1  ;;  %v12232_v63 = vpop.f32.mrf.mxu0 }
 0x584   : > { %v12297_v17 = vadd.f32 %v12232_v63, %v12208_v20 }
 0x585   : > { %9094 = vmatmul.msk.f32.gmra.mxu2 %vm247_vm1, %v7085_v14  ;;  %v6469_v14 = vld [vmem:[#allocation2 + $0x63] sm:$0xff] }
 0x586   : > { %9057 = vmatmul.msk.f32.gmra.mxu1 %vm247_vm1, %v6468_v58  ;;  %v7088_v58 = vld [vmem:[#allocation2 + $0x74] sm:$0xff]  ;;  %13434 = vst [vmem:[#allocation33_spill] sm:$0xff] %v12297_v17 }
 0x587   : > { %9133 = vmatmul.msk.f32.gmra.mxu3 %vm247_vm1, %v7087_v37  ;;  %9170 = vmatmul.msk.f32.gmra.mxu0 %vm247_vm1, %v7395_v1  ;;  %v6476_v17 = vld [vmem:[#allocation2 + $0x9b] sm:$0xff] }
 0x588   : > { %v5819_v16 = vpop.f32.mrf.mxu2 }
 0x589   : > { %v5820_v53 = vadd.f32 %v5819_v16, %v5584_v12 }
 0x58a   : > { %v6091_v42 = vpop.f32.mrf.mxu3 }
 0x58b   : > { %v12230_v36 = vadd.f32 %v6091_v42, %v5820_v53  ;;  %v5587_v62 = vpop.f32.mrf.mxu1  ;;  %v12251_v55 = vpop.f32.mrf.mxu0 }
 0x58c   : > { %v12307_v63 = vadd.f32 %v12251_v55, %v12220_v24  ;;  %v7403_v24 = vld [vmem:[#allocation2 + $0xad] sm:$0xff] }
 0x58d   : > { %9095 = vmatmul.msk.f32.gmra.mxu2 %vm247_vm1, %v7086_v26  ;;  %v7089_v26 = vld [vmem:[#allocation2 + $0x7c] sm:$0xff] }
 0x58e   : > { %9058 = vmatmul.msk.f32.gmra.mxu1 %vm247_vm1, %v6469_v14  ;;  %v7397_v14 = vld [vmem:[#allocation2 + $0x7d] sm:$0xff]  ;;  %13435 = vst [vmem:[#allocation34_spill] sm:$0xff] %v12307_v63  ;;  %v7710_v63 = vld [vmem:[#allocation2 + $0xa6] sm:$0xff] }
 0x58f   : > { %9134 = vmatmul.msk.f32.gmra.mxu3 %vm247_vm1, %v7088_v58  ;;  %9171 = vmatmul.msk.f32.gmra.mxu0 %vm247_vm1, %v7396_v38 }
 0x590   : > { %v5822_v12 = vpop.f32.mrf.mxu2 }
 0x591   : > { %v5823_v1 = vadd.f32 %v5822_v12, %v5587_v62 }
 0x592   : > { %v6094_v16 = vpop.f32.mrf.mxu3 }
 0x593   : > { %v12242_v53 = vadd.f32 %v6094_v16, %v5823_v1  ;;  %v5590_v42 = vpop.f32.mrf.mxu1  ;;  %v6471_v16 = vld [vmem:[#allocation2 + $0x73] sm:$0xff] }
 0x595   : > { %9096 = vmatmul.msk.f32.gmra.mxu2 %vm247_vm1, %v7087_v37 }
 0x596   : > { %9059 = vmatmul.msk.f32.gmra.mxu1 %vm247_vm1, %v6470_v32  ;;  %v7090_v32 = vld [vmem:[#allocation2 + $0x84] sm:$0xff] }
 0x597   : > { %9135 = vmatmul.msk.f32.gmra.mxu3 %vm247_vm1, %v7089_v26  ;;  %9172 = vmatmul.msk.f32.gmra.mxu0 %vm247_vm1, %v7397_v14  ;;  %v12264_v14 = vpop.f32.mrf.mxu0 }
 0x598   : > { %v5825_v62 = vpop.f32.mrf.mxu2 }
 0x599   : > { %v5826_v38 = vadd.f32 %v5825_v62, %v5590_v42 }
 0x59a   : > { %v6097_v12 = vpop.f32.mrf.mxu3 }
 0x59b   : > { %v12254_v1 = vadd.f32 %v6097_v12, %v5826_v38  ;;  %v5593_v37 = vpop.f32.mrf.mxu1 }
 0x59d   : > { %9097 = vmatmul.msk.f32.gmra.mxu2 %vm247_vm1, %v7088_v58 }
 0x59e   : > { %9060 = vmatmul.msk.f32.gmra.mxu1 %vm247_vm1, %v6471_v16  ;;  %v7091_v16 = vld [vmem:[#allocation2 + $0x8c] sm:$0xff] }
 0x59f   : > { %9136 = vmatmul.msk.f32.gmra.mxu3 %vm247_vm1, %v7090_v32  ;;  %9173 = vmatmul.msk.f32.gmra.mxu0 %vm247_vm1, %v7398_v13 }
 0x5a0   : > { %v5828_v42 = vpop.f32.mrf.mxu2 }
 0x5a1   : > { %v5829_v62 = vadd.f32 %v5828_v42, %v5593_v37 }
 0x5a2   : > { %v6100_v38 = vpop.f32.mrf.mxu3 }
 0x5a3   : > { %v12266_v12 = vadd.f32 %v6100_v38, %v5829_v62  ;;  %v5596_v58 = vpop.f32.mrf.mxu1  ;;  %v12276_v62 = vpop.f32.mrf.mxu0 }
 0x5a5   : > { %9098 = vmatmul.msk.f32.gmra.mxu2 %vm247_vm1, %v7089_v26 }
 0x5a6   : > { %9061 = vmatmul.msk.f32.gmra.mxu1 %vm247_vm1, %v6472_v7  ;;  %v7092_v7 = vld [vmem:[#allocation2 + $0x94] sm:$0xff] }
 0x5a7   : > { %9137 = vmatmul.msk.f32.gmra.mxu3 %vm247_vm1, %v7091_v16  ;;  %9174 = vmatmul.msk.f32.gmra.mxu0 %vm247_vm1, %v7399_v18 }
 0x5a8   : > { %v5831_v37 = vpop.f32.mrf.mxu2 }
 0x5a9   : > { %v5832_v13 = vadd.f32 %v5831_v37, %v5596_v58 }
 0x5aa   : > { %v6103_v42 = vpop.f32.mrf.mxu3 }
 0x5ab   : > { %v12278_v38 = vadd.f32 %v6103_v42, %v5832_v13  ;;  %v5599_v26 = vpop.f32.mrf.mxu1  ;;  %v12290_v25 = vpop.f32.mrf.mxu0 }
 0x5ad   : > { %9099 = vmatmul.msk.f32.gmra.mxu2 %vm247_vm1, %v7090_v32  ;;  %v6474_v32 = vld [vmem:[#allocation2 + $0x8b] sm:$0xff] }
 0x5ae   : > { %9062 = vmatmul.msk.f32.gmra.mxu1 %vm247_vm1, %v6473_v3  ;;  %v7093_v3 = vld [vmem:[#allocation2 + $0x9c] sm:$0xff] }
 0x5af   : > { %9138 = vmatmul.msk.f32.gmra.mxu3 %vm247_vm1, %v7092_v7  ;;  %9175 = vmatmul.msk.f32.gmra.mxu0 %vm247_vm1, %v7400_v19 }
 0x5b0   : > { %v5834_v58 = vpop.f32.mrf.mxu2 }
 0x5b1   : > { %v5835_v18 = vadd.f32 %v5834_v58, %v5599_v26 }
 0x5b2   : > { %v6106_v37 = vpop.f32.mrf.mxu3 }
 0x5b3   : > { %v12288_v13 = vadd.f32 %v6106_v37, %v5835_v18  ;;  %v5602_v42 = vpop.f32.mrf.mxu1  ;;  %v6411_v20 = vpop.f32.mrf.mxu0 }
 0x5b5   : > { %9100 = vmatmul.msk.f32.gmra.mxu2 %vm247_vm1, %v7091_v16  ;;  %v7094_v16 = vld [vmem:[#allocation2 + $0xa4] sm:$0xff] }
 0x5b6   : > { %9063 = vmatmul.msk.f32.gmra.mxu1 %vm247_vm1, %v6474_v32  ;;  %v7402_v32 = vld [vmem:[#allocation2 + $0xa5] sm:$0xff] }
 0x5b7   : > { %9139 = vmatmul.msk.f32.gmra.mxu3 %vm247_vm1, %v7093_v3  ;;  %9176 = vmatmul.msk.f32.gmra.mxu0 %vm247_vm1, %v7401_v28 }
 0x5b8   : > { %v5837_v26 = vpop.f32.mrf.mxu2 }
 0x5b9   : > { %v5838_v19 = vadd.f32 %v5837_v26, %v5602_v42 }
 0x5ba   : > { %v6109_v58 = vpop.f32.mrf.mxu3 }
 0x5bb   : > { %v12300_v18 = vadd.f32 %v6109_v58, %v5838_v19  ;;  %v6623_v37 = vpop.f32.mrf.mxu1 }
 0x5bc   : > { %v6731_v42 = vadd.f32 %v6623_v37, %v12022_v52  ;;  %v12318_v52 = vadd.f32 %v12264_v14, %v12230_v36  ;;  %v7404_v36 = vld [vmem:[#allocation2 + $0xb5] sm:$0xff] }
 0x5bd   : > { %9101 = vmatmul.msk.f32.gmra.mxu2 %vm247_vm1, %v7092_v7 }
 0x5be   : > { %9064 = vmatmul.msk.f32.gmra.mxu1 %vm247_vm1, %v6475_v23  ;;  %v7095_v23 = vld [vmem:[#allocation2 + $0xac] sm:$0xff]  ;;  %13436 = vst [vmem:[#allocation35_spill] sm:$0xff] %v12318_v52  ;;  %v7705_v52 = vld [vmem:[#allocation2 + $0x7e] sm:$0xff] }
 0x5bf   : > { %9140 = vmatmul.msk.f32.gmra.mxu3 %vm247_vm1, %v7094_v16  ;;  %9177 = vmatmul.msk.f32.gmra.mxu0 %vm247_vm1, %v7402_v32  ;;  %v6414_v32 = vpop.f32.mrf.mxu0 }
 0x5c0   : > { %v6931_v28 = vpop.f32.mrf.mxu2 }
 0x5c1   : > { %v7039_v26 = vadd.f32 %v6931_v28, %v6731_v42 }
 0x5c2   : > { %v7242_v19 = vpop.f32.mrf.mxu3 }
 0x5c3   : > { %v12311_v58 = vadd.f32 %v7242_v19, %v7039_v26  ;;  %v6626_v7 = vpop.f32.mrf.mxu1  ;;  %v6477_v19 = vld [vmem:[#allocation2 + $0xa3] sm:$0xff] }
 0x5c4   : > { %v6732_v55 = vadd.f32 %v6626_v7, %v12028_v29  ;;  %v12329_v29 = vadd.f32 %v12276_v62, %v12242_v53  ;;  %v7405_v53 = vld [vmem:[#allocation2 + $0xbd] sm:$0xff] }
 0x5c5   : > { %9102 = vmatmul.msk.f32.gmra.mxu2 %vm247_vm1, %v7093_v3 }
 0x5c6   : > { %9065 = vmatmul.msk.f32.gmra.mxu1 %vm247_vm1, %v6476_v17  ;;  %v7096_v17 = vld [vmem:[#allocation2 + $0xb4] sm:$0xff]  ;;  %13437 = vst [vmem:[#allocation8_spill] sm:$0xff] %v12329_v29 }
 0x5c7   : > { %9141 = vmatmul.msk.f32.gmra.mxu3 %vm247_vm1, %v7095_v23  ;;  %9178 = vmatmul.msk.f32.gmra.mxu0 %vm247_vm1, %v7403_v24  ;;  %v7704_v29 = vld [vmem:[#allocation2 + $0x76] sm:$0xff] }
 0x5c8   : > { %v6934_v37 = vpop.f32.mrf.mxu2 }
 0x5c9   : > { %v7040_v42 = vadd.f32 %v6934_v37, %v6732_v55  ;;  %v6417_v37 = vpop.f32.mrf.mxu0 }
 0x5ca   : > { %v7245_v28 = vpop.f32.mrf.mxu3 }
 0x5cb   : > { %v12322_v26 = vadd.f32 %v7245_v28, %v7040_v42  ;;  %v6629_v3 = vpop.f32.mrf.mxu1  ;;  %v6478_v28 = vld [vmem:[#allocation2 + $0xab] sm:$0xff] }
 0x5cc   : > { %v6733_v14 = vadd.f32 %v6629_v3, %v12034_v33  ;;  %v12340_v33 = vadd.f32 %v12290_v25, %v12254_v1  ;;  %v7406_v1 = vld [vmem:[#allocation2 + $0xc5] sm:$0xff] }
 0x5cd   : > { %9103 = vmatmul.msk.f32.gmra.mxu2 %vm247_vm1, %v7094_v16 }
 0x5ce   : > { %9066 = vmatmul.msk.f32.gmra.mxu1 %vm247_vm1, %v6477_v19  ;;  %v7097_v19 = vld [vmem:[#allocation2 + $0xbc] sm:$0xff]  ;;  %13438 = vst [vmem:[#allocation13_spill] sm:$0xff] %v12340_v33  ;;  %v7703_v33 = vld [vmem:[#allocation2 + $0x6e] sm:$0xff] }
 0x5cf   : > { %9142 = vmatmul.msk.f32.gmra.mxu3 %vm247_vm1, %v7096_v17  ;;  %9179 = vmatmul.msk.f32.gmra.mxu0 %vm247_vm1, %v7404_v36 }
 0x5d0   : > { %v6937_v7 = vpop.f32.mrf.mxu2 }
 0x5d1   : > { %v7041_v24 = vadd.f32 %v6937_v7, %v6733_v14 }
 0x5d2   : > { %v7248_v55 = vpop.f32.mrf.mxu3 }
 0x5d3   : > { %v12333_v42 = vadd.f32 %v7248_v55, %v7041_v24  ;;  %v6632_v16 = vpop.f32.mrf.mxu1  ;;  %v6420_v24 = vpop.f32.mrf.mxu0  ;;  %v6479_v55 = vld [vmem:[#allocation2 + $0xb3] sm:$0xff] }
 0x5d4   : > { %v6734_v62 = vadd.f32 %v6632_v16, %v12040_v10  ;;  %v12350_v10 = vadd.f32 %v6411_v20, %v12266_v12  ;;  %v7407_v12 = vld [vmem:[#allocation2 + $0xcd] sm:$0xff]  ;;  %v12360_v20 = vadd.f32 %v6414_v32, %v12278_v38  ;;  %v7408_v38 = vld [vmem:[#allocation2 + $0xd5] sm:$0xff]  ;;  %v12370_v32 = vadd.f32 %v6417_v37, %v12288_v13  ;;  %v7409_v13 = vld [vmem:[#allocation2 + $0xdd] sm:$0xff] }
 0x5d5   : > { %9104 = vmatmul.msk.f32.gmra.mxu2 %vm247_vm1, %v7095_v23 }
 0x5d6   : > { %9067 = vmatmul.msk.f32.gmra.mxu1 %vm247_vm1, %v6478_v28  ;;  %v7098_v28 = vld [vmem:[#allocation2 + $0xc4] sm:$0xff]  ;;  %13439 = vst [vmem:[#allocation10_spill] sm:$0xff] %v12350_v10 }
 0x5d7   : > { %9143 = vmatmul.msk.f32.gmra.mxu3 %vm247_vm1, %v7097_v19  ;;  %9180 = vmatmul.msk.f32.gmra.mxu0 %vm247_vm1, %v7405_v53  ;;  %13440 = vst [vmem:[#allocation15_spill] sm:$0xff] %v12360_v20  ;;  %v7701_v20 = vld [vmem:[#allocation2 + $0x5e] sm:$0xff]  ;;  %v7702_v10 = vld [vmem:[#allocation2 + $0x66] sm:$0xff] }
 0x5d8   : > { %v6940_v3 = vpop.f32.mrf.mxu2  ;;  %13441 = vst [vmem:[#allocation36_spill] sm:$0xff] %v12370_v32  ;;  %v7700_v32 = vld [vmem:[#allocation2 + $0x56] sm:$0xff] }
 0x5d9   : > { %v7042_v36 = vadd.f32 %v6940_v3, %v6734_v62 }
 0x5da   : > { %v7251_v14 = vpop.f32.mrf.mxu3 }
 0x5db   : > { %v12344_v7 = vadd.f32 %v7251_v14, %v7042_v36  ;;  %v6635_v23 = vpop.f32.mrf.mxu1  ;;  %v7099_v14 = vld [vmem:[#allocation2 + $0xcc] sm:$0xff] }
 0x5dc   : > { %v6735_v25 = vadd.f32 %v6635_v23, %v12046_v8  ;;  %v7550_v8 = vpop.f32.mrf.mxu0 }
 0x5dd   : > { %9105 = vmatmul.msk.f32.gmra.mxu2 %vm247_vm1, %v7096_v17  ;;  %v6480_v17 = vld [vmem:[#allocation2 + $0xbb] sm:$0xff] }
 0x5de   : > { %9068 = vmatmul.msk.f32.gmra.mxu1 %vm247_vm1, %v6479_v55 }
 0x5df   : > { %9144 = vmatmul.msk.f32.gmra.mxu3 %vm247_vm1, %v7098_v28  ;;  %9181 = vmatmul.msk.f32.gmra.mxu0 %vm247_vm1, %v7406_v1 }
 0x5e0   : > { %v6943_v16 = vpop.f32.mrf.mxu2 }
 0x5e1   : > { %v7043_v53 = vadd.f32 %v6943_v16, %v6735_v25 }
 0x5e2   : > { %v7254_v62 = vpop.f32.mrf.mxu3 }
 0x5e3   : > { %v12354_v3 = vadd.f32 %v7254_v62, %v7043_v53  ;;  %v6638_v36 = vpop.f32.mrf.mxu1  ;;  %v6481_v53 = vld [vmem:[#allocation2 + $0xc3] sm:$0xff]  ;;  %v7100_v62 = vld [vmem:[#allocation2 + $0xd4] sm:$0xff] }
 0x5e4   : > { %v6736_v23 = vadd.f32 %v6638_v36, %v12052_v15 }
 0x5e5   : > { %9106 = vmatmul.msk.f32.gmra.mxu2 %vm247_vm1, %v7097_v19 }
 0x5e6   : > { %9069 = vmatmul.msk.f32.gmra.mxu1 %vm247_vm1, %v6480_v17  ;;  %v7553_v17 = vpop.f32.mrf.mxu0 }
 0x5e7   : > { %9145 = vmatmul.msk.f32.gmra.mxu3 %vm247_vm1, %v7099_v14  ;;  %9182 = vmatmul.msk.f32.gmra.mxu0 %vm247_vm1, %v7407_v12 }
 0x5e8   : > { %v6946_v55 = vpop.f32.mrf.mxu2 }
 0x5e9   : > { %v7044_v1 = vadd.f32 %v6946_v55, %v6736_v23 }
 0x5ea   : > { %v7257_v25 = vpop.f32.mrf.mxu3 }
 0x5eb   : > { %v12364_v16 = vadd.f32 %v7257_v25, %v7044_v1  ;;  %v6641_v19 = vpop.f32.mrf.mxu1  ;;  %v6482_v1 = vld [vmem:[#allocation2 + $0xcb] sm:$0xff]  ;;  %v7101_v25 = vld [vmem:[#allocation2 + $0xdc] sm:$0xff] }
 0x5ec   : > { %v6737_v15 = vadd.f32 %v6641_v19, %v12058_v46  ;;  %v12380_v46 = vadd.f32 %v6420_v24, %v12300_v18  ;;  %v7410_v18 = vld [vmem:[#allocation2 + $0xe5] sm:$0xff] }
 0x5ed   : > { %9107 = vmatmul.msk.f32.gmra.mxu2 %vm247_vm1, %v7098_v28 }
 0x5ee   : > { %9070 = vmatmul.msk.f32.gmra.mxu1 %vm247_vm1, %v6481_v53  ;;  %13442 = vst [vmem:[#allocation37_spill] sm:$0xff] %v12380_v46  ;;  %v7699_v46 = vld [vmem:[#allocation2 + $0x4e] sm:$0xff] }
 0x5ef   : > { %9146 = vmatmul.msk.f32.gmra.mxu3 %vm247_vm1, %v7100_v62  ;;  %9183 = vmatmul.msk.f32.gmra.mxu0 %vm247_vm1, %v7408_v38 }
 0x5f0   : > { %v6949_v36 = vpop.f32.mrf.mxu2 }
 0x5f1   : > { %v7045_v12 = vadd.f32 %v6949_v36, %v6737_v15  ;;  %v7556_v15 = vpop.f32.mrf.mxu0 }
 0x5f2   : > { %v7260_v23 = vpop.f32.mrf.mxu3 }
 0x5f3   : > { %v12374_v55 = vadd.f32 %v7260_v23, %v7045_v12  ;;  %v6644_v28 = vpop.f32.mrf.mxu1  ;;  %v6483_v12 = vld [vmem:[#allocation2 + $0xd3] sm:$0xff]  ;;  %v7102_v23 = vld [vmem:[#allocation2 + $0xe4] sm:$0xff] }
 0x5f4   : > { %v6738_v37 = vadd.f32 %v6644_v28, %v12066_v43  ;;  %v12390_v43 = vadd.f32 %v7550_v8, %v12311_v58  ;;  %v7411_v58 = vld [vmem:[#allocation2 + $0xed] sm:$0xff] }
 0x5f5   : > { %9108 = vmatmul.msk.f32.gmra.mxu2 %vm247_vm1, %v7099_v14 }
 0x5f6   : > { %9071 = vmatmul.msk.f32.gmra.mxu1 %vm247_vm1, %v6482_v1 }
 0x5f7   : > { %9147 = vmatmul.msk.f32.gmra.mxu3 %vm247_vm1, %v7101_v25  ;;  %9184 = vmatmul.msk.f32.gmra.mxu0 %vm247_vm1, %v7409_v13 }
 0x5f8   : > { %v6952_v19 = vpop.f32.mrf.mxu2 }
 0x5f9   : > { %v7046_v53 = vadd.f32 %v6952_v19, %v6738_v37 }
 0x5fa   : > { %v7263_v38 = vpop.f32.mrf.mxu3 }
 0x5fb   : > { %v12384_v36 = vadd.f32 %v7263_v38, %v7046_v53  ;;  %v6647_v14 = vpop.f32.mrf.mxu1  ;;  %v6484_v53 = vld [vmem:[#allocation2 + $0xdb] sm:$0xff]  ;;  %v7103_v38 = vld [vmem:[#allocation2 + $0xec] sm:$0xff] }
 0x5fc   : > { %v6739_v24 = vadd.f32 %v6647_v14, %v12073_v44  ;;  %v12400_v44 = vadd.f32 %v7553_v17, %v12322_v26  ;;  %v7412_v26 = vld [vmem:[#allocation2 + $0xf5] sm:$0xff]  ;;  %v12410_v17 = vadd.f32 %v7556_v15, %v12333_v42  ;;  %v7413_v42 = vld [vmem:[#allocation2 + $0xfd] sm:$0xff] }
 0x5fd   : > { %9109 = vmatmul.msk.f32.gmra.mxu2 %vm247_vm1, %v7100_v62  ;;  %v7559_v62 = vpop.f32.mrf.mxu0 }
 0x5fe   : > { %9072 = vmatmul.msk.f32.gmra.mxu1 %vm247_vm1, %v6483_v12  ;;  %v12420_v15 = vadd.f32 %v7559_v62, %v12344_v7  ;;  %v7414_v7 = vld [vmem:[#allocation2 + $0x105] sm:$0xff] }
 0x5ff   : > { %9148 = vmatmul.msk.f32.gmra.mxu3 %vm247_vm1, %v7102_v23  ;;  %9185 = vmatmul.msk.f32.gmra.mxu0 %vm247_vm1, %v7410_v18 }
 0x600   : > { %v6955_v28 = vpop.f32.mrf.mxu2 }
 0x601   : > { %v7047_v1 = vadd.f32 %v6955_v28, %v6739_v24 }
 0x602   : > { %v7266_v13 = vpop.f32.mrf.mxu3 }
 0x603   : > { %v12394_v37 = vadd.f32 %v7266_v13, %v7047_v1  ;;  %v6650_v19 = vpop.f32.mrf.mxu1  ;;  %v7104_v1 = vld [vmem:[#allocation2 + $0xf4] sm:$0xff] }
 0x604   : > { %v6740_v8 = vadd.f32 %v6650_v19, %v12079_v6 }
 0x605   : > { %9110 = vmatmul.msk.f32.gmra.mxu2 %vm247_vm1, %v7101_v25  ;;  %v6485_v25 = vld [vmem:[#allocation2 + $0xe3] sm:$0xff]  ;;  %v7562_v6 = vpop.f32.mrf.mxu0 }
 0x606   : > { %9073 = vmatmul.msk.f32.gmra.mxu1 %vm247_vm1, %v6484_v53 }
 0x607   : > { %9149 = vmatmul.msk.f32.gmra.mxu3 %vm247_vm1, %v7103_v38  ;;  %9186 = vmatmul.msk.f32.gmra.mxu0 %vm247_vm1, %v7411_v58 }
 0x608   : > { %v6958_v14 = vpop.f32.mrf.mxu2 }
 0x609   : > { %v7048_v12 = vadd.f32 %v6958_v14, %v6740_v8  ;;  %v6486_v14 = vld [vmem:[#allocation2 + $0xeb] sm:$0xff] }
 0x60a   : > { %v7269_v18 = vpop.f32.mrf.mxu3 }
 0x60b   : > { %v12404_v24 = vadd.f32 %v7269_v18, %v7048_v12  ;;  %v6653_v28 = vpop.f32.mrf.mxu1  ;;  %v7105_v12 = vld [vmem:[#allocation2 + $0xfc] sm:$0xff] }
 0x60c   : > { %v6741_v13 = vadd.f32 %v6653_v28, %v12085_v40 }
 0x60d   : > { %9111 = vmatmul.msk.f32.gmra.mxu2 %vm247_vm1, %v7102_v23  ;;  %v7565_v28 = vpop.f32.mrf.mxu0 }
 0x60e   : > { %9074 = vmatmul.msk.f32.gmra.mxu1 %vm247_vm1, %v6485_v25 }
 0x60f   : > { %9150 = vmatmul.msk.f32.gmra.mxu3 %vm247_vm1, %v7104_v1  ;;  %9187 = vmatmul.msk.f32.gmra.mxu0 %vm247_vm1, %v7412_v26 }
 0x610   : > { %v6961_v19 = vpop.f32.mrf.mxu2 }
 0x611   : > { %v7049_v53 = vadd.f32 %v6961_v19, %v6741_v13  ;;  %v6487_v19 = vld [vmem:[#allocation2 + $0xf3] sm:$0xff] }
 0x612   : > { %v7272_v58 = vpop.f32.mrf.mxu3 }
 0x613   : > { %v12414_v8 = vadd.f32 %v7272_v58, %v7049_v53  ;;  %v6656_v23 = vpop.f32.mrf.mxu1  ;;  %v7106_v53 = vld [vmem:[#allocation2 + $0x104] sm:$0xff] }
 0x614   : > { %v6742_v40 = vadd.f32 %v6656_v23, %v12091_v0  ;;  %v12432_v0 = vadd.f32 %v7562_v6, %v12354_v3  ;;  %v6488_v23 = vld [vmem:[#allocation2 + $0xfb] sm:$0xff] }
 0x615   : > { %9112 = vmatmul.msk.f32.gmra.mxu2 %vm247_vm1, %v7103_v38  ;;  %v7568_v62 = vpop.f32.mrf.mxu0 }
 0x616   : > { %9075 = vmatmul.msk.f32.gmra.mxu1 %vm247_vm1, %v6486_v14  ;;  %v7107_v14 = vld [vmem:[#allocation2 + $0x10c] sm:$0xff] }
 0x617   : > { %9151 = vmatmul.msk.f32.gmra.mxu3 %vm247_vm1, %v7105_v12  ;;  %9188 = vmatmul.msk.f32.gmra.mxu0 %vm247_vm1, %v7413_v42  ;;  %v12441_v42 = vadd.f32 %v7565_v28, %v12364_v16  ;;  %v6490_v28 = vld [vmem:[#allocation2 + $0x10b] sm:$0xff] }
 0x618   : > { %v6964_v18 = vpop.f32.mrf.mxu2 }
 0x619   : > { %v7050_v25 = vadd.f32 %v6964_v18, %v6742_v40  ;;  %v6489_v40 = vld [vmem:[#allocation2 + $0x103] sm:$0xff]  ;;  %v7108_v18 = vld [vmem:[#allocation2 + $0x114] sm:$0xff] }
 0x61a   : > { %v7275_v26 = vpop.f32.mrf.mxu3 }
 0x61b   : > { %v12424_v13 = vadd.f32 %v7275_v26, %v7050_v25  ;;  %v12426_v38 = vpop.f32.mrf.mxu1  ;;  %v12450_v25 = vadd.f32 %v7568_v62, %v12374_v55  ;;  %v7109_v26 = vld [vmem:[#allocation2 + $0x11c] sm:$0xff]  ;;  %v6491_v62 = vld [vmem:[#allocation2 + $0x113] sm:$0xff] }
 0x61d   : > { %9113 = vmatmul.msk.f32.gmra.mxu2 %vm247_vm1, %v7104_v1  ;;  %v7415_v1 = vld [vmem:[#allocation2 + $0x10d] sm:$0xff]  ;;  %v7571_v6 = vpop.f32.mrf.mxu0 }
 0x61e   : > { %9076 = vmatmul.msk.f32.gmra.mxu1 %vm247_vm1, %v6487_v19  ;;  %v7417_v19 = vld [vmem:[#allocation2 + $0x11d] sm:$0xff] }
 0x61f   : > { %9152 = vmatmul.msk.f32.gmra.mxu3 %vm247_vm1, %v7106_v53  ;;  %9189 = vmatmul.msk.f32.gmra.mxu0 %vm247_vm1, %v7414_v7 }
 0x623   : > { %v12435_v58 = vpop.f32.mrf.mxu1 }
 0x625   : > { %9114 = vmatmul.msk.f32.gmra.mxu2 %vm247_vm1, %v7105_v12  ;;  %v7416_v12 = vld [vmem:[#allocation2 + $0x115] sm:$0xff]  ;;  %v7574_v7 = vpop.f32.mrf.mxu0 }
 0x626   : > { %9077 = vmatmul.msk.f32.gmra.mxu1 %vm247_vm1, %v6488_v23  ;;  %v7110_v23 = vld [vmem:[#allocation2 + $0x124] sm:$0xff] }
 0x627   : > { %9153 = vmatmul.msk.f32.gmra.mxu3 %vm247_vm1, %v7107_v14  ;;  %9190 = vmatmul.msk.f32.gmra.mxu0 %vm247_vm1, %v7415_v1  ;;  %v12468_v1 = vadd.f32 %v7574_v7, %v12394_v37  ;;  %v6493_v7 = vld [vmem:[#allocation2 + $0x123] sm:$0xff] }
 0x62b   : > { %v12444_v3 = vpop.f32.mrf.mxu1 }
 0x62d   : > { %9115 = vmatmul.msk.f32.gmra.mxu2 %vm247_vm1, %v7106_v53  ;;  %v12459_v53 = vadd.f32 %v7571_v6, %v12384_v36  ;;  %v7577_v36 = vpop.f32.mrf.mxu0 }
 0x62e   : > { %9078 = vmatmul.msk.f32.gmra.mxu1 %vm247_vm1, %v6489_v40  ;;  %v6492_v40 = vld [vmem:[#allocation2 + $0x11b] sm:$0xff] }
 0x62f   : > { %9154 = vmatmul.msk.f32.gmra.mxu3 %vm247_vm1, %v7108_v18  ;;  %9191 = vmatmul.msk.f32.gmra.mxu0 %vm247_vm1, %v7416_v12  ;;  %v7111_v12 = vld [vmem:[#allocation2 + $0x12c] sm:$0xff] }
 0x633   : > { %v12453_v16 = vpop.f32.mrf.mxu1 }
 0x635   : > { %9116 = vmatmul.msk.f32.gmra.mxu2 %vm247_vm1, %v7107_v14  ;;  %v7418_v14 = vld [vmem:[#allocation2 + $0x125] sm:$0xff]  ;;  %v7580_v37 = vpop.f32.mrf.mxu0 }
 0x636   : > { %9079 = vmatmul.msk.f32.gmra.mxu1 %vm247_vm1, %v6490_v28  ;;  %v12477_v28 = vadd.f32 %v7577_v36, %v12404_v24 }
 0x637   : > { %9155 = vmatmul.msk.f32.gmra.mxu3 %vm247_vm1, %v7109_v26  ;;  %9192 = vmatmul.msk.f32.gmra.mxu0 %vm247_vm1, %v7417_v19 }
 0x63b   : > { %v12462_v55 = vpop.f32.mrf.mxu1 }
 0x63d   : > { %9117 = vmatmul.msk.f32.gmra.mxu2 %vm247_vm1, %v7108_v18  ;;  %v7419_v18 = vld [vmem:[#allocation2 + $0x12d] sm:$0xff]  ;;  %v7583_v36 = vpop.f32.mrf.mxu0 }
 0x63e   : > { %9080 = vmatmul.msk.f32.gmra.mxu1 %vm247_vm1, %v6491_v62  ;;  %v7112_v62 = vld [vmem:[#allocation2 + $0x134] sm:$0xff] }
 0x63f   : > { %9156 = vmatmul.msk.f32.gmra.mxu3 %vm247_vm1, %v7110_v23  ;;  %9193 = vmatmul.msk.f32.gmra.mxu0 %vm247_vm1, %v7418_v14  ;;  %v12486_v14 = vadd.f32 %v7580_v37, %v12414_v8  ;;  %v7694_v37 = vld [vmem:[#allocation2 + $0x26] sm:$0xff] }
 0x643   : > { %v12471_v6 = vpop.f32.mrf.mxu1 }
 0x645   : > { %9118 = vmatmul.msk.f32.gmra.mxu2 %vm247_vm1, %v7109_v26  ;;  %v7420_v26 = vld [vmem:[#allocation2 + $0x135] sm:$0xff] }
 0x646   : > { %9081 = vmatmul.msk.f32.gmra.mxu1 %vm247_vm1, %v6492_v40  ;;  %v6494_v40 = vld [vmem:[#allocation2 + $0x12b] sm:$0xff] }
 0x647   : > { %9157 = vmatmul.msk.f32.gmra.mxu3 %vm247_vm1, %v7111_v12  ;;  %9194 = vmatmul.msk.f32.gmra.mxu0 %vm247_vm1, %v7419_v18  ;;  %v7113_v18 = vld [vmem:[#allocation2 + $0x13c] sm:$0xff] }
 0x64b   : > { %v12480_v19 = vpop.f32.mrf.mxu1 }
 0x64d   : > { %9119 = vmatmul.msk.f32.gmra.mxu2 %vm247_vm1, %v7110_v23  ;;  %v7421_v23 = vld [vmem:[#allocation2 + $0x13d] sm:$0xff] }
 0x64e   : > { %9082 = vmatmul.msk.f32.gmra.mxu1 %vm247_vm1, %v6493_v7  ;;  %v12495_v7 = vadd.f32 %v7583_v36, %v12424_v13  ;;  %v7697_v13 = vld [vmem:[#allocation2 + $0x3e] sm:$0xff] }
 0x64f   : > { %9158 = vmatmul.msk.f32.gmra.mxu3 %vm247_vm1, %v7112_v62  ;;  %9195 = vmatmul.msk.f32.gmra.mxu0 %vm247_vm1, %v7420_v26  ;;  %v7695_v26 = vld [vmem:[#allocation2 + $0x2e] sm:$0xff] }
 0x653   : > { %v12489_v24 = vpop.f32.mrf.mxu1 }
 0x655   : > { %9120 = vmatmul.msk.f32.gmra.mxu2 %vm247_vm1, %v7111_v12 }
 0x656   : > { %9083 = vmatmul.msk.f32.gmra.mxu1 %vm247_vm1, %v6494_v40  ;;  %v7696_v40 = vld [vmem:[#allocation2 + $0x36] sm:$0xff] }
 0x657   : > { %9159 = vmatmul.msk.f32.gmra.mxu3 %vm247_vm1, %v7113_v18  ;;  %9196 = vmatmul.msk.f32.gmra.mxu0 %vm247_vm1, %v7421_v23  ;;  %v7698_v23 = vld [vmem:[#allocation2 + $0x46] sm:$0xff] }
 0x65b   : > { %v12498_v8 = vpop.f32.mrf.mxu1 }
 0x65e   : > { %9198 = vmatmul.msk.f32.vlgmr.msra.gmra.mxu1 %vm247_vm1, %v7694_v37 }
 0x663   : > { %v12501_v62 = vpop.f32.mrf.mxu1 }
 0x666   : > { %9199 = vmatmul.msk.f32.gmra.mxu1 %vm247_vm1, %v7695_v26 }
 0x66b   : > { %v12504_v12 = vpop.f32.mrf.mxu1 }
 0x66e   : > { %9200 = vmatmul.msk.f32.gmra.mxu1 %vm247_vm1, %v7696_v40 }
 0x673   : > { %v12507_v18 = vpop.f32.mrf.mxu1 }
 0x676   : > { %9201 = vmatmul.msk.f32.gmra.mxu1 %vm247_vm1, %v7697_v13 }
 0x67b   : > { %v12510_v36 = vpop.f32.mrf.mxu1 }
 0x67e   : > { %9202 = vmatmul.msk.f32.gmra.mxu1 %vm247_vm1, %v7698_v23 }
 0x683   : > { %v12513_v37 = vpop.f32.mrf.mxu1 }
 0x684   : > { %13443 = vst [vmem:[#allocation38_spill] sm:$0xff] %v12513_v37 }
 0x686   : > { %9203 = vmatmul.msk.f32.gmra.mxu1 %vm247_vm1, %v7699_v46 }
 0x68b   : > { %v12516_v26 = vpop.f32.mrf.mxu1 }
 0x68c   : > { %13444 = vst [vmem:[#allocation39_spill] sm:$0xff] %v12516_v26 }
 0x68e   : > { %9204 = vmatmul.msk.f32.gmra.mxu1 %vm247_vm1, %v7700_v32 }
 0x693   : > { %v12519_v40 = vpop.f32.mrf.mxu1 }
 0x694   : > { %13445 = vst [vmem:[#allocation40_spill] sm:$0xff] %v12519_v40  ;;  %v7711_v40 = vld [vmem:[#allocation2 + $0xae] sm:$0xff] }
 0x696   : > { %9205 = vmatmul.msk.f32.gmra.mxu1 %vm247_vm1, %v7701_v20 }
 0x69b   : > { %v12522_v13 = vpop.f32.mrf.mxu1 }
 0x69c   : > { %13446 = vst [vmem:[#allocation41_spill] sm:$0xff] %v12522_v13  ;;  %v7706_v13 = vld [vmem:[#allocation2 + $0x86] sm:$0xff] }
 0x69e   : > { %9206 = vmatmul.msk.f32.gmra.mxu1 %vm247_vm1, %v7702_v10 }
 0x6a3   : > { %v12525_v23 = vpop.f32.mrf.mxu1 }
 0x6a4   : > { %13447 = vst [vmem:[#allocation42_spill] sm:$0xff] %v12525_v23  ;;  %v7707_v23 = vld [vmem:[#allocation2 + $0x8e] sm:$0xff] }
 0x6a6   : > { %9207 = vmatmul.msk.f32.gmra.mxu1 %vm247_vm1, %v7703_v33 }
 0x6ab   : > { %v12528_v46 = vpop.f32.mrf.mxu1 }
 0x6ac   : > { %13448 = vst [vmem:[#allocation43_spill] sm:$0xff] %v12528_v46  ;;  %v7708_v46 = vld [vmem:[#allocation2 + $0x96] sm:$0xff] }
 0x6ae   : > { %9208 = vmatmul.msk.f32.gmra.mxu1 %vm247_vm1, %v7704_v29 }
 0x6b3   : > { %v12531_v32 = vpop.f32.mrf.mxu1 }
 0x6b4   : > { %13449 = vst [vmem:[#allocation44_spill] sm:$0xff] %v12531_v32  ;;  %v7709_v32 = vld [vmem:[#allocation2 + $0x9e] sm:$0xff] }
 0x6b6   : > { %9209 = vmatmul.msk.f32.gmra.mxu1 %vm247_vm1, %v7705_v52 }
 0x6bb   : > { %v12534_v20 = vpop.f32.mrf.mxu1 }
 0x6bc   : > { %13450 = vst [vmem:[#allocation45_spill] sm:$0xff] %v12534_v20 }
 0x6be   : > { %9210 = vmatmul.msk.f32.gmra.mxu1 %vm247_vm1, %v7706_v13 }
 0x6c3   : > { %v12537_v10 = vpop.f32.mrf.mxu1 }
 0x6c4   : > { %13451 = vst [vmem:[#allocation46_spill] sm:$0xff] %v12537_v10 }
 0x6c6   : > { %9211 = vmatmul.msk.f32.gmra.mxu1 %vm247_vm1, %v7707_v23 }
 0x6cb   : > { %v12540_v33 = vpop.f32.mrf.mxu1 }
 0x6cc   : > { %13452 = vst [vmem:[#allocation47_spill] sm:$0xff] %v12540_v33 }
 0x6ce   : > { %9212 = vmatmul.msk.f32.gmra.mxu1 %vm247_vm1, %v7708_v46 }
 0x6d3   : > { %v12543_v29 = vpop.f32.mrf.mxu1 }
 0x6d4   : > { %13453 = vst [vmem:[#allocation48_spill] sm:$0xff] %v12543_v29 }
 0x6d6   : > { %9213 = vmatmul.msk.f32.gmra.mxu1 %vm247_vm1, %v7709_v32 }
 0x6db   : > { %v7858_v52 = vpop.f32.mrf.mxu1 }
 0x6dc   : > { %v7966_v20 = vadd.f32 %v7858_v52, %v12390_v43 }
 0x6de   : > { %8230 = vst.msk [vmem:[#allocation3] sm:$0xff] %vm247_vm1, %v7966_v20  ;;  %9214 = vmatmul.msk.f32.gmra.mxu1 %vm247_vm1, %v7710_v63  ;;  %v8002_v23 = vsel %vm4142_vm3, %v7966_v20, 0.0  ;;  %vm13456_vm3 = vcmp.lt.s32.totalorder %v10369_v34, 16 }
 0x6df   : > { %v8116_v46 = vmul.f32 %v8002_v23, %v8002_v23  ;;  %v8038_v43 = vsel %vm247_vm1, %v8002_v23, 0.0 }
 0x6e1   : > { %v8152_v20 = vsel %vm247_vm1, %v8116_v46, 0.0 }
 0x6e3   : > { %v7861_v33 = vpop.f32.mrf.mxu1 }
 0x6e4   : > { %v7967_v10 = vadd.f32 %v7861_v33, %v12400_v44 }
 0x6e6   : > { %v8003_v29 = vsel %vm13455_vm0, %v7967_v10, 0.0  ;;  %8231 = vst.msk [vmem:[#allocation3 + $0x8] sm:$0xff] %vm247_vm1, %v7967_v10  ;;  %9215 = vmatmul.msk.f32.gmra.mxu1 %vm247_vm1, %v7711_v40  ;;  %vm13471_vm0 = vcmp.lt.s32.totalorder %v11144_v35, 16 }
 0x6e7   : > { %v8039_v32 = vsel %vm247_vm1, %v8003_v29, 0.0  ;;  %v8117_v63 = vmul.f32 %v8003_v29, %v8003_v29 }
 0x6e8   : > { %v8040_v52 = vadd.f32 %v8039_v32, %v8038_v43 }
 0x6e9   : > { %v8153_v13 = vsel %vm247_vm1, %v8117_v63, 0.0 }
 0x6ea   : > { %v8154_v44 = vadd.f32 %v8153_v13, %v8152_v20  ;;  %v7713_v20 = vld [vmem:[#allocation2 + $0xbe] sm:$0xff] }
 0x6eb   : > { %v7864_v33 = vpop.f32.mrf.mxu1 }
 0x6ec   : > { %v7968_v26 = vadd.f32 %v7864_v33, %v12410_v17 }
 0x6ee   : > { %v8004_v10 = vsel %vm13456_vm3, %v7968_v26, 0.0  ;;  %8232 = vst.msk [vmem:[#allocation3 + $0x10] sm:$0xff] %vm247_vm1, %v7968_v26  ;;  %9216 = vmatmul.msk.f32.gmra.mxu1 %vm247_vm1, %v7712_v59  ;;  %vm13472_vm3 = vcmp.lt.s32.totalorder %v11189_v48, 16 }
 0x6ef   : > { %v8041_v40 = vsel %vm247_vm1, %v8004_v10, 0.0  ;;  %v8118_v29 = vmul.f32 %v8004_v10, %v8004_v10 }
 0x6f0   : > { %v8042_v23 = vadd.f32 %v8041_v40, %v8040_v52  ;;  %v7714_v40 = vld [vmem:[#allocation2 + $0xc6] sm:$0xff] }
 0x6f1   : > { %v8155_v46 = vsel %vm247_vm1, %v8118_v29, 0.0 }
 0x6f2   : > { %v8156_v43 = vadd.f32 %v8155_v46, %v8154_v44 }
 0x6f3   : > { %v7867_v32 = vpop.f32.mrf.mxu1 }
 0x6f4   : > { %v7969_v63 = vadd.f32 %v7867_v32, %v12420_v15  ;;  %v13458_v15 = vld [vmem:[#allocation17_spill] sm:$0xff] }
 0x6f5   : > { %vm13459_vm11 = vcmp.lt.s32.totalorder %v13458_v15, 16 }
 0x6f6   : > { %v8005_v13 = vsel %vm4145_vm13, %v7969_v63, 0.0  ;;  %8233 = vst.msk [vmem:[#allocation3 + $0x18] sm:$0xff] %vm247_vm1, %v7969_v63  ;;  %9217 = vmatmul.msk.f32.gmra.mxu1 %vm247_vm1, %v7713_v20  ;;  %v12580_v20 = vpop.f32.mrf.mxu2 }
 0x6f7   : > { %v8043_v34 = vsel %vm247_vm1, %v8005_v13, 0.0  ;;  %v8119_v26 = vmul.f32 %v8005_v13, %v8005_v13  ;;  %v7715_v13 = vld [vmem:[#allocation2 + $0xce] sm:$0xff] }
 0x6f8   : > { %v8044_v33 = vadd.f32 %v8043_v34, %v8042_v23  ;;  %v13460_v34 = vld [vmem:[#allocation14_spill] sm:$0xff] }
 0x6f9   : > { %v8157_v52 = vsel %vm247_vm1, %v8119_v26, 0.0  ;;  %vm13461_vm13 = vcmp.lt.s32.totalorder %v13460_v34, 16 }
 0x6fa   : > { %v8158_v59 = vadd.f32 %v8157_v52, %v8156_v43  ;;  %v12588_v52 = vpop.f32.mrf.mxu3 }
 0x6fb   : > { %v7870_v10 = vpop.f32.mrf.mxu1 }
 0x6fc   : > { %v7970_v44 = vadd.f32 %v7870_v10, %v12432_v0 }
 0x6fe   : > { %v8006_v29 = vsel %vm13459_vm11, %v7970_v44, 0.0  ;;  %8234 = vst.msk [vmem:[#allocation3 + $0x20] sm:$0xff] %vm247_vm1, %v7970_v44  ;;  %9218 = vmatmul.msk.f32.gmra.mxu1 %vm247_vm1, %v7714_v40  ;;  %vm13473_vm11 = vcmp.lt.s32.totalorder %v11221_v5, 16 }
 0x6ff   : > { %v8045_v46 = vsel %vm247_vm1, %v8006_v29, 0.0  ;;  %v8120_v32 = vmul.f32 %v8006_v29, %v8006_v29 }
 0x700   : > { %v8046_v63 = vadd.f32 %v8045_v46, %v8044_v33 }
 0x701   : > { %v8159_v23 = vsel %vm247_vm1, %v8120_v32, 0.0  ;;  %v7716_v32 = vld [vmem:[#allocation2 + $0xd6] sm:$0xff] }
 0x702   : > { %v8160_v43 = vadd.f32 %v8159_v23, %v8158_v59  ;;  %v12592_v59 = vpop.f32.mrf.mxu0  ;;  %v13462_v23 = vld [vmem:[#allocation19_spill] sm:$0xff]  ;;  %v12602_v34 = vpop.f32.mrf.mxu3 }
 0x703   : > { %v7873_v17 = vpop.f32.mrf.mxu1  ;;  %vm13463_vm8 = vcmp.lt.s32.totalorder %v13462_v23, 16 }
 0x704   : > { %v7971_v0 = vadd.f32 %v7873_v17, %v12441_v42  ;;  %v12594_v42 = vpop.f32.mrf.mxu2 }
 0x706   : > { %v8007_v26 = vsel %vm13461_vm13, %v7971_v0, 0.0  ;;  %8235 = vst.msk [vmem:[#allocation3 + $0x28] sm:$0xff] %vm247_vm1, %v7971_v0  ;;  %9219 = vmatmul.msk.f32.gmra.mxu1 %vm247_vm1, %v7715_v13  ;;  %vm13474_vm13 = vcmp.lt.s32.totalorder %v11257_v41, 16 }
 0x707   : > { %v8047_v33 = vsel %vm247_vm1, %v8007_v26, 0.0  ;;  %v8121_v10 = vmul.f32 %v8007_v26, %v8007_v26 }
 0x708   : > { %v8048_v44 = vadd.f32 %v8047_v33, %v8046_v63 }
 0x709   : > { %v8161_v40 = vsel %vm247_vm1, %v8121_v10, 0.0 }
 0x70a   : > { %v8162_v15 = vadd.f32 %v8161_v40, %v8160_v43  ;;  %v12605_v10 = vpop.f32.mrf.mxu0 }
 0x70b   : > { %v7876_v29 = vpop.f32.mrf.mxu1 }
 0x70c   : > { %v7972_v46 = vadd.f32 %v7876_v29, %v12450_v25  ;;  %v12608_v40 = vpop.f32.mrf.mxu2  ;;  %v7717_v29 = vld [vmem:[#allocation2 + $0xde] sm:$0xff] }
 0x70e   : > { %v8008_v17 = vsel %vm13463_vm8, %v7972_v46, 0.0  ;;  %8236 = vst.msk [vmem:[#allocation3 + $0x30] sm:$0xff] %vm247_vm1, %v7972_v46  ;;  %9220 = vmatmul.msk.f32.gmra.mxu1 %vm247_vm1, %v7716_v32 }
 0x70f   : > { %v8049_v63 = vsel %vm247_vm1, %v8008_v17, 0.0  ;;  %v8122_v0 = vmul.f32 %v8008_v17, %v8008_v17 }
 0x710   : > { %v8050_v13 = vadd.f32 %v8049_v63, %v8048_v44  ;;  %v12616_v63 = vpop.f32.mrf.mxu3 }
 0x711   : > { %v8163_v43 = vsel %vm247_vm1, %v8122_v0, 0.0 }
 0x712   : > { %v8164_v26 = vadd.f32 %v8163_v43, %v8162_v15  ;;  %v7718_v43 = vld [vmem:[#allocation2 + $0xe6] sm:$0xff] }
 0x713   : > { %v7879_v33 = vpop.f32.mrf.mxu1 }
 0x714   : > { %v7973_v25 = vadd.f32 %v7879_v33, %v12459_v53  ;;  %v12619_v33 = vpop.f32.mrf.mxu0 }
 0x716   : > { %v8009_v46 = vsel %vm4149_vm2, %v7973_v25, 0.0  ;;  %8237 = vst.msk [vmem:[#allocation3 + $0x38] sm:$0xff] %vm247_vm1, %v7973_v25  ;;  %9221 = vmatmul.msk.f32.gmra.mxu1 %vm247_vm1, %v7717_v29  ;;  %v12625_v25 = vpop.f32.mrf.mxu2  ;;  %vm13464_vm2 = vcmp.lt.s32.totalorder %v10774_v31, 16  ;;  %v7720_v31 = vld [vmem:[#allocation2 + $0xf6] sm:$0xff] }
 0x717   : > { %v8051_v44 = vsel %vm247_vm1, %v8009_v46, 0.0  ;;  %v8123_v32 = vmul.f32 %v8009_v46, %v8009_v46 }
 0x718   : > { %v8052_v23 = vadd.f32 %v8051_v44, %v8050_v13 }
 0x719   : > { %v8165_v15 = vsel %vm247_vm1, %v8123_v32, 0.0 }
 0x71a   : > { %v8166_v17 = vadd.f32 %v8165_v15, %v8164_v26  ;;  %v12630_v15 = vpop.f32.mrf.mxu3 }
 0x71b   : > { %v7882_v53 = vpop.f32.mrf.mxu1 }
 0x71c   : > { %v7974_v0 = vadd.f32 %v7882_v53, %v12468_v1 }
 0x71e   : > { %v8010_v51 = vsel %vm4150_vm9, %v7974_v0, 0.0  ;;  %8238 = vst.msk [vmem:[#allocation3 + $0x40] sm:$0xff] %vm247_vm1, %v7974_v0  ;;  %9222 = vmatmul.msk.f32.gmra.mxu1 %vm247_vm1, %v7718_v43  ;;  %vm13465_vm9 = vcmp.lt.s32.totalorder %v10810_v11, 16 }
 0x71f   : > { %v8053_v13 = vsel %vm247_vm1, %v8010_v51, 0.0  ;;  %v8124_v26 = vmul.f32 %v8010_v51, %v8010_v51 }
 0x720   : > { %v8054_v29 = vadd.f32 %v8053_v13, %v8052_v23  ;;  %v12637_v23 = vpop.f32.mrf.mxu0 }
 0x721   : > { %v8167_v46 = vsel %vm247_vm1, %v8124_v26, 0.0 }
 0x722   : > { %v8168_v44 = vadd.f32 %v8167_v46, %v8166_v17  ;;  %v12639_v17 = vpop.f32.mrf.mxu2 }
 0x723   : > { %v7885_v1 = vpop.f32.mrf.mxu1 }
 0x724   : > { %v7975_v32 = vadd.f32 %v7885_v1, %v12477_v28 }
 0x726   : > { %v8011_v53 = vsel %vm13464_vm2, %v7975_v32, 0.0  ;;  %8239 = vst.msk [vmem:[#allocation3 + $0x48] sm:$0xff] %vm247_vm1, %v7975_v32  ;;  %9223 = vmatmul.msk.f32.gmra.mxu1 %vm247_vm1, %v7719_v4  ;;  %v12647_v32 = vpop.f32.mrf.mxu3 }
 0x727   : > { %v8055_v0 = vsel %vm247_vm1, %v8011_v53, 0.0  ;;  %v8125_v43 = vmul.f32 %v8011_v53, %v8011_v53  ;;  %v6743_v53 = vadd.f32 %v12426_v38, %v12097_v30 }
 0x728   : > { %v8056_v51 = vadd.f32 %v8055_v0, %v8054_v29 }
 0x729   : > { %v8169_v28 = vsel %vm247_vm1, %v8125_v43, 0.0  ;;  %v12654_v43 = vpop.f32.mrf.mxu0 }
 0x72a   : > { %v8170_v13 = vadd.f32 %v8169_v28, %v8168_v44  ;;  %v12656_v28 = vpop.f32.mrf.mxu2 }
 0x72b   : > { %v7888_v26 = vpop.f32.mrf.mxu1 }
 0x72c   : > { %v7976_v46 = vadd.f32 %v7888_v26, %v12486_v14  ;;  %v7051_v14 = vadd.f32 %v12580_v20, %v6743_v53  ;;  %v6744_v20 = vadd.f32 %v12435_v58, %v12110_v39 }
 0x72e   : > { %v8012_v1 = vsel %vm13465_vm9, %v7976_v46, 0.0  ;;  %8240 = vst.msk [vmem:[#allocation3 + $0x50] sm:$0xff] %vm247_vm1, %v7976_v46  ;;  %9224 = vmatmul.msk.f32.gmra.mxu1 %vm247_vm1, %v7720_v31  ;;  %v7721_v31 = vld [vmem:[#allocation2 + $0xfe] sm:$0xff]  ;;  %v7362_v37 = vadd.f32 %v12588_v52, %v7051_v14  ;;  %v7052_v52 = vadd.f32 %v12594_v42, %v6744_v20 }
 0x72f   : > { %v8057_v29 = vsel %vm247_vm1, %v8012_v1, 0.0  ;;  %v8126_v4 = vmul.f32 %v8012_v1, %v8012_v1 }
 0x730   : > { %v8058_v44 = vadd.f32 %v8057_v29, %v8056_v51  ;;  %v7670_v9 = vadd.f32 %v12592_v59, %v7362_v37  ;;  %v6745_v37 = vadd.f32 %v12444_v3, %v12119_v61 }
 0x731   : > { %v8171_v0 = vsel %vm247_vm1, %v8126_v4, 0.0  ;;  %v12672_v53 = vpop.f32.mrf.mxu0 }
 0x732   : > { %v8172_v11 = vadd.f32 %v8171_v0, %v8170_v13  ;;  %v12667_v13 = vpop.f32.mrf.mxu3  ;;  %v12674_v14 = vpop.f32.mrf.mxu2 }
 0x733   : > { %v7891_v26 = vpop.f32.mrf.mxu1 }
 0x734   : > { %v7977_v46 = vadd.f32 %v7891_v26, %v12495_v7  ;;  %v7722_v26 = vld [vmem:[#allocation2 + $0x106] sm:$0xff] }
 0x736   : > { %v8013_v1 = vsel %vm13466_vm7, %v7977_v46, 0.0  ;;  %8241 = vst.msk [vmem:[#allocation3 + $0x58] sm:$0xff] %vm247_vm1, %v7977_v46  ;;  %9225 = vmatmul.msk.f32.gmra.mxu1 %vm247_vm1, %v7721_v31  ;;  %v7363_v46 = vadd.f32 %v12602_v34, %v7052_v52 }
 0x737   : > { %v8059_v30 = vsel %vm247_vm1, %v8013_v1, 0.0  ;;  %v8127_v38 = vmul.f32 %v8013_v1, %v8013_v1 }
 0x738   : > { %v8060_v51 = vadd.f32 %v8059_v30, %v8058_v44  ;;  %v7671_v34 = vadd.f32 %v12605_v10, %v7363_v46  ;;  %v7724_v46 = vld [vmem:[#allocation2 + $0x116] sm:$0xff] }
 0x739   : > { %v8173_v7 = vsel %vm247_vm1, %v8127_v38, 0.0  ;;  %v7723_v38 = vld [vmem:[#allocation2 + $0x10e] sm:$0xff] }
 0x73a   : > { %v8174_v29 = vadd.f32 %v8173_v7, %v8172_v11  ;;  %v7053_v11 = vadd.f32 %v12608_v40, %v6745_v37  ;;  %v12687_v57 = vpop.f32.mrf.mxu3  ;;  %v12690_v7 = vpop.f32.mrf.mxu0 }
 0x73b   : > { %v7894_v4 = vpop.f32.mrf.mxu1  ;;  %v12696_v3 = vpop.f32.mrf.mxu2 }
 0x73c   : > { %v7978_v0 = vadd.f32 %v7894_v4, %v7670_v9  ;;  %v7364_v20 = vadd.f32 %v12616_v63, %v7053_v11 }
 0x73e   : > { %v8014_v39 = vsel %vm13467_vm14, %v7978_v0, 0.0  ;;  %8242 = vst.msk [vmem:[#allocation3 + $0x60] sm:$0xff] %vm247_vm1, %v7978_v0  ;;  %9226 = vmatmul.msk.f32.gmra.mxu1 %vm247_vm1, %v7722_v26  ;;  %v7672_v50 = vadd.f32 %v12619_v33, %v7364_v20  ;;  %v6747_v33 = vadd.f32 %v12462_v55, %v12138_v22 }
 0x73f   : > { %v8061_v58 = vsel %vm247_vm1, %v8014_v39, 0.0  ;;  %v8128_v42 = vmul.f32 %v8014_v39, %v8014_v39 }
 0x740   : > { %v8062_v59 = vadd.f32 %v8061_v58, %v8060_v51  ;;  %v6746_v51 = vadd.f32 %v12453_v16, %v12131_v60  ;;  %v7055_v2 = vadd.f32 %v12639_v17, %v6747_v33 }
 0x741   : > { %v8175_v44 = vsel %vm247_vm1, %v8128_v42, 0.0 }
 0x742   : > { %v8176_v31 = vadd.f32 %v8175_v44, %v8174_v29  ;;  %v7054_v29 = vadd.f32 %v12625_v25, %v6746_v51  ;;  %v12704_v26 = vpop.f32.mrf.mxu3  ;;  %v12714_v25 = vpop.f32.mrf.mxu0 }
 0x743   : > { %v7897_v1 = vpop.f32.mrf.mxu1  ;;  %v12716_v37 = vpop.f32.mrf.mxu2 }
 0x744   : > { %v7979_v30 = vadd.f32 %v7897_v1, %v7671_v34  ;;  %v7365_v39 = vadd.f32 %v12630_v15, %v7054_v29  ;;  %v7725_v34 = vld [vmem:[#allocation2 + $0x11e] sm:$0xff]  ;;  %v7366_v1 = vadd.f32 %v12647_v32, %v7055_v2 }
 0x746   : > { %v8015_v61 = vsel %vm13468_vm12, %v7979_v30, 0.0  ;;  %8243 = vst.msk [vmem:[#allocation3 + $0x68] sm:$0xff] %vm247_vm1, %v7979_v30  ;;  %9227 = vmatmul.msk.f32.gmra.mxu1 %vm247_vm1, %v7723_v38  ;;  %v7673_v44 = vadd.f32 %v12637_v23, %v7365_v39  ;;  %v6748_v23 = vadd.f32 %v12471_v6, %v12144_v27 }
 0x747   : > { %v8063_v10 = vsel %vm247_vm1, %v8015_v61, 0.0  ;;  %v8129_v40 = vmul.f32 %v8015_v61, %v8015_v61 }
 0x748   : > { %v8064_v52 = vadd.f32 %v8063_v10, %v8062_v59  ;;  %v7056_v32 = vadd.f32 %v12656_v28, %v6748_v23  ;;  %v7674_v10 = vadd.f32 %v12654_v43, %v7366_v1  ;;  %v6749_v43 = vadd.f32 %v12480_v19, %v12150_v45 }
 0x749   : > { %v8177_v63 = vsel %vm247_vm1, %v8129_v40, 0.0 }
 0x74a   : > { %v8178_v9 = vadd.f32 %v8177_v63, %v8176_v31  ;;  %v12726_v55 = vpop.f32.mrf.mxu3  ;;  %v12733_v61 = vpop.f32.mrf.mxu0  ;;  %v7726_v63 = vld [vmem:[#allocation2 + $0x126] sm:$0xff]  ;;  %v7367_v29 = vadd.f32 %v12667_v13, %v7056_v32 }
 0x74b   : > { %v7900_v4 = vpop.f32.mrf.mxu1  ;;  %v12736_v40 = vpop.f32.mrf.mxu2 }
 0x74c   : > { %v7980_v0 = vadd.f32 %v7900_v4, %v7672_v50  ;;  %v7675_v35 = vadd.f32 %v12672_v53, %v7367_v29  ;;  %v6750_v53 = vadd.f32 %v12489_v24, %v12160_v54 }
 0x74e   : > { %v8016_v58 = vsel %vm13469_vm10, %v7980_v0, 0.0  ;;  %8244 = vst.msk [vmem:[#allocation3 + $0x70] sm:$0xff] %vm247_vm1, %v7980_v0  ;;  %9228 = vmatmul.msk.f32.gmra.mxu1 %vm247_vm1, %v7724_v46  ;;  %v7057_v0 = vadd.f32 %v12674_v14, %v6749_v43  ;;  %v7058_v2 = vadd.f32 %v12696_v3, %v6750_v53 }
 0x74f   : > { %v8065_v60 = vsel %vm247_vm1, %v8016_v58, 0.0  ;;  %v8130_v16 = vmul.f32 %v8016_v58, %v8016_v58 }
 0x750   : > { %v8066_v42 = vadd.f32 %v8065_v60, %v8064_v52  ;;  %v7368_v33 = vadd.f32 %v12687_v57, %v7057_v0 }
 0x751   : > { %v8179_v15 = vsel %vm247_vm1, %v8130_v16, 0.0  ;;  %v7727_v16 = vld [vmem:[#allocation2 + $0x12e] sm:$0xff] }
 0x752   : > { %v8180_v59 = vadd.f32 %v8179_v15, %v8178_v9  ;;  %v7305_v50 = vpop.f32.mrf.mxu3  ;;  %v12749_v39 = vpop.f32.mrf.mxu0  ;;  %v7676_v57 = vadd.f32 %v12690_v7, %v7368_v33  ;;  %v6751_v7 = vadd.f32 %v12498_v8, %v12215_v47 }
 0x753   : > { %v7903_v11 = vpop.f32.mrf.mxu1  ;;  %v6997_v60 = vpop.f32.mrf.mxu2 }
 0x754   : > { %v7981_v31 = vadd.f32 %v7903_v11, %v7673_v44 }
 0x756   : > { %v8017_v22 = vsel %vm13470_vm5, %v7981_v31, 0.0  ;;  %8245 = vst.msk [vmem:[#allocation3 + $0x78] sm:$0xff] %vm247_vm1, %v7981_v31  ;;  %9229 = vmatmul.msk.f32.gmra.mxu1 %vm247_vm1, %v7725_v34  ;;  %v7728_v31 = vld [vmem:[#allocation2 + $0x136] sm:$0xff]  ;;  %v7369_v34 = vadd.f32 %v12704_v26, %v7058_v2  ;;  %v7059_v26 = vadd.f32 %v12716_v37, %v6751_v7  ;;  %v6752_v37 = vadd.f32 %v12501_v62, %v12227_v49 }
 0x757   : > { %v8067_v30 = vsel %vm247_vm1, %v8017_v22, 0.0  ;;  %v8131_v17 = vmul.f32 %v8017_v22, %v8017_v22 }
 0x758   : > { %v8068_v38 = vadd.f32 %v8067_v30, %v8066_v42  ;;  %v7677_v5 = vadd.f32 %v12714_v25, %v7369_v34 }
 0x759   : > { %v8181_v20 = vsel %vm247_vm1, %v8131_v17, 0.0 }
 0x75a   : > { %v8182_v21 = vadd.f32 %v8181_v20, %v8180_v59  ;;  %v7308_v48 = vpop.f32.mrf.mxu3  ;;  %v7616_v1 = vpop.f32.mrf.mxu0 }
 0x75b   : > { %v7906_v51 = vpop.f32.mrf.mxu1  ;;  %v7000_v54 = vpop.f32.mrf.mxu2 }
 0x75c   : > { %v7982_v52 = vadd.f32 %v7906_v51, %v7674_v10  ;;  %v7370_v10 = vadd.f32 %v12726_v55, %v7059_v26  ;;  %v7060_v55 = vadd.f32 %v12736_v40, %v6752_v37 }
 0x75e   : > { %v8018_v27 = vsel %vm13471_vm0, %v7982_v52, 0.0  ;;  %8246 = vst.msk [vmem:[#allocation3 + $0x80] sm:$0xff] %vm247_vm1, %v7982_v52  ;;  %9230 = vmatmul.msk.f32.gmra.mxu1 %vm247_vm1, %v7726_v63  ;;  %v7678_v41 = vadd.f32 %v12733_v61, %v7370_v10  ;;  %v7371_v43 = vadd.f32 %v7305_v50, %v7060_v55 }
 0x75f   : > { %v8069_v6 = vsel %vm247_vm1, %v8018_v27, 0.0  ;;  %v8132_v28 = vmul.f32 %v8018_v27, %v8018_v27 }
 0x760   : > { %v8070_v9 = vadd.f32 %v8069_v6, %v8068_v38  ;;  %v7679_v50 = vadd.f32 %v12749_v39, %v7371_v43 }
 0x761   : > { %v8183_v4 = vsel %vm247_vm1, %v8132_v28, 0.0 }
 0x762   : > { %v8184_v13 = vadd.f32 %v8183_v4, %v8182_v21  ;;  %v7311_v32 = vpop.f32.mrf.mxu3  ;;  %v7729_v21 = vld [vmem:[#allocation2 + $0x13e] sm:$0xff]  ;;  %v7619_v25 = vpop.f32.mrf.mxu0 }
 0x763   : > { %v7909_v46 = vpop.f32.mrf.mxu1  ;;  %v7003_v63 = vpop.f32.mrf.mxu2 }
 0x764   : > { %v7983_v58 = vadd.f32 %v7909_v46, %v7675_v35 }
 0x766   : > { %v8019_v45 = vsel %vm13472_vm3, %v7983_v58, 0.0  ;;  %8247 = vst.msk [vmem:[#allocation3 + $0x88] sm:$0xff] %vm247_vm1, %v7983_v58  ;;  %9231 = vmatmul.msk.f32.gmra.mxu1 %vm247_vm1, %v7727_v16 }
 0x767   : > { %v8071_v19 = vsel %vm247_vm1, %v8019_v45, 0.0  ;;  %v8133_v14 = vmul.f32 %v8019_v45, %v8019_v45 }
 0x768   : > { %v8072_v42 = vadd.f32 %v8071_v19, %v8070_v9  ;;  %v13475_v9 = vld [vmem:[#allocation16_spill] sm:$0xff] }
 0x769   : > { %v8185_v15 = vsel %vm247_vm1, %v8133_v14, 0.0  ;;  %vm13476_vm8 = vcmp.lt.s32.totalorder %v13475_v9, 16  ;;  %v13477_v14 = vld [vmem:[#allocation21_spill] sm:$0xff] }
 0x76a   : > { %v8186_v59 = vadd.f32 %v8185_v15, %v8184_v13  ;;  %v7314_v0 = vpop.f32.mrf.mxu3  ;;  %v6753_v13 = vadd.f32 %v12504_v12, %v12239_v56  ;;  %v7622_v61 = vpop.f32.mrf.mxu0  ;;  %vm13478_vm2 = vcmp.lt.s32.totalorder %v13477_v14, 16  ;;  %v13479_v12 = vld [vmem:[#allocation29_spill] sm:$0xff] }
 0x76b   : > { %v7912_v44 = vpop.f32.mrf.mxu1  ;;  %v7006_v16 = vpop.f32.mrf.mxu2  ;;  %v6754_v15 = vadd.f32 %v12507_v18, %v13479_v12 }
 0x76c   : > { %v7984_v11 = vadd.f32 %v7912_v44, %v7676_v57  ;;  %v7061_v46 = vadd.f32 %v6997_v60, %v6753_v13 }
 0x76d   : > { %v7062_v39 = vadd.f32 %v7000_v54, %v6754_v15 }
 0x76e   : > { %v8020_v22 = vsel %vm13473_vm11, %v7984_v11, 0.0  ;;  %8248 = vst.msk [vmem:[#allocation3 + $0x90] sm:$0xff] %vm247_vm1, %v7984_v11  ;;  %9232 = vmatmul.msk.f32.gmra.mxu1 %vm247_vm1, %v7728_v31  ;;  %v7372_v19 = vadd.f32 %v7308_v48, %v7061_v46 }
 0x76f   : > { %v8073_v24 = vsel %vm247_vm1, %v8020_v22, 0.0  ;;  %v8134_v3 = vmul.f32 %v8020_v22, %v8020_v22  ;;  %v7373_v22 = vadd.f32 %v7311_v32, %v7062_v39  ;;  %v13494_v39 = vld [vmem:[#allocation40_spill] sm:$0xff] }
 0x770   : > { %v8074_v30 = vadd.f32 %v8073_v24, %v8072_v42  ;;  %v7680_v44 = vadd.f32 %v7616_v1, %v7372_v19  ;;  %v13480_v24 = vld [vmem:[#allocation18_spill] sm:$0xff] }
 0x771   : > { %v8187_v17 = vsel %vm247_vm1, %v8134_v3, 0.0  ;;  %vm13481_vm9 = vcmp.lt.s32.totalorder %v13480_v24, 16 }
 0x772   : > { %v8188_v23 = vadd.f32 %v8187_v17, %v8186_v59  ;;  %v7317_v2 = vpop.f32.mrf.mxu3  ;;  %v7625_v48 = vpop.f32.mrf.mxu0 }
 0x773   : > { %v7915_v38 = vpop.f32.mrf.mxu1  ;;  %v7009_v34 = vpop.f32.mrf.mxu2 }
 0x774   : > { %v7985_v20 = vadd.f32 %v7915_v38, %v7677_v5  ;;  %v7681_v5 = vadd.f32 %v7619_v25, %v7373_v22 }
 0x776   : > { %v8021_v51 = vsel %vm13474_vm13, %v7985_v20, 0.0  ;;  %8249 = vst.msk [vmem:[#allocation3 + $0x98] sm:$0xff] %vm247_vm1, %v7985_v20  ;;  %9233 = vmatmul.msk.f32.gmra.mxu1 %vm247_vm1, %v7729_v21 }
 0x777   : > { %v8075_v47 = vsel %vm247_vm1, %v8021_v51, 0.0  ;;  %v8135_v8 = vmul.f32 %v8021_v51, %v8021_v51  ;;  %v13483_v51 = vld [vmem:[#allocation20_spill] sm:$0xff] }
 0x778   : > { %v8076_v52 = vadd.f32 %v8075_v47, %v8074_v30  ;;  %v13482_v30 = vld [vmem:[#allocation30_spill] sm:$0xff]  ;;  %vm13484_vm7 = vcmp.lt.s32.totalorder %v13483_v51, 16 }
 0x779   : > { %v8189_v29 = vsel %vm247_vm1, %v8135_v8, 0.0  ;;  %v6755_v17 = vadd.f32 %v12510_v36, %v13482_v30  ;;  %v13495_v30 = vld [vmem:[#allocation7_spill] sm:$0xff] }
 0x77a   : > { %v8190_v27 = vadd.f32 %v8189_v29, %v8188_v23  ;;  %v7320_v38 = vpop.f32.mrf.mxu3  ;;  %v7628_v10 = vpop.f32.mrf.mxu0  ;;  %v13486_v29 = vld [vmem:[#allocation38_spill] sm:$0xff]  ;;  %vm13496_vm10 = vcmp.lt.s32.totalorder %v13495_v30, 16 }
 0x77b   : > { %v7918_v6 = vpop.f32.mrf.mxu1  ;;  %v7063_v1 = vadd.f32 %v7003_v63, %v6755_v17  ;;  %v7012_v8 = vpop.f32.mrf.mxu2 }
 0x77c   : > { %v7986_v28 = vadd.f32 %v7918_v6, %v7678_v41 }
 0x77d   : > { %v7374_v21 = vadd.f32 %v7314_v0, %v7063_v1  ;;  %v13487_v0 = vld [vmem:[#allocation22_spill] sm:$0xff] }
 0x77e   : > { %v8022_v4 = vsel %vm13476_vm8, %v7986_v28, 0.0  ;;  %8250 = vst.msk [vmem:[#allocation3 + $0xa0] sm:$0xff] %vm247_vm1, %v7986_v28  ;;  %vm13488_vm14 = vcmp.lt.s32.totalorder %v13487_v0, 16  ;;  %v13497_v1 = vld [vmem:[#allocation34_spill] sm:$0xff] }
 0x77f   : > { %v8077_v49 = vsel %vm247_vm1, %v8022_v4, 0.0  ;;  %v8136_v62 = vmul.f32 %v8022_v4, %v8022_v4  ;;  %v7682_v6 = vadd.f32 %v7622_v61, %v7374_v21 }
 0x780   : > { %v8078_v35 = vadd.f32 %v8077_v49, %v8076_v52  ;;  %v13485_v52 = vld [vmem:[#allocation31_spill] sm:$0xff] }
 0x781   : > { %v8191_v40 = vsel %vm247_vm1, %v8136_v62, 0.0  ;;  %v6756_v55 = vadd.f32 %v13486_v29, %v13485_v52  ;;  %v13499_v29 = vld [vmem:[#allocation5_spill] sm:$0xff] }
 0x782   : > { %v8192_v58 = vadd.f32 %v8191_v40, %v8190_v27  ;;  %v7323_v9 = vpop.f32.mrf.mxu3  ;;  %v13490_v40 = vld [vmem:[#allocation39_spill] sm:$0xff]  ;;  %vm13500_vm5 = vcmp.lt.s32.totalorder %v13499_v29, 16 }
 0x783   : > { %v7921_v33 = vpop.f32.mrf.mxu1  ;;  %v7064_v27 = vadd.f32 %v7006_v16, %v6756_v55  ;;  %v7015_v16 = vpop.f32.mrf.mxu2 }
 0x784   : > { %v7987_v45 = vadd.f32 %v7921_v33, %v7679_v50 }
 0x785   : > { %v7375_v4 = vadd.f32 %v7317_v2, %v7064_v27  ;;  %v13501_v27 = vld [vmem:[#allocation35_spill] sm:$0xff] }
 0x786   : > { %v8023_v53 = vsel %vm13478_vm2, %v7987_v45, 0.0  ;;  %8251 = vst.msk [vmem:[#allocation3 + $0xa8] sm:$0xff] %vm247_vm1, %v7987_v45 }
 0x787   : > { %v8079_v42 = vsel %vm247_vm1, %v8023_v53, 0.0  ;;  %v8137_v56 = vmul.f32 %v8023_v53, %v8023_v53  ;;  %v7683_v19 = vadd.f32 %v7625_v48, %v7375_v4 }
 0x788   : > { %v8080_v60 = vadd.f32 %v8079_v42, %v8078_v35  ;;  %v13489_v35 = vld [vmem:[#allocation32_spill] sm:$0xff] }
 0x789   : > { %v8193_v59 = vsel %vm247_vm1, %v8137_v56, 0.0  ;;  %v6757_v46 = vadd.f32 %v13490_v40, %v13489_v35  ;;  %v13491_v56 = vld [vmem:[#allocation4_spill] sm:$0xff] }
 0x78a   : > { %v8194_v57 = vadd.f32 %v8193_v59, %v8192_v58  ;;  %v7631_v58 = vpop.f32.mrf.mxu0  ;;  %vm13492_vm12 = vcmp.lt.s32.totalorder %v13491_v56, 16  ;;  %v7326_v15 = vpop.f32.mrf.mxu3  ;;  %v13493_v59 = vld [vmem:[#allocation33_spill] sm:$0xff] }
 0x78b   : > { %v7924_v11 = vpop.f32.mrf.mxu1  ;;  %v7065_v33 = vadd.f32 %v7009_v34, %v6757_v46  ;;  %v7018_v24 = vpop.f32.mrf.mxu2  ;;  %v13503_v46 = vld [vmem:[#allocation23_spill] sm:$0xff] }
 0x78c   : > { %v7988_v31 = vadd.f32 %v7924_v11, %v7680_v44  ;;  %vm13504_vm0 = vcmp.lt.s32.totalorder %v13503_v46, 16 }
 0x78d   : > { %v7376_v42 = vadd.f32 %v7320_v38, %v7065_v33  ;;  %v13505_v33 = vld [vmem:[#allocation8_spill] sm:$0xff] }
 0x78e   : > { %v8024_v3 = vsel %vm13481_vm9, %v7988_v31, 0.0  ;;  %8252 = vst.msk [vmem:[#allocation3 + $0xb0] sm:$0xff] %vm247_vm1, %v7988_v31 }
 0x78f   : > { %v8081_v7 = vsel %vm247_vm1, %v8024_v3, 0.0  ;;  %v8138_v18 = vmul.f32 %v8024_v3, %v8024_v3  ;;  %v7684_v22 = vadd.f32 %v7628_v10, %v7376_v42 }
 0x790   : > { %v8082_v26 = vadd.f32 %v8081_v7, %v8080_v60 }
 0x791   : > { %v8195_v54 = vsel %vm247_vm1, %v8138_v18, 0.0 }
 0x792   : > { %v8196_v23 = vadd.f32 %v8195_v54, %v8194_v57  ;;  %v6758_v57 = vadd.f32 %v13494_v39, %v13493_v59  ;;  %v7634_v48 = vpop.f32.mrf.mxu0  ;;  %v13507_v39 = vld [vmem:[#allocation9_spill] sm:$0xff] }
 0x793   : > { %v7927_v20 = vpop.f32.mrf.mxu1  ;;  %vm13508_vm3 = vcmp.lt.s32.totalorder %v13507_v39, 16 }
 0x794   : > { %v7989_v32 = vadd.f32 %v7927_v20, %v7681_v5  ;;  %v7066_v31 = vadd.f32 %v7012_v8, %v6758_v57  ;;  %v7329_v20 = vpop.f32.mrf.mxu3 }
 0x796   : > { %v8025_v47 = vsel %vm13484_vm7, %v7989_v32, 0.0  ;;  %8253 = vst.msk [vmem:[#allocation3 + $0xb8] sm:$0xff] %vm247_vm1, %v7989_v32  ;;  %v7377_v18 = vadd.f32 %v7323_v9, %v7066_v31  ;;  %v13509_v31 = vld [vmem:[#allocation13_spill] sm:$0xff] }
 0x797   : > { %v8083_v37 = vsel %vm247_vm1, %v8025_v47, 0.0  ;;  %v8139_v36 = vmul.f32 %v8025_v47, %v8025_v47 }
 0x798   : > { %v8084_v63 = vadd.f32 %v8083_v37, %v8082_v26  ;;  %v7685_v51 = vadd.f32 %v7631_v58, %v7377_v18 }
 0x799   : > { %v8197_v25 = vsel %vm247_vm1, %v8139_v36, 0.0  ;;  %v7021_v36 = vpop.f32.mrf.mxu2 }
 0x79a   : > { %v8198_v41 = vadd.f32 %v8197_v25, %v8196_v23  ;;  %v13498_v23 = vld [vmem:[#allocation41_spill] sm:$0xff]  ;;  %v7637_v8 = vpop.f32.mrf.mxu0 }
 0x79b   : > { %v7930_v28 = vpop.f32.mrf.mxu1  ;;  %v6759_v5 = vadd.f32 %v13498_v23, %v13497_v1  ;;  %v13511_v23 = vld [vmem:[#allocation6_spill] sm:$0xff] }
 0x79c   : > { %v7990_v43 = vadd.f32 %v7930_v28, %v7682_v6  ;;  %vm13512_vm11 = vcmp.lt.s32.totalorder %v13511_v23, 16 }
 0x79d   : > { %v7067_v21 = vadd.f32 %v7015_v16, %v6759_v5 }
 0x79e   : > { %v8026_v49 = vsel %vm13488_vm14, %v7990_v43, 0.0  ;;  %8254 = vst.msk [vmem:[#allocation3 + $0xc0] sm:$0xff] %vm247_vm1, %v7990_v43 }
 0x79f   : > { %v8085_v62 = vsel %vm247_vm1, %v8026_v49, 0.0  ;;  %v8140_v13 = vmul.f32 %v8026_v49, %v8026_v49  ;;  %v7378_v52 = vadd.f32 %v7326_v15, %v7067_v21  ;;  %v7332_v49 = vpop.f32.mrf.mxu3  ;;  %v13513_v21 = vld [vmem:[#allocation10_spill] sm:$0xff] }
 0x7a0   : > { %v8086_v50 = vadd.f32 %v8085_v62, %v8084_v63 }
 0x7a1   : > { %v8199_v61 = vsel %vm247_vm1, %v8140_v13, 0.0  ;;  %v7686_v0 = vadd.f32 %v7634_v48, %v7378_v52  ;;  %v13510_v48 = vld [vmem:[#allocation44_spill] sm:$0xff] }
 0x7a2   : > { %v8200_v45 = vadd.f32 %v8199_v61, %v8198_v41  ;;  %v13502_v41 = vld [vmem:[#allocation42_spill] sm:$0xff]  ;;  %v7640_v40 = vpop.f32.mrf.mxu0 }
 0x7a3   : > { %v7933_v14 = vpop.f32.mrf.mxu1  ;;  %v6760_v6 = vadd.f32 %v13502_v41, %v13501_v27  ;;  %v13515_v41 = vld [vmem:[#allocation24_spill] sm:$0xff] }
 0x7a4   : > { %v7991_v53 = vadd.f32 %v7933_v14, %v7683_v19  ;;  %vm13516_vm13 = vcmp.lt.s32.totalorder %v13515_v41, 16 }
 0x7a5   : > { %v7068_v9 = vadd.f32 %v7018_v24, %v6760_v6 }
 0x7a6   : > { %v8027_v12 = vsel %vm13492_vm12, %v7991_v53, 0.0  ;;  %8255 = vst.msk [vmem:[#allocation3 + $0xc8] sm:$0xff] %vm247_vm1, %v7991_v53 }
 0x7a7   : > { %v8087_v60 = vsel %vm247_vm1, %v8027_v12, 0.0  ;;  %v8141_v2 = vmul.f32 %v8027_v12, %v8027_v12  ;;  %v7379_v35 = vadd.f32 %v7329_v20, %v7068_v9  ;;  %v13517_v9 = vld [vmem:[#allocation15_spill] sm:$0xff] }
 0x7a8   : > { %v8088_v44 = vadd.f32 %v8087_v60, %v8086_v50  ;;  %v7024_v50 = vpop.f32.mrf.mxu2 }
 0x7a9   : > { %v8201_v11 = vsel %vm247_vm1, %v8141_v2, 0.0  ;;  %v7687_v12 = vadd.f32 %v7637_v8, %v7379_v35  ;;  %v7335_v2 = vpop.f32.mrf.mxu3 }
 0x7aa   : > { %v8202_v34 = vadd.f32 %v8201_v11, %v8200_v45  ;;  %v13506_v45 = vld [vmem:[#allocation43_spill] sm:$0xff] }
 0x7ab   : > { %v7936_v3 = vpop.f32.mrf.mxu1  ;;  %v6761_v19 = vadd.f32 %v13506_v45, %v13505_v33 }
 0x7ac   : > { %v7992_v7 = vadd.f32 %v7936_v3, %v7684_v22  ;;  %v7643_v22 = vpop.f32.mrf.mxu0 }
 0x7ad   : > { %v7069_v42 = vadd.f32 %v7021_v36, %v6761_v19 }
 0x7ae   : > { %v8028_v17 = vsel %vm13496_vm10, %v7992_v7, 0.0  ;;  %8256 = vst.msk [vmem:[#allocation3 + $0xd0] sm:$0xff] %vm247_vm1, %v7992_v7 }
 0x7af   : > { %v8089_v26 = vsel %vm247_vm1, %v8028_v17, 0.0  ;;  %v8142_v54 = vmul.f32 %v8028_v17, %v8028_v17  ;;  %v7380_v59 = vadd.f32 %v7332_v49, %v7069_v42  ;;  %v13520_v42 = vld [vmem:[#allocation36_spill] sm:$0xff] }
 0x7b0   : > { %v8090_v38 = vadd.f32 %v8089_v26, %v8088_v44  ;;  %v7027_v3 = vpop.f32.mrf.mxu2 }
 0x7b1   : > { %v8203_v32 = vsel %vm247_vm1, %v8142_v54, 0.0  ;;  %v7688_v17 = vadd.f32 %v7640_v40, %v7380_v59 }
 0x7b2   : > { %v8204_v10 = vadd.f32 %v8203_v32, %v8202_v34  ;;  %v6762_v34 = vadd.f32 %v13510_v48, %v13509_v31  ;;  %v13522_v48 = vld [vmem:[#allocation26_spill] sm:$0xff] }
 0x7b3   : > { %v7939_v47 = vpop.f32.mrf.mxu1 }
 0x7b4   : > { %v7993_v37 = vadd.f32 %v7939_v47, %v7685_v51  ;;  %v7070_v18 = vadd.f32 %v7024_v50, %v6762_v34 }
 0x7b6   : > { %v8029_v55 = vsel %vm13500_vm5, %v7993_v37, 0.0  ;;  %8257 = vst.msk [vmem:[#allocation3 + $0xd8] sm:$0xff] %vm247_vm1, %v7993_v37  ;;  %v7381_v1 = vadd.f32 %v7335_v2, %v7070_v18  ;;  %v7646_v37 = vpop.f32.mrf.mxu0  ;;  %v13524_v18 = vld [vmem:[#allocation37_spill] sm:$0xff] }
 0x7b7   : > { %v8091_v63 = vsel %vm247_vm1, %v8029_v55, 0.0  ;;  %v8143_v25 = vmul.f32 %v8029_v55, %v8029_v55 }
 0x7b8   : > { %v8092_v28 = vadd.f32 %v8091_v63, %v8090_v38  ;;  %v7338_v38 = vpop.f32.mrf.mxu3  ;;  %v7689_v29 = vadd.f32 %v7643_v22, %v7381_v1  ;;  %v7030_v55 = vpop.f32.mrf.mxu2 }
 0x7b9   : > { %v8205_v43 = vsel %vm247_vm1, %v8143_v25, 0.0 }
 0x7ba   : > { %v8206_v4 = vadd.f32 %v8205_v43, %v8204_v10  ;;  %v13514_v10 = vld [vmem:[#allocation45_spill] sm:$0xff] }
 0x7bb   : > { %v7942_v62 = vpop.f32.mrf.mxu1  ;;  %v6763_v51 = vadd.f32 %v13514_v10, %v13513_v21 }
 0x7bc   : > { %v7994_v13 = vadd.f32 %v7942_v62, %v7686_v0 }
 0x7bd   : > { %v7071_v36 = vadd.f32 %v7027_v3, %v6763_v51 }
 0x7be   : > { %v8030_v58 = vsel %vm13504_vm0, %v7994_v13, 0.0  ;;  %8258 = vst.msk [vmem:[#allocation3 + $0xe0] sm:$0xff] %vm247_vm1, %v7994_v13 }
 0x7bf   : > { %v8093_v16 = vsel %vm247_vm1, %v8030_v58, 0.0  ;;  %v8144_v61 = vmul.f32 %v8030_v58, %v8030_v58  ;;  %v7382_v27 = vadd.f32 %v7338_v38, %v7071_v36 }
 0x7c0   : > { %v8094_v14 = vadd.f32 %v8093_v16, %v8092_v28  ;;  %v7341_v62 = vpop.f32.mrf.mxu3  ;;  %v7649_v16 = vpop.f32.mrf.mxu0 }
 0x7c1   : > { %v8207_v53 = vsel %vm247_vm1, %v8144_v61, 0.0  ;;  %v7690_v46 = vadd.f32 %v7646_v37, %v7382_v27  ;;  %v7033_v61 = vpop.f32.mrf.mxu2 }
 0x7c2   : > { %v8208_v56 = vadd.f32 %v8207_v53, %v8206_v4  ;;  %v13518_v4 = vld [vmem:[#allocation46_spill] sm:$0xff] }
 0x7c3   : > { %v7945_v15 = vpop.f32.mrf.mxu1  ;;  %v6764_v0 = vadd.f32 %v13518_v4, %v13517_v9 }
 0x7c4   : > { %v7995_v60 = vadd.f32 %v7945_v15, %v7687_v12 }
 0x7c5   : > { %v7072_v35 = vadd.f32 %v7030_v55, %v6764_v0 }
 0x7c6   : > { %v8031_v57 = vsel %vm13508_vm3, %v7995_v60, 0.0  ;;  %8259 = vst.msk [vmem:[#allocation3 + $0xe8] sm:$0xff] %vm247_vm1, %v7995_v60 }
 0x7c7   : > { %v8095_v44 = vsel %vm247_vm1, %v8031_v57, 0.0  ;;  %v8145_v11 = vmul.f32 %v8031_v57, %v8031_v57  ;;  %v7383_v33 = vadd.f32 %v7341_v62, %v7072_v35 }
 0x7c8   : > { %v8096_v24 = vadd.f32 %v8095_v44, %v8094_v14  ;;  %v7344_v57 = vpop.f32.mrf.mxu3  ;;  %v7652_v22 = vpop.f32.mrf.mxu0 }
 0x7c9   : > { %v8209_v7 = vsel %vm247_vm1, %v8145_v11, 0.0  ;;  %v7691_v39 = vadd.f32 %v7649_v16, %v7383_v33 }
 0x7ca   : > { %v8210_v30 = vadd.f32 %v8209_v7, %v8208_v56  ;;  %v13521_v56 = vld [vmem:[#allocation47_spill] sm:$0xff] }
 0x7cb   : > { %v7948_v26 = vpop.f32.mrf.mxu1  ;;  %v6765_v12 = vadd.f32 %v13521_v56, %v13520_v42 }
 0x7cc   : > { %v7996_v54 = vadd.f32 %v7948_v26, %v7688_v17 }
 0x7cd   : > { %v7073_v2 = vadd.f32 %v7033_v61, %v6765_v12  ;;  %v12900_v12 = vld [vmem:[#allocation3] sm:$0xff] }
 0x7ce   : > { %v8032_v5 = vsel %vm13512_vm11, %v7996_v54, 0.0  ;;  %8260 = vst.msk [vmem:[#allocation3 + $0xf0] sm:$0xff] %vm247_vm1, %v7996_v54 }
 0x7cf   : > { %v8097_v20 = vsel %vm247_vm1, %v8032_v5, 0.0  ;;  %v8146_v32 = vmul.f32 %v8032_v5, %v8032_v5  ;;  %v7384_v31 = vadd.f32 %v7344_v57, %v7073_v2  ;;  %v12906_v2 = vld [vmem:[#allocation3 + $0x18] sm:$0xff]  ;;  %v12912_v57 = vld [vmem:[#allocation3 + $0x28] sm:$0xff] }
 0x7d0   : > { %v8098_v47 = vadd.f32 %v8097_v20, %v8096_v24  ;;  %v7036_v24 = vpop.f32.mrf.mxu2  ;;  %v7655_v36 = vpop.f32.mrf.mxu0 }
 0x7d1   : > { %v8211_v8 = vsel %vm247_vm1, %v8146_v32, 0.0  ;;  %v7692_v5 = vadd.f32 %v7652_v22, %v7384_v31  ;;  %v7347_v32 = vpop.f32.mrf.mxu3  ;;  %v12918_v31 = vld [vmem:[#allocation3 + $0x40] sm:$0xff] }
 0x7d2   : > { %v8212_v52 = vadd.f32 %v8211_v8, %v8210_v30  ;;  %v13525_v30 = vld [vmem:[#allocation48_spill] sm:$0xff] }
 0x7d3   : > { %v7951_v63 = vpop.f32.mrf.mxu1  ;;  %v6766_v17 = vadd.f32 %v13525_v30, %v13524_v18  ;;  %v12932_v18 = vld [vmem:[#allocation3 + $0x58] sm:$0xff]  ;;  %v12934_v30 = vld [vmem:[#allocation3 + $0x60] sm:$0xff] }
 0x7d4   : > { %v7997_v25 = vadd.f32 %v7951_v63, %v7689_v29 }
 0x7d5   : > { %v7074_v1 = vadd.f32 %v7036_v24, %v6766_v17 }
 0x7d6   : > { %v8033_v6 = vsel %vm13516_vm13, %v7997_v25, 0.0  ;;  %8261 = vst.msk [vmem:[#allocation3 + $0xf8] sm:$0xff] %vm247_vm1, %v7997_v25 }
 0x7d7   : > { %v8099_v28 = vsel %vm247_vm1, %v8033_v6, 0.0  ;;  %v8147_v43 = vmul.f32 %v8033_v6, %v8033_v6  ;;  %v7385_v21 = vadd.f32 %v7347_v32, %v7074_v1 }
 0x7d8   : > { %v8100_v49 = vadd.f32 %v8099_v28, %v8098_v47 }
 0x7d9   : > { %v8213_v13 = vsel %vm247_vm1, %v8147_v43, 0.0  ;;  %v7693_v55 = vadd.f32 %v7655_v36, %v7385_v21 }
 0x7da   : > { %v8214_v40 = vadd.f32 %v8213_v13, %v8212_v52 }
 0x7db   : > { %v7954_v58 = vpop.f32.mrf.mxu1 }
 0x7dc   : > { %v7998_v50 = vadd.f32 %v7954_v58, %v7690_v46 }
 0x7de   : > { %v8034_v19 = vsel %vm4174_vm15, %v7998_v50, 0.0  ;;  %8262 = vst.msk [vmem:[#allocation3 + $0x100] sm:$0xff] %vm247_vm1, %v7998_v50  ;;  %vm13523_vm15 = vcmp.lt.s32.totalorder %v13522_v48, 16  ;;  %v12920_v48 = vld [vmem:[#allocation3 + $0x48] sm:$0xff] }
 0x7df   : > { %v8101_v14 = vsel %vm247_vm1, %v8034_v19, 0.0  ;;  %v8148_v53 = vmul.f32 %v8034_v19, %v8034_v19 }
 0x7e0   : > { %v8102_v15 = vadd.f32 %v8101_v14, %v8100_v49 }
 0x7e1   : > { %v8215_v60 = vsel %vm247_vm1, %v8148_v53, 0.0 }
 0x7e2   : > { %v8216_v59 = vadd.f32 %v8215_v60, %v8214_v40  ;;  %v12904_v60 = vld [vmem:[#allocation3 + $0x10] sm:$0xff] }
 0x7e3   : > { %v7957_v44 = vpop.f32.mrf.mxu1 }
 0x7e4   : > { %v7999_v11 = vadd.f32 %v7957_v44, %v7691_v39  ;;  %v12910_v39 = vld [vmem:[#allocation3 + $0x20] sm:$0xff]  ;;  %v12914_v44 = vld [vmem:[#allocation3 + $0x30] sm:$0xff] }
 0x7e6   : > { %v8035_v34 = vsel %vm13523_vm15, %v7999_v11, 0.0  ;;  %8263 = vst.msk [vmem:[#allocation3 + $0x108] sm:$0xff] %vm247_vm1, %v7999_v11  ;;  %v12916_v11 = vld [vmem:[#allocation3 + $0x38] sm:$0xff] }
 0x7e7   : > { %v8103_v3 = vsel %vm247_vm1, %v8035_v34, 0.0  ;;  %v8149_v7 = vmul.f32 %v8035_v34, %v8035_v34 }
 0x7e8   : > { %v8104_v26 = vadd.f32 %v8103_v3, %v8102_v15  ;;  %v12902_v15 = vld [vmem:[#allocation3 + $0x8] sm:$0xff] }
 0x7e9   : > { %v8217_v54 = vsel %vm247_vm1, %v8149_v7, 0.0  ;;  %v12930_v7 = vld [vmem:[#allocation3 + $0x50] sm:$0xff] }
 0x7ea   : > { %v8218_v23 = vadd.f32 %v8217_v54, %v8216_v59 }
 0x7eb   : > { %v7960_v38 = vpop.f32.mrf.mxu1 }
 0x7ec   : > { %v8000_v20 = vadd.f32 %v7960_v38, %v7692_v5  ;;  %v12946_v5 = vld [vmem:[#allocation3 + $0x70] sm:$0xff]  ;;  %v12948_v38 = vld [vmem:[#allocation3 + $0x78] sm:$0xff] }
 0x7ee   : > { %v8036_v51 = vsel %vm4176_vm6, %v8000_v20, 0.0  ;;  %8264 = vst.msk [vmem:[#allocation3 + $0x110] sm:$0xff] %vm247_vm1, %v8000_v20 }
 0x7ef   : > { %v8105_v47 = vsel %vm247_vm1, %v8036_v51, 0.0  ;;  %v8150_v8 = vmul.f32 %v8036_v51, %v8036_v51  ;;  %v12957_v51 = vld [vmem:[#allocation3 + $0x80] sm:$0xff] }
 0x7f0   : > { %v8106_v37 = vadd.f32 %v8105_v47, %v8104_v26  ;;  %v12959_v47 = vld [vmem:[#allocation3 + $0x88] sm:$0xff] }
 0x7f1   : > { %v8219_v52 = vsel %vm247_vm1, %v8150_v8, 0.0  ;;  %v12961_v8 = vld [vmem:[#allocation3 + $0x90] sm:$0xff] }
 0x7f2   : > { %v8220_v29 = vadd.f32 %v8219_v52, %v8218_v23  ;;  %v12944_v23 = vld [vmem:[#allocation3 + $0x68] sm:$0xff] }
 0x7f3   : > { %v7963_v63 = vpop.f32.mrf.mxu1 }
 0x7f4   : > { %v8001_v25 = vadd.f32 %v7963_v63, %v7693_v55  ;;  %v12971_v55 = vld [vmem:[#allocation3 + $0x98] sm:$0xff]  ;;  %v12973_v63 = vld [vmem:[#allocation3 + $0xa0] sm:$0xff] }
 0x7f6   : > { %v8037_v41 = vsel %vm4177_vm4, %v8001_v25, 0.0  ;;  %8265 = vst.msk [vmem:[#allocation3 + $0x118] sm:$0xff] %vm247_vm1, %v8001_v25  ;;  %v12975_v25 = vld [vmem:[#allocation3 + $0xa8] sm:$0xff] }
 0x7f7   : > { %v8107_v6 = vsel %vm247_vm1, %v8037_v41, 0.0  ;;  %v8151_v28 = vmul.f32 %v8037_v41, %v8037_v41 }
 0x7f8   : > { %v8108_v43 = vadd.f32 %v8107_v6, %v8106_v37 }
 0x7f9   : > { %v8221_v9 = vsel %vm247_vm1, %v8151_v28, 0.0 }
 0x7fa   : > { %v8109_v4 = vrot.slane %v8108_v43, 4  ;;  %v8222_v0 = vadd.f32 %v8221_v9, %v8220_v29  ;;  %v12985_v9 = vld [vmem:[#allocation3 + $0xb8] sm:$0xff] }
 0x7fc   : > { %v8110_v49 = vadd.f32 %v8109_v4, %v8108_v43  ;;  %v8223_v62 = vrot.slane %v8222_v0, 4  ;;  %v12983_v43 = vld [vmem:[#allocation3 + $0xb0] sm:$0xff]  ;;  %v12987_v4 = vld [vmem:[#allocation3 + $0xc0] sm:$0xff] }
 0x7fe   : > { %v8111_v13 = vrot.slane %v8110_v49, 2  ;;  %v8224_v35 = vadd.f32 %v8223_v62, %v8222_v0 }
 0x800   : > { %v8112_v40 = vadd.f32 %v8111_v13, %v8110_v49  ;;  %v8225_v46 = vrot.slane %v8224_v35, 2 }
 0x802   : > { %v8113_v58 = vrot.slane %v8112_v40, 1  ;;  %v8226_v50 = vadd.f32 %v8225_v46, %v8224_v35  ;;  %v8307_v35 = vld [vmem:[#allocation3 + $0xc8] sm:$0xff]  ;;  %v8309_v46 = vld [vmem:[#allocation3 + $0xd8] sm:$0xff] }
 0x804   : > { %v8114_v16 = vadd.f32 %v8113_v58, %v8112_v40  ;;  %v8227_v61 = vrot.slane %v8226_v50, 1  ;;  %v8308_v40 = vld [vmem:[#allocation3 + $0xd0] sm:$0xff] }
 0x806   : > { %v8228_v33 = vadd.f32 %v8227_v61, %v8226_v50  ;;  %v12893_v45 = vmul.f32 0.00390625, %v8114_v16  ;;  %v8310_v61 = vld [vmem:[#allocation3 + $0xe0] sm:$0xff] }
 0x808   : > { %v8267_v19 = vmul.f32 0.00390625, %v8228_v33  ;;  %v8268_v14 = vmul.f32 %v12893_v45, %v12893_v45  ;;  %v8354_v22 = vsub.f32 %v12900_v12, %v12893_v45  ;;  %v8355_v24 = vsub.f32 %v12902_v15, %v12893_v45  ;;  %v8311_v33 = vld [vmem:[#allocation3 + $0xe8] sm:$0xff] }
 0x809   : > { %v8356_v3 = vsub.f32 %v12904_v60, %v12893_v45  ;;  %v8357_v17 = vsub.f32 %v12906_v2, %v12893_v45  ;;  %v8358_v26 = vsub.f32 %v12910_v39, %v12893_v45  ;;  %v8359_v54 = vsub.f32 %v12912_v57, %v12893_v45 }
 0x80a   : > { %v8269_v53 = vsub.f32 %v8267_v19, %v8268_v14  ;;  %v8360_v1 = vsub.f32 %v12914_v44, %v12893_v45  ;;  %v8361_v32 = vsub.f32 %v12916_v11, %v12893_v45  ;;  %v8362_v21 = vsub.f32 %v12918_v31, %v12893_v45  ;;  %v8312_v19 = vld [vmem:[#allocation3 + $0xf0] sm:$0xff] }
 0x80b   : > { %v8363_v10 = vsub.f32 %v12920_v48, %v12893_v45  ;;  %v8364_v37 = vsub.f32 %v12930_v7, %v12893_v45  ;;  %v8365_v36 = vsub.f32 %v12932_v18, %v12893_v45  ;;  %v8366_v52 = vsub.f32 %v12934_v30, %v12893_v45  ;;  %v8313_v7 = vld [vmem:[#allocation3 + $0xf8] sm:$0xff]  ;;  %v8314_v18 = vld [vmem:[#allocation3 + $0x100] sm:$0xff]  ;;  %v8315_v30 = vld [vmem:[#allocation3 + $0x108] sm:$0xff] }
 0x80c   : > { %v8270_v42 = vmax.f32 %v8269_v53, 0.0  ;;  %v8367_v29 = vsub.f32 %v12944_v23, %v12893_v45  ;;  %v8368_v41 = vsub.f32 %v12946_v5, %v12893_v45  ;;  %v8369_v6 = vsub.f32 %v12948_v38, %v12893_v45 }
 0x80d   : > { %v8370_v28 = vsub.f32 %v12957_v51, %v12893_v45  ;;  %v8371_v0 = vsub.f32 %v12959_v47, %v12893_v45  ;;  %v8372_v49 = vsub.f32 %v12961_v8, %v12893_v45  ;;  %v8373_v62 = vsub.f32 %v12971_v55, %v12893_v45  ;;  %v8317_v51 = vld [vmem:[#allocation3 + $0x118] sm:$0xff] }
 0x80e   : > { %v12897_v56 = vadd.f32 1e-05, %v8270_v42  ;;  %v8374_v13 = vsub.f32 %v12973_v63, %v12893_v45  ;;  %v8375_v50 = vsub.f32 %v12975_v25, %v12893_v45  ;;  %v8376_v16 = vsub.f32 %v12983_v43, %v12893_v45 }
 0x80f   : > { %v8377_v14 = vsub.f32 %v12985_v9, %v12893_v45  ;;  %v8378_v53 = vsub.f32 %v12987_v4, %v12893_v45  ;;  %v8379_v42 = vsub.f32 %v8307_v35, %v12893_v45  ;;  %v8381_v5 = vsub.f32 %v8309_v46, %v12893_v45 }
 0x810   : > { %9252 = vrsqrt.f32 %v12897_v56  ;;  %vm8278_vm4 = vweird.f32 %v12897_v56  ;;  %v8382_v38 = vsub.f32 %v8310_v61, %v12893_v45  ;;  %v8383_v47 = vsub.f32 %v8311_v33, %v12893_v45  ;;  %v8323_v61 = vld [vmem:[%s9318_s23 + $0x3b] sm:$0xff] }
 0x811   : > { %v8384_v8 = vsub.f32 %v8312_v19, %v12893_v45  ;;  %v8385_v55 = vsub.f32 %v8313_v7, %v12893_v45  ;;  %v8386_v63 = vsub.f32 %v8314_v18, %v12893_v45  ;;  %v8389_v43 = vsub.f32 %v8317_v51, %v12893_v45  ;;  %v8326_v18 = vld [vmem:[%s9318_s23 + $0x53] sm:$0xff]  ;;  %v8329_v51 = vld [vmem:[%s9318_s23 + $0x6b] sm:$0xff] }
 0x816   : > { %v12908_v59 = vpop.eup %9252 }
 0x817   : > { %v8273_v34 = vmul.f32 %v12908_v59, %v12897_v56  ;;  %vm8279_vm6 = vweird.f32 %v12908_v59  ;;  %v8387_v56 = vsub.f32 %v8315_v30, %v12893_v45 }
 0x818   : > { %vm8280_vm8 = vmor %vm8278_vm4, %vm8279_vm6 }
 0x819   : > { %v8274_v20 = vmul.f32 %v12908_v59, %v8273_v34  ;;  %v8380_v34 = vsub.f32 %v8308_v40, %v12893_v45 }
 0x81b   : > { %v8275_v27 = vmul.f32 0.5, %v8274_v20  ;;  %v8316_v20 = vld [vmem:[#allocation3 + $0x110] sm:$0xff] }
 0x81d   : > { %v8276_v58 = vsub.f32 1.5, %v8275_v27  ;;  %v8388_v27 = vsub.f32 %v8316_v20, %v12893_v45 }
 0x81f   : > { %v8277_v23 = vmul.f32 %v12908_v59, %v8276_v58 }
 0x821   : > { %v8281_v25 = vsel %vm8280_vm8, %v12908_v59, %v8277_v23  ;;  %v8327_v23 = vld [vmem:[%s9318_s23 + $0x5b] sm:$0xff] }
 0x822   : > { %v8390_v9 = vmul.f32 %v8354_v22, %v8281_v25  ;;  %v8391_v4 = vmul.f32 %v8355_v24, %v8281_v25  ;;  %v8392_v35 = vmul.f32 %v8356_v3, %v8281_v25  ;;  %v8393_v59 = vmul.f32 %v8357_v17, %v8281_v25 }
 0x823   : > { %v8394_v40 = vmul.f32 %v8358_v26, %v8281_v25  ;;  %v8395_v12 = vmul.f32 %v8359_v54, %v8281_v25  ;;  %v8396_v15 = vmul.f32 %v8360_v1, %v8281_v25  ;;  %v8397_v60 = vmul.f32 %v8361_v32, %v8281_v25 }
 0x824   : > { %v8398_v2 = vmul.f32 %v8362_v21, %v8281_v25  ;;  %v8399_v39 = vmul.f32 %v8363_v10, %v8281_v25  ;;  %v8400_v22 = vmul.f32 %v8364_v37, %v8281_v25  ;;  %v8401_v57 = vmul.f32 %v8365_v36, %v8281_v25  ;;  %v8318_v21 = vld [vmem:[%s9318_s23 + $0x13] sm:$0xff]  ;;  %v8319_v10 = vld [vmem:[%s9318_s23 + $0x1b] sm:$0xff]  ;;  %v8320_v37 = vld [vmem:[%s9318_s23 + $0x23] sm:$0xff] }
 0x825   : > { %v8402_v24 = vmul.f32 %v8366_v52, %v8281_v25  ;;  %v13052_v44 = vmul.f32 %v8367_v29, %v8281_v25  ;;  %v13054_v3 = vmul.f32 %v8368_v41, %v8281_v25  ;;  %v13056_v11 = vmul.f32 %v8369_v6, %v8281_v25  ;;  %v8321_v6 = vld [vmem:[%s9318_s23 + $0x2b] sm:$0xff] }
 0x826   : > { %v13059_v31 = vmul.f32 %v8370_v28, %v8281_v25  ;;  %v13061_v17 = vmul.f32 %v8371_v0, %v8281_v25  ;;  %v13063_v45 = vmul.f32 %v8372_v49, %v8281_v25  ;;  %v13065_v48 = vmul.f32 %v8373_v62, %v8281_v25 }
 0x827   : > { %v13067_v26 = vmul.f32 %v8374_v13, %v8281_v25  ;;  %v13069_v54 = vmul.f32 %v8375_v50, %v8281_v25  ;;  %v13071_v1 = vmul.f32 %v8376_v16, %v8281_v25  ;;  %v13073_v32 = vmul.f32 %v8377_v14, %v8281_v25  ;;  %v8322_v13 = vld [vmem:[%s9318_s23 + $0x33] sm:$0xff] }
 0x828   : > { %v13078_v36 = vmul.f32 %v8378_v53, %v8281_v25  ;;  %v13080_v52 = vmul.f32 %v8379_v42, %v8281_v25  ;;  %v13082_v29 = vmul.f32 %v8380_v34, %v8281_v25  ;;  %v13084_v41 = vmul.f32 %v8381_v5, %v8281_v25  ;;  %v8324_v53 = vld [vmem:[%s9318_s23 + $0x43] sm:$0xff]  ;;  %v8325_v34 = vld [vmem:[%s9318_s23 + $0x4b] sm:$0xff] }
 0x829   : > { %v13087_v28 = vmul.f32 %v8382_v38, %v8281_v25  ;;  %v13089_v0 = vmul.f32 %v8383_v47, %v8281_v25  ;;  %v13091_v49 = vmul.f32 %v8384_v8, %v8281_v25  ;;  %v13093_v62 = vmul.f32 %v8385_v55, %v8281_v25  ;;  %v8328_v38 = vld [vmem:[%s9318_s23 + $0x63] sm:$0xff]  ;;  %v8330_v8 = vld [vmem:[%s9318_s23 + $0x73] sm:$0xff] }
 0x82a   : > { %v13101_v46 = vmul.f32 %v8386_v63, %v8281_v25  ;;  %v13103_v58 = vmul.f32 %v8387_v56, %v8281_v25  ;;  %v13105_v50 = vmul.f32 %v8388_v27, %v8281_v25  ;;  %v13107_v16 = vmul.f32 %v8389_v43, %v8281_v25  ;;  %v8331_v63 = vld [vmem:[%s9318_s23 + $0x7b] sm:$0xff]  ;;  %v8332_v56 = vld [vmem:[%s9318_s23 + $0x83] sm:$0xff]  ;;  %v8333_v43 = vld [vmem:[%s9318_s23 + $0x8b] sm:$0xff] }
 0x82b   : > { %v8426_v33 = vadd.f32 %v8390_v9, %v8318_v21  ;;  %v8427_v19 = vadd.f32 %v8391_v4, %v8319_v10  ;;  %v8428_v14 = vadd.f32 %v8392_v35, %v8320_v37  ;;  %v8429_v42 = vadd.f32 %v8393_v59, %v8321_v6  ;;  %v8334_v4 = vld [vmem:[%s9318_s23 + $0x93] sm:$0xff]  ;;  %v8335_v59 = vld [vmem:[%s9318_s23 + $0x9b] sm:$0xff]  ;;  %v8344_v10 = vld [vmem:[%s9318_s23 + $0xe3] sm:$0xff] }
 0x82c   : > { %v8430_v7 = vadd.f32 %v8394_v40, %v8322_v13  ;;  %v8431_v30 = vadd.f32 %v8395_v12, %v8323_v61  ;;  %v8432_v5 = vadd.f32 %v8396_v15, %v8324_v53  ;;  %v8433_v20 = vadd.f32 %v8397_v60, %v8325_v34  ;;  %v8336_v12 = vld [vmem:[%s9318_s23 + $0xa3] sm:$0xff]  ;;  %v8337_v60 = vld [vmem:[%s9318_s23 + $0xab] sm:$0xff]  ;;  %v8343_v21 = vld [vmem:[%s9318_s23 + $0xdb] sm:$0xff] }
 0x82d   : > { %8462 = vst.msk [vmem:[%s13098_s19] sm:$0xff] %vm247_vm1, %v8426_v33  ;;  %v8434_v47 = vadd.f32 %v8398_v2, %v8326_v18  ;;  %v8435_v55 = vadd.f32 %v8399_v39, %v8327_v23  ;;  %v8436_v25 = vadd.f32 %v8400_v22, %v8328_v38  ;;  %v8437_v27 = vadd.f32 %v8401_v57, %v8329_v51  ;;  %v8338_v39 = vld [vmem:[%s9318_s23 + $0xb3] sm:$0xff]  ;;  %v8339_v57 = vld [vmem:[%s9318_s23 + $0xbb] sm:$0xff]  ;;  %v8345_v37 = vld [vmem:[%s9318_s23 + $0xeb] sm:$0xff] }
 0x82e   : > { %8463 = vst.msk [vmem:[%s13098_s19 + $0x8] sm:$0xff] %vm247_vm1, %v8427_v19  ;;  %v8438_v9 = vadd.f32 %v8402_v24, %v8330_v8  ;;  %v8439_v35 = vadd.f32 %v13052_v44, %v8331_v63  ;;  %v8440_v40 = vadd.f32 %v13054_v3, %v8332_v56  ;;  %v8441_v15 = vadd.f32 %v13056_v11, %v8333_v43  ;;  %v8340_v44 = vld [vmem:[%s9318_s23 + $0xc3] sm:$0xff]  ;;  %v8341_v11 = vld [vmem:[%s9318_s23 + $0xcb] sm:$0xff]  ;;  %v8346_v6 = vld [vmem:[%s9318_s23 + $0xf3] sm:$0xff] }
 0x82f   : > { %8464 = vst.msk [vmem:[%s13098_s19 + $0x10] sm:$0xff] %vm247_vm1, %v8428_v14  ;;  %v8442_v2 = vadd.f32 %v13059_v31, %v8334_v4  ;;  %v8443_v22 = vadd.f32 %v13061_v17, %v8335_v59  ;;  %v8444_v24 = vadd.f32 %v13063_v45, %v8336_v12  ;;  %v8445_v3 = vadd.f32 %v13065_v48, %v8337_v60  ;;  %v8342_v17 = vld [vmem:[%s9318_s23 + $0xd3] sm:$0xff]  ;;  %v8347_v13 = vld [vmem:[%s9318_s23 + $0xfb] sm:$0xff]  ;;  %v8348_v61 = vld [vmem:[%s9318_s23 + $0x103] sm:$0xff] }
 0x830   : > { %8465 = vst.msk [vmem:[%s13098_s19 + $0x18] sm:$0xff] %vm247_vm1, %v8429_v42  ;;  %v8446_v31 = vadd.f32 %v13067_v26, %v8338_v39  ;;  %v8447_v45 = vadd.f32 %v13069_v54, %v8339_v57  ;;  %v8448_v48 = vadd.f32 %v13071_v1, %v8340_v44  ;;  %v8449_v26 = vadd.f32 %v13073_v32, %v8341_v11  ;;  %v8349_v33 = vld [vmem:[%s9318_s23 + $0x10b] sm:$0xff]  ;;  %v8350_v19 = vld [vmem:[%s9318_s23 + $0x113] sm:$0xff]  ;;  %v8351_v14 = vld [vmem:[%s9318_s23 + $0x11b] sm:$0xff] }
 0x831   : > { %8466 = vst.msk [vmem:[%s13098_s19 + $0x20] sm:$0xff] %vm247_vm1, %v8430_v7  ;;  %v8450_v54 = vadd.f32 %v13078_v36, %v8342_v17  ;;  %v8451_v1 = vadd.f32 %v13080_v52, %v8343_v21  ;;  %v8452_v32 = vadd.f32 %v13082_v29, %v8344_v10  ;;  %v8453_v36 = vadd.f32 %v13084_v41, %v8345_v37  ;;  %v8352_v53 = vld [vmem:[%s9318_s23 + $0x123] sm:$0xff]  ;;  %v8353_v42 = vld [vmem:[%s9318_s23 + $0x12b] sm:$0xff] }
 0x832   : > { %8467 = vst.msk [vmem:[%s13098_s19 + $0x28] sm:$0xff] %vm247_vm1, %v8431_v30  ;;  %v8454_v52 = vadd.f32 %v13087_v28, %v8346_v6  ;;  %v8455_v29 = vadd.f32 %v13089_v0, %v8347_v13  ;;  %v8456_v41 = vadd.f32 %v13091_v49, %v8348_v61  ;;  %v8457_v28 = vadd.f32 %v13093_v62, %v8349_v33 }
 0x833   : > { %8468 = vst.msk [vmem:[%s13098_s19 + $0x30] sm:$0xff] %vm247_vm1, %v8432_v5  ;;  %v8458_v0 = vadd.f32 %v13101_v46, %v8350_v19  ;;  %v8459_v34 = vadd.f32 %v13103_v58, %v8351_v14  ;;  %v8460_v49 = vadd.f32 %v13105_v50, %v8352_v53  ;;  %v8461_v7 = vadd.f32 %v13107_v16, %v8353_v42 }
 0x834   : > { %8469 = vst.msk [vmem:[%s13098_s19 + $0x38] sm:$0xff] %vm247_vm1, %v8433_v20 }
 0x835   : > { %8470 = vst.msk [vmem:[%s13098_s19 + $0x40] sm:$0xff] %vm247_vm1, %v8434_v47 }
 0x836   : > { %8471 = vst.msk [vmem:[%s13098_s19 + $0x48] sm:$0xff] %vm247_vm1, %v8435_v55 }
 0x837   : > { %8472 = vst.msk [vmem:[%s13098_s19 + $0x50] sm:$0xff] %vm247_vm1, %v8436_v25 }
 0x838   : > { %8473 = vst.msk [vmem:[%s13098_s19 + $0x58] sm:$0xff] %vm247_vm1, %v8437_v27 }
 0x839   : > { %8474 = vst.msk [vmem:[%s13098_s19 + $0x60] sm:$0xff] %vm247_vm1, %v8438_v9 }
 0x83a   : > { %8475 = vst.msk [vmem:[%s13098_s19 + $0x68] sm:$0xff] %vm247_vm1, %v8439_v35 }
 0x83b   : > { %8476 = vst.msk [vmem:[%s13098_s19 + $0x70] sm:$0xff] %vm247_vm1, %v8440_v40 }
 0x83c   : > { %8477 = vst.msk [vmem:[%s13098_s19 + $0x78] sm:$0xff] %vm247_vm1, %v8441_v15 }
 0x83d   : > { %8478 = vst.msk [vmem:[%s13098_s19 + $0x80] sm:$0xff] %vm247_vm1, %v8442_v2 }
 0x83e   : > { %8479 = vst.msk [vmem:[%s13098_s19 + $0x88] sm:$0xff] %vm247_vm1, %v8443_v22 }
 0x83f   : > { %8480 = vst.msk [vmem:[%s13098_s19 + $0x90] sm:$0xff] %vm247_vm1, %v8444_v24 }
 0x840   : > { %8481 = vst.msk [vmem:[%s13098_s19 + $0x98] sm:$0xff] %vm247_vm1, %v8445_v3 }
 0x841   : > { %8482 = vst.msk [vmem:[%s13098_s19 + $0xa0] sm:$0xff] %vm247_vm1, %v8446_v31 }
 0x842   : > { %8483 = vst.msk [vmem:[%s13098_s19 + $0xa8] sm:$0xff] %vm247_vm1, %v8447_v45 }
 0x843   : > { %8484 = vst.msk [vmem:[%s13098_s19 + $0xb0] sm:$0xff] %vm247_vm1, %v8448_v48 }
 0x844   : > { %8485 = vst.msk [vmem:[%s13098_s19 + $0xb8] sm:$0xff] %vm247_vm1, %v8449_v26 }
 0x845   : > { %8486 = vst.msk [vmem:[%s13098_s19 + $0xc0] sm:$0xff] %vm247_vm1, %v8450_v54 }
 0x846   : > { %8487 = vst.msk [vmem:[%s13098_s19 + $0xc8] sm:$0xff] %vm247_vm1, %v8451_v1 }
 0x847   : > { %8488 = vst.msk [vmem:[%s13098_s19 + $0xd0] sm:$0xff] %vm247_vm1, %v8452_v32 }
 0x848   : > { %8489 = vst.msk [vmem:[%s13098_s19 + $0xd8] sm:$0xff] %vm247_vm1, %v8453_v36 }
 0x849   : > { %8490 = vst.msk [vmem:[%s13098_s19 + $0xe0] sm:$0xff] %vm247_vm1, %v8454_v52 }
 0x84a   : > { %8491 = vst.msk [vmem:[%s13098_s19 + $0xe8] sm:$0xff] %vm247_vm1, %v8455_v29 }
 0x84b   : > { %8492 = vst.msk [vmem:[%s13098_s19 + $0xf0] sm:$0xff] %vm247_vm1, %v8456_v41 }
 0x84c   : > { %8493 = vst.msk [vmem:[%s13098_s19 + $0xf8] sm:$0xff] %vm247_vm1, %v8457_v28 }
 0x84d   : > { %8494 = vst.msk [vmem:[%s13098_s19 + $0x100] sm:$0xff] %vm247_vm1, %v8458_v0 }
 0x84e   : > { %8495 = vst.msk [vmem:[%s13098_s19 + $0x108] sm:$0xff] %vm247_vm1, %v8459_v34 }
 0x84f   : > { %8496 = vst.msk [vmem:[%s13098_s19 + $0x110] sm:$0xff] %vm247_vm1, %v8460_v49 }
 0x850   : > { %8497 = vst.msk [vmem:[%s13098_s19 + $0x118] sm:$0xff] %vm247_vm1, %v8461_v7 }
 0x851 PF: > { %s13_s12 = sadd.s32 1, %s9264_s12  }
 0x852   : > { %p10_p4 = scmp.ge.s32.totalorder %s13_s12, 4  }
 0x854   :  { %12 = sbr.rel (!%p10_p4) target bundleno = 1 (0x1), region = 66 }

</bundles_post_ra>
